<compile_context>
chip_gen: v7x
topology: tpu7x:2x2x1
jax: 0.10.0
libtpu: 0.0.40
codegen_flags: <defaults>
</compile_context>

<pallas_src>
import functools
import math

import jax
import jax.numpy as jnp
from jax import lax
from jax.experimental import pallas as pl
from jax.experimental.pallas import tpu as pltpu


# Row layout of the packed (8, D) vector table.
ROW_BO, ROW_G1, ROW_BE1, ROW_BB2, ROW_G2, ROW_BE2, ROW_WR, ROW_BR = range(8)
NUM_VEC_ROWS = 8


def _layer_norm(h, gamma, beta, eps=1e-5):
    mu = jnp.mean(h, axis=-1, keepdims=True)
    var = jnp.mean((h - mu) ** 2, axis=-1, keepdims=True)
    return (h - mu) * lax.rsqrt(var + eps) * gamma + beta


# ------------------------------- kernel -------------------------------------


def deeprli_block_kernel(
    x_ref,       # (BT*N, D)   bf16   node features of BT graphs
    wqkv_ref,    # (D, 3D)     bf16   fused Q/K/V projection
    bqkv_ref,    # (1, 3D)     f32    fused Q/K/V bias
    wo_ref,      # (D, D)      bf16   attention output projection
    w1_ref,      # (D, F)      bf16   FFN up
    bb1_ref,     # (1, F)      f32    FFN up bias
    w2_ref,      # (F, D)      bf16   FFN down
    vecs_ref,    # (8, D)      f32    packed biases / ln params / readout
    out_ref,     # (BT, 128)   f32    per-graph scalar, lane-broadcast
    *, num_heads, n_nodes, bt,
):
    m, d = x_ref.shape                       # m = BT * N
    dh = d // num_heads
    scale = 1.0 / math.sqrt(dh)
    bf = jnp.bfloat16

    x_bf = x_ref[...]                        # bf16
    x_f32 = x_bf.astype(jnp.float32)

    # --- fused QKV projection, one MXU pass over all BT graphs ---------------
    qkv = jnp.dot(x_bf, wqkv_ref[...],
                  preferred_element_type=jnp.float32) + bqkv_ref[...]        # (M, 3D)
    q = qkv[:, 0 * d:1 * d].reshape(bt, n_nodes, d)
    k = qkv[:, 1 * d:2 * d].reshape(bt, n_nodes, d)
    v = qkv[:, 2 * d:3 * d].reshape(bt, n_nodes, d)

    # --- multi-head self-attention, graph-batched per head -------------------
    # Heads are a short static loop (H small); each iteration is a 3-D einsum
    # batched over BT graphs.  Head outputs are recombined and fed to a SINGLE
    # Wo matmul with K = D (instead of H accumulated K = dh matmuls).
    head_outs = []
    for h in range(num_heads):
        sl = slice(h * dh, (h + 1) * dh)
        qh = q[:, :, sl].astype(bf)
        kh = k[:, :, sl].astype(bf)
        vh = v[:, :, sl].astype(bf)
        s = jnp.einsum("bnd,bmd->bnm", qh, kh,
                       preferred_element_type=jnp.float32) * scale           # (BT, N, N)
        s = s - jnp.max(s, axis=-1, keepdims=True)
        p = jnp.exp(s)
        p = p * pl.reciprocal(jnp.sum(p, axis=-1, keepdims=True), approx=True)
        pv = jnp.einsum("bnm,bmd->bnd", p.astype(bf), vh,
                        preferred_element_type=jnp.float32)                  # (BT, N, dh)
        head_outs.append(pv)
    attn_cat = jnp.concatenate(head_outs, axis=-1).reshape(m, d)             # (M, D)
    attn = jnp.dot(attn_cat.astype(bf), wo_ref[...],
                   preferred_element_type=jnp.float32)
    attn = attn + vecs_ref[ROW_BO:ROW_BO + 1, :]

    # --- residual + layer norm ------------------------------------------------
    h1 = _layer_norm(x_f32 + attn,
                     vecs_ref[ROW_G1:ROW_G1 + 1, :],
                     vecs_ref[ROW_BE1:ROW_BE1 + 1, :])

    # --- feed-forward block ---------------------------------------------------
    ff = jnp.dot(h1.astype(bf), w1_ref[...],
                 preferred_element_type=jnp.float32) + bb1_ref[...]
    ff = jnp.maximum(ff, 0.0)
    ff = jnp.dot(ff.astype(bf), w2_ref[...],
                 preferred_element_type=jnp.float32) + vecs_ref[ROW_BB2:ROW_BB2 + 1, :]
    h2 = _layer_norm(h1 + ff,
                     vecs_ref[ROW_G2:ROW_G2 + 1, :],
                     vecs_ref[ROW_BE2:ROW_BE2 + 1, :])

    # --- readout: per-graph mean-pool over nodes -> scalar --------------------
    pooled = jnp.mean(h2.reshape(bt, n_nodes, d), axis=1)                    # (BT, D)
    scores = (jnp.sum(pooled * vecs_ref[ROW_WR:ROW_WR + 1, :],
                      axis=-1, keepdims=True)
              + vecs_ref[ROW_BR:ROW_BR + 1, 0:1])                            # (BT, 1)
    # Lane-dense full-width store (avoids masked vst.msk partial stores).
    out_ref[...] = jnp.broadcast_to(scores, out_ref.shape).astype(out_ref.dtype)


# ------------------------------ wrapper --------------------------------------


def init_params(key, hidden_dim, ffn_dim):
    d, f = hidden_dim, ffn_dim
    keys = jax.random.split(key, 8)

    def w(k, shape, fan_in):
        return jax.random.normal(k, shape, jnp.float32) / (fan_in ** 0.5)

    return {
        "wq": w(keys[0], (d, d), d), "bq": jnp.zeros((1, d), jnp.float32),
        "wk": w(keys[1], (d, d), d), "bk": jnp.zeros((1, d), jnp.float32),
        "wv": w(keys[2], (d, d), d), "bv": jnp.zeros((1, d), jnp.float32),
        "wo": w(keys[3], (d, d), d), "bo": jnp.zeros((1, d), jnp.float32),
        "g1": jnp.ones((1, d), jnp.float32), "be1": jnp.zeros((1, d), jnp.float32),
        "w1": w(keys[4], (d, f), d), "bb1": jnp.zeros((1, f), jnp.float32),
        "w2": w(keys[5], (f, d), f), "bb2": jnp.zeros((1, d), jnp.float32),
        "g2": jnp.ones((1, d), jnp.float32), "be2": jnp.zeros((1, d), jnp.float32),
        "wr": w(keys[6], (1, d), d), "br": jnp.zeros((1, 1), jnp.float32),
    }


def _tensorcores_per_chip():
    """v7x has 2 TensorCores per chip; v5e/v6e have 1."""
    try:
        kind = jax.devices()[0].device_kind.lower()
    except Exception:  # pragma: no cover - defensive only
        return 1
    return 2 if "v7" in kind else 1


def contrastive_net_forward(inputs, params, num_heads, graphs_per_step=64):
    """Equivalent of `[self.potential(input) for input in inputs]`."""
    x = jnp.stack(inputs, axis=0).astype(jnp.float32)      # (B, N, D)
    b, n, d = x.shape
    assert d % num_heads == 0
    f = params["w1"].shape[1]

    # ---- per-step graph batch BT ---------------------------------------------
    bt = min(graphs_per_step, b)
    # v7x: keep >= num_tensorcores grid steps so the 'parallel' axis can be
    # sharded across both cores (only when B is large enough to matter).
    n_tc = _tensorcores_per_chip()
    if n_tc >= 2 and b >= 2 * 8:
        bt = min(bt, pl.cdiv(b, n_tc))
    n_steps = pl.cdiv(b, bt)
    if n_steps > 1:
        # TPU (8,128) tiling: with >1 grid step the (bt, 128) output block needs
        # bt % 8 == 0; also balance bt across steps to minimize graph padding.
        bt = 8 * pl.cdiv(pl.cdiv(b, n_steps), 8)
        n_steps = pl.cdiv(b, bt)
    b_pad = n_steps * bt
    if b_pad != b:
        x = jnp.concatenate([x, jnp.zeros((b_pad - b, n, d), x.dtype)], axis=0)
    x2d = x.reshape(b_pad * n, d).astype(jnp.bfloat16)      # (B_pad*N, D)

    # ---- fuse weights into few, lane-friendly inputs -------------------------
    w_qkv = jnp.concatenate([params["wq"], params["wk"], params["wv"]],
                            axis=1).astype(jnp.bfloat16)                     # (D, 3D)
    b_qkv = jnp.concatenate([params["bq"], params["bk"], params["bv"]],
                            axis=1).astype(jnp.float32)                      # (1, 3D)
    wo = params["wo"].astype(jnp.bfloat16)                                   # (D, D)
    w1 = params["w1"].astype(jnp.bfloat16)                                   # (D, F)
    w2 = params["w2"].astype(jnp.bfloat16)                                   # (F, D)
    bb1 = params["bb1"].astype(jnp.float32)                                  # (1, F)
    br_row = jnp.pad(params["br"], ((0, 0), (0, d - 1)))                     # (1, D)
    vecs = jnp.concatenate(
        [params["bo"], params["g1"], params["be1"], params["bb2"],
         params["g2"], params["be2"], params["wr"], br_row],
        axis=0).astype(jnp.float32)                                          # (8, D)

    def whole(arr):
        # Constant across the grid: single-buffered (fetched once, no double
        # buffer copies) — matters once D/F grow, esp. on v7x's 64 MiB VMEM.
        nd = arr.ndim
        return pl.BlockSpec(arr.shape, lambda i, _nd=nd: (0,) * _nd,
                            pipeline_mode=pl.Buffered(1))

    # Advisory cost estimate so XLA schedules this small call sensibly.
    flops_per_graph = (2 * n * d * 3 * d        # fused QKV
                       + 4 * n * n * d          # scores + PV over all heads
                       + 2 * n * d * d          # Wo (single K=D matmul)
                       + 4 * n * d * f)         # FFN up + down
    cost = pl.CostEstimate(
        flops=int(b_pad * flops_per_graph),
        transcendentals=int(b_pad * (num_heads * n * n + 4 * n)),
        bytes_accessed=int(x2d.size * 2 + w_qkv.size * 2 + wo.size * 2
                           + w1.size * 2 + w2.size * 2
                           + b_qkv.size * 4 + bb1.size * 4 + vecs.size * 4
                           + b_pad * 128 * 4),
    )

    out = pl.pallas_call(
        functools.partial(deeprli_block_kernel,
                          num_heads=num_heads, n_nodes=n, bt=bt),
        out_shape=jax.ShapeDtypeStruct((b_pad, 128), jnp.float32),
        grid_spec=pltpu.PrefetchScalarGridSpec(
            num_scalar_prefetch=0,
            grid=(n_steps,),
            in_specs=[pl.BlockSpec((bt * n, d), lambda i: (i, 0)),
                      whole(w_qkv), whole(b_qkv), whole(wo), whole(w1),
                      whole(bb1), whole(w2), whole(vecs)],
            out_specs=pl.BlockSpec((bt, 128), lambda i: (i, 0)),
        ),
        compiler_params=pltpu.CompilerParams(
            # Graph-block axis is embarrassingly parallel (megacore sharding).
            dimension_semantics=("parallel",),
            # Explicit VMEM budget: safe on every generation (<= v7x's 64 MiB
            # physical) and far above this kernel's few-MB footprint at BT=64.
            vmem_limit_bytes=32 * 1024 * 1024,
        ),
        cost_estimate=cost,
    )(x2d, w_qkv, b_qkv, wo, w1, bb1, w2, vecs)

    scores = out[:b, 0]
    return [scores[i] for i in range(b)]


# ------------------------- pure-JAX reference --------------------------------
# Mirrors the kernel's precision choices (bf16 MXU operands, f32 accumulation,
# f32 softmax / layer-norm) so the comparison can be tight.  The math is the
# DeepRLI-style potential applied independently to each list element, exactly
# like ContrastiveNet.forward.


def reference_forward(inputs, params, num_heads):
    bf = jnp.bfloat16

    def mm(a, b):
        return jnp.dot(a.astype(bf), b.astype(bf),
                       preferred_element_type=jnp.float32)

    def potential(x):
        x = x.astype(bf).astype(jnp.float32)
        d = x.shape[-1]
        dh = d // num_heads
        q = mm(x, params["wq"]) + params["bq"]
        k = mm(x, params["wk"]) + params["bk"]
        v = mm(x, params["wv"]) + params["bv"]
        outs = []
        for h in range(num_heads):
            sl = slice(h * dh, (h + 1) * dh)
            s = mm(q[:, sl], k[:, sl].T) / (dh ** 0.5)
            p = jax.nn.softmax(s, axis=-1)
            outs.append(mm(p, v[:, sl]))
        attn = mm(jnp.concatenate(outs, axis=-1), params["wo"]) + params["bo"]
        h1 = _layer_norm(x + attn, params["g1"], params["be1"])
        ff = jax.nn.relu(mm(h1, params["w1"]) + params["bb1"])
        ff = mm(ff, params["w2"]) + params["bb2"]
        h2 = _layer_norm(h1 + ff, params["g2"], params["be2"])
        pooled = jnp.mean(h2, axis=0, keepdims=True)
        return jnp.sum(pooled * params["wr"]) + params["br"][0, 0]

    return [potential(x.astype(jnp.float32)) for x in inputs]


# --------------------------------- main ---------------------------------------

if __name__ == "__main__":
    HIDDEN_DIM = 32
    FFN_DIM = 128
    NUM_HEADS = 4
    N_NODES = 16
    B = 20  # number of elements in the `inputs` list

    key = jax.random.PRNGKey(0)
    k_params, k_in = jax.random.split(key)
    params = init_params(k_params, HIDDEN_DIM, FFN_DIM)

    in_keys = jax.random.split(k_in, B)
    inputs = [
        jax.random.normal(in_keys[i], (N_NODES, HIDDEN_DIM), jnp.float32)
        for i in range(B)
    ]

    ref_list = reference_forward(inputs, params, NUM_HEADS)

    # Default config: all graphs in one step (B <= graphs_per_step).
    out_list = contrastive_net_forward(inputs, params, NUM_HEADS)
    out_list = [jax.block_until_ready(o) for o in out_list]
    for idx, (o, r) in enumerate(zip(out_list, ref_list)):
        assert jnp.allclose(o, r, rtol=1e-2, atol=1e-2), (idx, o, r)

    # Small per-step batch: exercises the multi-step grid + graph padding path.
    out_list_tiled = contrastive_net_forward(inputs, params, NUM_HEADS,
                                             graphs_per_step=8)
    out_list_tiled = [jax.block_until_ready(o) for o in out_list_tiled]
    for idx, (o, r) in enumerate(zip(out_list_tiled, ref_list)):
        assert jnp.allclose(o, r, rtol=1e-2, atol=1e-2), (idx, o, r)

    print("KERNEL_OK")
</pallas_src>

<mosaic_0001>
module attributes {stable_mosaic.version = 11 : i64} {
  func.func @deeprli_block_kernel(%arg0: i32, %arg1: memref<320x32xbf16, #tpu.memory_space<vmem>>, %arg2: memref<32x96xbf16, #tpu.memory_space<vmem>>, %arg3: memref<1x96xf32, #tpu.memory_space<vmem>>, %arg4: memref<32x32xbf16, #tpu.memory_space<vmem>>, %arg5: memref<32x128xbf16, #tpu.memory_space<vmem>>, %arg6: memref<1x128xf32, #tpu.memory_space<vmem>>, %arg7: memref<128x32xbf16, #tpu.memory_space<vmem>>, %arg8: memref<8x32xf32, #tpu.memory_space<vmem>>, %arg9: memref<20x128xf32, #tpu.memory_space<vmem>>) attributes {dimension_semantics = [#tpu.dimension_semantics<parallel>], iteration_bounds = array<i64: 1>, scalar_prefetch = 0 : i64, scratch_operands = 0 : i64, tpu.core_type = #tpu.core_type<tc>, window_params = [{transform_indices = @transform_0, window_bounds = array<i64: 320, 32>}, {pipeline_mode = #tpu.pipeline_mode<synchronous>, transform_indices = @transform_1, window_bounds = array<i64: 32, 96>}, {pipeline_mode = #tpu.pipeline_mode<synchronous>, transform_indices = @transform_2, window_bounds = array<i64: 1, 96>}, {pipeline_mode = #tpu.pipeline_mode<synchronous>, transform_indices = @transform_3, window_bounds = array<i64: 32, 32>}, {pipeline_mode = #tpu.pipeline_mode<synchronous>, transform_indices = @transform_4, window_bounds = array<i64: 32, 128>}, {pipeline_mode = #tpu.pipeline_mode<synchronous>, transform_indices = @transform_5, window_bounds = array<i64: 1, 128>}, {pipeline_mode = #tpu.pipeline_mode<synchronous>, transform_indices = @transform_6, window_bounds = array<i64: 128, 32>}, {pipeline_mode = #tpu.pipeline_mode<synchronous>, transform_indices = @transform_7, window_bounds = array<i64: 8, 32>}, {transform_indices = @transform_8, window_bounds = array<i64: 20, 128>}]} {
    %c0 = arith.constant 0 : index
    %c0_0 = arith.constant 0 : index
    %0 = vector.load %arg1[%c0, %c0_0] : memref<320x32xbf16, #tpu.memory_space<vmem>>, vector<320x32xbf16>
    %1 = arith.extf %0 : vector<320x32xbf16> to vector<320x32xf32>
    %c0_1 = arith.constant 0 : index
    %c0_2 = arith.constant 0 : index
    %2 = vector.load %arg2[%c0_1, %c0_2] : memref<32x96xbf16, #tpu.memory_space<vmem>>, vector<32x96xbf16>
    %cst = arith.constant dense<0.000000e+00> : vector<320x96xf32>
    %3 = tpu.matmul %0, %2, %cst {dimension_numbers = #tpu.dot_dimension_numbers<[1], [0], [0], [1], [0, 0, 1, 1], [], []>} : vector<320x32xbf16>, vector<32x96xbf16>, vector<320x96xf32> -> vector<320x96xf32>
    %c0_3 = arith.constant 0 : index
    %c0_4 = arith.constant 0 : index
    %4 = vector.load %arg3[%c0_3, %c0_4] : memref<1x96xf32, #tpu.memory_space<vmem>>, vector<1x96xf32>
    %5 = vector.broadcast %4 : vector<1x96xf32> to vector<320x96xf32>
    %6 = arith.addf %3, %5 : vector<320x96xf32>
    %7 = vector.extract_strided_slice %6 {offsets = [0, 0], sizes = [320, 32], strides = [1, 1]} : vector<320x96xf32> to vector<320x32xf32>
    %8 = vector.shape_cast %7 : vector<320x32xf32> to vector<20x16x32xf32>
    %9 = vector.extract_strided_slice %6 {offsets = [0, 32], sizes = [320, 32], strides = [1, 1]} : vector<320x96xf32> to vector<320x32xf32>
    %10 = vector.shape_cast %9 : vector<320x32xf32> to vector<20x16x32xf32>
    %11 = vector.extract_strided_slice %6 {offsets = [0, 64], sizes = [320, 32], strides = [1, 1]} : vector<320x96xf32> to vector<320x32xf32>
    %12 = vector.shape_cast %11 : vector<320x32xf32> to vector<20x16x32xf32>
    %13 = vector.extract_strided_slice %8 {offsets = [0, 0, 0], sizes = [20, 16, 8], strides = [1, 1, 1]} : vector<20x16x32xf32> to vector<20x16x8xf32>
    %14 = arith.truncf %13 : vector<20x16x8xf32> to vector<20x16x8xbf16>
    %15 = vector.extract_strided_slice %10 {offsets = [0, 0, 0], sizes = [20, 16, 8], strides = [1, 1, 1]} : vector<20x16x32xf32> to vector<20x16x8xf32>
    %16 = arith.truncf %15 : vector<20x16x8xf32> to vector<20x16x8xbf16>
    %17 = vector.extract_strided_slice %12 {offsets = [0, 0, 0], sizes = [20, 16, 8], strides = [1, 1, 1]} : vector<20x16x32xf32> to vector<20x16x8xf32>
    %18 = arith.truncf %17 : vector<20x16x8xf32> to vector<20x16x8xbf16>
    "tpu.trace_start"() <{level = 10 : i32, message = "bnd,bmd->bnm"}> : () -> ()
    %cst_5 = arith.constant dense<0.000000e+00> : vector<20x16x16xf32>
    %19 = tpu.matmul %14, %16, %cst_5 {dimension_numbers = #tpu.dot_dimension_numbers<[2], [2], [1], [1], [0, 0, 0, 1, 1, 1], [0], [0]>} : vector<20x16x8xbf16>, vector<20x16x8xbf16>, vector<20x16x16xf32> -> vector<20x16x16xf32>
    "tpu.trace_stop"() : () -> ()
    %cst_6 = arith.constant 0.353553385 : f32
    %20 = vector.broadcast %cst_6 : f32 to vector<20x16x16xf32>
    %21 = arith.mulf %19, %20 : vector<20x16x16xf32>
    %cst_7 = arith.constant dense<0xFF800000> : vector<20x16xf32>
    %22 = vector.multi_reduction <maximumf>, %21, %cst_7 [2] : vector<20x16x16xf32> to vector<20x16xf32>
    %23 = vector.shape_cast %22 : vector<20x16xf32> to vector<20x16x1xf32>
    %24 = vector.broadcast %23 : vector<20x16x1xf32> to vector<20x16x16xf32>
    %25 = arith.subf %21, %24 : vector<20x16x16xf32>
    %26 = math.exp %25 : vector<20x16x16xf32>
    %cst_8 = arith.constant dense<0.000000e+00> : vector<20x16xf32>
    %27 = vector.multi_reduction <add>, %26, %cst_8 [2] : vector<20x16x16xf32> to vector<20x16xf32>
    %28 = vector.shape_cast %27 : vector<20x16xf32> to vector<20x16x1xf32>
    %29 = tpu.reciprocal %28 {approx = true} : vector<20x16x1xf32> -> vector<20x16x1xf32>
    %30 = vector.broadcast %29 : vector<20x16x1xf32> to vector<20x16x16xf32>
    %31 = arith.mulf %26, %30 : vector<20x16x16xf32>
    %32 = arith.truncf %31 : vector<20x16x16xf32> to vector<20x16x16xbf16>
    "tpu.trace_start"() <{level = 10 : i32, message = "bnm,bmd->bnd"}> : () -> ()
    %cst_9 = arith.constant dense<0.000000e+00> : vector<20x16x8xf32>
    %33 = tpu.matmul %32, %18, %cst_9 {dimension_numbers = #tpu.dot_dimension_numbers<[2], [1], [1], [2], [0, 0, 0, 1, 1, 2], [0], [0]>} : vector<20x16x16xbf16>, vector<20x16x8xbf16>, vector<20x16x8xf32> -> vector<20x16x8xf32>
    "tpu.trace_stop"() : () -> ()
    %34 = vector.extract_strided_slice %8 {offsets = [0, 0, 8], sizes = [20, 16, 8], strides = [1, 1, 1]} : vector<20x16x32xf32> to vector<20x16x8xf32>
    %35 = arith.truncf %34 : vector<20x16x8xf32> to vector<20x16x8xbf16>
    %36 = vector.extract_strided_slice %10 {offsets = [0, 0, 8], sizes = [20, 16, 8], strides = [1, 1, 1]} : vector<20x16x32xf32> to vector<20x16x8xf32>
    %37 = arith.truncf %36 : vector<20x16x8xf32> to vector<20x16x8xbf16>
    %38 = vector.extract_strided_slice %12 {offsets = [0, 0, 8], sizes = [20, 16, 8], strides = [1, 1, 1]} : vector<20x16x32xf32> to vector<20x16x8xf32>
    %39 = arith.truncf %38 : vector<20x16x8xf32> to vector<20x16x8xbf16>
    "tpu.trace_start"() <{level = 10 : i32, message = "bnd,bmd->bnm"}> : () -> ()
    %cst_10 = arith.constant dense<0.000000e+00> : vector<20x16x16xf32>
    %40 = tpu.matmul %35, %37, %cst_10 {dimension_numbers = #tpu.dot_dimension_numbers<[2], [2], [1], [1], [0, 0, 0, 1, 1, 1], [0], [0]>} : vector<20x16x8xbf16>, vector<20x16x8xbf16>, vector<20x16x16xf32> -> vector<20x16x16xf32>
    "tpu.trace_stop"() : () -> ()
    %cst_11 = arith.constant 0.353553385 : f32
    %41 = vector.broadcast %cst_11 : f32 to vector<20x16x16xf32>
    %42 = arith.mulf %40, %41 : vector<20x16x16xf32>
    %cst_12 = arith.constant dense<0xFF800000> : vector<20x16xf32>
    %43 = vector.multi_reduction <maximumf>, %42, %cst_12 [2] : vector<20x16x16xf32> to vector<20x16xf32>
    %44 = vector.shape_cast %43 : vector<20x16xf32> to vector<20x16x1xf32>
    %45 = vector.broadcast %44 : vector<20x16x1xf32> to vector<20x16x16xf32>
    %46 = arith.subf %42, %45 : vector<20x16x16xf32>
    %47 = math.exp %46 : vector<20x16x16xf32>
    %cst_13 = arith.constant dense<0.000000e+00> : vector<20x16xf32>
    %48 = vector.multi_reduction <add>, %47, %cst_13 [2] : vector<20x16x16xf32> to vector<20x16xf32>
    %49 = vector.shape_cast %48 : vector<20x16xf32> to vector<20x16x1xf32>
    %50 = tpu.reciprocal %49 {approx = true} : vector<20x16x1xf32> -> vector<20x16x1xf32>
    %51 = vector.broadcast %50 : vector<20x16x1xf32> to vector<20x16x16xf32>
    %52 = arith.mulf %47, %51 : vector<20x16x16xf32>
    %53 = arith.truncf %52 : vector<20x16x16xf32> to vector<20x16x16xbf16>
    "tpu.trace_start"() <{level = 10 : i32, message = "bnm,bmd->bnd"}> : () -> ()
    %cst_14 = arith.constant dense<0.000000e+00> : vector<20x16x8xf32>
    %54 = tpu.matmul %53, %39, %cst_14 {dimension_numbers = #tpu.dot_dimension_numbers<[2], [1], [1], [2], [0, 0, 0, 1, 1, 2], [0], [0]>} : vector<20x16x16xbf16>, vector<20x16x8xbf16>, vector<20x16x8xf32> -> vector<20x16x8xf32>
    "tpu.trace_stop"() : () -> ()
    %55 = vector.extract_strided_slice %8 {offsets = [0, 0, 16], sizes = [20, 16, 8], strides = [1, 1, 1]} : vector<20x16x32xf32> to vector<20x16x8xf32>
    %56 = arith.truncf %55 : vector<20x16x8xf32> to vector<20x16x8xbf16>
    %57 = vector.extract_strided_slice %10 {offsets = [0, 0, 16], sizes = [20, 16, 8], strides = [1, 1, 1]} : vector<20x16x32xf32> to vector<20x16x8xf32>
    %58 = arith.truncf %57 : vector<20x16x8xf32> to vector<20x16x8xbf16>
    %59 = vector.extract_strided_slice %12 {offsets = [0, 0, 16], sizes = [20, 16, 8], strides = [1, 1, 1]} : vector<20x16x32xf32> to vector<20x16x8xf32>
    %60 = arith.truncf %59 : vector<20x16x8xf32> to vector<20x16x8xbf16>
    "tpu.trace_start"() <{level = 10 : i32, message = "bnd,bmd->bnm"}> : () -> ()
    %cst_15 = arith.constant dense<0.000000e+00> : vector<20x16x16xf32>
    %61 = tpu.matmul %56, %58, %cst_15 {dimension_numbers = #tpu.dot_dimension_numbers<[2], [2], [1], [1], [0, 0, 0, 1, 1, 1], [0], [0]>} : vector<20x16x8xbf16>, vector<20x16x8xbf16>, vector<20x16x16xf32> -> vector<20x16x16xf32>
    "tpu.trace_stop"() : () -> ()
    %cst_16 = arith.constant 0.353553385 : f32
    %62 = vector.broadcast %cst_16 : f32 to vector<20x16x16xf32>
    %63 = arith.mulf %61, %62 : vector<20x16x16xf32>
    %cst_17 = arith.constant dense<0xFF800000> : vector<20x16xf32>
    %64 = vector.multi_reduction <maximumf>, %63, %cst_17 [2] : vector<20x16x16xf32> to vector<20x16xf32>
    %65 = vector.shape_cast %64 : vector<20x16xf32> to vector<20x16x1xf32>
    %66 = vector.broadcast %65 : vector<20x16x1xf32> to vector<20x16x16xf32>
    %67 = arith.subf %63, %66 : vector<20x16x16xf32>
    %68 = math.exp %67 : vector<20x16x16xf32>
    %cst_18 = arith.constant dense<0.000000e+00> : vector<20x16xf32>
    %69 = vector.multi_reduction <add>, %68, %cst_18 [2] : vector<20x16x16xf32> to vector<20x16xf32>
    %70 = vector.shape_cast %69 : vector<20x16xf32> to vector<20x16x1xf32>
    %71 = tpu.reciprocal %70 {approx = true} : vector<20x16x1xf32> -> vector<20x16x1xf32>
    %72 = vector.broadcast %71 : vector<20x16x1xf32> to vector<20x16x16xf32>
    %73 = arith.mulf %68, %72 : vector<20x16x16xf32>
    %74 = arith.truncf %73 : vector<20x16x16xf32> to vector<20x16x16xbf16>
    "tpu.trace_start"() <{level = 10 : i32, message = "bnm,bmd->bnd"}> : () -> ()
    %cst_19 = arith.constant dense<0.000000e+00> : vector<20x16x8xf32>
    %75 = tpu.matmul %74, %60, %cst_19 {dimension_numbers = #tpu.dot_dimension_numbers<[2], [1], [1], [2], [0, 0, 0, 1, 1, 2], [0], [0]>} : vector<20x16x16xbf16>, vector<20x16x8xbf16>, vector<20x16x8xf32> -> vector<20x16x8xf32>
    "tpu.trace_stop"() : () -> ()
    %76 = vector.extract_strided_slice %8 {offsets = [0, 0, 24], sizes = [20, 16, 8], strides = [1, 1, 1]} : vector<20x16x32xf32> to vector<20x16x8xf32>
    %77 = arith.truncf %76 : vector<20x16x8xf32> to vector<20x16x8xbf16>
    %78 = vector.extract_strided_slice %10 {offsets = [0, 0, 24], sizes = [20, 16, 8], strides = [1, 1, 1]} : vector<20x16x32xf32> to vector<20x16x8xf32>
    %79 = arith.truncf %78 : vector<20x16x8xf32> to vector<20x16x8xbf16>
    %80 = vector.extract_strided_slice %12 {offsets = [0, 0, 24], sizes = [20, 16, 8], strides = [1, 1, 1]} : vector<20x16x32xf32> to vector<20x16x8xf32>
    %81 = arith.truncf %80 : vector<20x16x8xf32> to vector<20x16x8xbf16>
    "tpu.trace_start"() <{level = 10 : i32, message = "bnd,bmd->bnm"}> : () -> ()
    %cst_20 = arith.constant dense<0.000000e+00> : vector<20x16x16xf32>
    %82 = tpu.matmul %77, %79, %cst_20 {dimension_numbers = #tpu.dot_dimension_numbers<[2], [2], [1], [1], [0, 0, 0, 1, 1, 1], [0], [0]>} : vector<20x16x8xbf16>, vector<20x16x8xbf16>, vector<20x16x16xf32> -> vector<20x16x16xf32>
    "tpu.trace_stop"() : () -> ()
    %cst_21 = arith.constant 0.353553385 : f32
    %83 = vector.broadcast %cst_21 : f32 to vector<20x16x16xf32>
    %84 = arith.mulf %82, %83 : vector<20x16x16xf32>
    %cst_22 = arith.constant dense<0xFF800000> : vector<20x16xf32>
    %85 = vector.multi_reduction <maximumf>, %84, %cst_22 [2] : vector<20x16x16xf32> to vector<20x16xf32>
    %86 = vector.shape_cast %85 : vector<20x16xf32> to vector<20x16x1xf32>
    %87 = vector.broadcast %86 : vector<20x16x1xf32> to vector<20x16x16xf32>
    %88 = arith.subf %84, %87 : vector<20x16x16xf32>
    %89 = math.exp %88 : vector<20x16x16xf32>
    %cst_23 = arith.constant dense<0.000000e+00> : vector<20x16xf32>
    %90 = vector.multi_reduction <add>, %89, %cst_23 [2] : vector<20x16x16xf32> to vector<20x16xf32>
    %91 = vector.shape_cast %90 : vector<20x16xf32> to vector<20x16x1xf32>
    %92 = tpu.reciprocal %91 {approx = true} : vector<20x16x1xf32> -> vector<20x16x1xf32>
    %93 = vector.broadcast %92 : vector<20x16x1xf32> to vector<20x16x16xf32>
    %94 = arith.mulf %89, %93 : vector<20x16x16xf32>
    %95 = arith.truncf %94 : vector<20x16x16xf32> to vector<20x16x16xbf16>
    "tpu.trace_start"() <{level = 10 : i32, message = "bnm,bmd->bnd"}> : () -> ()
    %cst_24 = arith.constant dense<0.000000e+00> : vector<20x16x8xf32>
    %96 = tpu.matmul %95, %81, %cst_24 {dimension_numbers = #tpu.dot_dimension_numbers<[2], [1], [1], [2], [0, 0, 0, 1, 1, 2], [0], [0]>} : vector<20x16x16xbf16>, vector<20x16x8xbf16>, vector<20x16x8xf32> -> vector<20x16x8xf32>
    "tpu.trace_stop"() : () -> ()
    %97 = tpu.concatenate %33, %54, %75, %96 in 2 : vector<20x16x8xf32>, vector<20x16x8xf32>, vector<20x16x8xf32>, vector<20x16x8xf32> -> vector<20x16x32xf32>
    %98 = vector.shape_cast %97 : vector<20x16x32xf32> to vector<320x32xf32>
    %99 = arith.truncf %98 : vector<320x32xf32> to vector<320x32xbf16>
    %c0_25 = arith.constant 0 : index
    %c0_26 = arith.constant 0 : index
    %100 = vector.load %arg4[%c0_25, %c0_26] : memref<32x32xbf16, #tpu.memory_space<vmem>>, vector<32x32xbf16>
    %cst_27 = arith.constant dense<0.000000e+00> : vector<320x32xf32>
    %101 = tpu.matmul %99, %100, %cst_27 {dimension_numbers = #tpu.dot_dimension_numbers<[1], [0], [0], [1], [0, 0, 1, 1], [], []>} : vector<320x32xbf16>, vector<32x32xbf16>, vector<320x32xf32> -> vector<320x32xf32>
    %c0_28 = arith.constant 0 : index
    %c0_29 = arith.constant 0 : index
    %102 = vector.load %arg8[%c0_28, %c0_29] : memref<8x32xf32, #tpu.memory_space<vmem>>, vector<1x32xf32>
    %103 = vector.broadcast %102 : vector<1x32xf32> to vector<320x32xf32>
    %104 = arith.addf %101, %103 : vector<320x32xf32>
    %105 = arith.addf %1, %104 : vector<320x32xf32>
    %c1 = arith.constant 1 : index
    %c0_30 = arith.constant 0 : index
    %106 = vector.load %arg8[%c1, %c0_30] : memref<8x32xf32, #tpu.memory_space<vmem>>, vector<1x32xf32>
    %c2 = arith.constant 2 : index
    %c0_31 = arith.constant 0 : index
    %107 = vector.load %arg8[%c2, %c0_31] : memref<8x32xf32, #tpu.memory_space<vmem>>, vector<1x32xf32>
    %cst_32 = arith.constant dense<0.000000e+00> : vector<320xf32>
    %108 = vector.multi_reduction <add>, %105, %cst_32 [1] : vector<320x32xf32> to vector<320xf32>
    %109 = vector.shape_cast %108 : vector<320xf32> to vector<320x1xf32>
    %cst_33 = arith.constant 3.200000e+01 : f32
    %110 = vector.broadcast %cst_33 : f32 to vector<320x1xf32>
    %111 = arith.divf %109, %110 : vector<320x1xf32>
    %112 = vector.broadcast %111 : vector<320x1xf32> to vector<320x32xf32>
    %113 = arith.subf %105, %112 : vector<320x32xf32>
    %114 = arith.mulf %113, %113 : vector<320x32xf32>
    %cst_34 = arith.constant dense<0.000000e+00> : vector<320xf32>
    %115 = vector.multi_reduction <add>, %114, %cst_34 [1] : vector<320x32xf32> to vector<320xf32>
    %116 = vector.shape_cast %115 : vector<320xf32> to vector<320x1xf32>
    %cst_35 = arith.constant 3.200000e+01 : f32
    %117 = vector.broadcast %cst_35 : f32 to vector<320x1xf32>
    %118 = arith.divf %116, %117 : vector<320x1xf32>
    %119 = vector.broadcast %111 : vector<320x1xf32> to vector<320x32xf32>
    %120 = arith.subf %105, %119 : vector<320x32xf32>
    %cst_36 = arith.constant 9.99999974E-6 : f32
    %121 = vector.broadcast %cst_36 : f32 to vector<320x1xf32>
    %122 = arith.addf %118, %121 : vector<320x1xf32>
    %123 = math.rsqrt %122 : vector<320x1xf32>
    %124 = vector.broadcast %123 : vector<320x1xf32> to vector<320x32xf32>
    %125 = arith.mulf %120, %124 : vector<320x32xf32>
    %126 = vector.broadcast %106 : vector<1x32xf32> to vector<320x32xf32>
    %127 = arith.mulf %125, %126 : vector<320x32xf32>
    %128 = vector.broadcast %107 : vector<1x32xf32> to vector<320x32xf32>
    %129 = arith.addf %127, %128 : vector<320x32xf32>
    %130 = arith.truncf %129 : vector<320x32xf32> to vector<320x32xbf16>
    %c0_37 = arith.constant 0 : index
    %c0_38 = arith.constant 0 : index
    %131 = vector.load %arg5[%c0_37, %c0_38] : memref<32x128xbf16, #tpu.memory_space<vmem>>, vector<32x128xbf16>
    %cst_39 = arith.constant dense<0.000000e+00> : vector<320x128xf32>
    %132 = tpu.matmul %130, %131, %cst_39 {dimension_numbers = #tpu.dot_dimension_numbers<[1], [0], [0], [1], [0, 0, 1, 1], [], []>} : vector<320x32xbf16>, vector<32x128xbf16>, vector<320x128xf32> -> vector<320x128xf32>
    %c0_40 = arith.constant 0 : index
    %c0_41 = arith.constant 0 : index
    %133 = vector.load %arg6[%c0_40, %c0_41] : memref<1x128xf32, #tpu.memory_space<vmem>>, vector<1x128xf32>
    %134 = vector.broadcast %133 : vector<1x128xf32> to vector<320x128xf32>
    %135 = arith.addf %132, %134 : vector<320x128xf32>
    %cst_42 = arith.constant 0.000000e+00 : f32
    %136 = vector.broadcast %cst_42 : f32 to vector<320x128xf32>
    %137 = arith.maximumf %135, %136 : vector<320x128xf32>
    %138 = arith.truncf %137 : vector<320x128xf32> to vector<320x128xbf16>
    %c0_43 = arith.constant 0 : index
    %c0_44 = arith.constant 0 : index
    %139 = vector.load %arg7[%c0_43, %c0_44] : memref<128x32xbf16, #tpu.memory_space<vmem>>, vector<128x32xbf16>
    %cst_45 = arith.constant dense<0.000000e+00> : vector<320x32xf32>
    %140 = tpu.matmul %138, %139, %cst_45 {dimension_numbers = #tpu.dot_dimension_numbers<[1], [0], [0], [1], [0, 0, 1, 1], [], []>} : vector<320x128xbf16>, vector<128x32xbf16>, vector<320x32xf32> -> vector<320x32xf32>
    %c3 = arith.constant 3 : index
    %c0_46 = arith.constant 0 : index
    %141 = vector.load %arg8[%c3, %c0_46] : memref<8x32xf32, #tpu.memory_space<vmem>>, vector<1x32xf32>
    %142 = vector.broadcast %141 : vector<1x32xf32> to vector<320x32xf32>
    %143 = arith.addf %140, %142 : vector<320x32xf32>
    %144 = arith.addf %129, %143 : vector<320x32xf32>
    %c4 = arith.constant 4 : index
    %c0_47 = arith.constant 0 : index
    %145 = vector.load %arg8[%c4, %c0_47] : memref<8x32xf32, #tpu.memory_space<vmem>>, vector<1x32xf32>
    %c5 = arith.constant 5 : index
    %c0_48 = arith.constant 0 : index
    %146 = vector.load %arg8[%c5, %c0_48] : memref<8x32xf32, #tpu.memory_space<vmem>>, vector<1x32xf32>
    %cst_49 = arith.constant dense<0.000000e+00> : vector<320xf32>
    %147 = vector.multi_reduction <add>, %144, %cst_49 [1] : vector<320x32xf32> to vector<320xf32>
    %148 = vector.shape_cast %147 : vector<320xf32> to vector<320x1xf32>
    %cst_50 = arith.constant 3.200000e+01 : f32
    %149 = vector.broadcast %cst_50 : f32 to vector<320x1xf32>
    %150 = arith.divf %148, %149 : vector<320x1xf32>
    %151 = vector.broadcast %150 : vector<320x1xf32> to vector<320x32xf32>
    %152 = arith.subf %144, %151 : vector<320x32xf32>
    %153 = arith.mulf %152, %152 : vector<320x32xf32>
    %cst_51 = arith.constant dense<0.000000e+00> : vector<320xf32>
    %154 = vector.multi_reduction <add>, %153, %cst_51 [1] : vector<320x32xf32> to vector<320xf32>
    %155 = vector.shape_cast %154 : vector<320xf32> to vector<320x1xf32>
    %cst_52 = arith.constant 3.200000e+01 : f32
    %156 = vector.broadcast %cst_52 : f32 to vector<320x1xf32>
    %157 = arith.divf %155, %156 : vector<320x1xf32>
    %158 = vector.broadcast %150 : vector<320x1xf32> to vector<320x32xf32>
    %159 = arith.subf %144, %158 : vector<320x32xf32>
    %cst_53 = arith.constant 9.99999974E-6 : f32
    %160 = vector.broadcast %cst_53 : f32 to vector<320x1xf32>
    %161 = arith.addf %157, %160 : vector<320x1xf32>
    %162 = math.rsqrt %161 : vector<320x1xf32>
    %163 = vector.broadcast %162 : vector<320x1xf32> to vector<320x32xf32>
    %164 = arith.mulf %159, %163 : vector<320x32xf32>
    %165 = vector.broadcast %145 : vector<1x32xf32> to vector<320x32xf32>
    %166 = arith.mulf %164, %165 : vector<320x32xf32>
    %167 = vector.broadcast %146 : vector<1x32xf32> to vector<320x32xf32>
    %168 = arith.addf %166, %167 : vector<320x32xf32>
    %169 = vector.shape_cast %168 : vector<320x32xf32> to vector<20x16x32xf32>
    %cst_54 = arith.constant dense<0.000000e+00> : vector<20x32xf32>
    %170 = vector.multi_reduction <add>, %169, %cst_54 [1] : vector<20x16x32xf32> to vector<20x32xf32>
    %cst_55 = arith.constant 1.600000e+01 : f32
    %171 = vector.broadcast %cst_55 : f32 to vector<20x32xf32>
    %172 = arith.divf %170, %171 : vector<20x32xf32>
    %c6 = arith.constant 6 : index
    %c0_56 = arith.constant 0 : index
    %173 = vector.load %arg8[%c6, %c0_56] : memref<8x32xf32, #tpu.memory_space<vmem>>, vector<1x32xf32>
    %174 = vector.broadcast %173 : vector<1x32xf32> to vector<20x32xf32>
    %175 = arith.mulf %172, %174 : vector<20x32xf32>
    %cst_57 = arith.constant dense<0.000000e+00> : vector<20xf32>
    %176 = vector.multi_reduction <add>, %175, %cst_57 [1] : vector<20x32xf32> to vector<20xf32>
    %177 = vector.shape_cast %176 : vector<20xf32> to vector<20x1xf32>
    %c7 = arith.constant 7 : index
    %c0_58 = arith.constant 0 : index
    %178 = vector.load %arg8[%c7, %c0_58] : memref<8x32xf32, #tpu.memory_space<vmem>>, vector<1x1xf32>
    %179 = vector.broadcast %178 : vector<1x1xf32> to vector<20x1xf32>
    %180 = arith.addf %177, %179 : vector<20x1xf32>
    %181 = vector.shape_cast %180 : vector<20x1xf32> to vector<20x1xf32>
    %182 = vector.broadcast %181 : vector<20x1xf32> to vector<20x128xf32>
    %c0_59 = arith.constant 0 : index
    %c0_60 = arith.constant 0 : index
    %183 = vector.load %arg9[%c0_59, %c0_60] : memref<20x128xf32, #tpu.memory_space<vmem>>, vector<20x128xf32>
    tpu.vector_store %arg9[%c0_59, %c0_60], %182 {strides = array<i32>} : memref<20x128xf32, #tpu.memory_space<vmem>>, vector<20x128xf32>,
    return
  }
  func.func @transform_0(%arg0: i32) -> (i32, i32) {
    %c0_i32 = arith.constant 0 : i32
    %c0_i32_0 = arith.constant 0 : i32
    return %arg0, %c0_i32 : i32, i32
  }
  func.func @transform_1(%arg0: i32) -> (i32, i32) {
    %c0_i32 = arith.constant 0 : i32
    %c0_i32_0 = arith.constant 0 : i32
    %c0_i32_1 = arith.constant 0 : i32
    return %c0_i32, %c0_i32_0 : i32, i32
  }
  func.func @transform_2(%arg0: i32) -> (i32, i32) {
    %c0_i32 = arith.constant 0 : i32
    %c0_i32_0 = arith.constant 0 : i32
    %c0_i32_1 = arith.constant 0 : i32
    return %c0_i32, %c0_i32_0 : i32, i32
  }
  func.func @transform_3(%arg0: i32) -> (i32, i32) {
    %c0_i32 = arith.constant 0 : i32
    %c0_i32_0 = arith.constant 0 : i32
    %c0_i32_1 = arith.constant 0 : i32
    return %c0_i32, %c0_i32_0 : i32, i32
  }
  func.func @transform_4(%arg0: i32) -> (i32, i32) {
    %c0_i32 = arith.constant 0 : i32
    %c0_i32_0 = arith.constant 0 : i32
    %c0_i32_1 = arith.constant 0 : i32
    return %c0_i32, %c0_i32_0 : i32, i32
  }
  func.func @transform_5(%arg0: i32) -> (i32, i32) {
    %c0_i32 = arith.constant 0 : i32
    %c0_i32_0 = arith.constant 0 : i32
    %c0_i32_1 = arith.constant 0 : i32
    return %c0_i32, %c0_i32_0 : i32, i32
  }
  func.func @transform_6(%arg0: i32) -> (i32, i32) {
    %c0_i32 = arith.constant 0 : i32
    %c0_i32_0 = arith.constant 0 : i32
    %c0_i32_1 = arith.constant 0 : i32
    return %c0_i32, %c0_i32_0 : i32, i32
  }
  func.func @transform_7(%arg0: i32) -> (i32, i32) {
    %c0_i32 = arith.constant 0 : i32
    %c0_i32_0 = arith.constant 0 : i32
    %c0_i32_1 = arith.constant 0 : i32
    return %c0_i32, %c0_i32_0 : i32, i32
  }
  func.func @transform_8(%arg0: i32) -> (i32, i32) {
    %c0_i32 = arith.constant 0 : i32
    %c0_i32_0 = arith.constant 0 : i32
    return %arg0, %c0_i32 : i32, i32
  }
}

</mosaic_0001>

<bundles_post_ra>
// kernel: tpu_custom_call.1
= control target key start
LH: loop header
LB: loop body
LE: loop exit
PB: predicated region body
PF: predicated region fallthrough
CT: control target
= control target key end

     0   :  { %vm234_vm0 = vcmask 261120   ;;  %s22307_s0 = inlined_call_operand.vmem [shape: bf16[320,32], index: 0, kind: input, shape index: {}]   ;;  %s22308_s1 = inlined_call_operand.vmem [shape: bf16[32,96], index: 1, kind: input, shape index: {}]   ;;  %s22309_s2 = inlined_call_operand.vmem [shape: f32[1,96], index: 2, kind: input, shape index: {}]   ;;  %s22310_s3 = inlined_call_operand.vmem [shape: bf16[32,32], index: 3, kind: input, shape index: {}]   ;;  %s22311_s4 = inlined_call_operand.vmem [shape: bf16[32,128], index: 4, kind: input, shape index: {}]   ;;  %s22312_s5 = inlined_call_operand.vmem [shape: f32[1,128], index: 5, kind: input, shape index: {}]   ;;  %s22313_s6 = inlined_call_operand.vmem [shape: bf16[128,32], index: 6, kind: input, shape index: {}]   ;;  %s22314_s7 = inlined_call_operand.vmem [shape: f32[8,32], index: 7, kind: input, shape index: {}]   ;;  %s22315_s8 = inlined_call_operand.hbm [shape: f32[20,128], index: 8, kind: output, shape index: {}]  }
   0x1   :  { %v15637_v0 = vld [vmem:[%s22308_s1] sm:$0xff]   ;;  %v15638_v1 = vld [vmem:[%s22308_s1 + $0x8] sm:$0xff]   ;;  %v35_v4 = vld [vmem:[%s22307_s0 + $0x10] sm:$0xff]  }
   0x2   :  { %14164 = vmatprep.subr.bf16.mxu0 %v15637_v0  ;;  %v31_v2 = vld [vmem:[%s22307_s0] sm:$0xff]   ;;  %15312 = vmatprep.subr.bf16.mxu1 %v15637_v0  ;;  %v33_v3 = vld [vmem:[%s22307_s0 + $0x8] sm:$0xff]   ;;  %v51_v5 = vld [vmem:[%s22307_s0 + $0x50] sm:$0xff]  }
   0x3   :  { %14165 = vmatpush3.bf16.msra.mxu0 %v15637_v0  ;;  %15314 = vmatpush3.bf16.msra.mxu1 %v15637_v0  ;;  %v53_v6 = vld [vmem:[%s22307_s0 + $0x58] sm:$0xff]   ;;  %v55_v7 = vld [vmem:[%s22307_s0 + $0x60] sm:$0xff]   ;;  %v57_v9 = vld [vmem:[%s22307_s0 + $0x68] sm:$0xff]  }
   0x4   :  { %14166 = vmatprep.subr.bf16.mxu0 %v15638_v1  ;;  %15313 = vmatprep.subr.bf16.mxu1 %v15638_v1  ;;  %v37_v8 = vld [vmem:[%s22307_s0 + $0x18] sm:$0xff]   ;;  %v39_v10 = vld [vmem:[%s22307_s0 + $0x20] sm:$0xff]   ;;  %v59_v11 = vld [vmem:[%s22307_s0 + $0x70] sm:$0xff]  }
   0x5   :  { %14168 = vmatprep.mubr.msk.bf16.mxu0 %vm234_vm0, %v31_v2  ;;  %14188 = vmatprep.mubr.msk.bf16.mxu1 %vm234_vm0, %v51_v5 }
   0x7   :  { %14167 = vmatpush3.bf16.msra.mxu0 %v15638_v1  ;;  %15315 = vmatpush3.bf16.msra.mxu1 %v15638_v1 }
   0xa   :  { %14169 = vmatmul.mubr.msk.bf16.vlgmr.msra.gmra.mrb[0].mxu0 %vm234_vm0, %v33_v3  ;;  %14189 = vmatmul.mubr.msk.bf16.vlgmr.msra.gmra.mrb[0].mxu1 %vm234_vm0, %v53_v6 }
   0xb   :  { %14172 = vmatprep.mubr.msk.bf16.mxu0 %vm234_vm0, %v35_v4  ;;  %14192 = vmatprep.mubr.msk.bf16.mxu1 %vm234_vm0, %v55_v7 }
   0xc   :  { %13 = vsyncpa [#allocation3], 0  ;;  %v41_v12 = vld [vmem:[%s22307_s0 + $0x28] sm:$0xff]   ;;  %v61_v13 = vld [vmem:[%s22307_s0 + $0x78] sm:$0xff]   ;;  %v22316_v22 = vmov 0.0   ;;  %vm16536_vm1 = vmmov 0  }
   0xd   :  { %v43_v14 = vld [vmem:[%s22307_s0 + $0x30] sm:$0xff]   ;;  %v63_v15 = vld [vmem:[%s22307_s0 + $0x80] sm:$0xff]   ;;  %v45_v16 = vld [vmem:[%s22307_s0 + $0x38] sm:$0xff]   ;;  %14208 = vmatprep.subr.bf16.mxu1 %v22316_v22  ;;  %14268 = vmatprep.subr.bf16.mxu0 %v22316_v22  ;;  %s16538_s27 = smov 64   ;;  %vm511_vm2 = vcmask 64512   ;;  %vm1549_vm3 = vcmask 130048  }
   0xe   :  { %v65_v17 = vld [vmem:[%s22307_s0 + $0x88] sm:$0xff]   ;;  %v47_v18 = vld [vmem:[%s22307_s0 + $0x40] sm:$0xff]   ;;  %v67_v19 = vld [vmem:[%s22307_s0 + $0x90] sm:$0xff]   ;;  %s16539_s28 = smov 88   ;;  %s16540_s29 = smov 120   ;;  %vm10890_vm4 = vcmask 195584  }
   0xf   :  { %v49_v20 = vld [vmem:[%s22307_s0 + $0x48] sm:$0xff]   ;;  %v69_v21 = vld [vmem:[%s22307_s0 + $0x98] sm:$0xff]   ;;  %v16690_v24 = vld [vmem:[%s22309_s2] ss:$0 sm:$0xff]  ;;  %s16537_s2 = smov 96   ;;  %s16541_s30 = smov 56  }
  0x10   :  { %s16542_s9 = smov 80   ;;  %s16543_s10 = smov 112   ;;  %vm13391_vm5 = vcmask 1041409   ;;  %vm13394_vm6 = vcmask 1042434   ;;  %vm13397_vm7 = vcmask 1043459   ;;  %vm13400_vm8 = vcmask 1044484  }
  0x11   :  { %s16544_s11 = smov 48   ;;  %s16545_s12 = smov 72   ;;  %vm13403_vm9 = vcmask 1045509   ;;  %vm13406_vm10 = vcmask 1046534   ;;  %vm13409_vm11 = vcmask 1047559   ;;  %vm13440_vm12 = vcmask 257024  }
  0x12   :  { %14173 = vmatmul.mubr.msk.bf16.gmra.mrb[4].mxu0 %vm234_vm0, %v37_v8  ;;  %14193 = vmatmul.mubr.msk.bf16.gmra.mrb[4].mxu1 %vm234_vm0, %v57_v9  ;;  %s16546_s13 = smov 104   ;;  %s16547_s14 = smov 40  }
  0x13   :  { %14176 = vmatprep.mubr.msk.bf16.mxu0 %vm234_vm0, %v39_v10  ;;  %14196 = vmatprep.mubr.msk.bf16.mxu1 %vm234_vm0, %v59_v11  ;;  %s16548_s1 = smov 8   ;;  %s16549_s15 = smov 16  }
  0x14   :  { %s16550_s20 = smov 24  }
  0x1a   :  { %14177 = vmatmul.mubr.msk.bf16.gmra.mrb[8].mxu0 %vm234_vm0, %v41_v12  ;;  %14197 = vmatmul.mubr.msk.bf16.gmra.mrb[8].mxu1 %vm234_vm0, %v61_v13 }
  0x1b   :  { %14180 = vmatprep.mubr.msk.bf16.mxu0 %vm234_vm0, %v43_v14  ;;  %14200 = vmatprep.mubr.msk.bf16.mxu1 %vm234_vm0, %v63_v15 }
  0x22   :  { %14181 = vmatmul.mubr.msk.bf16.gmra.mrb[12].mxu0 %vm234_vm0, %v45_v16  ;;  %14201 = vmatmul.mubr.msk.bf16.gmra.mrb[12].mxu1 %vm234_vm0, %v65_v17 }
  0x23   :  { %14184 = vmatprep.mubr.msk.bf16.mxu0 %vm234_vm0, %v47_v18  ;;  %14204 = vmatprep.mubr.msk.bf16.mxu1 %vm234_vm0, %v67_v19 }
  0x2a   :  { %14185 = vmatmul.mubr.msk.bf16.gmra.mrb[16].mxu0 %vm234_vm0, %v49_v20  ;;  %14205 = vmatmul.mubr.msk.bf16.gmra.mrb[16].mxu1 %vm234_vm0, %v69_v21 }
  0x2b   :  { %14210 = vmatprep.mubr.msk.bf16.mxu1 %vm16536_vm1, %v22316_v22  ;;  %14270 = vmatprep.mubr.msk.bf16.mxu0 %vm16536_vm1, %v22316_v22 }
  0xdd   :  { %v14170_v23 = vpop.f32.mrb[0].mxu0  ;;  %v14190_v25 = vpop.f32.mrb[0].mxu1 }
  0xde   :  { %v329_v26 = vpop.f32.mrb[1].mxu0  ;;  %v418_v27 = vadd.f32 %v14190_v25, %v16690_v24  ;;  %v409_v28 = vpop.f32.mrb[1].mxu1  ;;  %v338_v32 = vadd.f32 %v14170_v23, %v16690_v24 }
  0xdf   :  { %v14171_v29 = vpop.f32.mrb[2].mxu0  ;;  %v410_v30 = vadd.f32 %v16690_v24, %v409_v28  ;;  %v14191_v31 = vpop.f32.mrb[2].mxu1  ;;  %v330_v37 = vadd.f32 %v16690_v24, %v329_v26 }
  0xe0   :  { %v341_v33 = vadd.f32 %v14171_v29, %v16690_v24  ;;  %v332_v34 = vpop.f32.mrb[3].mxu0  ;;  %v421_v35 = vadd.f32 %v14191_v31, %v16690_v24  ;;  %v412_v36 = vpop.f32.mrb[3].mxu1 }
  0xe1   :  { %v333_v38 = vadd.f32 %v16690_v24, %v332_v34  ;;  %v413_v39 = vadd.f32 %v16690_v24, %v412_v36 }
  0xe2   :  { %v16704_v40 = vpack.c.bf16 %v341_v33, %v338_v32  ;;  %v16706_v41 = vpack.c.bf16 %v421_v35, %v418_v27 }
  0xe3   :  { %v16708_v42 = vpack.c.bf16 %v333_v38, %v330_v37  ;;  %v16710_v43 = vpack.c.bf16 %v413_v39, %v410_v30 }
  0xe4   :  { %22458 = vst [vmem:[#allocation5_spill] sm:$0xff] %v16706_v41 }
  0xe5   :  { %22459 = vst [vmem:[#allocation6_spill] sm:$0xff] %v16710_v43  ;;  %v14174_v44 = vpop.f32.mrb[4].mxu0  ;;  %509 = vrot.lane.b32.xlu0 %v16708_v42, %s16537_s2  ;;  %v14194_v45 = vpop.f32.mrb[4].mxu1 }
  0xe6   :  { %v345_v46 = vpop.f32.mrb[5].mxu0  ;;  %v434_v47 = vadd.f32 %v14194_v45, %v16690_v24  ;;  %v425_v48 = vpop.f32.mrb[5].mxu1  ;;  %v354_v52 = vadd.f32 %v14174_v44, %v16690_v24 }
  0xe7   :  { %v14175_v49 = vpop.f32.mrb[6].mxu0  ;;  %v426_v50 = vadd.f32 %v16690_v24, %v425_v48  ;;  %v14195_v51 = vpop.f32.mrb[6].mxu1  ;;  %v346_v57 = vadd.f32 %v16690_v24, %v345_v46 }
  0xe8   :  { %v357_v53 = vadd.f32 %v14175_v49, %v16690_v24  ;;  %v348_v54 = vpop.f32.mrb[7].mxu0  ;;  %v437_v55 = vadd.f32 %v14195_v51, %v16690_v24  ;;  %v428_v56 = vpop.f32.mrb[7].mxu1 }
  0xe9   :  { %v349_v58 = vadd.f32 %v16690_v24, %v348_v54  ;;  %560 = vrot.lane.b32.xlu0 %v16704_v40, %s16537_s2  ;;  %v429_v59 = vadd.f32 %v16690_v24, %v428_v56 }
  0xea   :  { %v16724_v60 = vpack.c.bf16 %v357_v53, %v354_v52  ;;  %v16726_v61 = vpack.c.bf16 %v437_v55, %v434_v47 }
  0xeb   :  { %v16728_v62 = vpack.c.bf16 %v349_v58, %v346_v57  ;;  %v16730_v63 = vpack.c.bf16 %v429_v59, %v426_v50 }
  0xec   :  { %22460 = vst [vmem:[#allocation7_spill] sm:$0xff] %v16726_v61 }
  0xed   :  { %22461 = vst [vmem:[#allocation8_spill] sm:$0xff] %v16730_v63  ;;  %v14178_v0 = vpop.f32.mrb[8].mxu0  ;;  %610 = vrot.lane.b32.xlu1 %v16728_v62, %s16537_s2  ;;  %v14198_v1 = vpop.f32.mrb[8].mxu1 }
  0xee   :  { %v361_v2 = vpop.f32.mrb[9].mxu0  ;;  %v450_v3 = vadd.f32 %v14198_v1, %v16690_v24  ;;  %v441_v4 = vpop.f32.mrb[9].mxu1  ;;  %v370_v8 = vadd.f32 %v14178_v0, %v16690_v24 }
  0xef   :  { %v14179_v5 = vpop.f32.mrb[10].mxu0  ;;  %v442_v6 = vadd.f32 %v16690_v24, %v441_v4  ;;  %v14199_v7 = vpop.f32.mrb[10].mxu1  ;;  %v362_v13 = vadd.f32 %v16690_v24, %v361_v2 }
  0xf0   :  { %v373_v9 = vadd.f32 %v14179_v5, %v16690_v24  ;;  %v364_v10 = vpop.f32.mrb[11].mxu0  ;;  %v453_v11 = vadd.f32 %v14199_v7, %v16690_v24  ;;  %v444_v12 = vpop.f32.mrb[11].mxu1 }
  0xf1   :  { %v365_v14 = vadd.f32 %v16690_v24, %v364_v10  ;;  %660 = vrot.lane.b32.xlu1 %v16724_v60, %s16537_s2  ;;  %v445_v15 = vadd.f32 %v16690_v24, %v444_v12 }
  0xf2   :  { %v16744_v16 = vpack.c.bf16 %v373_v9, %v370_v8  ;;  %v16746_v17 = vpack.c.bf16 %v453_v11, %v450_v3 }
  0xf3   :  { %v16748_v18 = vpack.c.bf16 %v365_v14, %v362_v13  ;;  %v16750_v19 = vpack.c.bf16 %v445_v15, %v442_v6 }
  0xf4   :  { %22462 = vst [vmem:[#allocation9_spill] sm:$0xff] %v16746_v17 }
  0xf5   :  { %22463 = vst [vmem:[#allocation10_spill] sm:$0xff] %v16750_v19  ;;  %v14182_v20 = vpop.f32.mrb[12].mxu0  ;;  %760 = vrot.lane.b32.xlu1 %v16744_v16, %s16537_s2  ;;  %710 = vrot.lane.b32.xlu0 %v16748_v18, %s16537_s2  ;;  %v14202_v21 = vpop.f32.mrb[12].mxu1 }
  0xf6   :  { %v377_v23 = vpop.f32.mrb[13].mxu0  ;;  %v466_v25 = vadd.f32 %v14202_v21, %v16690_v24  ;;  %v457_v26 = vpop.f32.mrb[13].mxu1  ;;  %v386_v30 = vadd.f32 %v14182_v20, %v16690_v24 }
  0xf7   :  { %v14183_v27 = vpop.f32.mrb[14].mxu0  ;;  %v458_v28 = vadd.f32 %v16690_v24, %v457_v26  ;;  %v14203_v29 = vpop.f32.mrb[14].mxu1  ;;  %v378_v35 = vadd.f32 %v16690_v24, %v377_v23 }
  0xf8   :  { %v389_v31 = vadd.f32 %v14183_v27, %v16690_v24  ;;  %v380_v32 = vpop.f32.mrb[15].mxu0  ;;  %v469_v33 = vadd.f32 %v14203_v29, %v16690_v24  ;;  %v460_v34 = vpop.f32.mrb[15].mxu1 }
  0xf9   :  { %v381_v36 = vadd.f32 %v16690_v24, %v380_v32  ;;  %v461_v37 = vadd.f32 %v16690_v24, %v460_v34 }
  0xfa   :  { %v16764_v38 = vpack.c.bf16 %v389_v31, %v386_v30  ;;  %v16766_v39 = vpack.c.bf16 %v469_v33, %v466_v25 }
  0xfb   :  { %v16768_v44 = vpack.c.bf16 %v381_v36, %v378_v35  ;;  %v16770_v45 = vpack.c.bf16 %v461_v37, %v458_v28 }
  0xfc   :  { %22464 = vst [vmem:[#allocation11_spill] sm:$0xff] %v16764_v38  ;;  %22465 = vst [vmem:[#allocation12_spill] sm:$0xff] %v16766_v39  ;;  %860 = vrot.lane.b32.xlu1 %v16764_v38, %s16537_s2 }
  0xfd   :  { %22466 = vst [vmem:[#allocation13_spill] sm:$0xff] %v16770_v45  ;;  %v14186_v46 = vpop.f32.mrb[16].mxu0  ;;  %810 = vrot.lane.b32.xlu0 %v16768_v44, %s16537_s2  ;;  %v14206_v47 = vpop.f32.mrb[16].mxu1 }
  0xfe   :  { %v393_v48 = vpop.f32.mrb[17].mxu0  ;;  %v482_v49 = vadd.f32 %v14206_v47, %v16690_v24  ;;  %v473_v50 = vpop.f32.mrb[17].mxu1  ;;  %v402_v54 = vadd.f32 %v14186_v46, %v16690_v24 }
  0xff   :  { %v14187_v51 = vpop.f32.mrb[18].mxu0  ;;  %v474_v52 = vadd.f32 %v16690_v24, %v473_v50  ;;  %v14207_v53 = vpop.f32.mrb[18].mxu1  ;;  %v394_v59 = vadd.f32 %v16690_v24, %v393_v48 }
 0x100   :  { %v405_v55 = vadd.f32 %v14187_v51, %v16690_v24  ;;  %v396_v56 = vpop.f32.mrb[19].mxu0  ;;  %v485_v57 = vadd.f32 %v14207_v53, %v16690_v24  ;;  %v476_v58 = vpop.f32.mrb[19].mxu1 }
 0x101   :  { %v397_v0 = vadd.f32 %v16690_v24, %v396_v56  ;;  %v477_v1 = vadd.f32 %v16690_v24, %v476_v58 }
 0x102   :  { %v16784_v2 = vpack.c.bf16 %v405_v55, %v402_v54  ;;  %v16786_v3 = vpack.c.bf16 %v485_v57, %v482_v49 }
 0x103   :  { %v16788_v4 = vpack.c.bf16 %v397_v0, %v394_v59  ;;  %v16790_v5 = vpack.c.bf16 %v477_v1, %v474_v52 }
 0x104   :  { %22467 = vst [vmem:[#allocation14_spill] sm:$0xff] %v16784_v2  ;;  %22468 = vst [vmem:[#allocation15_spill] sm:$0xff] %v16786_v3  ;;  %960 = vrot.lane.b32.xlu1 %v16784_v2, %s16537_s2 }
 0x105   :  { %22469 = vst [vmem:[#allocation16_spill] sm:$0xff] %v16788_v4  ;;  %22470 = vst [vmem:[#allocation17_spill] sm:$0xff] %v16790_v5  ;;  %910 = vrot.lane.b32.xlu0 %v16788_v4, %s16537_s2 }
 0x108   :  { %1060 = vrot.lane.b32.xlu1 %v16706_v41, %s16537_s2 }
 0x109   :  { %1010 = vrot.lane.b32.xlu0 %v16710_v43, %s16537_s2 }
 0x10c   :  { %1160 = vrot.lane.b32.xlu1 %v16726_v61, %s16537_s2 }
 0x10d   :  { %1110 = vrot.lane.b32.xlu0 %v16730_v63, %s16537_s2 }
 0x110   :  { %1260 = vrot.lane.b32.xlu1 %v16746_v17, %s16537_s2 }
 0x111   :  { %1210 = vrot.lane.b32.xlu0 %v16750_v19, %s16537_s2 }
 0x114   :  { %1360 = vrot.lane.b32.xlu1 %v16766_v39, %s16537_s2 }
 0x115   :  { %1310 = vrot.lane.b32.xlu0 %v16770_v45, %s16537_s2 }
 0x118   :  { %1460 = vrot.lane.b32.xlu1 %v16786_v3, %s16537_s2 }
 0x119   :  { %1410 = vrot.lane.b32.xlu0 %v16790_v5, %s16537_s2 }
 0x11c   :  { %2010 = vrot.lane.b32.xlu1 %v16708_v42, %s16538_s27 }
 0x11d   :  { %2057 = vrot.lane.b32.xlu0 %v16704_v40, %s16538_s27 }
 0x120   :  { %2104 = vrot.lane.b32.xlu1 %v16728_v62, %s16538_s27 }
 0x121   :  { %2151 = vrot.lane.b32.xlu0 %v16724_v60, %s16538_s27 }
 0x124   :  { %2198 = vrot.lane.b32.xlu1 %v16748_v18, %s16538_s27 }
 0x125   :  { %2245 = vrot.lane.b32.xlu0 %v16744_v16, %s16538_s27 }
 0x128   :  { %2292 = vrot.lane.b32.xlu1 %v16768_v44, %s16538_s27 }
 0x129   :  { %2339 = vrot.lane.b32.xlu0 %v16764_v38, %s16538_s27 }
 0x12c   :  { %2480 = vrot.lane.b32.xlu1 %v16710_v43, %s16538_s27 }
 0x12d   :  { %2433 = vrot.lane.b32.xlu0 %v16784_v2, %s16538_s27 }
 0x130   :  { %2574 = vrot.lane.b32.xlu1 %v16730_v63, %s16538_s27 }
 0x131   :  { %2527 = vrot.lane.b32.xlu0 %v16706_v41, %s16538_s27 }
 0x134   :  { %2668 = vrot.lane.b32.xlu1 %v16750_v19, %s16538_s27 }
 0x135   :  { %2621 = vrot.lane.b32.xlu0 %v16726_v61, %s16538_s27 }
 0x138   :  { %2715 = vrot.lane.b32.xlu1 %v16746_v17, %s16538_s27 }
 0x139   :  { %2762 = vrot.lane.b32.xlu0 %v16770_v45, %s16538_s27 }
 0x13c   :  { %2809 = vrot.lane.b32.xlu1 %v16766_v39, %s16538_s27 }
 0x140   :  { %2386 = vrot.lane.b32.xlu1 %v16788_v4, %s16538_s27 }
 0x157   :  { %v510_v24 = vpop.permute.xlu0 %509 }
 0x158   :  { %v516_v6 = vsel %vm511_vm2, %v510_v24, 0 }
 0x159   :  { %14209 = vmatpush3.bf16.xpose.msra.mxu1 %v516_v6 }
 0x15a   :  { %14214 = vmatprep.subr.bf16.mxu1 %v22316_v22 }
 0x15b   :  { %v561_v7 = vpop.permute.xlu0 %560 }
 0x15c   :  { %v566_v8 = vsel %vm511_vm2, %v561_v7, 0 }
 0x15f   :  { %v611_v9 = vpop.permute.xlu1 %610 }
 0x160   :  { %14211 = vmatmul.mubr.msk.bf16.vlgmr.msra.gmra.mrb[20].mxu1 %vm511_vm2, %v16708_v42  ;;  %v616_v10 = vsel %vm511_vm2, %v611_v9, 0 }
 0x161   :  { %14215 = vmatpush3.bf16.xpose.msra.mxu1 %v566_v8  ;;  %14216 = vmatprep.mubr.msk.bf16.mxu1 %vm16536_vm1, %v22316_v22 }
 0x162   :  { %14220 = vmatprep.subr.bf16.mxu1 %v22316_v22 }
 0x163   :  { %v661_v11 = vpop.permute.xlu1 %660 }
 0x164   :  { %v666_v13 = vsel %vm511_vm2, %v661_v11, 0 }
 0x167   :  { %v711_v12 = vpop.permute.xlu0 %710  ;;  %v761_v20 = vpop.permute.xlu1 %760 }
 0x168   :  { %14217 = vmatmul.mubr.msk.bf16.vlgmr.msra.gmra.mrb[24].mxu1 %vm511_vm2, %v16704_v40  ;;  %v716_v21 = vsel %vm511_vm2, %v711_v12, 0  ;;  %v766_v27 = vsel %vm511_vm2, %v761_v20, 0 }
 0x169   :  { %14221 = vmatpush3.bf16.xpose.msra.mxu1 %v616_v10  ;;  %14222 = vmatprep.mubr.msk.bf16.mxu1 %vm16536_vm1, %v22316_v22 }
 0x16a   :  { %14226 = vmatprep.subr.bf16.mxu1 %v22316_v22 }
 0x16e   :  { %v861_v25 = vpop.permute.xlu1 %860 }
 0x16f   :  { %v811_v14 = vpop.permute.xlu0 %810  ;;  %v866_v36 = vsel %vm511_vm2, %v861_v25, 0 }
 0x170   :  { %14223 = vmatmul.mubr.msk.bf16.vlgmr.msra.gmra.mrb[28].mxu1 %vm511_vm2, %v16728_v62  ;;  %v816_v32 = vsel %vm511_vm2, %v811_v14, 0 }
 0x171   :  { %14227 = vmatpush3.bf16.xpose.msra.mxu1 %v666_v13  ;;  %14228 = vmatprep.mubr.msk.bf16.mxu1 %vm16536_vm1, %v22316_v22 }
 0x172   :  { %14232 = vmatprep.subr.bf16.mxu1 %v22316_v22 }
 0x176   :  { %v961_v28 = vpop.permute.xlu1 %960 }
 0x177   :  { %v911_v15 = vpop.permute.xlu0 %910  ;;  %v966_v53 = vsel %vm511_vm2, %v961_v28, 0 }
 0x178   :  { %14229 = vmatmul.mubr.msk.bf16.vlgmr.msra.gmra.mrb[32].mxu1 %vm511_vm2, %v16724_v60  ;;  %v916_v48 = vsel %vm511_vm2, %v911_v15, 0 }
 0x179   :  { %14233 = vmatpush3.bf16.xpose.msra.mxu1 %v716_v21  ;;  %14234 = vmatprep.mubr.msk.bf16.mxu1 %vm16536_vm1, %v22316_v22 }
 0x17a   :  { %14238 = vmatprep.subr.bf16.mxu1 %v22316_v22  ;;  %v1061_v31 = vpop.permute.xlu1 %1060 }
 0x17b   :  { %v1011_v23 = vpop.permute.xlu0 %1010  ;;  %v1066_v55 = vsel %vm511_vm2, %v1061_v31, 0 }
 0x17c   :  { %v1016_v26 = vsel %vm511_vm2, %v1011_v23, 0 }
 0x17d   :  { %14269 = vmatpush3.bf16.xpose.msra.mxu0 %v1016_v26 }
 0x17e   :  { %14280 = vmatprep.subr.bf16.mxu0 %v22316_v22  ;;  %v1161_v35 = vpop.permute.xlu1 %1160 }
 0x17f   :  { %v1111_v29 = vpop.permute.xlu0 %1110  ;;  %v1166_v56 = vsel %vm511_vm2, %v1161_v35, 0 }
 0x180   :  { %14235 = vmatmul.mubr.msk.bf16.vlgmr.msra.gmra.mrb[36].mxu1 %vm511_vm2, %v16748_v18  ;;  %v1116_v30 = vsel %vm511_vm2, %v1111_v29, 0 }
 0x181   :  { %14239 = vmatpush3.bf16.xpose.msra.mxu1 %v766_v27  ;;  %14240 = vmatprep.mubr.msk.bf16.mxu1 %vm16536_vm1, %v22316_v22 }
 0x182   :  { %14244 = vmatprep.subr.bf16.mxu1 %v22316_v22  ;;  %v1261_v46 = vpop.permute.xlu1 %1260 }
 0x183   :  { %v1211_v33 = vpop.permute.xlu0 %1210  ;;  %v1266_v57 = vsel %vm511_vm2, %v1261_v46, 0 }
 0x184   :  { %14271 = vmatmul.mubr.msk.bf16.vlgmr.msra.gmra.mrb[20].mxu0 %vm511_vm2, %v16710_v43  ;;  %v1216_v34 = vsel %vm511_vm2, %v1211_v33, 0 }
 0x185   :  { %14281 = vmatpush3.bf16.xpose.msra.mxu0 %v1116_v30  ;;  %14282 = vmatprep.mubr.msk.bf16.mxu0 %vm16536_vm1, %v22316_v22 }
 0x186   :  { %14292 = vmatprep.subr.bf16.mxu0 %v22316_v22  ;;  %v1361_v49 = vpop.permute.xlu1 %1360 }
 0x187   :  { %v1311_v37 = vpop.permute.xlu0 %1310  ;;  %v1366_v58 = vsel %vm511_vm2, %v1361_v49, 0 }
 0x188   :  { %14241 = vmatmul.mubr.msk.bf16.vlgmr.msra.gmra.mrb[40].mxu1 %vm511_vm2, %v16744_v16  ;;  %v1316_v47 = vsel %vm511_vm2, %v1311_v37, 0 }
 0x189   :  { %14245 = vmatpush3.bf16.xpose.msra.mxu1 %v816_v32  ;;  %14246 = vmatprep.mubr.msk.bf16.mxu1 %vm16536_vm1, %v22316_v22 }
 0x18a   :  { %14250 = vmatprep.subr.bf16.mxu1 %v22316_v22  ;;  %v1461_v52 = vpop.permute.xlu1 %1460 }
 0x18b   :  { %v1411_v50 = vpop.permute.xlu0 %1410  ;;  %v1466_v59 = vsel %vm511_vm2, %v1461_v52, 0 }
 0x18c   :  { %14283 = vmatmul.mubr.msk.bf16.vlgmr.msra.gmra.mrb[24].mxu0 %vm511_vm2, %v16730_v63  ;;  %v1416_v51 = vsel %vm511_vm2, %v1411_v50, 0 }
 0x18d   :  { %14293 = vmatpush3.bf16.xpose.msra.mxu0 %v1216_v34  ;;  %14294 = vmatprep.mubr.msk.bf16.mxu0 %vm16536_vm1, %v22316_v22 }
 0x18e   :  { %14304 = vmatprep.subr.bf16.mxu0 %v22316_v22  ;;  %v2011_v54 = vpop.permute.xlu1 %2010 }
 0x18f   :  { %v2058_v0 = vpop.permute.xlu0 %2057 }
 0x190   :  { %14247 = vmatmul.mubr.msk.bf16.vlgmr.msra.gmra.mrb[44].mxu1 %vm511_vm2, %v16768_v44 }
 0x191   :  { %14251 = vmatpush3.bf16.xpose.msra.mxu1 %v866_v36  ;;  %14252 = vmatprep.mubr.msk.bf16.mxu1 %vm16536_vm1, %v22316_v22 }
 0x192   :  { %14256 = vmatprep.subr.bf16.mxu1 %v22316_v22 }
 0x194   :  { %14295 = vmatmul.mubr.msk.bf16.vlgmr.msra.gmra.mrb[28].mxu0 %vm511_vm2, %v16750_v19 }
 0x195   :  { %14305 = vmatpush3.bf16.xpose.msra.mxu0 %v1316_v47  ;;  %14306 = vmatprep.mubr.msk.bf16.mxu0 %vm16536_vm1, %v22316_v22 }
 0x196   :  { %14316 = vmatprep.subr.bf16.mxu0 %v22316_v22 }
 0x198   :  { %14253 = vmatmul.mubr.msk.bf16.vlgmr.msra.gmra.mrb[48].mxu1 %vm511_vm2, %v16764_v38 }
 0x199   :  { %14257 = vmatpush3.bf16.xpose.msra.mxu1 %v916_v48  ;;  %14258 = vmatprep.mubr.msk.bf16.mxu1 %vm16536_vm1, %v22316_v22 }
 0x19a   :  { %14262 = vmatprep.subr.bf16.mxu1 %v22316_v22 }
 0x19c   :  { %14307 = vmatmul.mubr.msk.bf16.vlgmr.msra.gmra.mrb[32].mxu0 %vm511_vm2, %v16770_v45 }
 0x19d   :  { %14317 = vmatpush3.bf16.xpose.msra.mxu0 %v1416_v51  ;;  %14318 = vmatprep.mubr.msk.bf16.mxu0 %vm16536_vm1, %v22316_v22 }
 0x19e   :  { %14328 = vmatprep.subr.bf16.mxu0 %v22316_v22 }
 0x1a0   :  { %14259 = vmatmul.mubr.msk.bf16.vlgmr.msra.gmra.mrb[52].mxu1 %vm511_vm2, %v16788_v4 }
 0x1a1   :  { %14263 = vmatpush3.bf16.xpose.msra.mxu1 %v966_v53  ;;  %14264 = vmatprep.mubr.msk.bf16.mxu1 %vm16536_vm1, %v22316_v22 }
 0x1a2   :  { %14274 = vmatprep.subr.bf16.mxu1 %v22316_v22 }
 0x1a4   :  { %14319 = vmatmul.mubr.msk.bf16.vlgmr.msra.gmra.mrb[36].mxu0 %vm511_vm2, %v16790_v5 }
 0x1a5   :  { %14329 = vmatpush3.bf16.msra.mxu0 %v2011_v54  ;;  %14330 = vmatprep.mubr.msk.bf16.mxu0 %vm16536_vm1, %v22316_v22 }
 0x1a6   :  { %14340 = vmatprep.subr.bf16.mxu0 %v22316_v22 }
 0x1a8   :  { %14265 = vmatmul.mubr.msk.bf16.vlgmr.msra.gmra.mrb[56].mxu1 %vm511_vm2, %v16784_v2 }
 0x1a9   :  { %14275 = vmatpush3.bf16.xpose.msra.mxu1 %v1066_v55  ;;  %14276 = vmatprep.mubr.msk.bf16.mxu1 %vm16536_vm1, %v22316_v22 }
 0x1aa   :  { %14286 = vmatprep.subr.bf16.mxu1 %v22316_v22 }
 0x1b0   :  { %14277 = vmatmul.mubr.msk.bf16.vlgmr.msra.gmra.mrb[60].mxu1 %vm511_vm2, %v16706_v41 }
 0x1b1   :  { %14287 = vmatpush3.bf16.xpose.msra.mxu1 %v1166_v56  ;;  %14288 = vmatprep.mubr.msk.bf16.mxu1 %vm16536_vm1, %v22316_v22 }
 0x1b2   :  { %14298 = vmatprep.subr.bf16.mxu1 %v22316_v22 }
 0x1b8   :  { %14289 = vmatmul.mubr.msk.bf16.vlgmr.msra.gmra.mrb[64].mxu1 %vm511_vm2, %v16726_v61 }
 0x1b9   :  { %14299 = vmatpush3.bf16.xpose.msra.mxu1 %v1266_v57  ;;  %14300 = vmatprep.mubr.msk.bf16.mxu1 %vm16536_vm1, %v22316_v22 }
 0x1ba   :  { %14310 = vmatprep.subr.bf16.mxu1 %v22316_v22 }
 0x1c0   :  { %14301 = vmatmul.mubr.msk.bf16.vlgmr.msra.gmra.mrb[68].mxu1 %vm511_vm2, %v16746_v17 }
 0x1c1   :  { %14311 = vmatpush3.bf16.xpose.msra.mxu1 %v1366_v58  ;;  %14312 = vmatprep.mubr.msk.bf16.mxu1 %vm16536_vm1, %v22316_v22 }
 0x1c2   :  { %14322 = vmatprep.subr.bf16.mxu1 %v22316_v22 }
 0x1c8   :  { %14313 = vmatmul.mubr.msk.bf16.vlgmr.msra.gmra.mrb[72].mxu1 %vm511_vm2, %v16766_v39 }
 0x1c9   :  { %14323 = vmatpush3.bf16.xpose.msra.mxu1 %v1466_v59  ;;  %14324 = vmatprep.mubr.msk.bf16.mxu1 %vm16536_vm1, %v22316_v22 }
 0x1ca   :  { %14334 = vmatprep.subr.bf16.mxu1 %v22316_v22 }
 0x1d0   :  { %14325 = vmatmul.mubr.msk.bf16.vlgmr.msra.gmra.mrb[76].mxu1 %vm511_vm2, %v16786_v3 }
 0x1d1   :  { %14335 = vmatpush3.bf16.msra.mxu1 %v2058_v0  ;;  %14336 = vmatprep.mubr.msk.bf16.mxu1 %vm16536_vm1, %v22316_v22 }
 0x1d2   :  { %14346 = vmatprep.subr.bf16.mxu1 %v22316_v22 }
 0x233   :  { %v552_v1 = vpop.f32.mrb[20].mxu1 }
 0x234   :  { %v14212_v24 = vpop.f32.mrb[21].mxu1  ;;  %v16974_v6 = vmul.f32 0.35355338, %v552_v1 }
 0x235   :  { %v555_v7 = vpop.f32.mrb[22].mxu1 }
 0x236   :  { %v14213_v8 = vpop.f32.mrb[23].mxu1  ;;  %v1550_v9 = vsel %vm1549_vm3, %v16974_v6, -inf  ;;  %v16990_v47 = vmul.f32 0.35355338, %v555_v7 }
 0x237   :  { %1551 = vmax.xlane.f32.xlu0 %v1550_v9 }
 0x238   :  { %v1553_v54 = vsel %vm1549_vm3, %v16990_v47, -inf }
 0x23b   :  { %v602_v10 = vpop.f32.mrb[24].mxu1 }
 0x23c   :  { %v14218_v11 = vpop.f32.mrb[25].mxu1  ;;  %v16996_v51 = vmul.f32 0.35355338, %v602_v10 }
 0x23d   :  { %v605_v12 = vpop.f32.mrb[26].mxu1 }
 0x23e   :  { %v14219_v13 = vpop.f32.mrb[27].mxu1  ;;  %v1556_v57 = vsel %vm1549_vm3, %v16996_v51, -inf  ;;  %v17006_v59 = vmul.f32 0.35355338, %v605_v12 }
 0x240   :  { %v1559_v10 = vsel %vm1549_vm3, %v17006_v59, -inf }
 0x243   :  { %v652_v14 = vpop.f32.mrb[28].mxu1 }
 0x244   :  { %v14224_v15 = vpop.f32.mrb[29].mxu1  ;;  %v17010_v7 = vmul.f32 0.35355338, %v652_v14 }
 0x245   :  { %v655_v20 = vpop.f32.mrb[30].mxu1 }
 0x246   :  { %v14225_v21 = vpop.f32.mrb[31].mxu1  ;;  %v1562_v15 = vsel %vm1549_vm3, %v17010_v7, -inf }
 0x24b   :  { %v702_v23 = vpop.f32.mrb[32].mxu1 }
 0x24c   :  { %v14230_v25 = vpop.f32.mrb[33].mxu1 }
 0x24d   :  { %v16978_v26 = vpop.f32.mrb[34].mxu1 }
 0x24e   :  { %v14231_v27 = vpop.f32.mrb[35].mxu1 }
 0x253   :  { %v16980_v28 = vpop.f32.mrb[36].mxu1 }
 0x254   :  { %v14236_v29 = vpop.f32.mrb[37].mxu1 }
 0x255   :  { %v16982_v30 = vpop.f32.mrb[38].mxu1  ;;  %v17026_v29 = vmul.f32 0.35355338, %v655_v20 }
 0x256   :  { %v14237_v31 = vpop.f32.mrb[39].mxu1 }
 0x257   :  { %v1052_v32 = vpop.f32.mrb[20].mxu0 }
 0x258   :  { %v14272_v33 = vpop.f32.mrb[21].mxu0  ;;  %v16984_v34 = vmul.f32 0.35355338, %v1052_v32 }
 0x259   :  { %v1055_v35 = vpop.f32.mrb[22].mxu0 }
 0x25a   :  { %v14273_v36 = vpop.f32.mrb[23].mxu0  ;;  %v1610_v37 = vsel %vm1549_vm3, %v16984_v34, -inf  ;;  %v16988_v46 = vmul.f32 0.35355338, %v1055_v35  ;;  %v17030_v35 = vmul.f32 0.35355338, %v702_v23 }
 0x25b   :  { %v16992_v48 = vpop.f32.mrb[40].mxu1  ;;  %1611 = vmax.xlane.f32.xlu1 %v1610_v37 }
 0x25c   :  { %v14242_v49 = vpop.f32.mrb[41].mxu1  ;;  %v1613_v50 = vsel %vm1549_vm3, %v16988_v46, -inf }
 0x25d   :  { %v16998_v52 = vpop.f32.mrb[42].mxu1  ;;  %1614 = vmax.xlane.f32.xlu0 %v1613_v50  ;;  %v1565_v49 = vsel %vm1549_vm3, %v17026_v29, -inf }
 0x25e   :  { %v14243_v53 = vpop.f32.mrb[43].mxu1 }
 0x25f   :  { %1554 = vmax.xlane.f32.xlu1 %v1553_v54  ;;  %v1152_v55 = vpop.f32.mrb[24].mxu0  ;;  %v1568_v54 = vsel %vm1549_vm3, %v17030_v35, -inf }
 0x260   :  { %v14284_v56 = vpop.f32.mrb[25].mxu0  ;;  %v17004_v58 = vmul.f32 0.35355338, %v1152_v55 }
 0x261   :  { %1557 = vmax.xlane.f32.xlu0 %v1556_v57  ;;  %v1155_v0 = vpop.f32.mrb[26].mxu0 }
 0x262   :  { %v14285_v1 = vpop.f32.mrb[27].mxu0  ;;  %v1622_v24 = vsel %vm1549_vm3, %v17004_v58, -inf  ;;  %v17016_v11 = vmul.f32 0.35355338, %v1155_v0  ;;  %v17045_v0 = vmul.f32 0.35355338, %v16978_v26 }
 0x263   :  { %v17012_v8 = vpop.f32.mrb[44].mxu1  ;;  %1623 = vmax.xlane.f32.xlu1 %v1622_v24 }
 0x264   :  { %v14248_v9 = vpop.f32.mrb[45].mxu1  ;;  %v1625_v25 = vsel %vm1549_vm3, %v17016_v11, -inf }
 0x265   :  { %v17018_v13 = vpop.f32.mrb[46].mxu1  ;;  %1560 = vmax.xlane.f32.xlu0 %v1559_v10  ;;  %v17050_v10 = vmul.f32 0.35355338, %v16980_v28 }
 0x266   :  { %v14249_v12 = vpop.f32.mrb[47].mxu1 }
 0x267   :  { %1563 = vmax.xlane.f32.xlu1 %v1562_v15  ;;  %v1252_v21 = vpop.f32.mrb[28].mxu0 }
 0x268   :  { %v14296_v14 = vpop.f32.mrb[29].mxu0  ;;  %v17024_v27 = vmul.f32 0.35355338, %v1252_v21  ;;  %v1571_v21 = vsel %vm1549_vm3, %v17045_v0, -inf }
 0x269   :  { %1626 = vmax.xlane.f32.xlu0 %v1625_v25  ;;  %v1255_v31 = vpop.f32.mrb[30].mxu0 }
 0x26a   :  { %v14297_v32 = vpop.f32.mrb[31].mxu0  ;;  %v1634_v33 = vsel %vm1549_vm3, %v17024_v27, -inf  ;;  %v17034_v50 = vmul.f32 0.35355338, %v1255_v31  ;;  %v1574_v31 = vsel %vm1549_vm3, %v17050_v10, -inf }
 0x26b   :  { %v902_v36 = vpop.f32.mrb[48].mxu1  ;;  %1635 = vmax.xlane.f32.xlu1 %v1634_v33 }
 0x26c   :  { %v14254_v37 = vpop.f32.mrb[49].mxu1  ;;  %v1637_v23 = vsel %vm1549_vm3, %v17034_v50, -inf }
 0x26d   :  { %v17036_v53 = vpop.f32.mrb[50].mxu1  ;;  %1566 = vmax.xlane.f32.xlu0 %v1565_v49  ;;  %v17063_v49 = vmul.f32 0.35355338, %v16982_v30 }
 0x26e   :  { %v14255_v20 = vpop.f32.mrb[51].mxu1 }
 0x26f   :  { %1569 = vmax.xlane.f32.xlu1 %v1568_v54  ;;  %v1352_v55 = vpop.f32.mrb[32].mxu0 }
 0x270   :  { %v14308_v56 = vpop.f32.mrb[33].mxu0  ;;  %v17042_v57 = vmul.f32 0.35355338, %v1352_v55 }
 0x271   :  { %1638 = vmax.xlane.f32.xlu0 %v1637_v23  ;;  %v1355_v1 = vpop.f32.mrb[34].mxu0  ;;  %v17068_v56 = vmul.f32 0.35355338, %v16992_v48 }
 0x272   :  { %v14309_v24 = vpop.f32.mrb[35].mxu0  ;;  %v1646_v9 = vsel %vm1549_vm3, %v17042_v57, -inf  ;;  %v17054_v14 = vmul.f32 0.35355338, %v1355_v1 }
 0x273   :  { %v952_v12 = vpop.f32.mrb[52].mxu1  ;;  %1647 = vmax.xlane.f32.xlu1 %v1646_v9  ;;  %v1577_v24 = vsel %vm1549_vm3, %v17063_v49, -inf }
 0x274   :  { %v14260_v15 = vpop.f32.mrb[53].mxu1  ;;  %v1649_v28 = vsel %vm1549_vm3, %v17054_v14, -inf }
 0x275   :  { %v955_v25 = vpop.f32.mrb[54].mxu1  ;;  %1572 = vmax.xlane.f32.xlu0 %v1571_v21  ;;  %v1580_v21 = vsel %vm1549_vm3, %v17068_v56, -inf }
 0x276   :  { %v14261_v26 = vpop.f32.mrb[55].mxu1 }
 0x277   :  { %1575 = vmax.xlane.f32.xlu1 %v1574_v31  ;;  %v1452_v32 = vpop.f32.mrb[36].mxu0  ;;  %v17077_v26 = vmul.f32 0.35355338, %v17012_v8  ;;  %v17082_v31 = vmul.f32 0.35355338, %v16998_v52 }
 0x278   :  { %v14320_v33 = vpop.f32.mrb[37].mxu0  ;;  %v17060_v37 = vmul.f32 0.35355338, %v1452_v32 }
 0x279   :  { %1650 = vmax.xlane.f32.xlu0 %v1649_v28  ;;  %v1455_v20 = vpop.f32.mrb[38].mxu0  ;;  %v1586_v32 = vsel %vm1549_vm3, %v17077_v26, -inf  ;;  %v17086_v33 = vmul.f32 0.35355338, %v902_v36  ;;  %v1583_v8 = vsel %vm1549_vm3, %v17082_v31, -inf }
 0x27a   :  { %v14321_v54 = vpop.f32.mrb[39].mxu0  ;;  %v1658_v55 = vsel %vm1549_vm3, %v17060_v37, -inf  ;;  %v17072_v9 = vmul.f32 0.35355338, %v1455_v20 }
 0x27b   :  { %v1002_v23 = vpop.f32.mrb[56].mxu1  ;;  %1659 = vmax.xlane.f32.xlu1 %v1658_v55  ;;  %v17091_v54 = vmul.f32 0.35355338, %v17018_v13  ;;  %v1592_v52 = vsel %vm1549_vm3, %v17086_v33, -inf }
 0x27c   :  { %v14266_v1 = vpop.f32.mrb[57].mxu1  ;;  %v1661_v48 = vsel %vm1549_vm3, %v17072_v9, -inf }
 0x27d   :  { %v1005_v15 = vpop.f32.mrb[58].mxu1  ;;  %1578 = vmax.xlane.f32.xlu0 %v1577_v24  ;;  %v17095_v24 = vmul.f32 0.35355338, %v952_v12  ;;  %v1589_v36 = vsel %vm1549_vm3, %v17091_v54, -inf }
 0x27e   :  { %v14267_v30 = vpop.f32.mrb[59].mxu1 }
 0x27f   :  { %1581 = vmax.xlane.f32.xlu1 %v1580_v21  ;;  %v17100_v30 = vmul.f32 0.35355338, %v17036_v53  ;;  %v1598_v13 = vsel %vm1549_vm3, %v17095_v24, -inf  ;;  %v17104_v21 = vmul.f32 0.35355338, %v1002_v23 }
 0x281   :  { %1662 = vmax.xlane.f32.xlu0 %v1661_v48  ;;  %v1595_v12 = vsel %vm1549_vm3, %v17100_v30, -inf  ;;  %v1604_v53 = vsel %vm1549_vm3, %v17104_v21, -inf }
 0x283   :  { %v1102_v28 = vpop.f32.mrb[60].mxu1  ;;  %1587 = vmax.xlane.f32.xlu1 %v1586_v32 }
 0x284   :  { %v14278_v20 = vpop.f32.mrb[61].mxu1 }
 0x285   :  { %v1105_v55 = vpop.f32.mrb[62].mxu1  ;;  %1584 = vmax.xlane.f32.xlu0 %v1583_v8  ;;  %v17108_v20 = vmul.f32 0.35355338, %v955_v25 }
 0x286   :  { %v14279_v1 = vpop.f32.mrb[63].mxu1 }
 0x287   :  { %1593 = vmax.xlane.f32.xlu1 %v1592_v52  ;;  %v17112_v52 = vmul.f32 0.35355338, %v1102_v28  ;;  %v1601_v23 = vsel %vm1549_vm3, %v17108_v20, -inf  ;;  %v17124_v28 = vmul.f32 0.35355338, %v1105_v55 }
 0x289   :  { %1590 = vmax.xlane.f32.xlu0 %v1589_v36  ;;  %v17116_v36 = vmul.f32 0.35355338, %v1005_v15 }
 0x28b   :  { %v1202_v48 = vpop.f32.mrb[64].mxu1  ;;  %1599 = vmax.xlane.f32.xlu1 %v1598_v13  ;;  %v1616_v13 = vsel %vm1549_vm3, %v17112_v52, -inf }
 0x28c   :  { %v14290_v32 = vpop.f32.mrb[65].mxu1  ;;  %v17120_v25 = vmul.f32 0.35355338, %v1202_v48  ;;  %v1619_v48 = vsel %vm1549_vm3, %v17124_v28, -inf }
 0x28d   :  { %v1205_v8 = vpop.f32.mrb[66].mxu1  ;;  %1596 = vmax.xlane.f32.xlu0 %v1595_v12 }
 0x28e   :  { %v14291_v1 = vpop.f32.mrb[67].mxu1  ;;  %v1628_v15 = vsel %vm1549_vm3, %v17120_v25, -inf  ;;  %v17132_v39 = vmul.f32 0.35355338, %v1205_v8 }
 0x28f   :  { %1605 = vmax.xlane.f32.xlu1 %v1604_v53  ;;  %v1607_v1 = vsel %vm1549_vm3, %v17116_v36, -inf }
 0x291   :  { %1602 = vmax.xlane.f32.xlu0 %v1601_v23 }
 0x293   :  { %v1302_v32 = vpop.f32.mrb[68].mxu1  ;;  %1617 = vmax.xlane.f32.xlu1 %v1616_v13 }
 0x294   :  { %v14302_v12 = vpop.f32.mrb[69].mxu1  ;;  %v17128_v23 = vmul.f32 0.35355338, %v1302_v32 }
 0x295   :  { %v1305_v53 = vpop.f32.mrb[70].mxu1  ;;  %1608 = vmax.xlane.f32.xlu0 %v1607_v1  ;;  %v17136_v12 = vpop.permute.xlu0 %2151  ;;  %v1631_v1 = vsel %vm1549_vm3, %v17132_v39, -inf }
 0x296   :  { %v14303_v22 = vpop.f32.mrb[71].mxu1  ;;  %v1640_v13 = vsel %vm1549_vm3, %v17128_v23, -inf  ;;  %22471 = vst [vmem:[#allocation18_spill] sm:$0xff] %v17136_v12 }
 0x297   :  { %1629 = vmax.xlane.f32.xlu1 %v1628_v15  ;;  %v17142_v15 = vmul.f32 0.35355338, %v1305_v53 }
 0x299   :  { %1620 = vmax.xlane.f32.xlu0 %v1619_v48 }
 0x29b   :  { %v1402_v55 = vpop.f32.mrb[72].mxu1  ;;  %1641 = vmax.xlane.f32.xlu1 %v1640_v13  ;;  %v1643_v13 = vsel %vm1549_vm3, %v17142_v15, -inf }
 0x29c   :  { %v14314_v22 = vpop.f32.mrb[73].mxu1  ;;  %v17140_v32 = vmul.f32 0.35355338, %v1402_v55 }
 0x29d   :  { %v1405_v45 = vpop.f32.mrb[74].mxu1  ;;  %1632 = vmax.xlane.f32.xlu0 %v1631_v1  ;;  %v17150_v22 = vpop.permute.xlu0 %2245 }
 0x29e   :  { %v14315_v8 = vpop.f32.mrb[75].mxu1  ;;  %v1652_v48 = vsel %vm1549_vm3, %v17140_v32, -inf  ;;  %v17148_v17 = vmul.f32 0.35355338, %v1405_v45  ;;  %22472 = vst [vmem:[#allocation19_spill] sm:$0xff] %v17150_v22  ;;  %v17166_v22 = vpop.permute.xlu1 %2104 }
 0x29f   :  { %1653 = vmax.xlane.f32.xlu1 %v1652_v48 }
 0x2a0   :  { %v1655_v53 = vsel %vm1549_vm3, %v17148_v17, -inf }
 0x2a1   :  { %1644 = vmax.xlane.f32.xlu0 %v1643_v13  ;;  %v17160_v45 = vpop.permute.xlu0 %2339 }
 0x2a2   :  { %22473 = vst [vmem:[#allocation20_spill] sm:$0xff] %v17160_v45 }
 0x2a3   :  { %v1502_v19 = vpop.f32.mrb[76].mxu1 }
 0x2a4   :  { %v14326_v55 = vpop.f32.mrb[77].mxu1  ;;  %v17154_v61 = vmul.f32 0.35355338, %v1502_v19 }
 0x2a5   :  { %v1505_v1 = vpop.f32.mrb[78].mxu1  ;;  %1656 = vmax.xlane.f32.xlu0 %v1655_v53  ;;  %v17164_v55 = vpop.permute.xlu0 %2433 }
 0x2a6   :  { %v14327_v8 = vpop.f32.mrb[79].mxu1  ;;  %v1664_v48 = vsel %vm1549_vm3, %v17154_v61, -inf  ;;  %v17158_v63 = vmul.f32 0.35355338, %v1505_v1  ;;  %22474 = vst [vmem:[#allocation21_spill] sm:$0xff] %v17164_v55  ;;  %v17170_v53 = vpop.permute.xlu1 %2198 }
 0x2a7   :  { %1665 = vmax.xlane.f32.xlu1 %v1664_v48  ;;  %22476 = vst [vmem:[#allocation23_spill] sm:$0xff] %v17170_v53 }
 0x2a8   :  { %v1667_v13 = vsel %vm1549_vm3, %v17158_v63, -inf }
 0x2a9   :  { %1668 = vmax.xlane.f32.xlu0 %v1667_v13  ;;  %v17168_v19 = vpop.permute.xlu0 %2527 }
 0x2aa   :  { %22475 = vst [vmem:[#allocation22_spill] sm:$0xff] %v17168_v19  ;;  %v17174_v41 = vpop.permute.xlu1 %2292 }
 0x2ab   :  { %22478 = vst [vmem:[#allocation25_spill] sm:$0xff] %v17174_v41 }
 0x2ad   :  { %v17172_v8 = vpop.permute.xlu0 %2621 }
 0x2ae   :  { %22477 = vst [vmem:[#allocation24_spill] sm:$0xff] %v17172_v8  ;;  %v17179_v43 = vpop.permute.xlu1 %2480 }
 0x2af   :  { %22480 = vst [vmem:[#allocation27_spill] sm:$0xff] %v17179_v43 }
 0x2b1   :  { %v17176_v1 = vpop.permute.xlu0 %2762 }
 0x2b2   :  { %22479 = vst [vmem:[#allocation26_spill] sm:$0xff] %v17176_v1  ;;  %v17181_v55 = vpop.permute.xlu1 %2574 }
 0x2b3   :  { %22481 = vst [vmem:[#allocation28_spill] sm:$0xff] %v17181_v55 }
 0x2b6   :  { %v17183_v2 = vpop.permute.xlu1 %2668 }
 0x2b7   :  { %22482 = vst [vmem:[#allocation29_spill] sm:$0xff] %v17183_v2 }
 0x2ba   :  { %v17189_v41 = vpop.permute.xlu1 %2715 }
 0x2bb   :  { %22483 = vst [vmem:[#allocation30_spill] sm:$0xff] %v17189_v41 }
 0x2be   :  { %v17191_v1 = vpop.permute.xlu1 %2809 }
 0x2bf   :  { %22484 = vst [vmem:[#allocation31_spill] sm:$0xff] %v17191_v1 }
 0x2c2   :  { %v17193_v53 = vpop.permute.xlu1 %2386 }
 0x2c3   :  { %22485 = vst [vmem:[#allocation32_spill] sm:$0xff] %v17193_v53 }
 0x2c4   :  { %v1552_v48 = vpop.xlane.xlu0 %1551 }
 0x2c5   :  { %v1670_v45 = vsub.f32 %v16974_v6, %v1552_v48 }
 0x2c7   :  { %v1710_v13 = vmul.f32 1.442695, %v1670_v45 }
 0x2c9   :  { %15691 = vpow2.f32 %v1710_v13 }
 0x2d3   :  { %v17185_v19 = vpop.eup %15691 }
 0x2d4   :  { %v1790_v8 = vsel %vm1549_vm3, %v17185_v19, 0.0 }
 0x2d5   :  { %1791 = vadd.xlane.f32.xlu1 %v1790_v8 }
 0x2e8   :  { %v1612_v6 = vpop.xlane.xlu1 %1611 }
 0x2e9   :  { %v1690_v45 = vsub.f32 %v16984_v34, %v1612_v6 }
 0x2ea   :  { %v1615_v48 = vpop.xlane.xlu0 %1614 }
 0x2eb   :  { %v1750_v13 = vmul.f32 1.442695, %v1690_v45  ;;  %v1691_v55 = vsub.f32 %v16988_v46, %v1615_v48 }
 0x2ec   :  { %v1555_v2 = vpop.xlane.xlu1 %1554 }
 0x2ed   :  { %15693 = vpow2.f32 %v1750_v13  ;;  %v1671_v43 = vsub.f32 %v16990_v47, %v1555_v2  ;;  %v1752_v12 = vmul.f32 1.442695, %v1691_v55 }
 0x2ee   :  { %v1558_v4 = vpop.xlane.xlu0 %1557 }
 0x2ef   :  { %v1712_v8 = vmul.f32 1.442695, %v1671_v43  ;;  %v1672_v41 = vsub.f32 %v16996_v51, %v1558_v4 }
 0x2f0   :  { %v1624_v38 = vpop.xlane.xlu1 %1623 }
 0x2f1   :  { %15695 = vpow2.f32 %v1712_v8  ;;  %v1714_v1 = vmul.f32 1.442695, %v1672_v41  ;;  %v1694_v53 = vsub.f32 %v17004_v58, %v1624_v38 }
 0x2f2   :  { %15697 = vpow2.f32 %v1752_v12  ;;  %v1561_v34 = vpop.xlane.xlu0 %1560 }
 0x2f3   :  { %15699 = vpow2.f32 %v1714_v1  ;;  %v1758_v6 = vmul.f32 1.442695, %v1694_v53  ;;  %v1673_v46 = vsub.f32 %v17006_v59, %v1561_v34 }
 0x2f4   :  { %v1564_v45 = vpop.xlane.xlu1 %1563 }
 0x2f5   :  { %15701 = vpow2.f32 %v1758_v6  ;;  %v1716_v48 = vmul.f32 1.442695, %v1673_v46  ;;  %v1674_v2 = vsub.f32 %v17010_v7, %v1564_v45 }
 0x2f6   :  { %v1627_v47 = vpop.xlane.xlu0 %1626 }
 0x2f7   :  { %v17202_v43 = vpop.eup %15693  ;;  %15703 = vpow2.f32 %v1716_v48  ;;  %v1718_v4 = vmul.f32 1.442695, %v1674_v2  ;;  %v1695_v41 = vsub.f32 %v17016_v11, %v1627_v47 }
 0x2f8   :  { %v1636_v51 = vpop.xlane.xlu1 %1635  ;;  %v1850_v38 = vsel %vm1549_vm3, %v17202_v43, 0.0 }
 0x2f9   :  { %15705 = vpow2.f32 %v1718_v4  ;;  %v1760_v58 = vmul.f32 1.442695, %v1695_v41  ;;  %v1698_v59 = vsub.f32 %v17024_v27, %v1636_v51  ;;  %1851 = vadd.xlane.f32.xlu1 %v1850_v38 }
 0x2fa   :  { %v1567_v12 = vpop.xlane.xlu0 %1566 }
 0x2fb   :  { %v17208_v55 = vpop.eup %15695  ;;  %15707 = vpow2.f32 %v1760_v58  ;;  %v1766_v7 = vmul.f32 1.442695, %v1698_v59  ;;  %v1675_v53 = vsub.f32 %v17026_v29, %v1567_v12 }
 0x2fc   :  { %v17211_v1 = vpop.eup %15697  ;;  %v1570_v13 = vpop.xlane.xlu1 %1569  ;;  %v1793_v11 = vsel %vm1549_vm3, %v17208_v55, 0.0 }
 0x2fd   :  { %v17215_v8 = vpop.eup %15699  ;;  %15709 = vpow2.f32 %v1766_v7  ;;  %v1720_v34 = vmul.f32 1.442695, %v1675_v53  ;;  %v1676_v27 = vsub.f32 %v17030_v35, %v1570_v13  ;;  %1794 = vadd.xlane.f32.xlu0 %v1793_v11  ;;  %v1853_v47 = vsel %vm1549_vm3, %v17211_v1, 0.0 }
 0x2fe   :  { %v1639_v6 = vpop.xlane.xlu0 %1638  ;;  %v1796_v46 = vsel %vm1549_vm3, %v17215_v8, 0.0 }
 0x2ff   :  { %v17220_v45 = vpop.eup %15701  ;;  %15711 = vpow2.f32 %v1720_v34  ;;  %v1722_v29 = vmul.f32 1.442695, %v1676_v27  ;;  %v1699_v48 = vsub.f32 %v17034_v50, %v1639_v6  ;;  %1797 = vadd.xlane.f32.xlu1 %v1796_v46 }
 0x300   :  { %v1648_v2 = vpop.xlane.xlu1 %1647  ;;  %v1862_v38 = vsel %vm1549_vm3, %v17220_v45, 0.0 }
 0x301   :  { %v17225_v4 = vpop.eup %15703  ;;  %15713 = vpow2.f32 %v1722_v29  ;;  %v1768_v35 = vmul.f32 1.442695, %v1699_v48  ;;  %v1702_v41 = vsub.f32 %v17042_v57, %v1648_v2  ;;  %1854 = vadd.xlane.f32.xlu0 %v1853_v47 }
 0x302   :  { %v1573_v51 = vpop.xlane.xlu0 %1572  ;;  %v1799_v7 = vsel %vm1549_vm3, %v17225_v4, 0.0 }
 0x303   :  { %v17230_v58 = vpop.eup %15705  ;;  %15715 = vpow2.f32 %v1768_v35  ;;  %v1774_v50 = vmul.f32 1.442695, %v1702_v41  ;;  %v1677_v59 = vsub.f32 %v17045_v0, %v1573_v51  ;;  %1863 = vadd.xlane.f32.xlu1 %v1862_v38 }
 0x304   :  { %v1576_v12 = vpop.xlane.xlu1 %1575  ;;  %v1802_v34 = vsel %vm1549_vm3, %v17230_v58, 0.0 }
 0x305   :  { %v17235_v53 = vpop.eup %15707  ;;  %15717 = vpow2.f32 %v1774_v50  ;;  %v1724_v57 = vmul.f32 1.442695, %v1677_v59  ;;  %v1678_v13 = vsub.f32 %v17050_v10, %v1576_v12  ;;  %1800 = vadd.xlane.f32.xlu0 %v1799_v7 }
 0x306   :  { %v1651_v11 = vpop.xlane.xlu0 %1650  ;;  %v1865_v29 = vsel %vm1549_vm3, %v17235_v53, 0.0 }
 0x307   :  { %v17240_v27 = vpop.eup %15709  ;;  %15719 = vpow2.f32 %v1724_v57  ;;  %v1726_v0 = vmul.f32 1.442695, %v1678_v13  ;;  %v1703_v6 = vsub.f32 %v17054_v14, %v1651_v11  ;;  %1803 = vadd.xlane.f32.xlu1 %v1802_v34 }
 0x308   :  { %v1660_v46 = vpop.xlane.xlu1 %1659  ;;  %v1874_v35 = vsel %vm1549_vm3, %v17240_v27, 0.0 }
 0x309   :  { %v17245_v48 = vpop.eup %15711  ;;  %15721 = vpow2.f32 %v1726_v0  ;;  %v1776_v10 = vmul.f32 1.442695, %v1703_v6  ;;  %v1706_v2 = vsub.f32 %v17060_v37, %v1660_v46  ;;  %1866 = vadd.xlane.f32.xlu0 %v1865_v29 }
 0x30a   :  { %v1579_v47 = vpop.xlane.xlu0 %1578  ;;  %v1805_v50 = vsel %vm1549_vm3, %v17245_v48, 0.0 }
 0x30b   :  { %v17250_v41 = vpop.eup %15713  ;;  %15723 = vpow2.f32 %v1776_v10  ;;  %v1782_v14 = vmul.f32 1.442695, %v1706_v2  ;;  %v1679_v51 = vsub.f32 %v17063_v49, %v1579_v47  ;;  %1875 = vadd.xlane.f32.xlu1 %v1874_v35 }
 0x30c   :  { %v1582_v38 = vpop.xlane.xlu1 %1581  ;;  %v1808_v57 = vsel %vm1549_vm3, %v17250_v41, 0.0 }
 0x30d   :  { %v17255_v59 = vpop.eup %15715  ;;  %15725 = vpow2.f32 %v1782_v14  ;;  %v1728_v37 = vmul.f32 1.442695, %v1679_v51  ;;  %v1680_v12 = vsub.f32 %v17068_v56, %v1582_v38  ;;  %1806 = vadd.xlane.f32.xlu0 %v1805_v50 }
 0x30e   :  { %v1663_v7 = vpop.xlane.xlu0 %1662  ;;  %v1877_v0 = vsel %vm1549_vm3, %v17255_v59, 0.0 }
 0x30f   :  { %v17260_v13 = vpop.eup %15717  ;;  %15727 = vpow2.f32 %v1728_v37  ;;  %v1730_v49 = vmul.f32 1.442695, %v1680_v12  ;;  %v1707_v11 = vsub.f32 %v17072_v9, %v1663_v7  ;;  %1809 = vadd.xlane.f32.xlu1 %v1808_v57 }
 0x310   :  { %v1588_v34 = vpop.xlane.xlu1 %1587  ;;  %v1886_v10 = vsel %vm1549_vm3, %v17260_v13, 0.0 }
 0x311   :  { %v17265_v6 = vpop.eup %15719  ;;  %15729 = vpow2.f32 %v1730_v49  ;;  %v1784_v56 = vmul.f32 1.442695, %v1707_v11  ;;  %v1682_v46 = vsub.f32 %v17077_v26, %v1588_v34  ;;  %1878 = vadd.xlane.f32.xlu0 %v1877_v0 }
 0x312   :  { %v1585_v29 = vpop.xlane.xlu0 %1584  ;;  %v1811_v14 = vsel %vm1549_vm3, %v17265_v6, 0.0 }
 0x313   :  { %v17270_v2 = vpop.eup %15721  ;;  %15731 = vpow2.f32 %v1784_v56  ;;  %v1734_v9 = vmul.f32 1.442695, %v1682_v46  ;;  %v1681_v47 = vsub.f32 %v17082_v31, %v1585_v29  ;;  %1887 = vadd.xlane.f32.xlu1 %v1886_v10 }
 0x314   :  { %v1594_v35 = vpop.xlane.xlu1 %1593  ;;  %v1814_v37 = vsel %vm1549_vm3, %v17270_v2, 0.0 }
 0x315   :  { %v17275_v51 = vpop.eup %15723  ;;  %15733 = vpow2.f32 %v1734_v9  ;;  %v1732_v26 = vmul.f32 1.442695, %v1681_v47  ;;  %v1684_v38 = vsub.f32 %v17086_v33, %v1594_v35  ;;  %1812 = vadd.xlane.f32.xlu0 %v1811_v14 }
 0x316   :  { %v1591_v50 = vpop.xlane.xlu0 %1590  ;;  %v1889_v49 = vsel %vm1549_vm3, %v17275_v51, 0.0 }
 0x317   :  { %v17280_v12 = vpop.eup %15725  ;;  %15735 = vpow2.f32 %v1732_v26  ;;  %v1738_v31 = vmul.f32 1.442695, %v1684_v38  ;;  %v1683_v7 = vsub.f32 %v17091_v54, %v1591_v50  ;;  %1815 = vadd.xlane.f32.xlu1 %v1814_v37 }
 0x318   :  { %22486 = vst [vmem:[#allocation33_spill] sm:$0xff] %v17280_v12  ;;  %v1600_v57 = vpop.xlane.xlu1 %1599  ;;  %v1898_v56 = vsel %vm1549_vm3, %v17280_v12, 0.0 }
 0x319   :  { %v17285_v11 = vpop.eup %15727  ;;  %15737 = vpow2.f32 %v1738_v31  ;;  %v1736_v33 = vmul.f32 1.442695, %v1683_v7  ;;  %v1686_v34 = vsub.f32 %v17095_v24, %v1600_v57  ;;  %1890 = vadd.xlane.f32.xlu0 %v1889_v49 }
 0x31a   :  { %v1597_v0 = vpop.xlane.xlu0 %1596  ;;  %v1817_v9 = vsel %vm1549_vm3, %v17285_v11, 0.0 }
 0x31b   :  { %v17290_v46 = vpop.eup %15729  ;;  %15739 = vpow2.f32 %v1736_v33  ;;  %v1742_v54 = vmul.f32 1.442695, %v1686_v34  ;;  %v1685_v29 = vsub.f32 %v17100_v30, %v1597_v0  ;;  %1899 = vadd.xlane.f32.xlu1 %v1898_v56 }
 0x31c   :  { %v1606_v10 = vpop.xlane.xlu1 %1605  ;;  %v1820_v26 = vsel %vm1549_vm3, %v17290_v46, 0.0 }
 0x31d   :  { %v17295_v47 = vpop.eup %15731  ;;  %15741 = vpow2.f32 %v1742_v54  ;;  %v1740_v24 = vmul.f32 1.442695, %v1685_v29  ;;  %v1688_v35 = vsub.f32 %v17104_v21, %v1606_v10  ;;  %1818 = vadd.xlane.f32.xlu0 %v1817_v9 }
 0x31e   :  { %22487 = vst [vmem:[#allocation34_spill] sm:$0xff] %v17295_v47  ;;  %v1603_v14 = vpop.xlane.xlu0 %1602  ;;  %v1901_v31 = vsel %vm1549_vm3, %v17295_v47, 0.0  ;;  %v22498_v47 = vld [vmem:[#allocation23_spill] sm:$0xff] }
 0x31f   :  { %v17300_v38 = vpop.eup %15733  ;;  %15743 = vpow2.f32 %v1740_v24  ;;  %v1746_v30 = vmul.f32 1.442695, %v1688_v35  ;;  %v1687_v50 = vsub.f32 %v17108_v20, %v1603_v14  ;;  %1821 = vadd.xlane.f32.xlu1 %v1820_v26 }
 0x320   :  { %v1618_v37 = vpop.xlane.xlu1 %1617  ;;  %v1826_v33 = vsel %vm1549_vm3, %v17300_v38, 0.0 }
 0x321   :  { %v17305_v7 = vpop.eup %15735  ;;  %15745 = vpow2.f32 %v1746_v30  ;;  %v1744_v21 = vmul.f32 1.442695, %v1687_v50  ;;  %v1692_v57 = vsub.f32 %v17112_v52, %v1618_v37  ;;  %1902 = vadd.xlane.f32.xlu0 %v1901_v31 }
 0x322   :  { %v1609_v49 = vpop.xlane.xlu0 %1608  ;;  %v1823_v54 = vsel %vm1549_vm3, %v17305_v7, 0.0 }
 0x323   :  { %v17310_v34 = vpop.eup %15737  ;;  %15747 = vpow2.f32 %v1744_v21  ;;  %v1754_v20 = vmul.f32 1.442695, %v1692_v57  ;;  %v1689_v0 = vsub.f32 %v17116_v36, %v1609_v49  ;;  %1827 = vadd.xlane.f32.xlu1 %v1826_v33 }
 0x324   :  { %v1630_v56 = vpop.xlane.xlu1 %1629  ;;  %v1832_v24 = vsel %vm1549_vm3, %v17310_v34, 0.0 }
 0x325   :  { %v17315_v29 = vpop.eup %15739  ;;  %15749 = vpow2.f32 %v1754_v20  ;;  %v1748_v52 = vmul.f32 1.442695, %v1689_v0  ;;  %v1696_v10 = vsub.f32 %v17120_v25, %v1630_v56  ;;  %1824 = vadd.xlane.f32.xlu0 %v1823_v54 }
 0x326   :  { %v1621_v9 = vpop.xlane.xlu0 %1620  ;;  %v1829_v30 = vsel %vm1549_vm3, %v17315_v29, 0.0 }
 0x327   :  { %v17320_v35 = vpop.eup %15741  ;;  %15751 = vpow2.f32 %v1748_v52  ;;  %v1762_v36 = vmul.f32 1.442695, %v1696_v10  ;;  %v1693_v14 = vsub.f32 %v17124_v28, %v1621_v9  ;;  %1833 = vadd.xlane.f32.xlu1 %v1832_v24 }
 0x328   :  { %v1642_v26 = vpop.xlane.xlu1 %1641  ;;  %v1838_v21 = vsel %vm1549_vm3, %v17320_v35, 0.0 }
 0x329   :  { %v17325_v50 = vpop.eup %15743  ;;  %15753 = vpow2.f32 %v1762_v36  ;;  %v1756_v25 = vmul.f32 1.442695, %v1693_v14  ;;  %v1700_v37 = vsub.f32 %v17128_v23, %v1642_v26  ;;  %1830 = vadd.xlane.f32.xlu0 %v1829_v30 }
 0x32a   :  { %v1633_v31 = vpop.xlane.xlu0 %1632  ;;  %v1835_v20 = vsel %vm1549_vm3, %v17325_v50, 0.0 }
 0x32b   :  { %v17330_v57 = vpop.eup %15745  ;;  %15755 = vpow2.f32 %v1756_v25  ;;  %v1770_v28 = vmul.f32 1.442695, %v1700_v37  ;;  %v1697_v49 = vsub.f32 %v17132_v39, %v1633_v31  ;;  %1839 = vadd.xlane.f32.xlu1 %v1838_v21 }
 0x32c   :  { %v1654_v33 = vpop.xlane.xlu1 %1653  ;;  %v1844_v52 = vsel %vm1549_vm3, %v17330_v57, 0.0 }
 0x32d   :  { %v17335_v0 = vpop.eup %15747  ;;  %15757 = vpow2.f32 %v1770_v28  ;;  %v1764_v23 = vmul.f32 1.442695, %v1697_v49  ;;  %v1704_v56 = vsub.f32 %v17140_v32, %v1654_v33  ;;  %1836 = vadd.xlane.f32.xlu0 %v1835_v20 }
 0x32e   :  { %v1645_v54 = vpop.xlane.xlu0 %1644  ;;  %v1841_v24 = vsel %vm1549_vm3, %v17335_v0, 0.0 }
 0x32f   :  { %v17340_v10 = vpop.eup %15749  ;;  %15759 = vpow2.f32 %v1764_v23  ;;  %v1778_v39 = vmul.f32 1.442695, %v1704_v56  ;;  %v1701_v9 = vsub.f32 %v17142_v15, %v1645_v54  ;;  %1845 = vadd.xlane.f32.xlu1 %v1844_v52 }
 0x330   :  { %v1856_v26 = vsel %vm1549_vm3, %v17340_v10, 0.0 }
 0x331   :  { %v17345_v36 = vpop.eup %15751  ;;  %15761 = vpow2.f32 %v1778_v39  ;;  %v1772_v14 = vmul.f32 1.442695, %v1701_v9  ;;  %1842 = vadd.xlane.f32.xlu0 %v1841_v24 }
 0x332   :  { %v1657_v32 = vpop.xlane.xlu0 %1656  ;;  %v1847_v15 = vsel %vm1549_vm3, %v17345_v36, 0.0 }
 0x333   :  { %v17349_v30 = vpop.eup %15753  ;;  %15763 = vpow2.f32 %v1772_v14  ;;  %v1705_v25 = vsub.f32 %v17148_v17, %v1657_v32  ;;  %1857 = vadd.xlane.f32.xlu1 %v1856_v26 }
 0x334   :  { %v1868_v21 = vsel %vm1549_vm3, %v17349_v30, 0.0  ;;  %v1666_v24 = vpop.xlane.xlu1 %1665 }
 0x335   :  { %v17354_v37 = vpop.eup %15755  ;;  %v1780_v31 = vmul.f32 1.442695, %v1705_v25  ;;  %1848 = vadd.xlane.f32.xlu0 %v1847_v15  ;;  %v1708_v14 = vsub.f32 %v17154_v61, %v1666_v24 }
 0x336   :  { %v1859_v49 = vsel %vm1549_vm3, %v17354_v37, 0.0  ;;  %v1669_v32 = vpop.xlane.xlu0 %1668 }
 0x337   :  { %v17358_v28 = vpop.eup %15757  ;;  %15765 = vpow2.f32 %v1780_v31  ;;  %1869 = vadd.xlane.f32.xlu1 %v1868_v21  ;;  %v1786_v26 = vmul.f32 1.442695, %v1708_v14  ;;  %v1709_v25 = vsub.f32 %v17158_v63, %v1669_v32 }
 0x338   :  { %v1880_v17 = vsel %vm1549_vm3, %v17358_v28, 0.0 }
 0x339   :  { %v17362_v33 = vpop.eup %15759  ;;  %1860 = vadd.xlane.f32.xlu0 %v1859_v49  ;;  %15767 = vpow2.f32 %v1786_v26  ;;  %v1788_v15 = vmul.f32 1.442695, %v1709_v25 }
 0x33a   :  { %v1871_v23 = vsel %vm1549_vm3, %v17362_v33, 0.0 }
 0x33b   :  { %v17366_v20 = vpop.eup %15761  ;;  %1881 = vadd.xlane.f32.xlu1 %v1880_v17  ;;  %15769 = vpow2.f32 %v1788_v15 }
 0x33c   :  { %22488 = vst [vmem:[#allocation35_spill] sm:$0xff] %v17366_v20  ;;  %v1892_v54 = vsel %vm1549_vm3, %v17366_v20, 0.0 }
 0x33d   :  { %v17370_v56 = vpop.eup %15763  ;;  %1872 = vadd.xlane.f32.xlu0 %v1871_v23 }
 0x33e   :  { %v1883_v52 = vsel %vm1549_vm3, %v17370_v56, 0.0 }
 0x33f   :  { %1893 = vadd.xlane.f32.xlu1 %v1892_v54 }
 0x341   :  { %v17376_v39 = vpop.eup %15765  ;;  %1884 = vadd.xlane.f32.xlu0 %v1883_v52 }
 0x342   :  { %22489 = vst [vmem:[#allocation36_spill] sm:$0xff] %v17376_v39  ;;  %v1895_v9 = vsel %vm1549_vm3, %v17376_v39, 0.0  ;;  %v22501_v39 = vld [vmem:[#allocation19_spill] sm:$0xff] }
 0x343   :  { %v17386_v31 = vpop.eup %15767 }
 0x344   :  { %22490 = vst [vmem:[#allocation37_spill] sm:$0xff] %v17386_v31  ;;  %v1904_v21 = vsel %vm1549_vm3, %v17386_v31, 0.0  ;;  %v22495_v31 = vld [vmem:[#allocation18_spill] sm:$0xff] }
 0x345   :  { %1896 = vadd.xlane.f32.xlu0 %v1895_v9  ;;  %v17390_v49 = vpop.eup %15769 }
 0x346   :  { %22491 = vst [vmem:[#allocation38_spill] sm:$0xff] %v17390_v49  ;;  %v1907_v17 = vsel %vm1549_vm3, %v17390_v49, 0.0 }
 0x350   :  { %2903 = vrot.lane.b32.xlu1 %v16786_v3, %s16538_s27 }
 0x35b   :  { %2856 = vrot.lane.b32.xlu0 %v16790_v5, %s16538_s27 }
 0x362   :  { %v1792_v61 = vpop.xlane.xlu1 %1791 }
 0x363   :  { %15771 = vrcp.f32 %v1792_v61 }
 0x36d   :  { %v15772_v14 = vpop.eup %15771 }
 0x36e   :  { %v1950_v25 = vmul.f32 %v15772_v14, %v17185_v19  ;;  %v22492_v19 = vmov 0.0   ;;  %v22493_v14 = vld [vmem:[#allocation11_spill] sm:$0xff] }
 0x374   :  { %1905 = vadd.xlane.f32.xlu1 %v1904_v21 }
 0x37a   :  { %1908 = vadd.xlane.f32.xlu0 %v1907_v17 }
 0x385   :  { %3003 = vrot.lane.b32.xlu1 %v16704_v40, %s16539_s28 }
 0x386   :  { %v17396_v63 = vpop.xlane.xlu1 %1851 }
 0x389   :  { %3054 = vrot.lane.b32.xlu1 %v16728_v62, %s16539_s28 }
 0x38a   :  { %v1795_v23 = vpop.xlane.xlu0 %1794 }
 0x38b   :  { %15773 = vrcp.f32 %v1795_v23 }
 0x38c   :  { %v1798_v54 = vpop.xlane.xlu1 %1797 }
 0x38d   :  { %3105 = vrot.lane.b32.xlu1 %v16724_v60, %s16539_s28  ;;  %15775 = vrcp.f32 %v1798_v54 }
 0x38e   :  { %v17402_v52 = vpop.xlane.xlu0 %1854 }
 0x390   :  { %v17404_v9 = vpop.xlane.xlu1 %1863  ;;  %2952 = vrot.lane.b32.xlu0 %v16708_v42, %s16539_s28 }
 0x391   :  { %3156 = vrot.lane.b32.xlu1 %v16748_v18, %s16539_s28 }
 0x392   :  { %v1801_v24 = vpop.xlane.xlu0 %1800 }
 0x393   :  { %15777 = vrcp.f32 %v1801_v24 }
 0x394   :  { %v1804_v32 = vpop.xlane.xlu1 %1803  ;;  %2950 = vrot.lane.b32.xlu0 %v16708_v42, %s16540_s29 }
 0x395   :  { %v15774_v26 = vpop.eup %15773  ;;  %3207 = vrot.lane.b32.xlu1 %v16744_v16, %s16539_s28  ;;  %15779 = vrcp.f32 %v1804_v32 }
 0x396   :  { %v1951_v15 = vmul.f32 %v15774_v26, %v17208_v55  ;;  %v17416_v21 = vpop.xlane.xlu0 %1866 }
 0x397   :  { %v15776_v54 = vpop.eup %15775 }
 0x398   :  { %v17418_v17 = vpop.xlane.xlu1 %1875  ;;  %3001 = vrot.lane.b32.xlu0 %v16704_v40, %s16540_s29  ;;  %v1990_v61 = vpack.c.bf16 %v1951_v15, %v1950_v25  ;;  %v1952_v32 = vmul.f32 %v15776_v54, %v17215_v8  ;;  %v22496_v54 = vld [vmem:[#allocation14_spill] sm:$0xff] }
 0x399   :  { %3258 = vrot.lane.b32.xlu1 %v16768_v44, %s16539_s28 }
 0x39a   :  { %14331 = vmatmul.mubr.msk.bf16.vlgmr.msra.gmra.mrb[40].mxu0 %vm1549_vm3, %v1990_v61  ;;  %v1807_v23 = vpop.xlane.xlu0 %1806  ;;  %v22494_v61 = vld [vmem:[#allocation16_spill] sm:$0xff] }
 0x39b   :  { %14341 = vmatpush3.bf16.msra.mxu0 %v17166_v22  ;;  %15781 = vrcp.f32 %v1807_v23  ;;  %14342 = vmatprep.mubr.msk.bf16.mxu0 %vm16536_vm1, %v22492_v19 }
 0x39c   :  { %v1810_v55 = vpop.xlane.xlu1 %1809  ;;  %3052 = vrot.lane.b32.xlu0 %v16728_v62, %s16540_s29  ;;  %14352 = vmatprep.subr.bf16.mxu0 %v22492_v19 }
 0x39d   :  { %v15778_v24 = vpop.eup %15777  ;;  %3309 = vrot.lane.b32.xlu1 %v22493_v14, %s16539_s28  ;;  %15783 = vrcp.f32 %v1810_v55 }
 0x39e   :  { %v1953_v26 = vmul.f32 %v15778_v24, %v17225_v4  ;;  %v17435_v25 = vpop.xlane.xlu0 %1878 }
 0x39f   :  { %v15780_v49 = vpop.eup %15779 }
 0x3a0   :  { %v17437_v22 = vpop.xlane.xlu1 %1887  ;;  %3103 = vrot.lane.b32.xlu0 %v16724_v60, %s16540_s29  ;;  %v1991_v15 = vpack.c.bf16 %v1953_v26, %v1952_v32  ;;  %v1954_v55 = vmul.f32 %v15780_v49, %v17230_v58  ;;  %v22499_v49 = vld [vmem:[#allocation5_spill] sm:$0xff] }
 0x3a1   :  { %3360 = vrot.lane.b32.xlu1 %v22494_v61, %s16539_s28 }
 0x3a2   :  { %14337 = vmatmul.mubr.msk.bf16.vlgmr.msra.gmra.mrb[80].mxu1 %vm1549_vm3, %v1991_v15  ;;  %v1813_v23 = vpop.xlane.xlu0 %1812  ;;  %v22497_v15 = vld [vmem:[#allocation6_spill] sm:$0xff] }
 0x3a3   :  { %14347 = vmatpush3.bf16.msra.mxu1 %v22495_v31  ;;  %15785 = vrcp.f32 %v1813_v23  ;;  %14348 = vmatprep.mubr.msk.bf16.mxu1 %vm16536_vm1, %v22492_v19 }
 0x3a4   :  { %v1816_v8 = vpop.xlane.xlu1 %1815  ;;  %3154 = vrot.lane.b32.xlu0 %v16748_v18, %s16540_s29  ;;  %14358 = vmatprep.subr.bf16.mxu1 %v22492_v19 }
 0x3a5   :  { %v15782_v4 = vpop.eup %15781  ;;  %3411 = vrot.lane.b32.xlu1 %v22496_v54, %s16539_s28  ;;  %15787 = vrcp.f32 %v1816_v8 }
 0x3a6   :  { %v1955_v24 = vmul.f32 %v15782_v4, %v17245_v48  ;;  %v17454_v32 = vpop.xlane.xlu0 %1890 }
 0x3a7   :  { %v15784_v12 = vpop.eup %15783 }
 0x3a8   :  { %v17456_v31 = vpop.xlane.xlu1 %1899  ;;  %3205 = vrot.lane.b32.xlu0 %v16744_v16, %s16540_s29  ;;  %v1992_v26 = vpack.c.bf16 %v1955_v24, %v1954_v55  ;;  %v1956_v8 = vmul.f32 %v15784_v12, %v17250_v41  ;;  %v22502_v12 = vld [vmem:[#allocation7_spill] sm:$0xff] }
 0x3a9   :  { %3462 = vrot.lane.b32.xlu1 %v22497_v15, %s16539_s28 }
 0x3aa   :  { %14343 = vmatmul.mubr.msk.bf16.vlgmr.msra.gmra.mrb[44].mxu0 %vm1549_vm3, %v1992_v26  ;;  %v1819_v23 = vpop.xlane.xlu0 %1818  ;;  %v22500_v26 = vld [vmem:[#allocation8_spill] sm:$0xff] }
 0x3ab   :  { %14353 = vmatpush3.bf16.msra.mxu0 %v22498_v47  ;;  %15789 = vrcp.f32 %v1819_v23  ;;  %14354 = vmatprep.mubr.msk.bf16.mxu0 %vm16536_vm1, %v22492_v19 }
 0x3ac   :  { %v1822_v58 = vpop.xlane.xlu1 %1821  ;;  %3256 = vrot.lane.b32.xlu0 %v16768_v44, %s16540_s29  ;;  %14364 = vmatprep.subr.bf16.mxu0 %v22492_v19 }
 0x3ad   :  { %v15786_v48 = vpop.eup %15785  ;;  %3513 = vrot.lane.b32.xlu1 %v22499_v49, %s16539_s28  ;;  %15791 = vrcp.f32 %v1822_v58 }
 0x3ae   :  { %v1957_v4 = vmul.f32 %v15786_v48, %v17265_v6  ;;  %v17473_v55 = vpop.xlane.xlu0 %1902 }
 0x3af   :  { %v15788_v20 = vpop.eup %15787 }
 0x3b0   :  { %v1828_v47 = vpop.xlane.xlu1 %1827  ;;  %3307 = vrot.lane.b32.xlu0 %v22493_v14, %s16540_s29  ;;  %v1993_v24 = vpack.c.bf16 %v1957_v4, %v1956_v8  ;;  %v1958_v58 = vmul.f32 %v15788_v20, %v17270_v2  ;;  %v22504_v14 = vld [vmem:[#allocation25_spill] sm:$0xff] }
 0x3b1   :  { %3564 = vrot.lane.b32.xlu1 %v22500_v26, %s16539_s28 }
 0x3b2   :  { %14349 = vmatmul.mubr.msk.bf16.vlgmr.msra.gmra.mrb[84].mxu1 %vm1549_vm3, %v1993_v24  ;;  %v1825_v23 = vpop.xlane.xlu0 %1824  ;;  %v22503_v24 = vld [vmem:[#allocation10_spill] sm:$0xff] }
 0x3b3   :  { %14359 = vmatpush3.bf16.msra.mxu1 %v22501_v39  ;;  %15793 = vrcp.f32 %v1825_v23  ;;  %14360 = vmatprep.mubr.msk.bf16.mxu1 %vm16536_vm1, %v22492_v19 }
 0x3b4   :  { %v1834_v41 = vpop.xlane.xlu1 %1833  ;;  %3358 = vrot.lane.b32.xlu0 %v22494_v61, %s16540_s29  ;;  %14370 = vmatprep.subr.bf16.mxu1 %v22492_v19  ;;  %15795 = vrcp.f32 %v1828_v47 }
 0x3b5   :  { %v15790_v6 = vpop.eup %15789  ;;  %3615 = vrot.lane.b32.xlu1 %v22502_v12, %s16539_s28 }
 0x3b6   :  { %v1959_v48 = vmul.f32 %v15790_v6, %v17285_v11  ;;  %v1831_v39 = vpop.xlane.xlu0 %1830  ;;  %v22505_v11 = vld [vmem:[#allocation9_spill] sm:$0xff] }
 0x3b7   :  { %15797 = vrcp.f32 %v1831_v39  ;;  %v15792_v23 = vpop.eup %15791 }
 0x3b8   :  { %v1840_v8 = vpop.xlane.xlu1 %1839  ;;  %3409 = vrot.lane.b32.xlu0 %v22496_v54, %s16540_s29  ;;  %v1994_v4 = vpack.c.bf16 %v1959_v48, %v1958_v58  ;;  %15799 = vrcp.f32 %v1834_v41  ;;  %v1960_v20 = vmul.f32 %v15792_v23, %v17290_v46  ;;  %v22507_v23 = vld [vmem:[#allocation20_spill] sm:$0xff] }
 0x3b9   :  { %3666 = vrot.lane.b32.xlu1 %v22503_v24, %s16539_s28 }
 0x3ba   :  { %14355 = vmatmul.mubr.msk.bf16.vlgmr.msra.gmra.mrb[48].mxu0 %vm1549_vm3, %v1994_v4  ;;  %v1837_v47 = vpop.xlane.xlu0 %1836  ;;  %v22506_v4 = vld [vmem:[#allocation13_spill] sm:$0xff] }
 0x3bb   :  { %14365 = vmatpush3.bf16.msra.mxu0 %v22504_v14  ;;  %15801 = vrcp.f32 %v1837_v47  ;;  %14366 = vmatprep.mubr.msk.bf16.mxu0 %vm16536_vm1, %v22492_v19 }
 0x3bc   :  { %3460 = vrot.lane.b32.xlu0 %v22497_v15, %s16540_s29  ;;  %14376 = vmatprep.subr.bf16.mxu0 %v22492_v19  ;;  %15803 = vrcp.f32 %v1840_v8  ;;  %v1846_v6 = vpop.xlane.xlu1 %1845 }
 0x3bd   :  { %v15794_v2 = vpop.eup %15793  ;;  %3717 = vrot.lane.b32.xlu1 %v22505_v11, %s16539_s28 }
 0x3be   :  { %v1961_v41 = vmul.f32 %v15794_v2, %v17305_v7  ;;  %v1843_v14 = vpop.xlane.xlu0 %1842  ;;  %v15796_v58 = vpop.eup %15795 }
 0x3bf   :  { %15805 = vrcp.f32 %v1843_v14  ;;  %v1962_v8 = vmul.f32 %v15796_v58, %v17300_v38  ;;  %v22508_v38 = vld [vmem:[#allocation12_spill] sm:$0xff] }
 0x3c0   :  { %3511 = vrot.lane.b32.xlu0 %v22499_v49, %s16540_s29  ;;  %v1995_v48 = vpack.c.bf16 %v1961_v41, %v1960_v20  ;;  %15807 = vrcp.f32 %v1846_v6  ;;  %v1858_v41 = vpop.xlane.xlu1 %1857  ;;  %v22509_v58 = vld [vmem:[#allocation32_spill] sm:$0xff] }
 0x3c1   :  { %v15798_v39 = vpop.eup %15797  ;;  %3768 = vrot.lane.b32.xlu1 %v22506_v4, %s16539_s28  ;;  %15809 = vrcp.f32 %v17402_v52 }
 0x3c2   :  { %v1963_v46 = vmul.f32 %v15798_v39, %v17315_v29  ;;  %14361 = vmatmul.mubr.msk.bf16.vlgmr.msra.gmra.mrb[88].mxu1 %vm1549_vm3, %v1995_v48  ;;  %v1849_v7 = vpop.xlane.xlu0 %1848  ;;  %v15800_v47 = vpop.eup %15799 }
 0x3c3   :  { %14371 = vmatpush3.bf16.msra.mxu1 %v22507_v23  ;;  %15811 = vrcp.f32 %v1849_v7  ;;  %14372 = vmatprep.mubr.msk.bf16.mxu1 %vm16536_vm1, %v22492_v19  ;;  %v1964_v29 = vmul.f32 %v15800_v47, %v17310_v34 }
 0x3c4   :  { %3562 = vrot.lane.b32.xlu0 %v22500_v26, %s16540_s29  ;;  %v1996_v2 = vpack.c.bf16 %v1963_v46, %v1962_v8  ;;  %14382 = vmatprep.subr.bf16.mxu1 %v22492_v19  ;;  %15813 = vrcp.f32 %v17396_v63  ;;  %v22510_v8 = vld [vmem:[#allocation21_spill] sm:$0xff]  ;;  %v1870_v23 = vpop.xlane.xlu1 %1869 }
 0x3c5   :  { %v15802_v52 = vpop.eup %15801  ;;  %3819 = vrot.lane.b32.xlu1 %v22508_v38, %s16539_s28 }
 0x3c6   :  { %v1965_v20 = vmul.f32 %v15802_v52, %v17325_v50  ;;  %14367 = vmatmul.mubr.msk.bf16.vlgmr.msra.gmra.mrb[52].mxu0 %vm1549_vm3, %v1996_v2  ;;  %v1861_v6 = vpop.xlane.xlu0 %1860  ;;  %v15804_v14 = vpop.eup %15803  ;;  %v22511_v52 = vld [vmem:[#allocation27_spill] sm:$0xff] }
 0x3c7   :  { %14377 = vmatpush3.bf16.msra.mxu0 %v22509_v58  ;;  %15815 = vrcp.f32 %v1861_v6  ;;  %14378 = vmatprep.mubr.msk.bf16.mxu0 %vm16536_vm1, %v22492_v19  ;;  %v1966_v50 = vmul.f32 %v15804_v14, %v17320_v35 }
 0x3c8   :  { %3613 = vrot.lane.b32.xlu0 %v22502_v12, %s16540_s29  ;;  %v1997_v63 = vpack.c.bf16 %v1965_v20, %v1964_v29  ;;  %14388 = vmatprep.subr.bf16.mxu0 %v22492_v19  ;;  %15817 = vrcp.f32 %v1858_v41  ;;  %v22512_v41 = vld [vmem:[#allocation22_spill] sm:$0xff]  ;;  %v1882_v58 = vpop.xlane.xlu1 %1881 }
 0x3c9   :  { %v15806_v34 = vpop.eup %15805  ;;  %3870 = vrot.lane.b32.xlu1 %v16790_v5, %s16539_s28  ;;  %15819 = vrcp.f32 %v17416_v21 }
 0x3ca   :  { %v1967_v48 = vmul.f32 %v15806_v34, %v17335_v0  ;;  %14373 = vmatmul.mubr.msk.bf16.vlgmr.msra.gmra.mrb[92].mxu1 %vm1549_vm3, %v1997_v63  ;;  %v15808_v39 = vpop.eup %15807  ;;  %v1873_v7 = vpop.xlane.xlu0 %1872  ;;  %15821 = vrcp.f32 %v17404_v9  ;;  %v22513_v63 = vld [vmem:[#allocation28_spill] sm:$0xff] }
 0x3cb   :  { %14383 = vmatpush3.bf16.msra.mxu1 %v22510_v8  ;;  %14384 = vmatprep.mubr.msk.bf16.mxu1 %vm16536_vm1, %v22492_v19  ;;  %v15810_v46 = vpop.eup %15809  ;;  %v1968_v0 = vmul.f32 %v15808_v39, %v17330_v57  ;;  %15823 = vrcp.f32 %v1873_v7  ;;  %v22514_v39 = vld [vmem:[#allocation24_spill] sm:$0xff] }
 0x3cc   :  { %3664 = vrot.lane.b32.xlu0 %v22503_v24, %s16540_s29  ;;  %v1998_v47 = vpack.c.bf16 %v1967_v48, %v1966_v50  ;;  %14394 = vmatprep.subr.bf16.mxu1 %v22492_v19  ;;  %v1971_v29 = vmul.f32 %v15810_v46, %v17211_v1  ;;  %15825 = vrcp.f32 %v1870_v23  ;;  %v1894_v7 = vpop.xlane.xlu1 %1893  ;;  %v22516_v23 = vld [vmem:[#allocation30_spill] sm:$0xff] }
 0x3cd   :  { %v15812_v35 = vpop.eup %15811  ;;  %3921 = vrot.lane.b32.xlu1 %v16786_v3, %s16539_s28  ;;  %15827 = vrcp.f32 %v17435_v25 }
 0x3ce   :  { %v1969_v21 = vmul.f32 %v15812_v35, %v17345_v36  ;;  %14379 = vmatmul.mubr.msk.bf16.vlgmr.msra.gmra.mrb[56].mxu0 %vm1549_vm3, %v1998_v47  ;;  %v15814_v2 = vpop.eup %15813  ;;  %v1885_v6 = vpop.xlane.xlu0 %1884  ;;  %15829 = vrcp.f32 %v17418_v17 }
 0x3cf   :  { %14389 = vmatpush3.bf16.msra.mxu0 %v22511_v52  ;;  %14390 = vmatprep.mubr.msk.bf16.mxu0 %vm16536_vm1, %v22492_v19  ;;  %v1970_v36 = vmul.f32 %v15814_v2, %v17202_v43  ;;  %15831 = vrcp.f32 %v1885_v6 }
 0x3d0   :  { %3715 = vrot.lane.b32.xlu0 %v22505_v11, %s16540_s29  ;;  %v1999_v9 = vpack.c.bf16 %v1969_v21, %v1968_v0  ;;  %14400 = vmatprep.subr.bf16.mxu0 %v22492_v19  ;;  %15833 = vrcp.f32 %v1882_v58  ;;  %v22522_v58 = vld [vmem:[#allocation34_spill] sm:$0xff] }
 0x3d1   :  { %v15816_v57 = vpop.eup %15815  ;;  %3919 = vrot.lane.b32.xlu1 %v16786_v3, %s16540_s29  ;;  %v2000_v14 = vpack.c.bf16 %v1971_v29, %v1970_v36  ;;  %15835 = vrcp.f32 %v17454_v32  ;;  %v22517_v29 = vld [vmem:[#allocation26_spill] sm:$0xff]  ;;  %v22518_v36 = vld [vmem:[#allocation31_spill] sm:$0xff] }
 0x3d2   :  { %14385 = vmatmul.mubr.msk.bf16.vlgmr.msra.gmra.mrb[96].mxu1 %vm1549_vm3, %v1999_v9  ;;  %v15818_v20 = vpop.eup %15817  ;;  %v1973_v1 = vmul.f32 %v15816_v57, %v17354_v37  ;;  %v1897_v8 = vpop.xlane.xlu0 %1896  ;;  %15837 = vrcp.f32 %v17437_v22 }
 0x3d3   :  { %14395 = vmatpush3.bf16.msra.mxu1 %v22512_v41  ;;  %14396 = vmatprep.mubr.msk.bf16.mxu1 %vm16536_vm1, %v22492_v19  ;;  %v15820_v43 = vpop.eup %15819  ;;  %v1972_v25 = vmul.f32 %v15818_v20, %v17340_v10  ;;  %15839 = vrcp.f32 %v1897_v8  ;;  %v22520_v41 = vld [vmem:[#allocation11_spill] sm:$0xff] }
 0x3d4   :  { %3766 = vrot.lane.b32.xlu0 %v22506_v4, %s16540_s29  ;;  %14406 = vmatprep.subr.bf16.mxu1 %v22492_v19  ;;  %v15822_v37 = vpop.eup %15821  ;;  %v1975_v34 = vmul.f32 %v15820_v43, %v17235_v53  ;;  %15841 = vrcp.f32 %v1894_v7 }
 0x3d5   :  { %4470 = vrot.lane.b32.xlu1 %v16708_v42, %s16541_s30  ;;  %v2001_v17 = vpack.c.bf16 %v1973_v1, %v1972_v25  ;;  %v15824_v50 = vpop.eup %15823  ;;  %v1974_v10 = vmul.f32 %v15822_v37, %v17220_v45  ;;  %15843 = vrcp.f32 %v17473_v55 }
 0x3d6   :  { %14391 = vmatmul.mubr.msk.bf16.vlgmr.msra.gmra.mrb[60].mxu0 %vm1549_vm3, %v2000_v14  ;;  %v15826_v48 = vpop.eup %15825  ;;  %v1977_v53 = vmul.f32 %v15824_v50, %v17362_v33  ;;  %v22515_v33 = vld [vmem:[#allocation29_spill] sm:$0xff]  ;;  %15845 = vrcp.f32 %v17456_v31  ;;  %v2857_v43 = vpop.permute.xlu0 %2856 }
 0x3d7   :  { %14401 = vmatpush3.bf16.msra.mxu0 %v22513_v63  ;;  %14402 = vmatprep.mubr.msk.bf16.mxu0 %vm16536_vm1, %v22492_v19  ;;  %v2002_v46 = vpack.c.bf16 %v1975_v34, %v1974_v10  ;;  %v15828_v45 = vpop.eup %15827  ;;  %v1976_v32 = vmul.f32 %v15826_v48, %v17349_v30  ;;  %v22523_v34 = vld [vmem:[#allocation33_spill] sm:$0xff]  ;;  %v2904_v50 = vpop.permute.xlu1 %2903 }
 0x3d8   :  { %3817 = vrot.lane.b32.xlu0 %v22508_v38, %s16540_s29  ;;  %14412 = vmatprep.subr.bf16.mxu0 %v22492_v19  ;;  %v15830_v47 = vpop.eup %15829  ;;  %v1979_v35 = vmul.f32 %v15828_v45, %v17255_v59 }
 0x3d9   :  { %4564 = vrot.lane.b32.xlu1 %v16728_v62, %s16541_s30  ;;  %v2003_v22 = vpack.c.bf16 %v1977_v53, %v1976_v32  ;;  %v15832_v0 = vpop.eup %15831  ;;  %v1978_v30 = vmul.f32 %v15830_v47, %v17240_v27 }
 0x3da   :  { %14397 = vmatmul.mubr.msk.bf16.vlgmr.msra.gmra.mrb[100].mxu1 %vm1549_vm3, %v2001_v17  ;;  %v15834_v21 = vpop.eup %15833  ;;  %v1981_v59 = vmul.f32 %v15832_v0, %v17370_v56 }
 0x3db   :  { %14407 = vmatpush3.bf16.msra.mxu1 %v22514_v39  ;;  %14408 = vmatprep.mubr.msk.bf16.mxu1 %vm16536_vm1, %v22492_v19  ;;  %v2004_v2 = vpack.c.bf16 %v1979_v35, %v1978_v30  ;;  %v15836_v52 = vpop.eup %15835  ;;  %v1980_v27 = vmul.f32 %v15834_v21, %v17358_v28  ;;  %v22525_v30 = vld [vmem:[#allocation38_spill] sm:$0xff] }
 0x3dc   :  { %3868 = vrot.lane.b32.xlu0 %v16790_v5, %s16540_s29  ;;  %14418 = vmatprep.subr.bf16.mxu1 %v22492_v19  ;;  %v15838_v55 = vpop.eup %15837  ;;  %v1983_v56 = vmul.f32 %v15836_v52, %v17275_v51  ;;  %v22519_v51 = vld [vmem:[#allocation36_spill] sm:$0xff] }
 0x3dd   :  { %4658 = vrot.lane.b32.xlu1 %v16748_v18, %s16541_s30  ;;  %v2005_v9 = vpack.c.bf16 %v1981_v59, %v1980_v27  ;;  %v15840_v31 = vpop.eup %15839  ;;  %v1982_v28 = vmul.f32 %v15838_v55, %v17260_v13  ;;  %v22521_v13 = vld [vmem:[#allocation35_spill] sm:$0xff] }
 0x3de   :  { %14403 = vmatmul.mubr.msk.bf16.vlgmr.msra.gmra.mrb[64].mxu0 %vm1549_vm3, %v2002_v46  ;;  %v15842_v57 = vpop.eup %15841  ;;  %v1985_v20 = vmul.f32 %v15840_v31, %v22519_v51 }
 0x3df   :  { %14413 = vmatpush3.bf16.msra.mxu0 %v22515_v33  ;;  %14414 = vmatprep.mubr.msk.bf16.mxu0 %vm16536_vm1, %v22492_v19  ;;  %v2006_v1 = vpack.c.bf16 %v1983_v56, %v1982_v28  ;;  %v15844_v6 = vpop.eup %15843  ;;  %v1984_v14 = vmul.f32 %v15842_v57, %v22521_v13 }
 0x3e0   :  { %4517 = vrot.lane.b32.xlu0 %v16704_v40, %s16541_s30  ;;  %14424 = vmatprep.subr.bf16.mxu0 %v22492_v19  ;;  %v15846_v25 = vpop.eup %15845  ;;  %v1987_v37 = vmul.f32 %v15844_v6, %v22522_v58 }
 0x3e1   :  { %4752 = vrot.lane.b32.xlu1 %v16768_v44, %s16541_s30  ;;  %v2007_v63 = vpack.c.bf16 %v1985_v20, %v1984_v14  ;;  %v1986_v17 = vmul.f32 %v15846_v25, %v22523_v34 }
 0x3e2   :  { %14409 = vmatmul.mubr.msk.bf16.vlgmr.msra.gmra.mrb[104].mxu1 %vm1549_vm3, %v2003_v22  ;;  %v22524_v22 = vld [vmem:[#allocation37_spill] sm:$0xff] }
 0x3e3   :  { %14419 = vmatpush3.bf16.msra.mxu1 %v22516_v23  ;;  %14420 = vmatprep.mubr.msk.bf16.mxu1 %vm16536_vm1, %v22492_v19  ;;  %v2008_v10 = vpack.c.bf16 %v1987_v37, %v1986_v17 }
 0x3e4   :  { %4611 = vrot.lane.b32.xlu0 %v16724_v60, %s16541_s30  ;;  %14430 = vmatprep.subr.bf16.mxu1 %v22492_v19 }
 0x3e5   :  { %4846 = vrot.lane.b32.xlu1 %v22494_v61, %s16541_s30 }
 0x3e6   :  { %14415 = vmatmul.mubr.msk.bf16.vlgmr.msra.gmra.mrb[68].mxu0 %vm1549_vm3, %v2004_v2 }
 0x3e7   :  { %14425 = vmatpush3.bf16.msra.mxu0 %v22517_v29  ;;  %14426 = vmatprep.mubr.msk.bf16.mxu0 %vm16536_vm1, %v22492_v19 }
 0x3e8   :  { %4705 = vrot.lane.b32.xlu0 %v16744_v16, %s16541_s30  ;;  %14436 = vmatprep.subr.bf16.mxu0 %v22492_v19 }
 0x3e9   :  { %4940 = vrot.lane.b32.xlu1 %v22497_v15, %s16541_s30 }
 0x3ea   :  { %14421 = vmatmul.mubr.msk.bf16.vlgmr.msra.gmra.mrb[108].mxu1 %vm1549_vm3, %v2005_v9 }
 0x3eb   :  { %14431 = vmatpush3.bf16.msra.mxu1 %v22518_v36  ;;  %14432 = vmatprep.mubr.msk.bf16.mxu1 %vm16536_vm1, %v22492_v19 }
 0x3ec   :  { %4799 = vrot.lane.b32.xlu0 %v22520_v41, %s16541_s30  ;;  %14442 = vmatprep.subr.bf16.mxu1 %v22492_v19 }
 0x3ed   :  { %5034 = vrot.lane.b32.xlu1 %v22500_v26, %s16541_s30 }
 0x3ee   :  { %14427 = vmatmul.mubr.msk.bf16.vlgmr.msra.gmra.mrb[72].mxu0 %vm1549_vm3, %v2006_v1 }
 0x3ef   :  { %14437 = vmatpush3.bf16.msra.mxu0 %v2857_v43  ;;  %14438 = vmatprep.mubr.msk.bf16.mxu0 %vm16536_vm1, %v22492_v19 }
 0x3f0   :  { %4893 = vrot.lane.b32.xlu0 %v22496_v54, %s16541_s30  ;;  %14448 = vmatprep.subr.bf16.mxu0 %v22492_v19 }
 0x3f1   :  { %5128 = vrot.lane.b32.xlu1 %v22503_v24, %s16541_s30 }
 0x3f2   :  { %14433 = vmatmul.mubr.msk.bf16.vlgmr.msra.gmra.mrb[112].mxu1 %vm1549_vm3, %v2007_v63 }
 0x3f3   :  { %14443 = vmatpush3.bf16.msra.mxu1 %v2904_v50  ;;  %14444 = vmatprep.mubr.msk.bf16.mxu1 %vm16536_vm1, %v22492_v19 }
 0x3f4   :  { %4987 = vrot.lane.b32.xlu0 %v22499_v49, %s16541_s30  ;;  %14454 = vmatprep.subr.bf16.mxu1 %v22492_v19 }
 0x3f5   :  { %5175 = vrot.lane.b32.xlu1 %v22505_v11, %s16541_s30 }
 0x3f6   :  { %14439 = vmatmul.mubr.msk.bf16.vlgmr.msra.gmra.mrb[76].mxu0 %vm1549_vm3, %v2008_v10 }
 0x3f7   :  { %14450 = vmatprep.mubr.msk.bf16.mxu0 %vm16536_vm1, %v22492_v19 }
 0x3f8   :  { %5081 = vrot.lane.b32.xlu0 %v22502_v12, %s16541_s30 }
 0x3f9   :  { %5269 = vrot.lane.b32.xlu1 %v22508_v38, %s16541_s30 }
 0x3fc   :  { %5222 = vrot.lane.b32.xlu0 %v22506_v4, %s16541_s30 }
 0x401   :  { %v1906_v48 = vpop.xlane.xlu1 %1905 }
 0x402   :  { %15847 = vrcp.f32 %v1906_v48 }
 0x405   :  { %v3004_v39 = vpop.permute.xlu1 %3003 }
 0x406   :  { %v3009_v27 = vsel %vm511_vm2, %v3004_v39, 0 }
 0x407   :  { %v1909_v53 = vpop.xlane.xlu0 %1908 }
 0x408   :  { %15849 = vrcp.f32 %v1909_v53 }
 0x409   :  { %v3055_v8 = vpop.permute.xlu1 %3054 }
 0x40a   :  { %v3060_v59 = vsel %vm511_vm2, %v3055_v8, 0 }
 0x40b   :  { %v2953_v46 = vpop.permute.xlu0 %2952 }
 0x40c   :  { %v2958_v45 = vsel %vm511_vm2, %v2953_v46, 0  ;;  %v15848_v47 = vpop.eup %15847 }
 0x40d   :  { %v3106_v32 = vpop.permute.xlu1 %3105  ;;  %14449 = vmatpush3.bf16.xpose.msra.mxu0 %v2958_v45  ;;  %v1988_v0 = vmul.f32 %v15848_v47, %v22524_v22 }
 0x40e   :  { %14460 = vmatprep.subr.bf16.mxu0 %v22492_v19  ;;  %v3111_v28 = vsel %vm511_vm2, %v3106_v32, 0 }
 0x40f   :  { %v2951_v7 = vpop.permute.xlu0 %2950 }
 0x411   :  { %v3157_v33 = vpop.permute.xlu1 %3156 }
 0x412   :  { %v15850_v35 = vpop.eup %15849  ;;  %v3162_v9 = vsel %vm511_vm2, %v3157_v33, 0 }
 0x413   :  { %v1989_v21 = vmul.f32 %v15850_v35, %v22525_v30  ;;  %v3002_v23 = vpop.permute.xlu0 %3001 }
 0x414   :  { %14451 = vmatmul.mubr.msk.bf16.vlgmr.msra.gmra.mrb[80].mxu0 %vm511_vm2, %v2951_v7 }
 0x415   :  { %v3208_v2 = vpop.permute.xlu1 %3207  ;;  %14461 = vmatpush3.bf16.xpose.msra.mxu0 %v3060_v59  ;;  %v2009_v52 = vpack.c.bf16 %v1989_v21, %v1988_v0  ;;  %14462 = vmatprep.mubr.msk.bf16.mxu0 %vm16536_vm1, %v22492_v19 }
 0x416   :  { %14472 = vmatprep.subr.bf16.mxu0 %v22492_v19  ;;  %v3213_v6 = vsel %vm511_vm2, %v3208_v2, 0 }
 0x417   :  { %14445 = vmatmul.mubr.msk.bf16.vlgmr.msra.gmra.mrb[116].mxu1 %vm1549_vm3, %v2009_v52  ;;  %v3053_v55 = vpop.permute.xlu0 %3052 }
 0x418   :  { %14455 = vmatpush3.bf16.xpose.msra.mxu1 %v3009_v27  ;;  %14456 = vmatprep.mubr.msk.bf16.mxu1 %vm16536_vm1, %v22492_v19 }
 0x419   :  { %v3259_v29 = vpop.permute.xlu1 %3258  ;;  %14466 = vmatprep.subr.bf16.mxu1 %v22492_v19 }
 0x41a   :  { %v3264_v20 = vsel %vm511_vm2, %v3259_v29, 0 }
 0x41b   :  { %v3104_v56 = vpop.permute.xlu0 %3103 }
 0x41c   :  { %14463 = vmatmul.mubr.msk.bf16.vlgmr.msra.gmra.mrb[84].mxu0 %vm511_vm2, %v3053_v55 }
 0x41d   :  { %v3310_v31 = vpop.permute.xlu1 %3309  ;;  %14473 = vmatpush3.bf16.xpose.msra.mxu0 %v3162_v9  ;;  %14474 = vmatprep.mubr.msk.bf16.mxu0 %vm16536_vm1, %v22492_v19 }
 0x41e   :  { %14484 = vmatprep.subr.bf16.mxu0 %v22492_v19  ;;  %v3315_v37 = vsel %vm511_vm2, %v3310_v31, 0 }
 0x41f   :  { %14457 = vmatmul.mubr.msk.bf16.vlgmr.msra.gmra.mrb[120].mxu1 %vm511_vm2, %v3002_v23  ;;  %v3155_v57 = vpop.permute.xlu0 %3154 }
 0x420   :  { %14467 = vmatpush3.bf16.xpose.msra.mxu1 %v3111_v28  ;;  %14468 = vmatprep.mubr.msk.bf16.mxu1 %vm16536_vm1, %v22492_v19 }
 0x421   :  { %v3361_v36 = vpop.permute.xlu1 %3360  ;;  %14478 = vmatprep.subr.bf16.mxu1 %v22492_v19 }
 0x422   :  { %v3366_v25 = vsel %vm511_vm2, %v3361_v36, 0 }
 0x423   :  { %v3206_v51 = vpop.permute.xlu0 %3205 }
 0x424   :  { %14475 = vmatmul.mubr.msk.bf16.vlgmr.msra.gmra.mrb[88].mxu0 %vm511_vm2, %v3155_v57 }
 0x425   :  { %v3412_v1 = vpop.permute.xlu1 %3411  ;;  %14485 = vmatpush3.bf16.xpose.msra.mxu0 %v3264_v20  ;;  %14486 = vmatprep.mubr.msk.bf16.mxu0 %vm16536_vm1, %v22492_v19 }
 0x426   :  { %14496 = vmatprep.subr.bf16.mxu0 %v22492_v19  ;;  %v3417_v48 = vsel %vm511_vm2, %v3412_v1, 0 }
 0x427   :  { %14469 = vmatmul.mubr.msk.bf16.vlgmr.msra.gmra.mrb[124].mxu1 %vm511_vm2, %v3104_v56  ;;  %v3257_v13 = vpop.permute.xlu0 %3256 }
 0x428   :  { %14479 = vmatpush3.bf16.xpose.msra.mxu1 %v3213_v6  ;;  %14480 = vmatprep.mubr.msk.bf16.mxu1 %vm16536_vm1, %v22492_v19 }
 0x429   :  { %v3463_v14 = vpop.permute.xlu1 %3462  ;;  %14490 = vmatprep.subr.bf16.mxu1 %v22492_v19 }
 0x42a   :  { %v3468_v50 = vsel %vm511_vm2, %v3463_v14, 0 }
 0x42b   :  { %v3308_v43 = vpop.permute.xlu0 %3307 }
 0x42c   :  { %14487 = vmatmul.mubr.msk.bf16.vlgmr.msra.gmra.mrb[92].mxu0 %vm511_vm2, %v3257_v13 }
 0x42d   :  { %v3514_v58 = vpop.permute.xlu1 %3513  ;;  %14497 = vmatpush3.bf16.xpose.msra.mxu0 %v3366_v25  ;;  %14498 = vmatprep.mubr.msk.bf16.mxu0 %vm16536_vm1, %v22492_v19 }
 0x42e   :  { %14508 = vmatprep.subr.bf16.mxu0 %v22492_v19  ;;  %v3519_v32 = vsel %vm511_vm2, %v3514_v58, 0 }
 0x42f   :  { %14481 = vmatmul.mubr.msk.bf16.vlgmr.msra.gmra.mrb[128].mxu1 %vm511_vm2, %v3206_v51  ;;  %v3359_v63 = vpop.permute.xlu0 %3358 }
 0x430   :  { %14491 = vmatpush3.bf16.xpose.msra.mxu1 %v3315_v37  ;;  %14492 = vmatprep.mubr.msk.bf16.mxu1 %vm16536_vm1, %v22492_v19 }
 0x431   :  { %v3565_v34 = vpop.permute.xlu1 %3564  ;;  %14502 = vmatprep.subr.bf16.mxu1 %v22492_v19 }
 0x432   :  { %v3570_v46 = vsel %vm511_vm2, %v3565_v34, 0 }
 0x433   :  { %v3410_v17 = vpop.permute.xlu0 %3409 }
 0x434   :  { %14499 = vmatmul.mubr.msk.bf16.vlgmr.msra.gmra.mrb[96].mxu0 %vm511_vm2, %v3359_v63 }
 0x435   :  { %v3616_v10 = vpop.permute.xlu1 %3615  ;;  %14509 = vmatpush3.bf16.xpose.msra.mxu0 %v3468_v50  ;;  %14510 = vmatprep.mubr.msk.bf16.mxu0 %vm16536_vm1, %v22492_v19 }
 0x436   :  { %14520 = vmatprep.subr.bf16.mxu0 %v22492_v19  ;;  %v3621_v0 = vsel %vm511_vm2, %v3616_v10, 0 }
 0x437   :  { %14493 = vmatmul.mubr.msk.bf16.vlgmr.msra.gmra.mrb[132].mxu1 %vm511_vm2, %v3308_v43  ;;  %v3461_v39 = vpop.permute.xlu0 %3460 }
 0x438   :  { %14503 = vmatpush3.bf16.xpose.msra.mxu1 %v3417_v48  ;;  %14504 = vmatprep.mubr.msk.bf16.mxu1 %vm16536_vm1, %v22492_v19 }
 0x439   :  { %v3667_v53 = vpop.permute.xlu1 %3666  ;;  %14514 = vmatprep.subr.bf16.mxu1 %v22492_v19 }
 0x43a   :  { %v3672_v35 = vsel %vm511_vm2, %v3667_v53, 0 }
 0x43b   :  { %v3512_v8 = vpop.permute.xlu0 %3511 }
 0x43c   :  { %14511 = vmatmul.mubr.msk.bf16.vlgmr.msra.gmra.mrb[100].mxu0 %vm511_vm2, %v3461_v39 }
 0x43d   :  { %v3718_v45 = vpop.permute.xlu1 %3717  ;;  %14521 = vmatpush3.bf16.xpose.msra.mxu0 %v3570_v46  ;;  %14522 = vmatprep.mubr.msk.bf16.mxu0 %vm16536_vm1, %v22492_v19 }
 0x43e   :  { %14532 = vmatprep.subr.bf16.mxu0 %v22492_v19  ;;  %v3723_v2 = vsel %vm511_vm2, %v3718_v45, 0 }
 0x43f   :  { %14505 = vmatmul.mubr.msk.bf16.vlgmr.msra.gmra.mrb[136].mxu1 %vm511_vm2, %v3410_v17  ;;  %v3563_v7 = vpop.permute.xlu0 %3562 }
 0x440   :  { %14515 = vmatpush3.bf16.xpose.msra.mxu1 %v3519_v32  ;;  %14516 = vmatprep.mubr.msk.bf16.mxu1 %vm16536_vm1, %v22492_v19 }
 0x441   :  { %v3769_v47 = vpop.permute.xlu1 %3768  ;;  %14526 = vmatprep.subr.bf16.mxu1 %v22492_v19 }
 0x442   :  { %v3774_v59 = vsel %vm511_vm2, %v3769_v47, 0 }
 0x443   :  { %v3614_v33 = vpop.permute.xlu0 %3613 }
 0x444   :  { %14523 = vmatmul.mubr.msk.bf16.vlgmr.msra.gmra.mrb[104].mxu0 %vm511_vm2, %v3563_v7 }
 0x445   :  { %v3820_v22 = vpop.permute.xlu1 %3819  ;;  %14533 = vmatpush3.bf16.xpose.msra.mxu0 %v3672_v35  ;;  %14534 = vmatprep.mubr.msk.bf16.mxu0 %vm16536_vm1, %v22492_v19 }
 0x446   :  { %14544 = vmatprep.subr.bf16.mxu0 %v22492_v19  ;;  %v3825_v9 = vsel %vm511_vm2, %v3820_v22, 0 }
 0x447   :  { %14517 = vmatmul.mubr.msk.bf16.vlgmr.msra.gmra.mrb[140].mxu1 %vm511_vm2, %v3512_v8  ;;  %v3665_v30 = vpop.permute.xlu0 %3664 }
 0x448   :  { %14527 = vmatpush3.bf16.xpose.msra.mxu1 %v3621_v0  ;;  %14528 = vmatprep.mubr.msk.bf16.mxu1 %vm16536_vm1, %v22492_v19 }
 0x449   :  { %14538 = vmatprep.subr.bf16.mxu1 %v22492_v19  ;;  %v3871_v21 = vpop.permute.xlu1 %3870 }
 0x44a   :  { %v3876_v55 = vsel %vm511_vm2, %v3871_v21, 0 }
 0x44b   :  { %v3716_v23 = vpop.permute.xlu0 %3715 }
 0x44c   :  { %14535 = vmatmul.mubr.msk.bf16.vlgmr.msra.gmra.mrb[108].mxu0 %vm511_vm2, %v3665_v30 }
 0x44d   :  { %14545 = vmatpush3.bf16.xpose.msra.mxu0 %v3774_v59  ;;  %14546 = vmatprep.mubr.msk.bf16.mxu0 %vm16536_vm1, %v22492_v19  ;;  %v3922_v27 = vpop.permute.xlu1 %3921 }
 0x44e   :  { %14556 = vmatprep.subr.bf16.mxu0 %v22492_v19  ;;  %v3927_v57 = vsel %vm511_vm2, %v3922_v27, 0 }
 0x44f   :  { %14529 = vmatmul.mubr.msk.bf16.vlgmr.msra.gmra.mrb[144].mxu1 %vm511_vm2, %v3614_v33  ;;  %v3767_v52 = vpop.permute.xlu0 %3766 }
 0x450   :  { %14539 = vmatpush3.bf16.xpose.msra.mxu1 %v3723_v2  ;;  %14540 = vmatprep.mubr.msk.bf16.mxu1 %vm16536_vm1, %v22492_v19 }
 0x451   :  { %14550 = vmatprep.subr.bf16.mxu1 %v22492_v19  ;;  %v3920_v56 = vpop.permute.xlu1 %3919 }
 0x453   :  { %v3818_v29 = vpop.permute.xlu0 %3817 }
 0x454   :  { %14547 = vmatmul.mubr.msk.bf16.vlgmr.msra.gmra.mrb[112].mxu0 %vm511_vm2, %v3767_v52 }
 0x455   :  { %14557 = vmatpush3.bf16.xpose.msra.mxu0 %v3876_v55  ;;  %14558 = vmatprep.mubr.msk.bf16.mxu0 %vm16536_vm1, %v22492_v19  ;;  %v4471_v28 = vpop.permute.xlu1 %4470 }
 0x456   :  { %14568 = vmatprep.subr.bf16.mxu0 %v22492_v19 }
 0x457   :  { %14541 = vmatmul.mubr.msk.bf16.vlgmr.msra.gmra.mrb[148].mxu1 %vm511_vm2, %v3716_v23  ;;  %v3869_v31 = vpop.permute.xlu0 %3868 }
 0x458   :  { %14551 = vmatpush3.bf16.xpose.msra.mxu1 %v3825_v9  ;;  %14552 = vmatprep.mubr.msk.bf16.mxu1 %vm16536_vm1, %v22492_v19 }
 0x459   :  { %14562 = vmatprep.subr.bf16.mxu1 %v22492_v19 }
 0x45b   :  { %v4518_v36 = vpop.permute.xlu0 %4517 }
 0x45c   :  { %14559 = vmatmul.mubr.msk.bf16.vlgmr.msra.gmra.mrb[116].mxu0 %vm511_vm2, %v3869_v31 }
 0x45d   :  { %14569 = vmatpush3.bf16.msra.mxu0 %v4471_v28  ;;  %14570 = vmatprep.mubr.msk.bf16.mxu0 %vm16536_vm1, %v22492_v19 }
 0x45e   :  { %14580 = vmatprep.subr.bf16.mxu0 %v22492_v19 }
 0x45f   :  { %14553 = vmatmul.mubr.msk.bf16.vlgmr.msra.gmra.mrb[152].mxu1 %vm511_vm2, %v3818_v29 }
 0x460   :  { %14563 = vmatpush3.bf16.xpose.msra.mxu1 %v3927_v57  ;;  %14564 = vmatprep.mubr.msk.bf16.mxu1 %vm16536_vm1, %v22492_v19 }
 0x461   :  { %14574 = vmatprep.subr.bf16.mxu1 %v22492_v19 }
 0x467   :  { %14565 = vmatmul.mubr.msk.bf16.vlgmr.msra.gmra.mrb[156].mxu1 %vm511_vm2, %v3920_v56 }
 0x468   :  { %14575 = vmatpush3.bf16.msra.mxu1 %v4518_v36  ;;  %14576 = vmatprep.mubr.msk.bf16.mxu1 %vm16536_vm1, %v22492_v19 }
 0x469   :  { %14586 = vmatprep.subr.bf16.mxu1 %v22492_v19 }
 0x46d   :  { %v17776_v51 = vpop.f32.mrb[40].mxu0 }
 0x46e   :  { %22526 = vst [vmem:[#allocation16_spill] sm:$0xff] %v17776_v51  ;;  %v14332_v20 = vpop.f32.mrb[41].mxu0 }
 0x46f   :  { %v17778_v1 = vpop.f32.mrb[42].mxu0 }
 0x470   :  { %22527 = vst [vmem:[#allocation18_spill] sm:$0xff] %v17778_v1  ;;  %v14333_v6 = vpop.f32.mrb[43].mxu0 }
 0x475   :  { %v17780_v13 = vpop.f32.mrb[80].mxu1 }
 0x476   :  { %22528 = vst [vmem:[#allocation14_spill] sm:$0xff] %v17780_v13  ;;  %v14338_v14 = vpop.f32.mrb[81].mxu1 }
 0x477   :  { %v17782_v43 = vpop.f32.mrb[82].mxu1 }
 0x478   :  { %22529 = vst [vmem:[#allocation23_spill] sm:$0xff] %v17782_v43  ;;  %v14339_v25 = vpop.f32.mrb[83].mxu1 }
 0x47d   :  { %v17784_v58 = vpop.f32.mrb[44].mxu0 }
 0x47e   :  { %22530 = vst [vmem:[#allocation19_spill] sm:$0xff] %v17784_v58  ;;  %v14344_v37 = vpop.f32.mrb[45].mxu0 }
 0x47f   :  { %v17786_v63 = vpop.f32.mrb[46].mxu0 }
 0x480   :  { %22531 = vst [vmem:[#allocation25_spill] sm:$0xff] %v17786_v63  ;;  %v14345_v34 = vpop.f32.mrb[47].mxu0 }
 0x485   :  { %v17788_v17 = vpop.f32.mrb[84].mxu1 }
 0x486   :  { %22532 = vst [vmem:[#allocation20_spill] sm:$0xff] %v17788_v17  ;;  %v14350_v50 = vpop.f32.mrb[85].mxu1 }
 0x487   :  { %v17790_v10 = vpop.f32.mrb[86].mxu1 }
 0x488   :  { %22533 = vst [vmem:[#allocation32_spill] sm:$0xff] %v17790_v10  ;;  %v14351_v48 = vpop.f32.mrb[87].mxu1 }
 0x48d   :  { %v17792_v39 = vpop.f32.mrb[48].mxu0 }
 0x48e   :  { %22534 = vst [vmem:[#allocation21_spill] sm:$0xff] %v17792_v39  ;;  %v14356_v53 = vpop.f32.mrb[49].mxu0 }
 0x48f   :  { %v17794_v8 = vpop.f32.mrb[50].mxu0 }
 0x490   :  { %22535 = vst [vmem:[#allocation27_spill] sm:$0xff] %v17794_v8  ;;  %v14357_v46 = vpop.f32.mrb[51].mxu0 }
 0x495   :  { %v17796_v45 = vpop.f32.mrb[88].mxu1 }
 0x496   :  { %22536 = vst [vmem:[#allocation22_spill] sm:$0xff] %v17796_v45  ;;  %v14362_v32 = vpop.f32.mrb[89].mxu1 }
 0x497   :  { %v17798_v7 = vpop.f32.mrb[90].mxu1 }
 0x498   :  { %22537 = vst [vmem:[#allocation28_spill] sm:$0xff] %v17798_v7  ;;  %v14363_v47 = vpop.f32.mrb[91].mxu1 }
 0x499   :  { %v17800_v33 = vpop.f32.mrb[52].mxu0 }
 0x49a   :  { %22538 = vst [vmem:[#allocation24_spill] sm:$0xff] %v17800_v33  ;;  %v14368_v35 = vpop.f32.mrb[53].mxu0 }
 0x49b   :  { %v17802_v22 = vpop.f32.mrb[54].mxu0 }
 0x49c   :  { %22539 = vst [vmem:[#allocation29_spill] sm:$0xff] %v17802_v22  ;;  %v14369_v0 = vpop.f32.mrb[55].mxu0 }
 0x49d   :  { %v17804_v30 = vpop.f32.mrb[92].mxu1 }
 0x49e   :  { %22540 = vst [vmem:[#allocation30_spill] sm:$0xff] %v17804_v30  ;;  %v14374_v21 = vpop.f32.mrb[93].mxu1 }
 0x49f   :  { %v17806_v23 = vpop.f32.mrb[94].mxu1 }
 0x4a0   :  { %22541 = vst [vmem:[#allocation26_spill] sm:$0xff] %v17806_v23  ;;  %v14375_v59 = vpop.f32.mrb[95].mxu1 }
 0x4a1   :  { %v17808_v2 = vpop.f32.mrb[56].mxu0 }
 0x4a2   :  { %22542 = vst [vmem:[#allocation31_spill] sm:$0xff] %v17808_v2  ;;  %v14380_v52 = vpop.f32.mrb[57].mxu0 }
 0x4a3   :  { %v17810_v27 = vpop.f32.mrb[58].mxu0 }
 0x4a4   :  { %22543 = vst [vmem:[#allocation36_spill] sm:$0xff] %v17810_v27  ;;  %v14381_v55 = vpop.f32.mrb[59].mxu0 }
 0x4a5   :  { %v17812_v29 = vpop.f32.mrb[96].mxu1 }
 0x4a6   :  { %22544 = vst [vmem:[#allocation11_spill] sm:$0xff] %v17812_v29  ;;  %v14386_v56 = vpop.f32.mrb[97].mxu1 }
 0x4a7   :  { %v17814_v9 = vpop.f32.mrb[98].mxu1 }
 0x4a8   :  { %22545 = vst [vmem:[#allocation35_spill] sm:$0xff] %v17814_v9  ;;  %v14387_v31 = vpop.f32.mrb[99].mxu1 }
 0x4a9   :  { %v17816_v28 = vpop.f32.mrb[60].mxu0 }
 0x4aa   :  { %22546 = vst [vmem:[#allocation34_spill] sm:$0xff] %v17816_v28  ;;  %v14392_v57 = vpop.f32.mrb[61].mxu0 }
 0x4ab   :  { %v17818_v36 = vpop.f32.mrb[62].mxu0 }
 0x4ac   :  { %22547 = vst [vmem:[#allocation33_spill] sm:$0xff] %v17818_v36  ;;  %v14393_v20 = vpop.f32.mrb[63].mxu0 }
 0x4ad   :  { %v17820_v6 = vpop.f32.mrb[100].mxu1 }
 0x4ae   :  { %22548 = vst [vmem:[#allocation37_spill] sm:$0xff] %v17820_v6  ;;  %v14398_v14 = vpop.f32.mrb[101].mxu1 }
 0x4af   :  { %v17822_v25 = vpop.f32.mrb[102].mxu1 }
 0x4b0   :  { %22549 = vst [vmem:[#allocation38_spill] sm:$0xff] %v17822_v25  ;;  %v14399_v37 = vpop.f32.mrb[103].mxu1 }
 0x4b1   :  { %v17824_v34 = vpop.f32.mrb[64].mxu0 }
 0x4b2   :  { %22550 = vst [vmem:[#allocation39_spill] sm:$0xff] %v17824_v34  ;;  %v14404_v50 = vpop.f32.mrb[65].mxu0 }
 0x4b3   :  { %v17826_v48 = vpop.f32.mrb[66].mxu0 }
 0x4b4   :  { %22551 = vst [vmem:[#allocation40_spill] sm:$0xff] %v17826_v48  ;;  %v14405_v53 = vpop.f32.mrb[67].mxu0 }
 0x4b5   :  { %v17828_v46 = vpop.f32.mrb[104].mxu1 }
 0x4b6   :  { %22552 = vst [vmem:[#allocation41_spill] sm:$0xff] %v17828_v46  ;;  %v14410_v32 = vpop.f32.mrb[105].mxu1 }
 0x4b7   :  { %v17830_v47 = vpop.f32.mrb[106].mxu1 }
 0x4b8   :  { %22553 = vst [vmem:[#allocation42_spill] sm:$0xff] %v17830_v47  ;;  %v14411_v35 = vpop.f32.mrb[107].mxu1 }
 0x4b9   :  { %v17832_v0 = vpop.f32.mrb[68].mxu0 }
 0x4ba   :  { %22554 = vst [vmem:[#allocation43_spill] sm:$0xff] %v17832_v0  ;;  %v14416_v21 = vpop.f32.mrb[69].mxu0 }
 0x4bb   :  { %v17834_v59 = vpop.f32.mrb[70].mxu0 }
 0x4bc   :  { %22555 = vst [vmem:[#allocation44_spill] sm:$0xff] %v17834_v59  ;;  %v14417_v52 = vpop.f32.mrb[71].mxu0 }
 0x4bd   :  { %v17836_v55 = vpop.f32.mrb[108].mxu1 }
 0x4be   :  { %22556 = vst [vmem:[#allocation45_spill] sm:$0xff] %v17836_v55  ;;  %v14422_v56 = vpop.f32.mrb[109].mxu1 }
 0x4bf   :  { %v17838_v31 = vpop.f32.mrb[110].mxu1 }
 0x4c0   :  { %22557 = vst [vmem:[#allocation46_spill] sm:$0xff] %v17838_v31  ;;  %v14423_v57 = vpop.f32.mrb[111].mxu1 }
 0x4c1   :  { %v17840_v20 = vpop.f32.mrb[72].mxu0 }
 0x4c2   :  { %22558 = vst [vmem:[#allocation47_spill] sm:$0xff] %v17840_v20  ;;  %v14428_v14 = vpop.f32.mrb[73].mxu0 }
 0x4c3   :  { %v17842_v37 = vpop.f32.mrb[74].mxu0 }
 0x4c4   :  { %22559 = vst [vmem:[#allocation48_spill] sm:$0xff] %v17842_v37  ;;  %v14429_v50 = vpop.f32.mrb[75].mxu0 }
 0x4c5   :  { %v17844_v53 = vpop.f32.mrb[112].mxu1 }
 0x4c6   :  { %22560 = vst [vmem:[#allocation49_spill] sm:$0xff] %v17844_v53  ;;  %v14434_v32 = vpop.f32.mrb[113].mxu1 }
 0x4c7   :  { %v17846_v35 = vpop.f32.mrb[114].mxu1 }
 0x4c8   :  { %22561 = vst [vmem:[#allocation50_spill] sm:$0xff] %v17846_v35  ;;  %v14435_v21 = vpop.f32.mrb[115].mxu1 }
 0x4c9   :  { %v17848_v0 = vpop.f32.mrb[76].mxu0 }
 0x4ca   :  { %22562 = vst [vmem:[#allocation51_spill] sm:$0xff] %v17848_v0  ;;  %v14440_v52 = vpop.f32.mrb[77].mxu0 }
 0x4cb   :  { %v17850_v55 = vpop.f32.mrb[78].mxu0 }
 0x4cc   :  { %22563 = vst [vmem:[#allocation52_spill] sm:$0xff] %v17850_v55  ;;  %v14441_v56 = vpop.f32.mrb[79].mxu0 }
 0x4e7   :  { %v2994_v31 = vpop.f32.mrb[80].mxu0 }
 0x4e8   :  { %v17852_v57 = vmul.f32 0.35355338, %v2994_v31  ;;  %v14452_v20 = vpop.f32.mrb[81].mxu0 }
 0x4e9   :  { %v2997_v14 = vpop.f32.mrb[82].mxu0 }
 0x4ea   :  { %v17854_v59 = vmul.f32 0.35355338, %v2997_v14  ;;  %v17856_v50 = vpop.f32.mrb[116].mxu1  ;;  %v14453_v53 = vpop.f32.mrb[83].mxu0  ;;  %v4010_v32 = vsel %vm1549_vm3, %v17852_v57, -inf }
 0x4eb   :  { %22564 = vst [vmem:[#allocation53_spill] sm:$0xff] %v17856_v50  ;;  %v14446_v21 = vpop.f32.mrb[117].mxu1  ;;  %4011 = vmax.xlane.f32.xlu0 %v4010_v32 }
 0x4ec   :  { %v17860_v0 = vpop.f32.mrb[118].mxu1  ;;  %v4013_v52 = vsel %vm1549_vm3, %v17854_v59, -inf }
 0x4ed   :  { %22565 = vst [vmem:[#allocation54_spill] sm:$0xff] %v17860_v0  ;;  %v14447_v56 = vpop.f32.mrb[119].mxu1  ;;  %4014 = vmax.xlane.f32.xlu1 %v4013_v52 }
 0x4ef   :  { %v3096_v31 = vpop.f32.mrb[84].mxu0 }
 0x4f0   :  { %v17864_v20 = vmul.f32 0.35355338, %v3096_v31  ;;  %v14464_v14 = vpop.f32.mrb[85].mxu0 }
 0x4f1   :  { %v3099_v55 = vpop.f32.mrb[86].mxu0 }
 0x4f2   :  { %v3045_v35 = vpop.f32.mrb[120].mxu1  ;;  %v14465_v50 = vpop.f32.mrb[87].mxu0  ;;  %v4022_v53 = vsel %vm1549_vm3, %v17864_v20, -inf  ;;  %v17874_v31 = vmul.f32 0.35355338, %v3099_v55 }
 0x4f3   :  { %v17868_v37 = vmul.f32 0.35355338, %v3045_v35  ;;  %v14458_v32 = vpop.f32.mrb[121].mxu1  ;;  %4023 = vmax.xlane.f32.xlu1 %v4022_v53 }
 0x4f4   :  { %v3048_v21 = vpop.f32.mrb[122].mxu1 }
 0x4f5   :  { %v17870_v0 = vmul.f32 0.35355338, %v3048_v21  ;;  %v14459_v46 = vpop.f32.mrb[123].mxu1  ;;  %v4016_v52 = vsel %vm1549_vm3, %v17868_v37, -inf }
 0x4f6   :  { %4017 = vmax.xlane.f32.xlu0 %v4016_v52  ;;  %v4025_v46 = vsel %vm1549_vm3, %v17874_v31, -inf }
 0x4f7   :  { %v3198_v56 = vpop.f32.mrb[88].mxu0  ;;  %v4019_v47 = vsel %vm1549_vm3, %v17870_v0, -inf }
 0x4f8   :  { %v14476_v14 = vpop.f32.mrb[89].mxu0  ;;  %v17882_v48 = vmul.f32 0.35355338, %v3198_v56 }
 0x4f9   :  { %v3201_v50 = vpop.f32.mrb[90].mxu0 }
 0x4fa   :  { %4020 = vmax.xlane.f32.xlu0 %v4019_v47  ;;  %v3147_v35 = vpop.f32.mrb[124].mxu1  ;;  %v14477_v32 = vpop.f32.mrb[91].mxu0  ;;  %v17888_v6 = vmul.f32 0.35355338, %v3201_v50  ;;  %v4034_v56 = vsel %vm1549_vm3, %v17882_v48, -inf }
 0x4fb   :  { %v17878_v53 = vmul.f32 0.35355338, %v3147_v35  ;;  %v14470_v21 = vpop.f32.mrb[125].mxu1 }
 0x4fc   :  { %v3150_v34 = vpop.f32.mrb[126].mxu1  ;;  %v4037_v50 = vsel %vm1549_vm3, %v17888_v6, -inf }
 0x4fd   :  { %v17884_v52 = vmul.f32 0.35355338, %v3150_v34  ;;  %v14471_v55 = vpop.f32.mrb[127].mxu1  ;;  %v4028_v14 = vsel %vm1549_vm3, %v17878_v53, -inf }
 0x4fe   :  { %4026 = vmax.xlane.f32.xlu0 %v4025_v46  ;;  %4029 = vmax.xlane.f32.xlu1 %v4028_v14 }
 0x4ff   :  { %v3300_v47 = vpop.f32.mrb[92].mxu0  ;;  %v4031_v21 = vsel %vm1549_vm3, %v17884_v52, -inf }
 0x500   :  { %v14488_v35 = vpop.f32.mrb[93].mxu0  ;;  %v17898_v14 = vmul.f32 0.35355338, %v3300_v47 }
 0x501   :  { %v3303_v32 = vpop.f32.mrb[94].mxu0 }
 0x502   :  { %4032 = vmax.xlane.f32.xlu0 %v4031_v21  ;;  %4035 = vmax.xlane.f32.xlu1 %v4034_v56  ;;  %v3249_v34 = vpop.f32.mrb[128].mxu1  ;;  %v14489_v55 = vpop.f32.mrb[95].mxu0  ;;  %v17904_v56 = vmul.f32 0.35355338, %v3303_v32  ;;  %v4046_v47 = vsel %vm1549_vm3, %v17898_v14, -inf }
 0x503   :  { %v17894_v25 = vmul.f32 0.35355338, %v3249_v34  ;;  %v14482_v28 = vpop.f32.mrb[129].mxu1 }
 0x504   :  { %v3252_v46 = vpop.f32.mrb[130].mxu1 }
 0x505   :  { %v17900_v35 = vmul.f32 0.35355338, %v3252_v46  ;;  %v14483_v36 = vpop.f32.mrb[131].mxu1  ;;  %v4040_v29 = vsel %vm1549_vm3, %v17894_v25, -inf }
 0x506   :  { %4038 = vmax.xlane.f32.xlu0 %v4037_v50  ;;  %4041 = vmax.xlane.f32.xlu1 %v4040_v29  ;;  %v4049_v29 = vsel %vm1549_vm3, %v17904_v56, -inf }
 0x507   :  { %v3402_v21 = vpop.f32.mrb[96].mxu0  ;;  %v4043_v28 = vsel %vm1549_vm3, %v17900_v35, -inf }
 0x508   :  { %v14500_v34 = vpop.f32.mrb[97].mxu0  ;;  %v17914_v32 = vmul.f32 0.35355338, %v3402_v21 }
 0x509   :  { %v3405_v55 = vpop.f32.mrb[98].mxu0 }
 0x50a   :  { %4044 = vmax.xlane.f32.xlu0 %v4043_v28  ;;  %4047 = vmax.xlane.f32.xlu1 %v4046_v47  ;;  %v3351_v46 = vpop.f32.mrb[132].mxu1  ;;  %v14501_v36 = vpop.f32.mrb[99].mxu0  ;;  %v17920_v47 = vmul.f32 0.35355338, %v3405_v55  ;;  %v4058_v21 = vsel %vm1549_vm3, %v17914_v32, -inf }
 0x50b   :  { %v17910_v9 = vmul.f32 0.35355338, %v3351_v46  ;;  %v14494_v2 = vpop.f32.mrb[133].mxu1 }
 0x50c   :  { %v3354_v50 = vpop.f32.mrb[134].mxu1 }
 0x50d   :  { %v17916_v34 = vmul.f32 0.35355338, %v3354_v50  ;;  %v14495_v27 = vpop.f32.mrb[135].mxu1  ;;  %v4052_v30 = vsel %vm1549_vm3, %v17910_v9, -inf }
 0x50e   :  { %4050 = vmax.xlane.f32.xlu0 %v4049_v29  ;;  %4053 = vmax.xlane.f32.xlu1 %v4052_v30  ;;  %v4061_v30 = vsel %vm1549_vm3, %v17920_v47, -inf }
 0x50f   :  { %v3504_v28 = vpop.f32.mrb[100].mxu0  ;;  %v4055_v2 = vsel %vm1549_vm3, %v17916_v34, -inf }
 0x510   :  { %v14512_v46 = vpop.f32.mrb[101].mxu0  ;;  %v17930_v55 = vmul.f32 0.35355338, %v3504_v28 }
 0x511   :  { %v3507_v36 = vpop.f32.mrb[102].mxu0 }
 0x512   :  { %4056 = vmax.xlane.f32.xlu0 %v4055_v2  ;;  %4059 = vmax.xlane.f32.xlu1 %v4058_v21  ;;  %v3453_v50 = vpop.f32.mrb[136].mxu1  ;;  %v14513_v27 = vpop.f32.mrb[103].mxu0  ;;  %v17936_v21 = vmul.f32 0.35355338, %v3507_v36  ;;  %v4070_v28 = vsel %vm1549_vm3, %v17930_v55, -inf }
 0x513   :  { %v17926_v23 = vmul.f32 0.35355338, %v3453_v50  ;;  %v14506_v33 = vpop.f32.mrb[137].mxu1 }
 0x514   :  { %v3456_v29 = vpop.f32.mrb[138].mxu1 }
 0x515   :  { %v17932_v46 = vmul.f32 0.35355338, %v3456_v29  ;;  %v14507_v22 = vpop.f32.mrb[139].mxu1  ;;  %v4064_v45 = vsel %vm1549_vm3, %v17926_v23, -inf }
 0x516   :  { %4062 = vmax.xlane.f32.xlu0 %v4061_v30  ;;  %4065 = vmax.xlane.f32.xlu1 %v4064_v45  ;;  %v4073_v45 = vsel %vm1549_vm3, %v17936_v21, -inf }
 0x517   :  { %v3606_v2 = vpop.f32.mrb[104].mxu0  ;;  %v4067_v33 = vsel %vm1549_vm3, %v17932_v46, -inf }
 0x518   :  { %v14524_v50 = vpop.f32.mrb[105].mxu0  ;;  %v17946_v36 = vmul.f32 0.35355338, %v3606_v2 }
 0x519   :  { %v3609_v27 = vpop.f32.mrb[106].mxu0 }
 0x51a   :  { %4068 = vmax.xlane.f32.xlu0 %v4067_v33  ;;  %4071 = vmax.xlane.f32.xlu1 %v4070_v28  ;;  %v3555_v29 = vpop.f32.mrb[140].mxu1  ;;  %v14525_v22 = vpop.f32.mrb[107].mxu0  ;;  %v17952_v28 = vmul.f32 0.35355338, %v3609_v27  ;;  %v4082_v2 = vsel %vm1549_vm3, %v17946_v36, -inf }
 0x51b   :  { %v17942_v7 = vmul.f32 0.35355338, %v3555_v29  ;;  %v14518_v39 = vpop.f32.mrb[141].mxu1 }
 0x51c   :  { %v3558_v30 = vpop.f32.mrb[142].mxu1 }
 0x51d   :  { %v17948_v50 = vmul.f32 0.35355338, %v3558_v30  ;;  %v14519_v8 = vpop.f32.mrb[143].mxu1  ;;  %v4076_v17 = vsel %vm1549_vm3, %v17942_v7, -inf }
 0x51e   :  { %4074 = vmax.xlane.f32.xlu0 %v4073_v45  ;;  %4077 = vmax.xlane.f32.xlu1 %v4076_v17  ;;  %v4085_v17 = vsel %vm1549_vm3, %v17952_v28, -inf }
 0x51f   :  { %v3708_v33 = vpop.f32.mrb[108].mxu0  ;;  %v4079_v39 = vsel %vm1549_vm3, %v17948_v50, -inf }
 0x520   :  { %v14536_v29 = vpop.f32.mrb[109].mxu0  ;;  %v17962_v27 = vmul.f32 0.35355338, %v3708_v33 }
 0x521   :  { %v3711_v22 = vpop.f32.mrb[110].mxu0 }
 0x522   :  { %4080 = vmax.xlane.f32.xlu0 %v4079_v39  ;;  %4083 = vmax.xlane.f32.xlu1 %v4082_v2  ;;  %v3657_v30 = vpop.f32.mrb[144].mxu1  ;;  %v14537_v8 = vpop.f32.mrb[111].mxu0  ;;  %v17968_v2 = vmul.f32 0.35355338, %v3711_v22  ;;  %v4094_v33 = vsel %vm1549_vm3, %v17962_v27, -inf }
 0x523   :  { %v17958_v10 = vmul.f32 0.35355338, %v3657_v30  ;;  %v14530_v58 = vpop.f32.mrb[145].mxu1 }
 0x524   :  { %v3660_v45 = vpop.f32.mrb[146].mxu1 }
 0x525   :  { %v17964_v29 = vmul.f32 0.35355338, %v3660_v45  ;;  %v14531_v63 = vpop.f32.mrb[147].mxu1  ;;  %v4088_v13 = vsel %vm1549_vm3, %v17958_v10, -inf }
 0x526   :  { %4086 = vmax.xlane.f32.xlu0 %v4085_v17  ;;  %4089 = vmax.xlane.f32.xlu1 %v4088_v13  ;;  %v4097_v13 = vsel %vm1549_vm3, %v17968_v2, -inf }
 0x527   :  { %v3810_v39 = vpop.f32.mrb[112].mxu0  ;;  %v4091_v58 = vsel %vm1549_vm3, %v17964_v29, -inf }
 0x528   :  { %v14548_v30 = vpop.f32.mrb[113].mxu0  ;;  %v17978_v22 = vmul.f32 0.35355338, %v3810_v39 }
 0x529   :  { %v3813_v8 = vpop.f32.mrb[114].mxu0 }
 0x52a   :  { %4092 = vmax.xlane.f32.xlu0 %v4091_v58  ;;  %4095 = vmax.xlane.f32.xlu1 %v4094_v33  ;;  %v3759_v45 = vpop.f32.mrb[148].mxu1  ;;  %v14549_v63 = vpop.f32.mrb[115].mxu0  ;;  %v17984_v33 = vmul.f32 0.35355338, %v3813_v8  ;;  %v4106_v39 = vsel %vm1549_vm3, %v17978_v22, -inf }
 0x52b   :  { %v17974_v43 = vmul.f32 0.35355338, %v3759_v45  ;;  %v14542_v51 = vpop.f32.mrb[149].mxu1 }
 0x52c   :  { %v3762_v17 = vpop.f32.mrb[150].mxu1 }
 0x52d   :  { %v17980_v30 = vmul.f32 0.35355338, %v3762_v17  ;;  %v14543_v1 = vpop.f32.mrb[151].mxu1  ;;  %v4100_v38 = vsel %vm1549_vm3, %v17974_v43, -inf }
 0x52e   :  { %4098 = vmax.xlane.f32.xlu0 %v4097_v13  ;;  %4101 = vmax.xlane.f32.xlu1 %v4100_v38  ;;  %v4109_v38 = vsel %vm1549_vm3, %v17984_v33, -inf }
 0x52f   :  { %v3912_v58 = vpop.f32.mrb[116].mxu0  ;;  %v4103_v51 = vsel %vm1549_vm3, %v17980_v30, -inf }
 0x530   :  { %v14560_v45 = vpop.f32.mrb[117].mxu0  ;;  %v17994_v8 = vmul.f32 0.35355338, %v3912_v58 }
 0x531   :  { %v3915_v63 = vpop.f32.mrb[118].mxu0 }
 0x532   :  { %4104 = vmax.xlane.f32.xlu0 %v4103_v51  ;;  %4107 = vmax.xlane.f32.xlu1 %v4106_v39  ;;  %v3861_v17 = vpop.f32.mrb[152].mxu1  ;;  %v14561_v1 = vpop.f32.mrb[119].mxu0  ;;  %v18000_v51 = vmul.f32 0.35355338, %v3915_v63 }
 0x533   :  { %v17990_v19 = vmul.f32 0.35355338, %v3861_v17  ;;  %v14554_v4 = vpop.f32.mrb[153].mxu1 }
 0x534   :  { %v3864_v13 = vpop.f32.mrb[154].mxu1  ;;  %v4118_v4 = vsel %vm1549_vm3, %v17994_v8, -inf  ;;  %v4121_v63 = vsel %vm1549_vm3, %v18000_v51, -inf }
 0x535   :  { %v17996_v45 = vmul.f32 0.35355338, %v3864_v13  ;;  %v14555_v11 = vpop.f32.mrb[155].mxu1  ;;  %v4112_v24 = vsel %vm1549_vm3, %v17990_v19, -inf }
 0x536   :  { %4110 = vmax.xlane.f32.xlu0 %v4109_v38  ;;  %4113 = vmax.xlane.f32.xlu1 %v4112_v24 }
 0x537   :  { %v4115_v39 = vsel %vm1549_vm3, %v17996_v45, -inf }
 0x53a   :  { %4116 = vmax.xlane.f32.xlu0 %v4115_v39  ;;  %v3963_v17 = vpop.f32.mrb[156].mxu1  ;;  %4119 = vmax.xlane.f32.xlu1 %v4118_v4  ;;  %v18016_v39 = vpop.permute.xlu1 %4564 }
 0x53b   :  { %v18006_v58 = vmul.f32 0.35355338, %v3963_v17  ;;  %v14566_v1 = vpop.f32.mrb[157].mxu1  ;;  %22566 = vst [vmem:[#allocation55_spill] sm:$0xff] %v18016_v39 }
 0x53c   :  { %v3966_v11 = vpop.f32.mrb[158].mxu1 }
 0x53d   :  { %v18008_v13 = vmul.f32 0.35355338, %v3966_v11  ;;  %v14567_v12 = vpop.f32.mrb[159].mxu1  ;;  %v4124_v24 = vsel %vm1549_vm3, %v18006_v58, -inf }
 0x53e   :  { %4125 = vmax.xlane.f32.xlu1 %v4124_v24  ;;  %4122 = vmax.xlane.f32.xlu0 %v4121_v63  ;;  %v18018_v4 = vpop.permute.xlu1 %4658  ;;  %v18022_v12 = vpop.permute.xlu0 %4611 }
 0x53f   :  { %v4127_v38 = vsel %vm1549_vm3, %v18008_v13, -inf  ;;  %22567 = vst [vmem:[#allocation56_spill] sm:$0xff] %v18018_v4  ;;  %22568 = vst [vmem:[#allocation57_spill] sm:$0xff] %v18022_v12 }
 0x542   :  { %4128 = vmax.xlane.f32.xlu0 %v4127_v38  ;;  %v18024_v17 = vpop.permute.xlu1 %4752  ;;  %v18026_v1 = vpop.permute.xlu0 %4705 }
 0x543   :  { %22569 = vst [vmem:[#allocation58_spill] sm:$0xff] %v18024_v17  ;;  %22570 = vst [vmem:[#allocation59_spill] sm:$0xff] %v18026_v1 }
 0x546   :  { %v18028_v11 = vpop.permute.xlu1 %4846  ;;  %v18032_v24 = vpop.permute.xlu0 %4799 }
 0x547   :  { %22571 = vst [vmem:[#allocation60_spill] sm:$0xff] %v18028_v11  ;;  %22572 = vst [vmem:[#allocation61_spill] sm:$0xff] %v18032_v24 }
 0x54a   :  { %v18034_v63 = vpop.permute.xlu1 %4940  ;;  %v18036_v38 = vpop.permute.xlu0 %4893 }
 0x54b   :  { %22573 = vst [vmem:[#allocation62_spill] sm:$0xff] %v18034_v63  ;;  %22574 = vst [vmem:[#allocation63_spill] sm:$0xff] %v18036_v38 }
 0x54e   :  { %v18038_v4 = vpop.permute.xlu1 %5034 }
 0x54f   :  { %5363 = vrot.lane.b32.xlu1 %v16786_v3, %s16541_s30  ;;  %22575 = vst [vmem:[#allocation64_spill] sm:$0xff] %v18038_v4  ;;  %v18040_v3 = vpop.permute.xlu0 %4987 }
 0x550   :  { %22576 = vst [vmem:[#allocation65_spill] sm:$0xff] %v18040_v3 }
 0x552   :  { %v18042_v12 = vpop.permute.xlu1 %5128 }
 0x553   :  { %22577 = vst [vmem:[#allocation66_spill] sm:$0xff] %v18042_v12  ;;  %v18044_v17 = vpop.permute.xlu0 %5081 }
 0x554   :  { %22578 = vst [vmem:[#allocation67_spill] sm:$0xff] %v18044_v17 }
 0x556   :  { %v18046_v1 = vpop.permute.xlu1 %5175 }
 0x557   :  { %22579 = vst [vmem:[#allocation68_spill] sm:$0xff] %v18046_v1  ;;  %v18048_v11 = vpop.permute.xlu0 %5222 }
 0x558   :  { %5316 = vrot.lane.b32.xlu0 %v16790_v5, %s16541_s30  ;;  %22580 = vst [vmem:[#allocation69_spill] sm:$0xff] %v18048_v11 }
 0x55a   :  { %v18050_v39 = vpop.permute.xlu1 %5269 }
 0x55b   :  { %22581 = vst [vmem:[#allocation70_spill] sm:$0xff] %v18050_v39 }
 0x578   :  { %v4012_v5 = vpop.xlane.xlu0 %4011 }
 0x579   :  { %v4130_v24 = vsub.f32 %v17852_v57, %v4012_v5 }
 0x57a   :  { %v4015_v63 = vpop.xlane.xlu1 %4014 }
 0x57b   :  { %v4170_v26 = vmul.f32 1.442695, %v4130_v24  ;;  %v4131_v38 = vsub.f32 %v17854_v59, %v4015_v63 }
 0x57d   :  { %15851 = vpow2.f32 %v4170_v26  ;;  %v4172_v4 = vmul.f32 1.442695, %v4131_v38 }
 0x57f   :  { %15853 = vpow2.f32 %v4172_v4 }
 0x580   :  { %v4024_v3 = vpop.xlane.xlu1 %4023 }
 0x581   :  { %v4134_v12 = vsub.f32 %v17864_v20, %v4024_v3 }
 0x583   :  { %v4018_v17 = vpop.xlane.xlu0 %4017  ;;  %v4178_v49 = vmul.f32 1.442695, %v4134_v12 }
 0x584   :  { %v4132_v1 = vsub.f32 %v17868_v37, %v4018_v17 }
 0x586   :  { %v4174_v11 = vmul.f32 1.442695, %v4132_v1 }
 0x587   :  { %v18056_v15 = vpop.eup %15851  ;;  %v4021_v39 = vpop.xlane.xlu0 %4020 }
 0x588   :  { %15855 = vpow2.f32 %v4174_v11  ;;  %v4133_v5 = vsub.f32 %v17870_v0, %v4021_v39  ;;  %v4250_v59 = vsel %vm1549_vm3, %v18056_v15, 0.0 }
 0x589   :  { %v18061_v26 = vpop.eup %15853  ;;  %4251 = vadd.xlane.f32.xlu1 %v4250_v59  ;;  %15857 = vpow2.f32 %v4178_v49 }
 0x58a   :  { %v4176_v57 = vmul.f32 1.442695, %v4133_v5  ;;  %v4253_v3 = vsel %vm1549_vm3, %v18061_v26, 0.0 }
 0x58b   :  { %v4030_v37 = vpop.xlane.xlu1 %4029  ;;  %4254 = vadd.xlane.f32.xlu0 %v4253_v3  ;;  %v4027_v20 = vpop.xlane.xlu0 %4026 }
 0x58c   :  { %15859 = vpow2.f32 %v4176_v57  ;;  %v4136_v4 = vsub.f32 %v17878_v53, %v4030_v37  ;;  %v4135_v12 = vsub.f32 %v17874_v31, %v4027_v20 }
 0x58e   :  { %v4182_v0 = vmul.f32 1.442695, %v4136_v4  ;;  %v4180_v39 = vmul.f32 1.442695, %v4135_v12 }
 0x58f   :  { %v4036_v17 = vpop.xlane.xlu1 %4035  ;;  %v4033_v1 = vpop.xlane.xlu0 %4032 }
 0x590   :  { %15861 = vpow2.f32 %v4182_v0  ;;  %v4138_v11 = vsub.f32 %v17882_v48, %v4036_v17  ;;  %v4137_v49 = vsub.f32 %v17884_v52, %v4033_v1 }
 0x591   :  { %15863 = vpow2.f32 %v4180_v39 }
 0x592   :  { %v18069_v24 = vpop.eup %15855  ;;  %v4186_v63 = vmul.f32 1.442695, %v4138_v11  ;;  %v4184_v38 = vmul.f32 1.442695, %v4137_v49 }
 0x593   :  { %v4042_v5 = vpop.xlane.xlu1 %4041  ;;  %v4039_v59 = vpop.xlane.xlu0 %4038  ;;  %v4256_v53 = vsel %vm1549_vm3, %v18069_v24, 0.0 }
 0x594   :  { %v18073_v31 = vpop.eup %15857  ;;  %15865 = vpow2.f32 %v4186_v63  ;;  %v4140_v57 = vsub.f32 %v17894_v25, %v4042_v5  ;;  %v4139_v3 = vsub.f32 %v17888_v6, %v4039_v59  ;;  %4257 = vadd.xlane.f32.xlu1 %v4256_v53 }
 0x595   :  { %15867 = vpow2.f32 %v4184_v38  ;;  %v4262_v12 = vsel %vm1549_vm3, %v18073_v31, 0.0 }
 0x596   :  { %v18077_v48 = vpop.eup %15859  ;;  %v4190_v52 = vmul.f32 1.442695, %v4140_v57  ;;  %v4188_v37 = vmul.f32 1.442695, %v4139_v3 }
 0x597   :  { %v4048_v20 = vpop.xlane.xlu1 %4047  ;;  %v4045_v4 = vpop.xlane.xlu0 %4044  ;;  %v4259_v0 = vsel %vm1549_vm3, %v18077_v48, 0.0 }
 0x598   :  { %15869 = vpow2.f32 %v4190_v52  ;;  %v4142_v39 = vsub.f32 %v17898_v14, %v4048_v20  ;;  %v4141_v25 = vsub.f32 %v17900_v35, %v4045_v4  ;;  %4263 = vadd.xlane.f32.xlu1 %v4262_v12  ;;  %4260 = vadd.xlane.f32.xlu0 %v4259_v0 }
 0x599   :  { %15871 = vpow2.f32 %v4188_v37 }
 0x59a   :  { %v18085_v6 = vpop.eup %15861  ;;  %v4194_v17 = vmul.f32 1.442695, %v4142_v39  ;;  %v4192_v1 = vmul.f32 1.442695, %v4141_v25 }
 0x59b   :  { %v18087_v11 = vpop.eup %15863  ;;  %v4054_v49 = vpop.xlane.xlu1 %4053  ;;  %v4268_v38 = vsel %vm1549_vm3, %v18085_v6, 0.0 }
 0x59c   :  { %v4051_v63 = vpop.xlane.xlu0 %4050  ;;  %15873 = vpow2.f32 %v4194_v17  ;;  %v4144_v5 = vsub.f32 %v17910_v9, %v4054_v49  ;;  %4269 = vadd.xlane.f32.xlu1 %v4268_v38  ;;  %v4265_v35 = vsel %vm1549_vm3, %v18087_v11, 0.0 }
 0x59d   :  { %v4143_v14 = vsub.f32 %v17904_v56, %v4051_v63  ;;  %15875 = vpow2.f32 %v4192_v1  ;;  %4266 = vadd.xlane.f32.xlu0 %v4265_v35 }
 0x59e   :  { %v18095_v59 = vpop.eup %15865  ;;  %v4198_v53 = vmul.f32 1.442695, %v4144_v5 }
 0x59f   :  { %v4196_v57 = vmul.f32 1.442695, %v4143_v14  ;;  %v18097_v3 = vpop.eup %15867  ;;  %v4060_v52 = vpop.xlane.xlu1 %4059  ;;  %v4274_v20 = vsel %vm1549_vm3, %v18095_v59, 0.0 }
 0x5a0   :  { %v4057_v37 = vpop.xlane.xlu0 %4056  ;;  %15877 = vpow2.f32 %v4198_v53  ;;  %v4146_v9 = vsub.f32 %v17914_v32, %v4060_v52  ;;  %4275 = vadd.xlane.f32.xlu1 %v4274_v20  ;;  %v4271_v4 = vsel %vm1549_vm3, %v18097_v3, 0.0 }
 0x5a1   :  { %v4145_v56 = vsub.f32 %v17916_v34, %v4057_v37  ;;  %15879 = vpow2.f32 %v4196_v57  ;;  %4272 = vadd.xlane.f32.xlu0 %v4271_v4 }
 0x5a2   :  { %v18105_v12 = vpop.eup %15869  ;;  %v4202_v0 = vmul.f32 1.442695, %v4146_v9 }
 0x5a3   :  { %v4200_v39 = vmul.f32 1.442695, %v4145_v56  ;;  %v18107_v25 = vpop.eup %15871  ;;  %v4066_v17 = vpop.xlane.xlu1 %4065  ;;  %v4280_v49 = vsel %vm1549_vm3, %v18105_v12, 0.0 }
 0x5a4   :  { %v4063_v1 = vpop.xlane.xlu0 %4062  ;;  %15881 = vpow2.f32 %v4202_v0  ;;  %v4148_v32 = vsub.f32 %v17926_v23, %v4066_v17  ;;  %4281 = vadd.xlane.f32.xlu1 %v4280_v49  ;;  %v4277_v63 = vsel %vm1549_vm3, %v18107_v25, 0.0 }
 0x5a5   :  { %v4147_v34 = vsub.f32 %v17920_v47, %v4063_v1  ;;  %15883 = vpow2.f32 %v4200_v39  ;;  %4278 = vadd.xlane.f32.xlu0 %v4277_v63 }
 0x5a6   :  { %v18115_v38 = vpop.eup %15873  ;;  %v4206_v5 = vmul.f32 1.442695, %v4148_v32 }
 0x5a7   :  { %v4204_v14 = vmul.f32 1.442695, %v4147_v34  ;;  %v18117_v35 = vpop.eup %15875  ;;  %v4072_v53 = vpop.xlane.xlu1 %4071  ;;  %v4286_v52 = vsel %vm1549_vm3, %v18115_v38, 0.0 }
 0x5a8   :  { %v4069_v57 = vpop.xlane.xlu0 %4068  ;;  %15885 = vpow2.f32 %v4206_v5  ;;  %v4150_v23 = vsub.f32 %v17930_v55, %v4072_v53  ;;  %4287 = vadd.xlane.f32.xlu1 %v4286_v52  ;;  %v4283_v37 = vsel %vm1549_vm3, %v18117_v35, 0.0 }
 0x5a9   :  { %v4149_v47 = vsub.f32 %v17932_v46, %v4069_v57  ;;  %15887 = vpow2.f32 %v4204_v14  ;;  %4284 = vadd.xlane.f32.xlu0 %v4283_v37 }
 0x5aa   :  { %v18125_v20 = vpop.eup %15877  ;;  %v4210_v9 = vmul.f32 1.442695, %v4150_v23 }
 0x5ab   :  { %v4208_v56 = vmul.f32 1.442695, %v4149_v47  ;;  %v18127_v4 = vpop.eup %15879  ;;  %v4078_v0 = vpop.xlane.xlu1 %4077  ;;  %v4292_v17 = vsel %vm1549_vm3, %v18125_v20, 0.0 }
 0x5ac   :  { %v4075_v39 = vpop.xlane.xlu0 %4074  ;;  %15889 = vpow2.f32 %v4210_v9  ;;  %v4152_v55 = vsub.f32 %v17942_v7, %v4078_v0  ;;  %4293 = vadd.xlane.f32.xlu1 %v4292_v17  ;;  %v4289_v1 = vsel %vm1549_vm3, %v18127_v4, 0.0 }
 0x5ad   :  { %v4151_v46 = vsub.f32 %v17936_v21, %v4075_v39  ;;  %15891 = vpow2.f32 %v4208_v56  ;;  %4290 = vadd.xlane.f32.xlu0 %v4289_v1 }
 0x5ae   :  { %v18135_v49 = vpop.eup %15881  ;;  %v4214_v32 = vmul.f32 1.442695, %v4152_v55 }
 0x5af   :  { %v4212_v34 = vmul.f32 1.442695, %v4151_v46  ;;  %v18137_v63 = vpop.eup %15883  ;;  %v4084_v5 = vpop.xlane.xlu1 %4083  ;;  %v4298_v53 = vsel %vm1549_vm3, %v18135_v49, 0.0 }
 0x5b0   :  { %v4081_v14 = vpop.xlane.xlu0 %4080  ;;  %15893 = vpow2.f32 %v4214_v32  ;;  %v4154_v7 = vsub.f32 %v17946_v36, %v4084_v5  ;;  %4299 = vadd.xlane.f32.xlu1 %v4298_v53  ;;  %v4295_v57 = vsel %vm1549_vm3, %v18137_v63, 0.0 }
 0x5b1   :  { %v4153_v21 = vsub.f32 %v17948_v50, %v4081_v14  ;;  %15895 = vpow2.f32 %v4212_v34  ;;  %4296 = vadd.xlane.f32.xlu0 %v4295_v57 }
 0x5b2   :  { %v18145_v52 = vpop.eup %15885  ;;  %v4218_v23 = vmul.f32 1.442695, %v4154_v7 }
 0x5b3   :  { %v4216_v47 = vmul.f32 1.442695, %v4153_v21  ;;  %v18147_v37 = vpop.eup %15887  ;;  %v4090_v9 = vpop.xlane.xlu1 %4089  ;;  %v4304_v0 = vsel %vm1549_vm3, %v18145_v52, 0.0 }
 0x5b4   :  { %v4087_v56 = vpop.xlane.xlu0 %4086  ;;  %15897 = vpow2.f32 %v4218_v23  ;;  %v4156_v36 = vsub.f32 %v17958_v10, %v4090_v9  ;;  %4305 = vadd.xlane.f32.xlu1 %v4304_v0  ;;  %v4301_v39 = vsel %vm1549_vm3, %v18147_v37, 0.0 }
 0x5b5   :  { %v4155_v50 = vsub.f32 %v17952_v28, %v4087_v56  ;;  %15899 = vpow2.f32 %v4216_v47  ;;  %4302 = vadd.xlane.f32.xlu0 %v4301_v39 }
 0x5b6   :  { %v18155_v17 = vpop.eup %15889  ;;  %v4222_v55 = vmul.f32 1.442695, %v4156_v36 }
 0x5b7   :  { %v4220_v46 = vmul.f32 1.442695, %v4155_v50  ;;  %v18157_v1 = vpop.eup %15891  ;;  %v4096_v32 = vpop.xlane.xlu1 %4095  ;;  %v4310_v5 = vsel %vm1549_vm3, %v18155_v17, 0.0 }
 0x5b8   :  { %v4093_v34 = vpop.xlane.xlu0 %4092  ;;  %15901 = vpow2.f32 %v4222_v55  ;;  %v4158_v10 = vsub.f32 %v17962_v27, %v4096_v32  ;;  %4311 = vadd.xlane.f32.xlu1 %v4310_v5  ;;  %v4307_v14 = vsel %vm1549_vm3, %v18157_v1, 0.0 }
 0x5b9   :  { %v4157_v28 = vsub.f32 %v17964_v29, %v4093_v34  ;;  %15903 = vpow2.f32 %v4220_v46  ;;  %4308 = vadd.xlane.f32.xlu0 %v4307_v14 }
 0x5ba   :  { %v18165_v53 = vpop.eup %15893  ;;  %v4226_v7 = vmul.f32 1.442695, %v4158_v10 }
 0x5bb   :  { %v4224_v21 = vmul.f32 1.442695, %v4157_v28  ;;  %v18167_v57 = vpop.eup %15895  ;;  %v4102_v23 = vpop.xlane.xlu1 %4101  ;;  %v4316_v9 = vsel %vm1549_vm3, %v18165_v53, 0.0 }
 0x5bc   :  { %v4099_v47 = vpop.xlane.xlu0 %4098  ;;  %15905 = vpow2.f32 %v4226_v7  ;;  %v4160_v27 = vsub.f32 %v17974_v43, %v4102_v23  ;;  %4317 = vadd.xlane.f32.xlu1 %v4316_v9  ;;  %v4313_v56 = vsel %vm1549_vm3, %v18167_v57, 0.0 }
 0x5bd   :  { %v4159_v29 = vsub.f32 %v17968_v2, %v4099_v47  ;;  %15907 = vpow2.f32 %v4224_v21  ;;  %4314 = vadd.xlane.f32.xlu0 %v4313_v56 }
 0x5be   :  { %v18175_v0 = vpop.eup %15897  ;;  %v4230_v36 = vmul.f32 1.442695, %v4160_v27 }
 0x5bf   :  { %v4228_v50 = vmul.f32 1.442695, %v4159_v29  ;;  %v18177_v39 = vpop.eup %15899  ;;  %v4108_v55 = vpop.xlane.xlu1 %4107  ;;  %v4322_v32 = vsel %vm1549_vm3, %v18175_v0, 0.0 }
 0x5c0   :  { %v4105_v46 = vpop.xlane.xlu0 %4104  ;;  %15909 = vpow2.f32 %v4230_v36  ;;  %v4162_v43 = vsub.f32 %v17978_v22, %v4108_v55  ;;  %4323 = vadd.xlane.f32.xlu1 %v4322_v32  ;;  %v4319_v34 = vsel %vm1549_vm3, %v18177_v39, 0.0 }
 0x5c1   :  { %v4161_v2 = vsub.f32 %v17980_v30, %v4105_v46  ;;  %15911 = vpow2.f32 %v4228_v50  ;;  %4320 = vadd.xlane.f32.xlu0 %v4319_v34 }
 0x5c2   :  { %v18185_v5 = vpop.eup %15901  ;;  %v4234_v10 = vmul.f32 1.442695, %v4162_v43 }
 0x5c3   :  { %v4232_v28 = vmul.f32 1.442695, %v4161_v2  ;;  %v18187_v14 = vpop.eup %15903  ;;  %v4114_v7 = vpop.xlane.xlu1 %4113  ;;  %v4328_v23 = vsel %vm1549_vm3, %v18185_v5, 0.0 }
 0x5c4   :  { %v4111_v21 = vpop.xlane.xlu0 %4110  ;;  %15913 = vpow2.f32 %v4234_v10  ;;  %v4164_v22 = vsub.f32 %v17990_v19, %v4114_v7  ;;  %4329 = vadd.xlane.f32.xlu1 %v4328_v23  ;;  %v4325_v47 = vsel %vm1549_vm3, %v18187_v14, 0.0 }
 0x5c5   :  { %v4163_v30 = vsub.f32 %v17984_v33, %v4111_v21  ;;  %15915 = vpow2.f32 %v4232_v28  ;;  %4326 = vadd.xlane.f32.xlu0 %v4325_v47 }
 0x5c6   :  { %v18195_v9 = vpop.eup %15905  ;;  %v4238_v27 = vmul.f32 1.442695, %v4164_v22 }
 0x5c7   :  { %v4236_v29 = vmul.f32 1.442695, %v4163_v30  ;;  %v18197_v56 = vpop.eup %15907  ;;  %v4120_v36 = vpop.xlane.xlu1 %4119  ;;  %v4334_v55 = vsel %vm1549_vm3, %v18195_v9, 0.0 }
 0x5c8   :  { %v4117_v50 = vpop.xlane.xlu0 %4116  ;;  %15917 = vpow2.f32 %v4238_v27  ;;  %v4166_v19 = vsub.f32 %v17994_v8, %v4120_v36  ;;  %4335 = vadd.xlane.f32.xlu1 %v4334_v55  ;;  %v4331_v46 = vsel %vm1549_vm3, %v18197_v56, 0.0 }
 0x5c9   :  { %v4165_v33 = vsub.f32 %v17996_v45, %v4117_v50  ;;  %15919 = vpow2.f32 %v4236_v29  ;;  %4332 = vadd.xlane.f32.xlu0 %v4331_v46 }
 0x5ca   :  { %v18205_v32 = vpop.eup %15909  ;;  %v4242_v43 = vmul.f32 1.442695, %v4166_v19 }
 0x5cb   :  { %v4240_v2 = vmul.f32 1.442695, %v4165_v33  ;;  %v18207_v34 = vpop.eup %15911  ;;  %v4126_v10 = vpop.xlane.xlu1 %4125  ;;  %v4340_v7 = vsel %vm1549_vm3, %v18205_v32, 0.0 }
 0x5cc   :  { %v4123_v28 = vpop.xlane.xlu0 %4122  ;;  %15921 = vpow2.f32 %v4242_v43  ;;  %v4168_v8 = vsub.f32 %v18006_v58, %v4126_v10  ;;  %4341 = vadd.xlane.f32.xlu1 %v4340_v7  ;;  %v4337_v21 = vsel %vm1549_vm3, %v18207_v34, 0.0 }
 0x5cd   :  { %v4167_v45 = vsub.f32 %v18000_v51, %v4123_v28  ;;  %15923 = vpow2.f32 %v4240_v2  ;;  %4338 = vadd.xlane.f32.xlu0 %v4337_v21 }
 0x5ce   :  { %v18215_v23 = vpop.eup %15913  ;;  %v4246_v22 = vmul.f32 1.442695, %v4168_v8 }
 0x5cf   :  { %v4244_v30 = vmul.f32 1.442695, %v4167_v45  ;;  %v18217_v47 = vpop.eup %15915  ;;  %v4346_v29 = vsel %vm1549_vm3, %v18215_v23, 0.0 }
 0x5d0   :  { %v4129_v27 = vpop.xlane.xlu0 %4128  ;;  %15925 = vpow2.f32 %v4246_v22  ;;  %4347 = vadd.xlane.f32.xlu1 %v4346_v29  ;;  %v4343_v51 = vsel %vm1549_vm3, %v18217_v47, 0.0  ;;  %v22589_v22 = vld [vmem:[#allocation6_spill] sm:$0xff]  ;;  %v22592_v29 = vld [vmem:[#allocation5_spill] sm:$0xff] }
 0x5d1   :  { %v4169_v58 = vsub.f32 %v18008_v13, %v4129_v27  ;;  %15927 = vpow2.f32 %v4244_v30  ;;  %4344 = vadd.xlane.f32.xlu0 %v4343_v51  ;;  %v18286_v30 = vpop.permute.xlu1 %5363 }
 0x5d2   :  { %v18224_v36 = vpop.eup %15917  ;;  %22590 = vst [vmem:[#allocation78_spill] sm:$0xff] %v18286_v30  ;;  %v22597_v30 = vld [vmem:[#allocation55_spill] sm:$0xff] }
 0x5d3   :  { %22582 = vst [vmem:[#allocation71_spill] sm:$0xff] %v18224_v36  ;;  %v4248_v50 = vmul.f32 1.442695, %v4169_v58  ;;  %v18226_v55 = vpop.eup %15919  ;;  %v4352_v19 = vsel %vm1549_vm3, %v18224_v36, 0.0 }
 0x5d4   :  { %22583 = vst [vmem:[#allocation72_spill] sm:$0xff] %v18226_v55  ;;  %4353 = vadd.xlane.f32.xlu1 %v4352_v19  ;;  %v4349_v33 = vsel %vm1549_vm3, %v18226_v55, 0.0  ;;  %v18290_v27 = vpop.permute.xlu0 %5316  ;;  %v22594_v19 = vld [vmem:[#allocation7_spill] sm:$0xff] }
 0x5d5   :  { %15929 = vpow2.f32 %v4248_v50  ;;  %4350 = vadd.xlane.f32.xlu0 %v4349_v33  ;;  %22591 = vst [vmem:[#allocation79_spill] sm:$0xff] %v18290_v27  ;;  %v22593_v50 = vld [vmem:[#allocation8_spill] sm:$0xff] }
 0x5d6   :  { %v18232_v13 = vpop.eup %15921 }
 0x5d7   :  { %22584 = vst [vmem:[#allocation73_spill] sm:$0xff] %v18232_v13  ;;  %v18234_v46 = vpop.eup %15923  ;;  %v4358_v43 = vsel %vm1549_vm3, %v18232_v13, 0.0 }
 0x5d8   :  { %22585 = vst [vmem:[#allocation74_spill] sm:$0xff] %v18234_v46  ;;  %4359 = vadd.xlane.f32.xlu1 %v4358_v43  ;;  %v4355_v2 = vsel %vm1549_vm3, %v18234_v46, 0.0  ;;  %v22595_v43 = vld [vmem:[#allocation10_spill] sm:$0xff]  ;;  %v22602_v46 = vld [vmem:[#allocation15_spill] sm:$0xff] }
 0x5d9   :  { %4356 = vadd.xlane.f32.xlu0 %v4355_v2 }
 0x5da   :  { %v18240_v10 = vpop.eup %15925 }
 0x5db   :  { %22586 = vst [vmem:[#allocation75_spill] sm:$0xff] %v18240_v10  ;;  %v18242_v28 = vpop.eup %15927  ;;  %v4364_v7 = vsel %vm1549_vm3, %v18240_v10, 0.0 }
 0x5dc   :  { %22587 = vst [vmem:[#allocation76_spill] sm:$0xff] %v18242_v28  ;;  %4365 = vadd.xlane.f32.xlu1 %v4364_v7  ;;  %v4361_v8 = vsel %vm1549_vm3, %v18242_v28, 0.0 }
 0x5dd   :  { %4362 = vadd.xlane.f32.xlu0 %v4361_v8 }
 0x5df   :  { %v18248_v45 = vpop.eup %15929 }
 0x5e0   :  { %22588 = vst [vmem:[#allocation77_spill] sm:$0xff] %v18248_v45  ;;  %v4367_v21 = vsel %vm1549_vm3, %v18248_v45, 0.0 }
 0x5e1   :  { %4368 = vadd.xlane.f32.xlu0 %v4367_v21 }
 0x5ed   :  { %5463 = vrot.lane.b32.xlu1 %v16704_v40, %s16542_s9 }
 0x5f1   :  { %5514 = vrot.lane.b32.xlu1 %v16728_v62, %s16542_s9 }
 0x5f5   :  { %5565 = vrot.lane.b32.xlu1 %v16724_v60, %s16542_s9 }
 0x5f7   :  { %5412 = vrot.lane.b32.xlu0 %v16708_v42, %s16542_s9 }
 0x5f9   :  { %5616 = vrot.lane.b32.xlu1 %v16748_v18, %s16542_s9 }
 0x5fb   :  { %5410 = vrot.lane.b32.xlu0 %v16708_v42, %s16543_s10 }
 0x5fd   :  { %5667 = vrot.lane.b32.xlu1 %v16744_v16, %s16542_s9 }
 0x5ff   :  { %5461 = vrot.lane.b32.xlu0 %v16704_v40, %s16543_s10 }
 0x601   :  { %5718 = vrot.lane.b32.xlu1 %v16768_v44, %s16542_s9 }
 0x603   :  { %5512 = vrot.lane.b32.xlu0 %v16728_v62, %s16543_s10 }
 0x605   :  { %5769 = vrot.lane.b32.xlu1 %v22520_v41, %s16542_s9 }
 0x607   :  { %5563 = vrot.lane.b32.xlu0 %v16724_v60, %s16543_s10 }
 0x609   :  { %5820 = vrot.lane.b32.xlu1 %v22494_v61, %s16542_s9 }
 0x60b   :  { %5614 = vrot.lane.b32.xlu0 %v16748_v18, %s16543_s10 }
 0x60d   :  { %5871 = vrot.lane.b32.xlu1 %v22496_v54, %s16542_s9 }
 0x60f   :  { %5665 = vrot.lane.b32.xlu0 %v16744_v16, %s16543_s10 }
 0x611   :  { %5922 = vrot.lane.b32.xlu1 %v22589_v22, %s16542_s9 }
 0x613   :  { %5716 = vrot.lane.b32.xlu0 %v16768_v44, %s16543_s10 }
 0x615   :  { %5973 = vrot.lane.b32.xlu1 %v22592_v29, %s16542_s9 }
 0x616   :  { %v4252_v58 = vpop.xlane.xlu1 %4251 }
 0x617   :  { %15931 = vrcp.f32 %v4252_v58  ;;  %5767 = vrot.lane.b32.xlu0 %v22520_v41, %s16543_s10  ;;  %v22596_v58 = vld [vmem:[#allocation9_spill] sm:$0xff] }
 0x618   :  { %v4255_v51 = vpop.xlane.xlu0 %4254 }
 0x619   :  { %15933 = vrcp.f32 %v4255_v51  ;;  %6024 = vrot.lane.b32.xlu1 %v22593_v50, %s16542_s9 }
 0x61b   :  { %5818 = vrot.lane.b32.xlu0 %v22494_v61, %s16543_s10 }
 0x61d   :  { %6075 = vrot.lane.b32.xlu1 %v22594_v19, %s16542_s9 }
 0x61f   :  { %5869 = vrot.lane.b32.xlu0 %v22496_v54, %s16543_s10 }
 0x621   :  { %v15932_v33 = vpop.eup %15931  ;;  %6126 = vrot.lane.b32.xlu1 %v22595_v43, %s16542_s9  ;;  %v4258_v2 = vpop.xlane.xlu1 %4257 }
 0x622   :  { %v4410_v8 = vmul.f32 %v15932_v33, %v18056_v15  ;;  %15935 = vrcp.f32 %v4258_v2  ;;  %v22598_v15 = vld [vmem:[#allocation13_spill] sm:$0xff]  ;;  %v22599_v2 = vmov 0.0  }
 0x623   :  { %v15934_v7 = vpop.eup %15933  ;;  %5920 = vrot.lane.b32.xlu0 %v22589_v22, %s16543_s10 }
 0x624   :  { %v4411_v21 = vmul.f32 %v15934_v7, %v18061_v26 }
 0x625   :  { %6177 = vrot.lane.b32.xlu1 %v22596_v58, %s16542_s9  ;;  %v4264_v51 = vpop.xlane.xlu1 %4263  ;;  %v4261_v45 = vpop.xlane.xlu0 %4260 }
 0x626   :  { %v4450_v10 = vpack.c.bf16 %v4411_v21, %v4410_v8  ;;  %15937 = vrcp.f32 %v4261_v45  ;;  %v22601_v21 = vld [vmem:[#allocation17_spill] sm:$0xff] }
 0x627   :  { %5971 = vrot.lane.b32.xlu0 %v22592_v29, %s16543_s10  ;;  %15939 = vrcp.f32 %v4264_v51 }
 0x628   :  { %14571 = vmatmul.mubr.msk.bf16.vlgmr.msra.gmra.mrb[120].mxu0 %vm1549_vm3, %v4450_v10  ;;  %v22600_v10 = vld [vmem:[#allocation12_spill] sm:$0xff] }
 0x629   :  { %14581 = vmatpush3.bf16.msra.mxu0 %v22597_v30  ;;  %6228 = vrot.lane.b32.xlu1 %v22598_v15, %s16542_s9  ;;  %v4270_v26 = vpop.xlane.xlu1 %4269 }
 0x62a   :  { %v4267_v33 = vpop.xlane.xlu0 %4266  ;;  %14582 = vmatprep.mubr.msk.bf16.mxu0 %vm16536_vm1, %v22599_v2  ;;  %14592 = vmatprep.subr.bf16.mxu0 %v22599_v2 }
 0x62b   :  { %15941 = vrcp.f32 %v4267_v33  ;;  %6022 = vrot.lane.b32.xlu0 %v22593_v50, %s16543_s10 }
 0x62c   :  { %15943 = vrcp.f32 %v4270_v26  ;;  %v15936_v7 = vpop.eup %15935 }
 0x62d   :  { %6279 = vrot.lane.b32.xlu1 %v22600_v10, %s16542_s9  ;;  %v4276_v45 = vpop.xlane.xlu1 %4275  ;;  %v4412_v33 = vmul.f32 %v15936_v7, %v18069_v24  ;;  %v22603_v7 = vld [vmem:[#allocation57_spill] sm:$0xff] }
 0x62e   :  { %v4273_v30 = vpop.xlane.xlu0 %4272 }
 0x62f   :  { %15945 = vrcp.f32 %v4273_v30  ;;  %6073 = vrot.lane.b32.xlu0 %v22594_v19, %s16543_s10 }
 0x630   :  { %v15938_v8 = vpop.eup %15937  ;;  %15947 = vrcp.f32 %v4276_v45 }
 0x631   :  { %6330 = vrot.lane.b32.xlu1 %v22601_v21, %s16542_s9  ;;  %v4282_v51 = vpop.xlane.xlu1 %4281  ;;  %v4413_v26 = vmul.f32 %v15938_v8, %v18077_v48  ;;  %v15940_v13 = vpop.eup %15939 }
 0x632   :  { %v4279_v28 = vpop.xlane.xlu0 %4278  ;;  %v4414_v36 = vmul.f32 %v15940_v13, %v18073_v31 }
 0x633   :  { %15949 = vrcp.f32 %v4279_v28  ;;  %6124 = vrot.lane.b32.xlu0 %v22595_v43, %s16543_s10  ;;  %v4451_v30 = vpack.c.bf16 %v4413_v26, %v4412_v33 }
 0x634   :  { %15951 = vrcp.f32 %v4282_v51 }
 0x635   :  { %v15942_v27 = vpop.eup %15941  ;;  %6381 = vrot.lane.b32.xlu1 %v22602_v46, %s16542_s9  ;;  %v4288_v45 = vpop.xlane.xlu1 %4287  ;;  %14577 = vmatmul.mubr.msk.bf16.vlgmr.msra.gmra.mrb[160].mxu1 %vm1549_vm3, %v4451_v30 }
 0x636   :  { %v4415_v55 = vmul.f32 %v15942_v27, %v18087_v11  ;;  %v4285_v24 = vpop.xlane.xlu0 %4284  ;;  %v15944_v48 = vpop.eup %15943  ;;  %14587 = vmatpush3.bf16.msra.mxu1 %v22603_v7  ;;  %14588 = vmatprep.mubr.msk.bf16.mxu1 %vm16536_vm1, %v22599_v2 }
 0x637   :  { %15953 = vrcp.f32 %v4285_v24  ;;  %6175 = vrot.lane.b32.xlu0 %v22596_v58, %s16543_s10  ;;  %14598 = vmatprep.subr.bf16.mxu1 %v22599_v2  ;;  %v4416_v11 = vmul.f32 %v15944_v48, %v18085_v6  ;;  %v22605_v24 = vld [vmem:[#allocation59_spill] sm:$0xff] }
 0x638   :  { %v4452_v28 = vpack.c.bf16 %v4415_v55, %v4414_v36  ;;  %15955 = vrcp.f32 %v4288_v45  ;;  %v22604_v36 = vld [vmem:[#allocation56_spill] sm:$0xff] }
 0x639   :  { %v15946_v8 = vpop.eup %15945  ;;  %6379 = vrot.lane.b32.xlu1 %v22602_v46, %s16543_s10  ;;  %v4294_v31 = vpop.xlane.xlu1 %4293 }
 0x63a   :  { %v4417_v13 = vmul.f32 %v15946_v8, %v18097_v3  ;;  %14583 = vmatmul.mubr.msk.bf16.vlgmr.msra.gmra.mrb[124].mxu0 %vm1549_vm3, %v4452_v28  ;;  %v4291_v27 = vpop.xlane.xlu0 %4290  ;;  %v15948_v51 = vpop.eup %15947 }
 0x63b   :  { %14593 = vmatpush3.bf16.msra.mxu0 %v22604_v36  ;;  %15957 = vrcp.f32 %v4291_v27  ;;  %6226 = vrot.lane.b32.xlu0 %v22598_v15, %s16543_s10  ;;  %v4418_v3 = vmul.f32 %v15948_v51, %v18095_v59 }
 0x63c   :  { %v4453_v55 = vpack.c.bf16 %v4417_v13, %v4416_v11  ;;  %14594 = vmatprep.mubr.msk.bf16.mxu0 %vm16536_vm1, %v22599_v2  ;;  %14604 = vmatprep.subr.bf16.mxu0 %v22599_v2  ;;  %15959 = vrcp.f32 %v4294_v31  ;;  %v22606_v11 = vld [vmem:[#allocation58_spill] sm:$0xff] }
 0x63d   :  { %v15950_v33 = vpop.eup %15949  ;;  %6930 = vrot.lane.b32.xlu1 %v16708_v42, %s16544_s11  ;;  %v4300_v6 = vpop.xlane.xlu1 %4299 }
 0x63e   :  { %v4419_v26 = vmul.f32 %v15950_v33, %v18107_v25  ;;  %14589 = vmatmul.mubr.msk.bf16.vlgmr.msra.gmra.mrb[164].mxu1 %vm1549_vm3, %v4453_v55  ;;  %v4297_v30 = vpop.xlane.xlu0 %4296  ;;  %v15952_v45 = vpop.eup %15951  ;;  %v22607_v33 = vld [vmem:[#allocation61_spill] sm:$0xff] }
 0x63f   :  { %14599 = vmatpush3.bf16.msra.mxu1 %v22605_v24  ;;  %15961 = vrcp.f32 %v4297_v30  ;;  %6277 = vrot.lane.b32.xlu0 %v22600_v10, %s16543_s10  ;;  %v4420_v25 = vmul.f32 %v15952_v45, %v18105_v12  ;;  %v22608_v24 = vld [vmem:[#allocation60_spill] sm:$0xff] }
 0x640   :  { %v4454_v48 = vpack.c.bf16 %v4419_v26, %v4418_v3  ;;  %14600 = vmatprep.mubr.msk.bf16.mxu1 %vm16536_vm1, %v22599_v2  ;;  %14610 = vmatprep.subr.bf16.mxu1 %v22599_v2  ;;  %15963 = vrcp.f32 %v4300_v6 }
 0x641   :  { %v15954_v7 = vpop.eup %15953  ;;  %7024 = vrot.lane.b32.xlu1 %v16728_v62, %s16544_s11  ;;  %v4306_v59 = vpop.xlane.xlu1 %4305 }
 0x642   :  { %v4421_v28 = vmul.f32 %v15954_v7, %v18117_v35  ;;  %14595 = vmatmul.mubr.msk.bf16.vlgmr.msra.gmra.mrb[128].mxu0 %vm1549_vm3, %v4454_v48  ;;  %v4303_v8 = vpop.xlane.xlu0 %4302  ;;  %v15956_v31 = vpop.eup %15955 }
 0x643   :  { %14605 = vmatpush3.bf16.msra.mxu0 %v22606_v11  ;;  %15965 = vrcp.f32 %v4303_v8  ;;  %6328 = vrot.lane.b32.xlu0 %v22601_v21, %s16543_s10  ;;  %v4422_v35 = vmul.f32 %v15956_v31, %v18115_v38  ;;  %v22609_v8 = vld [vmem:[#allocation63_spill] sm:$0xff] }
 0x644   :  { %v4455_v13 = vpack.c.bf16 %v4421_v28, %v4420_v25  ;;  %14606 = vmatprep.mubr.msk.bf16.mxu0 %vm16536_vm1, %v22599_v2  ;;  %14616 = vmatprep.subr.bf16.mxu0 %v22599_v2  ;;  %15967 = vrcp.f32 %v4306_v59 }
 0x645   :  { %v15958_v27 = vpop.eup %15957  ;;  %7118 = vrot.lane.b32.xlu1 %v16748_v18, %s16544_s11  ;;  %v4312_v12 = vpop.xlane.xlu1 %4311 }
 0x646   :  { %v4423_v51 = vmul.f32 %v15958_v27, %v18127_v4  ;;  %14601 = vmatmul.mubr.msk.bf16.vlgmr.msra.gmra.mrb[168].mxu1 %vm1549_vm3, %v4455_v13  ;;  %v4309_v36 = vpop.xlane.xlu0 %4308  ;;  %v15960_v55 = vpop.eup %15959 }
 0x647   :  { %14611 = vmatpush3.bf16.msra.mxu1 %v22607_v33  ;;  %15969 = vrcp.f32 %v4309_v36  ;;  %6977 = vrot.lane.b32.xlu0 %v16704_v40, %s16544_s11  ;;  %v4424_v4 = vmul.f32 %v15960_v55, %v18125_v20 }
 0x648   :  { %v4456_v6 = vpack.c.bf16 %v4423_v51, %v4422_v35  ;;  %14612 = vmatprep.mubr.msk.bf16.mxu1 %vm16536_vm1, %v22599_v2  ;;  %14622 = vmatprep.subr.bf16.mxu1 %v22599_v2  ;;  %15971 = vrcp.f32 %v4312_v12  ;;  %v22610_v35 = vld [vmem:[#allocation62_spill] sm:$0xff] }
 0x649   :  { %v15962_v3 = vpop.eup %15961  ;;  %7212 = vrot.lane.b32.xlu1 %v16768_v44, %s16544_s11  ;;  %v4318_v38 = vpop.xlane.xlu1 %4317 }
 0x64a   :  { %v4425_v26 = vmul.f32 %v15962_v3, %v18137_v63  ;;  %14607 = vmatmul.mubr.msk.bf16.vlgmr.msra.gmra.mrb[132].mxu0 %vm1549_vm3, %v4456_v6  ;;  %v4315_v30 = vpop.xlane.xlu0 %4314  ;;  %v15964_v45 = vpop.eup %15963  ;;  %v22611_v3 = vld [vmem:[#allocation65_spill] sm:$0xff] }
 0x64b   :  { %14617 = vmatpush3.bf16.msra.mxu0 %v22608_v24  ;;  %15973 = vrcp.f32 %v4315_v30  ;;  %7071 = vrot.lane.b32.xlu0 %v16724_v60, %s16544_s11  ;;  %v4426_v63 = vmul.f32 %v15964_v45, %v18135_v49  ;;  %v22612_v24 = vld [vmem:[#allocation64_spill] sm:$0xff] }
 0x64c   :  { %v4457_v48 = vpack.c.bf16 %v4425_v26, %v4424_v4  ;;  %14618 = vmatprep.mubr.msk.bf16.mxu0 %vm16536_vm1, %v22599_v2  ;;  %14628 = vmatprep.subr.bf16.mxu0 %v22599_v2  ;;  %15975 = vrcp.f32 %v4318_v38 }
 0x64d   :  { %v15966_v7 = vpop.eup %15965  ;;  %7306 = vrot.lane.b32.xlu1 %v22494_v61, %s16544_s11  ;;  %v4324_v20 = vpop.xlane.xlu1 %4323 }
 0x64e   :  { %v4427_v59 = vmul.f32 %v15966_v7, %v18147_v37  ;;  %14613 = vmatmul.mubr.msk.bf16.vlgmr.msra.gmra.mrb[172].mxu1 %vm1549_vm3, %v4457_v48  ;;  %v4321_v25 = vpop.xlane.xlu0 %4320  ;;  %v15968_v28 = vpop.eup %15967 }
 0x64f   :  { %14623 = vmatpush3.bf16.msra.mxu1 %v22609_v8  ;;  %15977 = vrcp.f32 %v4321_v25  ;;  %7165 = vrot.lane.b32.xlu0 %v16744_v16, %s16544_s11  ;;  %v4428_v37 = vmul.f32 %v15968_v28, %v18145_v52  ;;  %v22613_v25 = vld [vmem:[#allocation67_spill] sm:$0xff] }
 0x650   :  { %v4458_v31 = vpack.c.bf16 %v4427_v59, %v4426_v63  ;;  %14624 = vmatprep.mubr.msk.bf16.mxu1 %vm16536_vm1, %v22599_v2  ;;  %14634 = vmatprep.subr.bf16.mxu1 %v22599_v2  ;;  %15979 = vrcp.f32 %v4324_v20 }
 0x651   :  { %v15970_v11 = vpop.eup %15969  ;;  %7400 = vrot.lane.b32.xlu1 %v22589_v22, %s16544_s11  ;;  %v4330_v49 = vpop.xlane.xlu1 %4329 }
 0x652   :  { %v4429_v13 = vmul.f32 %v15970_v11, %v18157_v1  ;;  %14619 = vmatmul.mubr.msk.bf16.vlgmr.msra.gmra.mrb[136].mxu0 %vm1549_vm3, %v4458_v31  ;;  %v4327_v27 = vpop.xlane.xlu0 %4326  ;;  %v15972_v12 = vpop.eup %15971 }
 0x653   :  { %14629 = vmatpush3.bf16.msra.mxu0 %v22610_v35  ;;  %15981 = vrcp.f32 %v4327_v27  ;;  %7259 = vrot.lane.b32.xlu0 %v22520_v41, %s16544_s11  ;;  %v4430_v1 = vmul.f32 %v15972_v12, %v18155_v17 }
 0x654   :  { %v4459_v51 = vpack.c.bf16 %v4429_v13, %v4428_v37  ;;  %14630 = vmatprep.mubr.msk.bf16.mxu0 %vm16536_vm1, %v22599_v2  ;;  %14640 = vmatprep.subr.bf16.mxu0 %v22599_v2  ;;  %15983 = vrcp.f32 %v4330_v49  ;;  %v22614_v37 = vld [vmem:[#allocation66_spill] sm:$0xff] }
 0x655   :  { %v15974_v36 = vpop.eup %15973  ;;  %7494 = vrot.lane.b32.xlu1 %v22593_v50, %s16544_s11  ;;  %v4336_v52 = vpop.xlane.xlu1 %4335 }
 0x656   :  { %v4431_v55 = vmul.f32 %v15974_v36, %v18167_v57  ;;  %14625 = vmatmul.mubr.msk.bf16.vlgmr.msra.gmra.mrb[176].mxu1 %vm1549_vm3, %v4459_v51  ;;  %v4333_v33 = vpop.xlane.xlu0 %4332  ;;  %v15976_v6 = vpop.eup %15975  ;;  %v22615_v36 = vld [vmem:[#allocation68_spill] sm:$0xff] }
 0x657   :  { %14635 = vmatpush3.bf16.msra.mxu1 %v22611_v3  ;;  %15985 = vrcp.f32 %v4333_v33  ;;  %7353 = vrot.lane.b32.xlu0 %v22496_v54, %s16544_s11  ;;  %v4432_v57 = vmul.f32 %v15976_v6, %v18165_v53  ;;  %v22616_v3 = vld [vmem:[#allocation69_spill] sm:$0xff] }
 0x658   :  { %v4460_v38 = vpack.c.bf16 %v4431_v55, %v4430_v1  ;;  %14636 = vmatprep.mubr.msk.bf16.mxu1 %vm16536_vm1, %v22599_v2  ;;  %14646 = vmatprep.subr.bf16.mxu1 %v22599_v2  ;;  %15987 = vrcp.f32 %v4336_v52 }
 0x659   :  { %v15978_v4 = vpop.eup %15977  ;;  %7588 = vrot.lane.b32.xlu1 %v22595_v43, %s16544_s11  ;;  %v4342_v17 = vpop.xlane.xlu1 %4341 }
 0x65a   :  { %v4433_v26 = vmul.f32 %v15978_v4, %v18177_v39  ;;  %14631 = vmatmul.mubr.msk.bf16.vlgmr.msra.gmra.mrb[140].mxu0 %vm1549_vm3, %v4460_v38  ;;  %v4339_v30 = vpop.xlane.xlu0 %4338  ;;  %v15980_v45 = vpop.eup %15979 }
 0x65b   :  { %14641 = vmatpush3.bf16.msra.mxu0 %v22612_v24  ;;  %15989 = vrcp.f32 %v4339_v30  ;;  %7447 = vrot.lane.b32.xlu0 %v22592_v29, %s16544_s11  ;;  %v4434_v39 = vmul.f32 %v15980_v45, %v18175_v0  ;;  %v22618_v45 = vld [vmem:[#allocation70_spill] sm:$0xff] }
 0x65c   :  { %v4461_v48 = vpack.c.bf16 %v4433_v26, %v4432_v57  ;;  %14642 = vmatprep.mubr.msk.bf16.mxu0 %vm16536_vm1, %v22599_v2  ;;  %14652 = vmatprep.subr.bf16.mxu0 %v22599_v2  ;;  %15991 = vrcp.f32 %v4342_v17  ;;  %v22617_v57 = vld [vmem:[#allocation72_spill] sm:$0xff] }
 0x65d   :  { %v15982_v7 = vpop.eup %15981  ;;  %7635 = vrot.lane.b32.xlu1 %v22596_v58, %s16544_s11  ;;  %v4348_v53 = vpop.xlane.xlu1 %4347 }
 0x65e   :  { %v4435_v20 = vmul.f32 %v15982_v7, %v18187_v14  ;;  %14637 = vmatmul.mubr.msk.bf16.vlgmr.msra.gmra.mrb[180].mxu1 %vm1549_vm3, %v4461_v48  ;;  %v4345_v63 = vpop.xlane.xlu0 %4344  ;;  %v15984_v59 = vpop.eup %15983 }
 0x65f   :  { %14647 = vmatpush3.bf16.msra.mxu1 %v22613_v25  ;;  %15993 = vrcp.f32 %v4345_v63  ;;  %7541 = vrot.lane.b32.xlu0 %v22594_v19, %s16544_s11  ;;  %v4436_v14 = vmul.f32 %v15984_v59, %v18185_v5  ;;  %v22621_v25 = vld [vmem:[#allocation79_spill] sm:$0xff] }
 0x660   :  { %v4462_v28 = vpack.c.bf16 %v4435_v20, %v4434_v39  ;;  %14648 = vmatprep.mubr.msk.bf16.mxu1 %vm16536_vm1, %v22599_v2  ;;  %14658 = vmatprep.subr.bf16.mxu1 %v22599_v2  ;;  %15995 = vrcp.f32 %v4348_v53  ;;  %v22619_v53 = vld [vmem:[#allocation71_spill] sm:$0xff] }
 0x661   :  { %v15986_v8 = vpop.eup %15985  ;;  %7729 = vrot.lane.b32.xlu1 %v22600_v10, %s16544_s11  ;;  %v4354_v0 = vpop.xlane.xlu1 %4353 }
 0x662   :  { %v4437_v31 = vmul.f32 %v15986_v8, %v18197_v56  ;;  %14643 = vmatmul.mubr.msk.bf16.vlgmr.msra.gmra.mrb[144].mxu0 %vm1549_vm3, %v4462_v28  ;;  %v4351_v11 = vpop.xlane.xlu0 %4350  ;;  %v15988_v49 = vpop.eup %15987 }
 0x663   :  { %14653 = vmatpush3.bf16.msra.mxu0 %v22614_v37  ;;  %15997 = vrcp.f32 %v4351_v11  ;;  %7682 = vrot.lane.b32.xlu0 %v22598_v15, %s16544_s11  ;;  %v4438_v56 = vmul.f32 %v15988_v49, %v18195_v9  ;;  %v22623_v11 = vld [vmem:[#allocation76_spill] sm:$0xff] }
 0x664   :  { %v4463_v13 = vpack.c.bf16 %v4437_v31, %v4436_v14  ;;  %14654 = vmatprep.mubr.msk.bf16.mxu0 %vm16536_vm1, %v22599_v2  ;;  %14664 = vmatprep.subr.bf16.mxu0 %v22599_v2  ;;  %15999 = vrcp.f32 %v4354_v0  ;;  %v22622_v14 = vld [vmem:[#allocation73_spill] sm:$0xff] }
 0x665   :  { %v15990_v27 = vpop.eup %15989  ;;  %v4360_v5 = vpop.xlane.xlu1 %4359 }
 0x666   :  { %v4439_v12 = vmul.f32 %v15990_v27, %v18207_v34  ;;  %14649 = vmatmul.mubr.msk.bf16.vlgmr.msra.gmra.mrb[184].mxu1 %vm1549_vm3, %v4463_v13  ;;  %v4357_v35 = vpop.xlane.xlu0 %4356  ;;  %v15992_v51 = vpop.eup %15991  ;;  %v22624_v27 = vld [vmem:[#allocation78_spill] sm:$0xff] }
 0x667   :  { %14659 = vmatpush3.bf16.msra.mxu1 %v22615_v36  ;;  %16001 = vrcp.f32 %v4357_v35  ;;  %14660 = vmatprep.mubr.msk.bf16.mxu1 %vm16536_vm1, %v22599_v2  ;;  %v4440_v9 = vmul.f32 %v15992_v51, %v18205_v32  ;;  %v22625_v35 = vld [vmem:[#allocation75_spill] sm:$0xff]  ;;  %v22626_v36 = vld [vmem:[#allocation77_spill] sm:$0xff] }
 0x668   :  { %v4464_v52 = vpack.c.bf16 %v4439_v12, %v4438_v56  ;;  %14670 = vmatprep.subr.bf16.mxu1 %v22599_v2  ;;  %16003 = vrcp.f32 %v4360_v5 }
 0x669   :  { %v15994_v1 = vpop.eup %15993  ;;  %v4366_v55 = vpop.xlane.xlu1 %4365 }
 0x66a   :  { %v4441_v34 = vmul.f32 %v15994_v1, %v18217_v47  ;;  %14655 = vmatmul.mubr.msk.bf16.vlgmr.msra.gmra.mrb[148].mxu0 %vm1549_vm3, %v4464_v52  ;;  %v4363_v33 = vpop.xlane.xlu0 %4362  ;;  %v15996_v6 = vpop.eup %15995 }
 0x66b   :  { %14665 = vmatpush3.bf16.msra.mxu0 %v22616_v3  ;;  %16005 = vrcp.f32 %v4363_v33  ;;  %14666 = vmatprep.mubr.msk.bf16.mxu0 %vm16536_vm1, %v22599_v2  ;;  %v4442_v32 = vmul.f32 %v15996_v6, %v18215_v23  ;;  %v22620_v23 = vld [vmem:[#allocation74_spill] sm:$0xff] }
 0x66c   :  { %v4465_v38 = vpack.c.bf16 %v4441_v34, %v4440_v9  ;;  %14676 = vmatprep.subr.bf16.mxu0 %v22599_v2  ;;  %16007 = vrcp.f32 %v4366_v55 }
 0x66d   :  { %v15998_v4 = vpop.eup %15997  ;;  %v5464_v17 = vpop.permute.xlu1 %5463 }
 0x66e   :  { %v4443_v47 = vmul.f32 %v15998_v4, %v22617_v57  ;;  %14661 = vmatmul.mubr.msk.bf16.vlgmr.msra.gmra.mrb[188].mxu1 %vm1549_vm3, %v4465_v38  ;;  %v4369_v26 = vpop.xlane.xlu0 %4368  ;;  %v16000_v30 = vpop.eup %15999  ;;  %v5469_v6 = vsel %vm511_vm2, %v5464_v17, 0 }
 0x66f   :  { %14671 = vmatpush3.bf16.msra.mxu1 %v22618_v45  ;;  %16009 = vrcp.f32 %v4369_v26  ;;  %14672 = vmatprep.mubr.msk.bf16.mxu1 %vm16536_vm1, %v22599_v2  ;;  %v4444_v39 = vmul.f32 %v16000_v30, %v22619_v53 }
 0x670   :  { %v4466_v24 = vpack.c.bf16 %v4443_v47, %v4442_v32  ;;  %14682 = vmatprep.subr.bf16.mxu1 %v22599_v2 }
 0x671   :  { %v16002_v48 = vpop.eup %16001  ;;  %v5515_v7 = vpop.permute.xlu1 %5514 }
 0x672   :  { %v4445_v20 = vmul.f32 %v16002_v48, %v22620_v23  ;;  %14667 = vmatmul.mubr.msk.bf16.vlgmr.msra.gmra.mrb[152].mxu0 %vm1549_vm3, %v4466_v24  ;;  %v5413_v63 = vpop.permute.xlu0 %5412  ;;  %v16004_v59 = vpop.eup %16003  ;;  %v5520_v4 = vsel %vm511_vm2, %v5515_v7, 0 }
 0x673   :  { %14677 = vmatpush3.bf16.msra.mxu0 %v22621_v25  ;;  %14678 = vmatprep.mubr.msk.bf16.mxu0 %vm16536_vm1, %v22599_v2  ;;  %v4446_v31 = vmul.f32 %v16004_v59, %v22622_v14  ;;  %v5418_v55 = vsel %vm511_vm2, %v5413_v63, 0 }
 0x674   :  { %v4467_v28 = vpack.c.bf16 %v4445_v20, %v4444_v39  ;;  %14688 = vmatprep.subr.bf16.mxu0 %v22599_v2 }
 0x675   :  { %v16006_v8 = vpop.eup %16005  ;;  %v5566_v0 = vpop.permute.xlu1 %5565 }
 0x676   :  { %v4447_v49 = vmul.f32 %v16006_v8, %v22623_v11  ;;  %14673 = vmatmul.mubr.msk.bf16.vlgmr.msra.gmra.mrb[192].mxu1 %vm1549_vm3, %v4467_v28  ;;  %v5411_v37 = vpop.permute.xlu0 %5410  ;;  %v16008_v13 = vpop.eup %16007  ;;  %v5571_v57 = vsel %vm511_vm2, %v5566_v0, 0 }
 0x677   :  { %14683 = vmatpush3.bf16.msra.mxu1 %v22624_v27  ;;  %14684 = vmatprep.mubr.msk.bf16.mxu1 %vm16536_vm1, %v22599_v2  ;;  %v4448_v51 = vmul.f32 %v16008_v13, %v22625_v35 }
 0x678   :  { %v4468_v5 = vpack.c.bf16 %v4447_v49, %v4446_v31  ;;  %14694 = vmatprep.subr.bf16.mxu1 %v22599_v2 }
 0x679   :  { %v16010_v56 = vpop.eup %16009  ;;  %v5617_v12 = vpop.permute.xlu1 %5616 }
 0x67a   :  { %v4449_v52 = vmul.f32 %v16010_v56, %v22626_v36  ;;  %14679 = vmatmul.mubr.msk.bf16.vlgmr.msra.gmra.mrb[156].mxu0 %vm1549_vm3, %v4468_v5  ;;  %v5462_v1 = vpop.permute.xlu0 %5461  ;;  %v5622_v30 = vsel %vm511_vm2, %v5617_v12, 0 }
 0x67b   :  { %14690 = vmatprep.mubr.msk.bf16.mxu0 %vm16536_vm1, %v22599_v2 }
 0x67c   :  { %14689 = vmatpush3.bf16.xpose.msra.mxu0 %v5418_v55  ;;  %v4469_v9 = vpack.c.bf16 %v4449_v52, %v4448_v51 }
 0x67d   :  { %v5668_v34 = vpop.permute.xlu1 %5667  ;;  %14700 = vmatprep.subr.bf16.mxu0 %v22599_v2 }
 0x67e   :  { %14685 = vmatmul.mubr.msk.bf16.vlgmr.msra.gmra.mrb[196].mxu1 %vm1549_vm3, %v4469_v9  ;;  %v5513_v33 = vpop.permute.xlu0 %5512  ;;  %v5673_v48 = vsel %vm511_vm2, %v5668_v34, 0 }
 0x67f   :  { %14696 = vmatprep.mubr.msk.bf16.mxu1 %vm16536_vm1, %v22599_v2 }
 0x680   :  { %14695 = vmatpush3.bf16.xpose.msra.mxu1 %v5469_v6 }
 0x681   :  { %v5719_v3 = vpop.permute.xlu1 %5718  ;;  %14706 = vmatprep.subr.bf16.mxu1 %v22599_v2 }
 0x682   :  { %v5564_v38 = vpop.permute.xlu0 %5563  ;;  %v5724_v39 = vsel %vm511_vm2, %v5719_v3, 0 }
 0x683   :  { %14691 = vmatmul.mubr.msk.bf16.vlgmr.msra.gmra.mrb[160].mxu0 %vm511_vm2, %v5411_v37 }
 0x684   :  { %14701 = vmatpush3.bf16.xpose.msra.mxu0 %v5520_v4  ;;  %14702 = vmatprep.mubr.msk.bf16.mxu0 %vm16536_vm1, %v22599_v2 }
 0x685   :  { %v5770_v32 = vpop.permute.xlu1 %5769  ;;  %14712 = vmatprep.subr.bf16.mxu0 %v22599_v2 }
 0x686   :  { %v5615_v17 = vpop.permute.xlu0 %5614  ;;  %v5775_v63 = vsel %vm511_vm2, %v5770_v32, 0 }
 0x687   :  { %14697 = vmatmul.mubr.msk.bf16.vlgmr.msra.gmra.mrb[200].mxu1 %vm511_vm2, %v5462_v1 }
 0x688   :  { %14707 = vmatpush3.bf16.xpose.msra.mxu1 %v5571_v57  ;;  %14708 = vmatprep.mubr.msk.bf16.mxu1 %vm16536_vm1, %v22599_v2 }
 0x689   :  { %v5821_v47 = vpop.permute.xlu1 %5820  ;;  %14718 = vmatprep.subr.bf16.mxu1 %v22599_v2 }
 0x68a   :  { %v5666_v26 = vpop.permute.xlu0 %5665  ;;  %v5826_v28 = vsel %vm511_vm2, %v5821_v47, 0 }
 0x68b   :  { %14703 = vmatmul.mubr.msk.bf16.vlgmr.msra.gmra.mrb[164].mxu0 %vm511_vm2, %v5513_v33 }
 0x68c   :  { %14713 = vmatpush3.bf16.xpose.msra.mxu0 %v5622_v30  ;;  %14714 = vmatprep.mubr.msk.bf16.mxu0 %vm16536_vm1, %v22599_v2 }
 0x68d   :  { %v5872_v45 = vpop.permute.xlu1 %5871  ;;  %14724 = vmatprep.subr.bf16.mxu0 %v22599_v2 }
 0x68e   :  { %v5717_v24 = vpop.permute.xlu0 %5716  ;;  %v5877_v14 = vsel %vm511_vm2, %v5872_v45, 0 }
 0x68f   :  { %14709 = vmatmul.mubr.msk.bf16.vlgmr.msra.gmra.mrb[204].mxu1 %vm511_vm2, %v5564_v38 }
 0x690   :  { %14719 = vmatpush3.bf16.xpose.msra.mxu1 %v5673_v48  ;;  %14720 = vmatprep.mubr.msk.bf16.mxu1 %vm16536_vm1, %v22599_v2 }
 0x691   :  { %v5923_v7 = vpop.permute.xlu1 %5922  ;;  %14730 = vmatprep.subr.bf16.mxu1 %v22599_v2 }
 0x692   :  { %v5768_v53 = vpop.permute.xlu0 %5767  ;;  %v5928_v49 = vsel %vm511_vm2, %v5923_v7, 0 }
 0x693   :  { %14715 = vmatmul.mubr.msk.bf16.vlgmr.msra.gmra.mrb[168].mxu0 %vm511_vm2, %v5615_v17 }
 0x694   :  { %14725 = vmatpush3.bf16.xpose.msra.mxu0 %v5724_v39  ;;  %14726 = vmatprep.mubr.msk.bf16.mxu0 %vm16536_vm1, %v22599_v2 }
 0x695   :  { %v5974_v23 = vpop.permute.xlu1 %5973  ;;  %14736 = vmatprep.subr.bf16.mxu0 %v22599_v2 }
 0x696   :  { %v5819_v20 = vpop.permute.xlu0 %5818  ;;  %v5979_v13 = vsel %vm511_vm2, %v5974_v23, 0 }
 0x697   :  { %14721 = vmatmul.mubr.msk.bf16.vlgmr.msra.gmra.mrb[208].mxu1 %vm511_vm2, %v5666_v26 }
 0x698   :  { %14731 = vmatpush3.bf16.xpose.msra.mxu1 %v5775_v63  ;;  %14732 = vmatprep.mubr.msk.bf16.mxu1 %vm16536_vm1, %v22599_v2 }
 0x699   :  { %v6025_v59 = vpop.permute.xlu1 %6024  ;;  %14742 = vmatprep.subr.bf16.mxu1 %v22599_v2 }
 0x69a   :  { %v5870_v25 = vpop.permute.xlu0 %5869  ;;  %v6030_v5 = vsel %vm511_vm2, %v6025_v59, 0 }
 0x69b   :  { %14727 = vmatmul.mubr.msk.bf16.vlgmr.msra.gmra.mrb[172].mxu0 %vm511_vm2, %v5717_v24 }
 0x69c   :  { %14737 = vmatpush3.bf16.xpose.msra.mxu0 %v5826_v28  ;;  %14738 = vmatprep.mubr.msk.bf16.mxu0 %vm16536_vm1, %v22599_v2 }
 0x69d   :  { %v6076_v8 = vpop.permute.xlu1 %6075  ;;  %14748 = vmatprep.subr.bf16.mxu0 %v22599_v2 }
 0x69e   :  { %v5921_v0 = vpop.permute.xlu0 %5920  ;;  %v6081_v35 = vsel %vm511_vm2, %v6076_v8, 0 }
 0x69f   :  { %14733 = vmatmul.mubr.msk.bf16.vlgmr.msra.gmra.mrb[212].mxu1 %vm511_vm2, %v5768_v53 }
 0x6a0   :  { %14743 = vmatpush3.bf16.xpose.msra.mxu1 %v5877_v14  ;;  %14744 = vmatprep.mubr.msk.bf16.mxu1 %vm16536_vm1, %v22599_v2 }
 0x6a1   :  { %v6127_v31 = vpop.permute.xlu1 %6126  ;;  %14754 = vmatprep.subr.bf16.mxu1 %v22599_v2 }
 0x6a2   :  { %v5972_v11 = vpop.permute.xlu0 %5971  ;;  %v6132_v36 = vsel %vm511_vm2, %v6127_v31, 0 }
 0x6a3   :  { %14739 = vmatmul.mubr.msk.bf16.vlgmr.msra.gmra.mrb[176].mxu0 %vm511_vm2, %v5819_v20 }
 0x6a4   :  { %14749 = vmatpush3.bf16.xpose.msra.mxu0 %v5928_v49  ;;  %14750 = vmatprep.mubr.msk.bf16.mxu0 %vm16536_vm1, %v22599_v2 }
 0x6a5   :  { %14760 = vmatprep.subr.bf16.mxu0 %v22599_v2  ;;  %v6178_v27 = vpop.permute.xlu1 %6177 }
 0x6a6   :  { %v6023_v37 = vpop.permute.xlu0 %6022  ;;  %v6183_v1 = vsel %vm511_vm2, %v6178_v27, 0 }
 0x6a7   :  { %14745 = vmatmul.mubr.msk.bf16.vlgmr.msra.gmra.mrb[216].mxu1 %vm511_vm2, %v5870_v25 }
 0x6a8   :  { %14755 = vmatpush3.bf16.xpose.msra.mxu1 %v5979_v13  ;;  %14756 = vmatprep.mubr.msk.bf16.mxu1 %vm16536_vm1, %v22599_v2 }
 0x6a9   :  { %14766 = vmatprep.subr.bf16.mxu1 %v22599_v2  ;;  %v6229_v12 = vpop.permute.xlu1 %6228 }
 0x6aa   :  { %v6074_v56 = vpop.permute.xlu0 %6073  ;;  %v6234_v34 = vsel %vm511_vm2, %v6229_v12, 0 }
 0x6ab   :  { %14751 = vmatmul.mubr.msk.bf16.vlgmr.msra.gmra.mrb[180].mxu0 %vm511_vm2, %v5921_v0 }
 0x6ac   :  { %14761 = vmatpush3.bf16.xpose.msra.mxu0 %v6030_v5  ;;  %14762 = vmatprep.mubr.msk.bf16.mxu0 %vm16536_vm1, %v22599_v2 }
 0x6ad   :  { %14772 = vmatprep.subr.bf16.mxu0 %v22599_v2  ;;  %v6280_v52 = vpop.permute.xlu1 %6279 }
 0x6ae   :  { %v6125_v51 = vpop.permute.xlu0 %6124  ;;  %v6285_v6 = vsel %vm511_vm2, %v6280_v52, 0 }
 0x6af   :  { %14757 = vmatmul.mubr.msk.bf16.vlgmr.msra.gmra.mrb[220].mxu1 %vm511_vm2, %v5972_v11 }
 0x6b0   :  { %14767 = vmatpush3.bf16.xpose.msra.mxu1 %v6081_v35  ;;  %14768 = vmatprep.mubr.msk.bf16.mxu1 %vm16536_vm1, %v22599_v2 }
 0x6b1   :  { %14778 = vmatprep.subr.bf16.mxu1 %v22599_v2  ;;  %v6331_v9 = vpop.permute.xlu1 %6330 }
 0x6b2   :  { %v6176_v55 = vpop.permute.xlu0 %6175  ;;  %v6336_v38 = vsel %vm511_vm2, %v6331_v9, 0 }
 0x6b3   :  { %14763 = vmatmul.mubr.msk.bf16.vlgmr.msra.gmra.mrb[184].mxu0 %vm511_vm2, %v6023_v37 }
 0x6b4   :  { %14773 = vmatpush3.bf16.xpose.msra.mxu0 %v6132_v36  ;;  %14774 = vmatprep.mubr.msk.bf16.mxu0 %vm16536_vm1, %v22599_v2 }
 0x6b5   :  { %14784 = vmatprep.subr.bf16.mxu0 %v22599_v2  ;;  %v6382_v3 = vpop.permute.xlu1 %6381 }
 0x6b6   :  { %v6227_v33 = vpop.permute.xlu0 %6226  ;;  %v6387_v17 = vsel %vm511_vm2, %v6382_v3, 0 }
 0x6b7   :  { %14769 = vmatmul.mubr.msk.bf16.vlgmr.msra.gmra.mrb[224].mxu1 %vm511_vm2, %v6074_v56 }
 0x6b8   :  { %14779 = vmatpush3.bf16.xpose.msra.mxu1 %v6183_v1  ;;  %14780 = vmatprep.mubr.msk.bf16.mxu1 %vm16536_vm1, %v22599_v2 }
 0x6b9   :  { %14790 = vmatprep.subr.bf16.mxu1 %v22599_v2  ;;  %v6380_v32 = vpop.permute.xlu1 %6379 }
 0x6ba   :  { %v6278_v4 = vpop.permute.xlu0 %6277 }
 0x6bb   :  { %14775 = vmatmul.mubr.msk.bf16.vlgmr.msra.gmra.mrb[188].mxu0 %vm511_vm2, %v6125_v51 }
 0x6bc   :  { %14785 = vmatpush3.bf16.xpose.msra.mxu0 %v6234_v34  ;;  %14786 = vmatprep.mubr.msk.bf16.mxu0 %vm16536_vm1, %v22599_v2 }
 0x6bd   :  { %14796 = vmatprep.subr.bf16.mxu0 %v22599_v2  ;;  %v6931_v47 = vpop.permute.xlu1 %6930 }
 0x6be   :  { %v6329_v57 = vpop.permute.xlu0 %6328 }
 0x6bf   :  { %14781 = vmatmul.mubr.msk.bf16.vlgmr.msra.gmra.mrb[228].mxu1 %vm511_vm2, %v6176_v55 }
 0x6c0   :  { %14791 = vmatpush3.bf16.xpose.msra.mxu1 %v6285_v6  ;;  %14792 = vmatprep.mubr.msk.bf16.mxu1 %vm16536_vm1, %v22599_v2 }
 0x6c1   :  { %14802 = vmatprep.subr.bf16.mxu1 %v22599_v2 }
 0x6c2   :  { %v6978_v26 = vpop.permute.xlu0 %6977 }
 0x6c3   :  { %14787 = vmatmul.mubr.msk.bf16.vlgmr.msra.gmra.mrb[192].mxu0 %vm511_vm2, %v6227_v33 }
 0x6c4   :  { %14797 = vmatpush3.bf16.xpose.msra.mxu0 %v6336_v38  ;;  %14798 = vmatprep.mubr.msk.bf16.mxu0 %vm16536_vm1, %v22599_v2 }
 0x6c5   :  { %14808 = vmatprep.subr.bf16.mxu0 %v22599_v2 }
 0x6c7   :  { %14793 = vmatmul.mubr.msk.bf16.vlgmr.msra.gmra.mrb[232].mxu1 %vm511_vm2, %v6278_v4 }
 0x6c8   :  { %14803 = vmatpush3.bf16.xpose.msra.mxu1 %v6387_v17  ;;  %14804 = vmatprep.mubr.msk.bf16.mxu1 %vm16536_vm1, %v22599_v2 }
 0x6c9   :  { %14814 = vmatprep.subr.bf16.mxu1 %v22599_v2 }
 0x6cb   :  { %14799 = vmatmul.mubr.msk.bf16.vlgmr.msra.gmra.mrb[196].mxu0 %vm511_vm2, %v6329_v57 }
 0x6cc   :  { %14809 = vmatpush3.bf16.msra.mxu0 %v6931_v47  ;;  %14810 = vmatprep.mubr.msk.bf16.mxu0 %vm16536_vm1, %v22599_v2 }
 0x6cd   :  { %14820 = vmatprep.subr.bf16.mxu0 %v22599_v2 }
 0x6cf   :  { %14805 = vmatmul.mubr.msk.bf16.vlgmr.msra.gmra.mrb[236].mxu1 %vm511_vm2, %v6380_v32 }
 0x6d0   :  { %14815 = vmatpush3.bf16.msra.mxu1 %v6978_v26  ;;  %14816 = vmatprep.mubr.msk.bf16.mxu1 %vm16536_vm1, %v22599_v2 }
 0x6d1   :  { %14826 = vmatprep.subr.bf16.mxu1 %v22599_v2 }
 0x6fb   :  { %v18610_v30 = vpop.f32.mrb[120].mxu0 }
 0x6fc   :  { %22627 = vst [vmem:[#allocation55_spill] sm:$0xff] %v18610_v30  ;;  %v14572_v45 = vpop.f32.mrb[121].mxu0 }
 0x6fd   :  { %v18612_v24 = vpop.f32.mrb[122].mxu0 }
 0x6fe   :  { %22628 = vst [vmem:[#allocation57_spill] sm:$0xff] %v18612_v24  ;;  %v14573_v7 = vpop.f32.mrb[123].mxu0 }
 0x708   :  { %v18616_v53 = vpop.f32.mrb[160].mxu1 }
 0x709   :  { %22629 = vst [vmem:[#allocation56_spill] sm:$0xff] %v18616_v53  ;;  %v14578_v39 = vpop.f32.mrb[161].mxu1 }
 0x70a   :  { %v18618_v23 = vpop.f32.mrb[162].mxu1 }
 0x70b   :  { %22630 = vst [vmem:[#allocation59_spill] sm:$0xff] %v18618_v23  ;;  %v14579_v63 = vpop.f32.mrb[163].mxu1 }
 0x70d   :  { %v18622_v59 = vpop.f32.mrb[124].mxu0 }
 0x70e   :  { %22631 = vst [vmem:[#allocation58_spill] sm:$0xff] %v18622_v59  ;;  %v14584_v25 = vpop.f32.mrb[125].mxu0 }
 0x70f   :  { %v18624_v28 = vpop.f32.mrb[126].mxu0 }
 0x710   :  { %22632 = vst [vmem:[#allocation61_spill] sm:$0xff] %v18624_v28  ;;  %v14585_v0 = vpop.f32.mrb[127].mxu0 }
 0x711   :  { %v18628_v14 = vpop.f32.mrb[164].mxu1 }
 0x712   :  { %22633 = vst [vmem:[#allocation60_spill] sm:$0xff] %v18628_v14  ;;  %v14590_v31 = vpop.f32.mrb[165].mxu1 }
 0x713   :  { %v18630_v11 = vpop.f32.mrb[166].mxu1 }
 0x714   :  { %22634 = vst [vmem:[#allocation63_spill] sm:$0xff] %v18630_v11  ;;  %v14591_v37 = vpop.f32.mrb[167].mxu1 }
 0x715   :  { %v18634_v13 = vpop.f32.mrb[128].mxu0 }
 0x716   :  { %22635 = vst [vmem:[#allocation62_spill] sm:$0xff] %v18634_v13  ;;  %v14596_v27 = vpop.f32.mrb[129].mxu0 }
 0x717   :  { %v18636_v5 = vpop.f32.mrb[130].mxu0 }
 0x718   :  { %22636 = vst [vmem:[#allocation65_spill] sm:$0xff] %v18636_v5  ;;  %v14597_v12 = vpop.f32.mrb[131].mxu0 }
 0x719   :  { %v18640_v35 = vpop.f32.mrb[168].mxu1 }
 0x71a   :  { %22637 = vst [vmem:[#allocation64_spill] sm:$0xff] %v18640_v35  ;;  %v14602_v51 = vpop.f32.mrb[169].mxu1 }
 0x71b   :  { %v18642_v36 = vpop.f32.mrb[170].mxu1 }
 0x71c   :  { %22638 = vst [vmem:[#allocation67_spill] sm:$0xff] %v18642_v36  ;;  %v14603_v1 = vpop.f32.mrb[171].mxu1 }
 0x71d   :  { %v18646_v55 = vpop.f32.mrb[132].mxu0 }
 0x71e   :  { %22639 = vst [vmem:[#allocation66_spill] sm:$0xff] %v18646_v55  ;;  %v14608_v9 = vpop.f32.mrb[133].mxu0 }
 0x71f   :  { %v18648_v34 = vpop.f32.mrb[134].mxu0 }
 0x720   :  { %22640 = vst [vmem:[#allocation68_spill] sm:$0xff] %v18648_v34  ;;  %v14609_v6 = vpop.f32.mrb[135].mxu0 }
 0x721   :  { %v18652_v3 = vpop.f32.mrb[172].mxu1 }
 0x722   :  { %22641 = vst [vmem:[#allocation69_spill] sm:$0xff] %v18652_v3  ;;  %v14614_v38 = vpop.f32.mrb[173].mxu1 }
 0x723   :  { %v18654_v4 = vpop.f32.mrb[174].mxu1 }
 0x724   :  { %22642 = vst [vmem:[#allocation72_spill] sm:$0xff] %v18654_v4  ;;  %v14615_v17 = vpop.f32.mrb[175].mxu1 }
 0x725   :  { %v18658_v57 = vpop.f32.mrb[136].mxu0 }
 0x726   :  { %22643 = vst [vmem:[#allocation70_spill] sm:$0xff] %v18658_v57  ;;  %v14620_v47 = vpop.f32.mrb[137].mxu0 }
 0x727   :  { %v18660_v26 = vpop.f32.mrb[138].mxu0 }
 0x728   :  { %22644 = vst [vmem:[#allocation71_spill] sm:$0xff] %v18660_v26  ;;  %v14621_v7 = vpop.f32.mrb[139].mxu0 }
 0x729   :  { %v18664_v39 = vpop.f32.mrb[176].mxu1 }
 0x72a   :  { %22645 = vst [vmem:[#allocation74_spill] sm:$0xff] %v18664_v39  ;;  %v14626_v63 = vpop.f32.mrb[177].mxu1 }
 0x72b   :  { %v18666_v25 = vpop.f32.mrb[178].mxu1 }
 0x72c   :  { %22646 = vst [vmem:[#allocation79_spill] sm:$0xff] %v18666_v25  ;;  %v14627_v31 = vpop.f32.mrb[179].mxu1 }
 0x72d   :  { %v18670_v37 = vpop.f32.mrb[140].mxu0 }
 0x72e   :  { %22647 = vst [vmem:[#allocation73_spill] sm:$0xff] %v18670_v37  ;;  %v14632_v27 = vpop.f32.mrb[141].mxu0 }
 0x72f   :  { %v18672_v12 = vpop.f32.mrb[142].mxu0 }
 0x730   :  { %22648 = vst [vmem:[#allocation76_spill] sm:$0xff] %v18672_v12  ;;  %v14633_v1 = vpop.f32.mrb[143].mxu0 }
 0x731   :  { %v18676_v9 = vpop.f32.mrb[180].mxu1 }
 0x732   :  { %22649 = vst [vmem:[#allocation78_spill] sm:$0xff] %v18676_v9  ;;  %v14638_v6 = vpop.f32.mrb[181].mxu1 }
 0x733   :  { %v18678_v38 = vpop.f32.mrb[182].mxu1 }
 0x734   :  { %22650 = vst [vmem:[#allocation75_spill] sm:$0xff] %v18678_v38  ;;  %v14639_v47 = vpop.f32.mrb[183].mxu1 }
 0x735   :  { %v18682_v7 = vpop.f32.mrb[144].mxu0 }
 0x736   :  { %22651 = vst [vmem:[#allocation77_spill] sm:$0xff] %v18682_v7  ;;  %v14644_v63 = vpop.f32.mrb[145].mxu0 }
 0x737   :  { %v18684_v31 = vpop.f32.mrb[146].mxu0 }
 0x738   :  { %22652 = vst [vmem:[#allocation80_spill] sm:$0xff] %v18684_v31  ;;  %v14645_v45 = vpop.f32.mrb[147].mxu0 }
 0x739   :  { %v18688_v51 = vpop.f32.mrb[184].mxu1 }
 0x73a   :  { %22653 = vst [vmem:[#allocation81_spill] sm:$0xff] %v18688_v51  ;;  %v14650_v1 = vpop.f32.mrb[185].mxu1 }
 0x73b   :  { %v18690_v33 = vpop.f32.mrb[186].mxu1 }
 0x73c   :  { %22654 = vst [vmem:[#allocation82_spill] sm:$0xff] %v18690_v33  ;;  %v14651_v0 = vpop.f32.mrb[187].mxu1 }
 0x73d   :  { %v18694_v17 = vpop.f32.mrb[148].mxu0 }
 0x73e   :  { %22655 = vst [vmem:[#allocation83_spill] sm:$0xff] %v18694_v17  ;;  %v14656_v47 = vpop.f32.mrb[149].mxu0 }
 0x73f   :  { %v18696_v56 = vpop.f32.mrb[150].mxu0 }
 0x740   :  { %22656 = vst [vmem:[#allocation84_spill] sm:$0xff] %v18696_v56  ;;  %v14657_v32 = vpop.f32.mrb[151].mxu0 }
 0x741   :  { %v18700_v27 = vpop.f32.mrb[188].mxu1 }
 0x742   :  { %22657 = vst [vmem:[#allocation85_spill] sm:$0xff] %v18700_v27  ;;  %v14662_v45 = vpop.f32.mrb[189].mxu1 }
 0x743   :  { %v18702_v8 = vpop.f32.mrb[190].mxu1 }
 0x744   :  { %22658 = vst [vmem:[#allocation86_spill] sm:$0xff] %v18702_v8  ;;  %v14663_v52 = vpop.f32.mrb[191].mxu1 }
 0x745   :  { %v18706_v6 = vpop.f32.mrb[152].mxu0 }
 0x746   :  { %22659 = vst [vmem:[#allocation87_spill] sm:$0xff] %v18706_v6  ;;  %v14668_v0 = vpop.f32.mrb[153].mxu0 }
 0x747   :  { %v18708_v48 = vpop.f32.mrb[154].mxu0 }
 0x748   :  { %22660 = vst [vmem:[#allocation88_spill] sm:$0xff] %v18708_v48  ;;  %v14669_v49 = vpop.f32.mrb[155].mxu0 }
 0x749   :  { %v18712_v63 = vpop.f32.mrb[192].mxu1 }
 0x74a   :  { %22661 = vst [vmem:[#allocation89_spill] sm:$0xff] %v18712_v63  ;;  %v14674_v32 = vpop.f32.mrb[193].mxu1 }
 0x74b   :  { %v18714_v20 = vpop.f32.mrb[194].mxu1 }
 0x74c   :  { %22662 = vst [vmem:[#allocation90_spill] sm:$0xff] %v18714_v20  ;;  %v14675_v17 = vpop.f32.mrb[195].mxu1 }
 0x74d   :  { %v18718_v1 = vpop.f32.mrb[156].mxu0 }
 0x74e   :  { %22663 = vst [vmem:[#allocation91_spill] sm:$0xff] %v18718_v1  ;;  %v14680_v52 = vpop.f32.mrb[157].mxu0 }
 0x74f   :  { %v18720_v27 = vpop.f32.mrb[158].mxu0 }
 0x750   :  { %22664 = vst [vmem:[#allocation92_spill] sm:$0xff] %v18720_v27  ;;  %v14681_v8 = vpop.f32.mrb[159].mxu0 }
 0x751   :  { %v18724_v47 = vpop.f32.mrb[196].mxu1 }
 0x752   :  { %22665 = vst [vmem:[#allocation93_spill] sm:$0xff] %v18724_v47  ;;  %v14686_v49 = vpop.f32.mrb[197].mxu1 }
 0x753   :  { %v18726_v6 = vpop.f32.mrb[198].mxu1 }
 0x754   :  { %22666 = vst [vmem:[#allocation94_spill] sm:$0xff] %v18726_v6  ;;  %v14687_v48 = vpop.f32.mrb[199].mxu1 }
 0x756   :  { %v5454_v45 = vpop.f32.mrb[160].mxu0 }
 0x757   :  { %v18730_v17 = vmul.f32 0.35355338, %v5454_v45  ;;  %v14692_v63 = vpop.f32.mrb[161].mxu0 }
 0x758   :  { %v5457_v52 = vpop.f32.mrb[162].mxu0 }
 0x759   :  { %v18732_v20 = vmul.f32 0.35355338, %v5457_v52  ;;  %v14693_v56 = vpop.f32.mrb[163].mxu0  ;;  %v6470_v8 = vsel %vm1549_vm3, %v18730_v17, -inf }
 0x75a   :  { %6471 = vmax.xlane.f32.xlu0 %v6470_v8  ;;  %v5505_v0 = vpop.f32.mrb[200].mxu1 }
 0x75b   :  { %v18736_v49 = vmul.f32 0.35355338, %v5505_v0  ;;  %v14698_v1 = vpop.f32.mrb[201].mxu1  ;;  %v6473_v32 = vsel %vm1549_vm3, %v18732_v20, -inf }
 0x75c   :  { %6474 = vmax.xlane.f32.xlu1 %v6473_v32  ;;  %v5508_v48 = vpop.f32.mrb[202].mxu1 }
 0x75d   :  { %v18740_v45 = vmul.f32 0.35355338, %v5508_v48  ;;  %v14699_v63 = vpop.f32.mrb[203].mxu1  ;;  %v6476_v52 = vsel %vm1549_vm3, %v18736_v49, -inf }
 0x75e   :  { %6477 = vmax.xlane.f32.xlu0 %v6476_v52  ;;  %v5556_v56 = vpop.f32.mrb[164].mxu0 }
 0x75f   :  { %v18744_v47 = vmul.f32 0.35355338, %v5556_v56  ;;  %v14704_v8 = vpop.f32.mrb[165].mxu0  ;;  %v6479_v27 = vsel %vm1549_vm3, %v18740_v45, -inf }
 0x760   :  { %v5559_v6 = vpop.f32.mrb[166].mxu0 }
 0x761   :  { %v18746_v0 = vmul.f32 0.35355338, %v5559_v6  ;;  %v14705_v1 = vpop.f32.mrb[167].mxu0  ;;  %v6482_v32 = vsel %vm1549_vm3, %v18744_v47, -inf }
 0x762   :  { %6480 = vmax.xlane.f32.xlu0 %v6479_v27  ;;  %6483 = vmax.xlane.f32.xlu1 %v6482_v32  ;;  %v5607_v48 = vpop.f32.mrb[204].mxu1 }
 0x763   :  { %v18752_v63 = vmul.f32 0.35355338, %v5607_v48  ;;  %v14710_v52 = vpop.f32.mrb[205].mxu1  ;;  %v6485_v6 = vsel %vm1549_vm3, %v18746_v0, -inf }
 0x764   :  { %v5610_v51 = vpop.f32.mrb[206].mxu1 }
 0x765   :  { %v18754_v56 = vmul.f32 0.35355338, %v5610_v51  ;;  %v14711_v8 = vpop.f32.mrb[207].mxu1  ;;  %v6488_v1 = vsel %vm1549_vm3, %v18752_v63, -inf }
 0x766   :  { %6486 = vmax.xlane.f32.xlu0 %v6485_v6  ;;  %6489 = vmax.xlane.f32.xlu1 %v6488_v1  ;;  %v5658_v33 = vpop.f32.mrb[168].mxu0 }
 0x767   :  { %v18760_v7 = vmul.f32 0.35355338, %v5658_v33  ;;  %v14716_v27 = vpop.f32.mrb[169].mxu0  ;;  %v6491_v51 = vsel %vm1549_vm3, %v18754_v56, -inf }
 0x768   :  { %v5661_v32 = vpop.f32.mrb[170].mxu0 }
 0x769   :  { %v18762_v48 = vmul.f32 0.35355338, %v5661_v32  ;;  %v14717_v52 = vpop.f32.mrb[171].mxu0  ;;  %v6494_v8 = vsel %vm1549_vm3, %v18760_v7, -inf }
 0x76a   :  { %6492 = vmax.xlane.f32.xlu0 %v6491_v51  ;;  %6495 = vmax.xlane.f32.xlu1 %v6494_v8  ;;  %v5709_v31 = vpop.f32.mrb[208].mxu1 }
 0x76b   :  { %v18768_v37 = vmul.f32 0.35355338, %v5709_v31  ;;  %v14722_v6 = vpop.f32.mrb[209].mxu1  ;;  %v6497_v32 = vsel %vm1549_vm3, %v18762_v48, -inf }
 0x76c   :  { %v5712_v1 = vpop.f32.mrb[210].mxu1 }
 0x76d   :  { %v18770_v33 = vmul.f32 0.35355338, %v5712_v1  ;;  %v14723_v27 = vpop.f32.mrb[211].mxu1  ;;  %v6500_v52 = vsel %vm1549_vm3, %v18768_v37, -inf }
 0x76e   :  { %6498 = vmax.xlane.f32.xlu0 %v6497_v32  ;;  %6501 = vmax.xlane.f32.xlu1 %v6500_v52  ;;  %v5760_v12 = vpop.f32.mrb[172].mxu0 }
 0x76f   :  { %v18776_v57 = vmul.f32 0.35355338, %v5760_v12  ;;  %v14728_v51 = vpop.f32.mrb[173].mxu0  ;;  %v6503_v1 = vsel %vm1549_vm3, %v18770_v33, -inf }
 0x770   :  { %v5763_v8 = vpop.f32.mrb[174].mxu0 }
 0x771   :  { %v18778_v31 = vmul.f32 0.35355338, %v5763_v8  ;;  %v14729_v6 = vpop.f32.mrb[175].mxu0  ;;  %v6506_v27 = vsel %vm1549_vm3, %v18776_v57, -inf }
 0x772   :  { %6504 = vmax.xlane.f32.xlu0 %v6503_v1  ;;  %6507 = vmax.xlane.f32.xlu1 %v6506_v27  ;;  %v5811_v26 = vpop.f32.mrb[212].mxu1 }
 0x773   :  { %v18784_v9 = vmul.f32 0.35355338, %v5811_v26  ;;  %v14734_v32 = vpop.f32.mrb[213].mxu1  ;;  %v6509_v8 = vsel %vm1549_vm3, %v18778_v31, -inf }
 0x774   :  { %v5814_v52 = vpop.f32.mrb[214].mxu1 }
 0x775   :  { %v18786_v12 = vmul.f32 0.35355338, %v5814_v52  ;;  %v14735_v51 = vpop.f32.mrb[215].mxu1  ;;  %v6512_v6 = vsel %vm1549_vm3, %v18784_v9, -inf }
 0x776   :  { %6510 = vmax.xlane.f32.xlu0 %v6509_v8  ;;  %6513 = vmax.xlane.f32.xlu1 %v6512_v6  ;;  %v5862_v38 = vpop.f32.mrb[176].mxu0 }
 0x777   :  { %v18792_v55 = vmul.f32 0.35355338, %v5862_v38  ;;  %v14740_v1 = vpop.f32.mrb[177].mxu0  ;;  %v6515_v52 = vsel %vm1549_vm3, %v18786_v12, -inf }
 0x778   :  { %v5865_v27 = vpop.f32.mrb[178].mxu0 }
 0x779   :  { %v18794_v26 = vmul.f32 0.35355338, %v5865_v27  ;;  %v14741_v32 = vpop.f32.mrb[179].mxu0  ;;  %v6518_v51 = vsel %vm1549_vm3, %v18792_v55, -inf }
 0x77a   :  { %6516 = vmax.xlane.f32.xlu0 %v6515_v52  ;;  %6519 = vmax.xlane.f32.xlu1 %v6518_v51  ;;  %v5913_v34 = vpop.f32.mrb[216].mxu1 }
 0x77b   :  { %v18800_v39 = vmul.f32 0.35355338, %v5913_v34  ;;  %v14746_v8 = vpop.f32.mrb[217].mxu1  ;;  %v6521_v27 = vsel %vm1549_vm3, %v18794_v26, -inf }
 0x77c   :  { %v5916_v6 = vpop.f32.mrb[218].mxu1 }
 0x77d   :  { %v18802_v38 = vmul.f32 0.35355338, %v5916_v6  ;;  %v14747_v1 = vpop.f32.mrb[219].mxu1  ;;  %v6524_v32 = vsel %vm1549_vm3, %v18800_v39, -inf }
 0x77e   :  { %6522 = vmax.xlane.f32.xlu0 %v6521_v27  ;;  %6525 = vmax.xlane.f32.xlu1 %v6524_v32  ;;  %v5964_v25 = vpop.f32.mrb[180].mxu0 }
 0x77f   :  { %v18808_v13 = vmul.f32 0.35355338, %v5964_v25  ;;  %v14752_v52 = vpop.f32.mrb[181].mxu0  ;;  %v6527_v6 = vsel %vm1549_vm3, %v18802_v38, -inf }
 0x780   :  { %v5967_v51 = vpop.f32.mrb[182].mxu0 }
 0x781   :  { %v18810_v34 = vmul.f32 0.35355338, %v5967_v51  ;;  %v14753_v8 = vpop.f32.mrb[183].mxu0  ;;  %v6530_v1 = vsel %vm1549_vm3, %v18808_v13, -inf }
 0x782   :  { %6528 = vmax.xlane.f32.xlu0 %v6527_v6  ;;  %6531 = vmax.xlane.f32.xlu1 %v6530_v1  ;;  %v6015_v5 = vpop.f32.mrb[220].mxu1 }
 0x783   :  { %v18816_v3 = vmul.f32 0.35355338, %v6015_v5  ;;  %v14758_v27 = vpop.f32.mrb[221].mxu1  ;;  %v6533_v51 = vsel %vm1549_vm3, %v18810_v34, -inf }
 0x784   :  { %v6018_v32 = vpop.f32.mrb[222].mxu1 }
 0x785   :  { %v18818_v25 = vmul.f32 0.35355338, %v6018_v32  ;;  %v14759_v52 = vpop.f32.mrb[223].mxu1  ;;  %v6536_v8 = vsel %vm1549_vm3, %v18816_v3, -inf }
 0x786   :  { %6534 = vmax.xlane.f32.xlu0 %v6533_v51  ;;  %6537 = vmax.xlane.f32.xlu1 %v6536_v8  ;;  %v6066_v4 = vpop.f32.mrb[184].mxu0 }
 0x787   :  { %v18824_v59 = vmul.f32 0.35355338, %v6066_v4  ;;  %v14764_v6 = vpop.f32.mrb[185].mxu0  ;;  %v6539_v32 = vsel %vm1549_vm3, %v18818_v25, -inf }
 0x788   :  { %v6069_v1 = vpop.f32.mrb[186].mxu0 }
 0x789   :  { %v18826_v5 = vmul.f32 0.35355338, %v6069_v1  ;;  %v14765_v27 = vpop.f32.mrb[187].mxu0  ;;  %v6542_v52 = vsel %vm1549_vm3, %v18824_v59, -inf }
 0x78a   :  { %6540 = vmax.xlane.f32.xlu0 %v6539_v32  ;;  %6543 = vmax.xlane.f32.xlu1 %v6542_v52  ;;  %v6117_v28 = vpop.f32.mrb[224].mxu1 }
 0x78b   :  { %v18832_v35 = vmul.f32 0.35355338, %v6117_v28  ;;  %v14770_v51 = vpop.f32.mrb[225].mxu1  ;;  %v6545_v1 = vsel %vm1549_vm3, %v18826_v5, -inf }
 0x78c   :  { %v6120_v8 = vpop.f32.mrb[226].mxu1 }
 0x78d   :  { %v18834_v4 = vmul.f32 0.35355338, %v6120_v8  ;;  %v14771_v6 = vpop.f32.mrb[227].mxu1  ;;  %v6548_v27 = vsel %vm1549_vm3, %v18832_v35, -inf }
 0x78e   :  { %6546 = vmax.xlane.f32.xlu0 %v6545_v1  ;;  %6549 = vmax.xlane.f32.xlu1 %v6548_v27  ;;  %v6168_v36 = vpop.f32.mrb[188].mxu0 }
 0x78f   :  { %v18840_v30 = vmul.f32 0.35355338, %v6168_v36  ;;  %v14776_v32 = vpop.f32.mrb[189].mxu0  ;;  %v6551_v8 = vsel %vm1549_vm3, %v18834_v4, -inf }
 0x790   :  { %v6171_v52 = vpop.f32.mrb[190].mxu0 }
 0x791   :  { %v18842_v28 = vmul.f32 0.35355338, %v6171_v52  ;;  %v14777_v51 = vpop.f32.mrb[191].mxu0  ;;  %v6554_v6 = vsel %vm1549_vm3, %v18840_v30, -inf }
 0x792   :  { %6552 = vmax.xlane.f32.xlu0 %v6551_v8  ;;  %6555 = vmax.xlane.f32.xlu1 %v6554_v6  ;;  %v6219_v24 = vpop.f32.mrb[228].mxu1 }
 0x793   :  { %v18848_v14 = vmul.f32 0.35355338, %v6219_v24  ;;  %v14782_v1 = vpop.f32.mrb[229].mxu1  ;;  %v6557_v52 = vsel %vm1549_vm3, %v18842_v28, -inf }
 0x794   :  { %v6222_v27 = vpop.f32.mrb[230].mxu1 }
 0x795   :  { %v18850_v36 = vmul.f32 0.35355338, %v6222_v27  ;;  %v14783_v32 = vpop.f32.mrb[231].mxu1  ;;  %v6560_v51 = vsel %vm1549_vm3, %v18848_v14, -inf }
 0x796   :  { %6558 = vmax.xlane.f32.xlu0 %v6557_v52  ;;  %6561 = vmax.xlane.f32.xlu1 %v6560_v51  ;;  %v6270_v11 = vpop.f32.mrb[192].mxu0 }
 0x797   :  { %v18856_v53 = vmul.f32 0.35355338, %v6270_v11  ;;  %v14788_v8 = vpop.f32.mrb[193].mxu0  ;;  %v6563_v27 = vsel %vm1549_vm3, %v18850_v36, -inf }
 0x798   :  { %v6273_v6 = vpop.f32.mrb[194].mxu0 }
 0x799   :  { %v18858_v24 = vmul.f32 0.35355338, %v6273_v6  ;;  %v14789_v1 = vpop.f32.mrb[195].mxu0  ;;  %v6566_v32 = vsel %vm1549_vm3, %v18856_v53, -inf }
 0x79a   :  { %6564 = vmax.xlane.f32.xlu0 %v6563_v27  ;;  %6567 = vmax.xlane.f32.xlu1 %v6566_v32  ;;  %v6321_v23 = vpop.f32.mrb[232].mxu1 }
 0x79b   :  { %v18864_v2 = vmul.f32 0.35355338, %v6321_v23  ;;  %v14794_v52 = vpop.f32.mrb[233].mxu1  ;;  %v6569_v6 = vsel %vm1549_vm3, %v18858_v24, -inf }
 0x79c   :  { %v6324_v51 = vpop.f32.mrb[234].mxu1 }
 0x79d   :  { %v18866_v11 = vmul.f32 0.35355338, %v6324_v51  ;;  %v14795_v8 = vpop.f32.mrb[235].mxu1  ;;  %v6572_v1 = vsel %vm1549_vm3, %v18864_v2, -inf }
 0x79e   :  { %6570 = vmax.xlane.f32.xlu0 %v6569_v6  ;;  %6573 = vmax.xlane.f32.xlu1 %v6572_v1  ;;  %v6372_v10 = vpop.f32.mrb[196].mxu0 }
 0x79f   :  { %v18872_v15 = vmul.f32 0.35355338, %v6372_v10  ;;  %v14800_v27 = vpop.f32.mrb[197].mxu0  ;;  %v6575_v51 = vsel %vm1549_vm3, %v18866_v11, -inf }
 0x7a0   :  { %v6375_v32 = vpop.f32.mrb[198].mxu0 }
 0x7a1   :  { %v18874_v23 = vmul.f32 0.35355338, %v6375_v32  ;;  %v14801_v52 = vpop.f32.mrb[199].mxu0  ;;  %v6578_v8 = vsel %vm1549_vm3, %v18872_v15, -inf }
 0x7a2   :  { %6576 = vmax.xlane.f32.xlu0 %v6575_v51  ;;  %v6423_v58 = vpop.f32.mrb[236].mxu1  ;;  %6579 = vmax.xlane.f32.xlu1 %v6578_v8  ;;  %v18890_v8 = vpop.permute.xlu1 %7024 }
 0x7a3   :  { %v18880_v43 = vmul.f32 0.35355338, %v6423_v58  ;;  %v14806_v6 = vpop.f32.mrb[237].mxu1  ;;  %v6581_v52 = vsel %vm1549_vm3, %v18874_v23, -inf  ;;  %22667 = vst [vmem:[#allocation95_spill] sm:$0xff] %v18890_v8 }
 0x7a4   :  { %v6426_v1 = vpop.f32.mrb[238].mxu1  ;;  %v18896_v6 = vpop.permute.xlu0 %7071 }
 0x7a5   :  { %v18882_v10 = vmul.f32 0.35355338, %v6426_v1  ;;  %v14807_v27 = vpop.f32.mrb[239].mxu1  ;;  %v6584_v32 = vsel %vm1549_vm3, %v18880_v43, -inf  ;;  %22669 = vst [vmem:[#allocation97_spill] sm:$0xff] %v18896_v6 }
 0x7a6   :  { %6585 = vmax.xlane.f32.xlu1 %v6584_v32  ;;  %6582 = vmax.xlane.f32.xlu0 %v6581_v52  ;;  %v18894_v58 = vpop.permute.xlu1 %7118 }
 0x7a7   :  { %v6587_v51 = vsel %vm1549_vm3, %v18882_v10, -inf  ;;  %22668 = vst [vmem:[#allocation96_spill] sm:$0xff] %v18894_v58 }
 0x7a8   :  { %v18902_v27 = vpop.permute.xlu0 %7165 }
 0x7a9   :  { %22671 = vst [vmem:[#allocation99_spill] sm:$0xff] %v18902_v27 }
 0x7aa   :  { %6588 = vmax.xlane.f32.xlu0 %v6587_v51  ;;  %v18900_v1 = vpop.permute.xlu1 %7212 }
 0x7ab   :  { %22670 = vst [vmem:[#allocation98_spill] sm:$0xff] %v18900_v1 }
 0x7ac   :  { %v18906_v52 = vpop.permute.xlu0 %7259 }
 0x7ad   :  { %22673 = vst [vmem:[#allocation101_spill] sm:$0xff] %v18906_v52 }
 0x7ae   :  { %v18904_v32 = vpop.permute.xlu1 %7306 }
 0x7af   :  { %22672 = vst [vmem:[#allocation100_spill] sm:$0xff] %v18904_v32 }
 0x7b0   :  { %v18910_v8 = vpop.permute.xlu0 %7353 }
 0x7b1   :  { %22675 = vst [vmem:[#allocation103_spill] sm:$0xff] %v18910_v8 }
 0x7b2   :  { %v18908_v51 = vpop.permute.xlu1 %7400 }
 0x7b3   :  { %22674 = vst [vmem:[#allocation102_spill] sm:$0xff] %v18908_v51 }
 0x7b4   :  { %v18914_v58 = vpop.permute.xlu0 %7447 }
 0x7b5   :  { %22677 = vst [vmem:[#allocation105_spill] sm:$0xff] %v18914_v58 }
 0x7b7   :  { %7823 = vrot.lane.b32.xlu1 %v22602_v46, %s16544_s11  ;;  %v18912_v46 = vpop.permute.xlu1 %7494 }
 0x7b8   :  { %22676 = vst [vmem:[#allocation104_spill] sm:$0xff] %v18912_v46  ;;  %v18918_v19 = vpop.permute.xlu0 %7541 }
 0x7b9   :  { %22679 = vst [vmem:[#allocation107_spill] sm:$0xff] %v18918_v19 }
 0x7bb   :  { %v18916_v6 = vpop.permute.xlu1 %7588 }
 0x7bc   :  { %22678 = vst [vmem:[#allocation106_spill] sm:$0xff] %v18916_v6  ;;  %v18922_v1 = vpop.permute.xlu0 %7682 }
 0x7bd   :  { %22681 = vst [vmem:[#allocation109_spill] sm:$0xff] %v18922_v1 }
 0x7c0   :  { %7776 = vrot.lane.b32.xlu0 %v22601_v21, %s16544_s11  ;;  %v18920_v21 = vpop.permute.xlu1 %7635 }
 0x7c1   :  { %22680 = vst [vmem:[#allocation108_spill] sm:$0xff] %v18920_v21 }
 0x7c4   :  { %v18924_v27 = vpop.permute.xlu1 %7729 }
 0x7c5   :  { %22682 = vst [vmem:[#allocation110_spill] sm:$0xff] %v18924_v27 }
 0x7e7   :  { %v6472_v32 = vpop.xlane.xlu0 %6471 }
 0x7e8   :  { %v6590_v52 = vsub.f32 %v18730_v17, %v6472_v32 }
 0x7e9   :  { %v6475_v51 = vpop.xlane.xlu1 %6474 }
 0x7ea   :  { %v6630_v50 = vmul.f32 1.442695, %v6590_v52  ;;  %v6591_v8 = vsub.f32 %v18732_v20, %v6475_v51 }
 0x7eb   :  { %v6478_v46 = vpop.xlane.xlu0 %6477 }
 0x7ec   :  { %16011 = vpow2.f32 %v6630_v50  ;;  %v6632_v58 = vmul.f32 1.442695, %v6591_v8  ;;  %v6592_v6 = vsub.f32 %v18736_v49, %v6478_v46 }
 0x7ee   :  { %16013 = vpow2.f32 %v6632_v58  ;;  %v6634_v19 = vmul.f32 1.442695, %v6592_v6 }
 0x7ef   :  { %v6484_v29 = vpop.xlane.xlu1 %6483  ;;  %v6481_v21 = vpop.xlane.xlu0 %6480 }
 0x7f0   :  { %16015 = vpow2.f32 %v6634_v19  ;;  %v6594_v1 = vsub.f32 %v18744_v47, %v6484_v29  ;;  %v6593_v27 = vsub.f32 %v18740_v45, %v6481_v21 }
 0x7f2   :  { %v6638_v22 = vmul.f32 1.442695, %v6594_v1  ;;  %v6636_v17 = vmul.f32 1.442695, %v6593_v27 }
 0x7f3   :  { %v6490_v32 = vpop.xlane.xlu1 %6489  ;;  %v6487_v52 = vpop.xlane.xlu0 %6486 }
 0x7f4   :  { %16017 = vpow2.f32 %v6638_v22  ;;  %v6596_v20 = vsub.f32 %v18752_v63, %v6490_v32  ;;  %v6595_v50 = vsub.f32 %v18746_v0, %v6487_v52 }
 0x7f5   :  { %16019 = vpow2.f32 %v6636_v17 }
 0x7f6   :  { %v18933_v46 = vpop.eup %16011  ;;  %v6642_v49 = vmul.f32 1.442695, %v6596_v20  ;;  %v6640_v8 = vmul.f32 1.442695, %v6595_v50 }
 0x7f7   :  { %v6496_v58 = vpop.xlane.xlu1 %6495  ;;  %v6493_v19 = vpop.xlane.xlu0 %6492  ;;  %v6710_v29 = vsel %vm1549_vm3, %v18933_v46, 0.0 }
 0x7f8   :  { %v18937_v21 = vpop.eup %16013  ;;  %16021 = vpow2.f32 %v6642_v49  ;;  %v6598_v47 = vsub.f32 %v18760_v7, %v6496_v58  ;;  %v6597_v22 = vsub.f32 %v18754_v56, %v6493_v19  ;;  %6711 = vadd.xlane.f32.xlu1 %v6710_v29 }
 0x7f9   :  { %16023 = vpow2.f32 %v6640_v8  ;;  %v6713_v45 = vsel %vm1549_vm3, %v18937_v21, 0.0 }
 0x7fa   :  { %v18943_v0 = vpop.eup %16015  ;;  %v6646_v63 = vmul.f32 1.442695, %v6598_v47  ;;  %v6644_v6 = vmul.f32 1.442695, %v6597_v22  ;;  %6714 = vadd.xlane.f32.xlu0 %v6713_v45 }
 0x7fb   :  { %v6502_v1 = vpop.xlane.xlu1 %6501  ;;  %v6499_v27 = vpop.xlane.xlu0 %6498  ;;  %v6716_v51 = vsel %vm1549_vm3, %v18943_v0, 0.0 }
 0x7fc   :  { %16025 = vpow2.f32 %v6646_v63  ;;  %v6600_v7 = vsub.f32 %v18768_v37, %v6502_v1  ;;  %v6599_v56 = vsub.f32 %v18762_v48, %v6499_v27  ;;  %6717 = vadd.xlane.f32.xlu1 %v6716_v51 }
 0x7fd   :  { %16027 = vpow2.f32 %v6644_v6 }
 0x7fe   :  { %v18949_v17 = vpop.eup %16017  ;;  %v6650_v32 = vmul.f32 1.442695, %v6600_v7  ;;  %v6648_v52 = vmul.f32 1.442695, %v6599_v56 }
 0x7ff   :  { %v18951_v20 = vpop.eup %16019  ;;  %v6508_v50 = vpop.xlane.xlu1 %6507  ;;  %v6722_v8 = vsel %vm1549_vm3, %v18949_v17, 0.0 }
 0x800   :  { %v6505_v49 = vpop.xlane.xlu0 %6504  ;;  %16029 = vpow2.f32 %v6650_v32  ;;  %v6602_v58 = vsub.f32 %v18776_v57, %v6508_v50  ;;  %6723 = vadd.xlane.f32.xlu1 %v6722_v8  ;;  %v6719_v48 = vsel %vm1549_vm3, %v18951_v20, 0.0 }
 0x801   :  { %v6601_v37 = vsub.f32 %v18770_v33, %v6505_v49  ;;  %16031 = vpow2.f32 %v6648_v52  ;;  %6720 = vadd.xlane.f32.xlu0 %v6719_v48 }
 0x802   :  { %v18959_v19 = vpop.eup %16021  ;;  %v6654_v29 = vmul.f32 1.442695, %v6602_v58 }
 0x803   :  { %v6652_v47 = vmul.f32 1.442695, %v6601_v37  ;;  %v18961_v22 = vpop.eup %16023  ;;  %v6514_v45 = vpop.xlane.xlu1 %6513  ;;  %v6728_v6 = vsel %vm1549_vm3, %v18959_v19, 0.0 }
 0x804   :  { %v6511_v63 = vpop.xlane.xlu0 %6510  ;;  %16033 = vpow2.f32 %v6654_v29  ;;  %v6604_v57 = vsub.f32 %v18784_v9, %v6514_v45  ;;  %6729 = vadd.xlane.f32.xlu1 %v6728_v6  ;;  %v6725_v1 = vsel %vm1549_vm3, %v18961_v22, 0.0 }
 0x805   :  { %v6603_v33 = vsub.f32 %v18778_v31, %v6511_v63  ;;  %16035 = vpow2.f32 %v6652_v47  ;;  %6726 = vadd.xlane.f32.xlu0 %v6725_v1 }
 0x806   :  { %v18969_v27 = vpop.eup %16025  ;;  %v6658_v51 = vmul.f32 1.442695, %v6604_v57 }
 0x807   :  { %v6656_v7 = vmul.f32 1.442695, %v6603_v33  ;;  %v18971_v56 = vpop.eup %16027  ;;  %v6520_v32 = vpop.xlane.xlu1 %6519  ;;  %v6734_v50 = vsel %vm1549_vm3, %v18969_v27, 0.0 }
 0x808   :  { %v6517_v52 = vpop.xlane.xlu0 %6516  ;;  %16037 = vpow2.f32 %v6658_v51  ;;  %v6606_v9 = vsub.f32 %v18792_v55, %v6520_v32  ;;  %6735 = vadd.xlane.f32.xlu1 %v6734_v50  ;;  %v6731_v49 = vsel %vm1549_vm3, %v18971_v56, 0.0 }
 0x809   :  { %v6605_v31 = vsub.f32 %v18786_v12, %v6517_v52  ;;  %16039 = vpow2.f32 %v6656_v7  ;;  %6732 = vadd.xlane.f32.xlu0 %v6731_v49 }
 0x80a   :  { %v18979_v8 = vpop.eup %16029  ;;  %v6662_v58 = vmul.f32 1.442695, %v6606_v9 }
 0x80b   :  { %v6660_v37 = vmul.f32 1.442695, %v6605_v31  ;;  %v18981_v48 = vpop.eup %16031  ;;  %v6526_v29 = vpop.xlane.xlu1 %6525  ;;  %v6740_v45 = vsel %vm1549_vm3, %v18979_v8, 0.0 }
 0x80c   :  { %v6523_v47 = vpop.xlane.xlu0 %6522  ;;  %16041 = vpow2.f32 %v6662_v58  ;;  %v6608_v55 = vsub.f32 %v18800_v39, %v6526_v29  ;;  %6741 = vadd.xlane.f32.xlu1 %v6740_v45  ;;  %v6737_v63 = vsel %vm1549_vm3, %v18981_v48, 0.0 }
 0x80d   :  { %v6607_v12 = vsub.f32 %v18794_v26, %v6523_v47  ;;  %16043 = vpow2.f32 %v6660_v37  ;;  %6738 = vadd.xlane.f32.xlu0 %v6737_v63 }
 0x80e   :  { %v18989_v6 = vpop.eup %16033  ;;  %v6666_v57 = vmul.f32 1.442695, %v6608_v55 }
 0x80f   :  { %v6664_v33 = vmul.f32 1.442695, %v6607_v12  ;;  %v18991_v1 = vpop.eup %16035  ;;  %v6532_v51 = vpop.xlane.xlu1 %6531  ;;  %v6746_v32 = vsel %vm1549_vm3, %v18989_v6, 0.0 }
 0x810   :  { %v6529_v7 = vpop.xlane.xlu0 %6528  ;;  %16045 = vpow2.f32 %v6666_v57  ;;  %v6610_v39 = vsub.f32 %v18808_v13, %v6532_v51  ;;  %6747 = vadd.xlane.f32.xlu1 %v6746_v32  ;;  %v6743_v52 = vsel %vm1549_vm3, %v18991_v1, 0.0 }
 0x811   :  { %v6609_v26 = vsub.f32 %v18802_v38, %v6529_v7  ;;  %16047 = vpow2.f32 %v6664_v33  ;;  %6744 = vadd.xlane.f32.xlu0 %v6743_v52 }
 0x812   :  { %v18999_v50 = vpop.eup %16037  ;;  %v6670_v9 = vmul.f32 1.442695, %v6610_v39 }
 0x813   :  { %v6668_v31 = vmul.f32 1.442695, %v6609_v26  ;;  %v19001_v49 = vpop.eup %16039  ;;  %v6538_v58 = vpop.xlane.xlu1 %6537  ;;  %v6752_v29 = vsel %vm1549_vm3, %v18999_v50, 0.0 }
 0x814   :  { %v6535_v37 = vpop.xlane.xlu0 %6534  ;;  %16049 = vpow2.f32 %v6670_v9  ;;  %v6612_v13 = vsub.f32 %v18816_v3, %v6538_v58  ;;  %6753 = vadd.xlane.f32.xlu1 %v6752_v29  ;;  %v6749_v47 = vsel %vm1549_vm3, %v19001_v49, 0.0 }
 0x815   :  { %v6611_v38 = vsub.f32 %v18810_v34, %v6535_v37  ;;  %16051 = vpow2.f32 %v6668_v31  ;;  %6750 = vadd.xlane.f32.xlu0 %v6749_v47 }
 0x816   :  { %v19009_v45 = vpop.eup %16041  ;;  %v6674_v55 = vmul.f32 1.442695, %v6612_v13 }
 0x817   :  { %v6672_v12 = vmul.f32 1.442695, %v6611_v38  ;;  %v19011_v63 = vpop.eup %16043  ;;  %v6544_v57 = vpop.xlane.xlu1 %6543  ;;  %v6758_v51 = vsel %vm1549_vm3, %v19009_v45, 0.0 }
 0x818   :  { %v6541_v33 = vpop.xlane.xlu0 %6540  ;;  %16053 = vpow2.f32 %v6674_v55  ;;  %v6614_v3 = vsub.f32 %v18824_v59, %v6544_v57  ;;  %6759 = vadd.xlane.f32.xlu1 %v6758_v51  ;;  %v6755_v7 = vsel %vm1549_vm3, %v19011_v63, 0.0 }
 0x819   :  { %v6613_v34 = vsub.f32 %v18818_v25, %v6541_v33  ;;  %16055 = vpow2.f32 %v6672_v12  ;;  %6756 = vadd.xlane.f32.xlu0 %v6755_v7 }
 0x81a   :  { %v19019_v32 = vpop.eup %16045  ;;  %v6678_v39 = vmul.f32 1.442695, %v6614_v3 }
 0x81b   :  { %v6676_v26 = vmul.f32 1.442695, %v6613_v34  ;;  %v19021_v52 = vpop.eup %16047  ;;  %v6550_v9 = vpop.xlane.xlu1 %6549  ;;  %v6764_v58 = vsel %vm1549_vm3, %v19019_v32, 0.0 }
 0x81c   :  { %v6547_v31 = vpop.xlane.xlu0 %6546  ;;  %16057 = vpow2.f32 %v6678_v39  ;;  %v6616_v59 = vsub.f32 %v18832_v35, %v6550_v9  ;;  %6765 = vadd.xlane.f32.xlu1 %v6764_v58  ;;  %v6761_v37 = vsel %vm1549_vm3, %v19021_v52, 0.0 }
 0x81d   :  { %v6615_v25 = vsub.f32 %v18826_v5, %v6547_v31  ;;  %16059 = vpow2.f32 %v6676_v26  ;;  %6762 = vadd.xlane.f32.xlu0 %v6761_v37 }
 0x81e   :  { %v19029_v29 = vpop.eup %16049  ;;  %v6682_v13 = vmul.f32 1.442695, %v6616_v59 }
 0x81f   :  { %v6680_v38 = vmul.f32 1.442695, %v6615_v25  ;;  %v19031_v47 = vpop.eup %16051  ;;  %v6556_v55 = vpop.xlane.xlu1 %6555  ;;  %v6770_v57 = vsel %vm1549_vm3, %v19029_v29, 0.0 }
 0x820   :  { %v6553_v12 = vpop.xlane.xlu0 %6552  ;;  %16061 = vpow2.f32 %v6682_v13  ;;  %v6618_v35 = vsub.f32 %v18840_v30, %v6556_v55  ;;  %6771 = vadd.xlane.f32.xlu1 %v6770_v57  ;;  %v6767_v33 = vsel %vm1549_vm3, %v19031_v47, 0.0 }
 0x821   :  { %v6617_v5 = vsub.f32 %v18834_v4, %v6553_v12  ;;  %16063 = vpow2.f32 %v6680_v38  ;;  %6768 = vadd.xlane.f32.xlu0 %v6767_v33 }
 0x822   :  { %v19039_v51 = vpop.eup %16053  ;;  %v6686_v3 = vmul.f32 1.442695, %v6618_v35 }
 0x823   :  { %v6684_v34 = vmul.f32 1.442695, %v6617_v5  ;;  %v19041_v7 = vpop.eup %16055  ;;  %v6562_v39 = vpop.xlane.xlu1 %6561  ;;  %v6776_v9 = vsel %vm1549_vm3, %v19039_v51, 0.0 }
 0x824   :  { %v6559_v26 = vpop.xlane.xlu0 %6558  ;;  %16065 = vpow2.f32 %v6686_v3  ;;  %v6620_v30 = vsub.f32 %v18848_v14, %v6562_v39  ;;  %6777 = vadd.xlane.f32.xlu1 %v6776_v9  ;;  %v6773_v31 = vsel %vm1549_vm3, %v19041_v7, 0.0 }
 0x825   :  { %v6619_v4 = vsub.f32 %v18842_v28, %v6559_v26  ;;  %16067 = vpow2.f32 %v6684_v34  ;;  %6774 = vadd.xlane.f32.xlu0 %v6773_v31 }
 0x826   :  { %v19049_v58 = vpop.eup %16057  ;;  %v6690_v59 = vmul.f32 1.442695, %v6620_v30 }
 0x827   :  { %v6688_v25 = vmul.f32 1.442695, %v6619_v4  ;;  %v19051_v37 = vpop.eup %16059  ;;  %v6568_v13 = vpop.xlane.xlu1 %6567  ;;  %v6782_v55 = vsel %vm1549_vm3, %v19049_v58, 0.0 }
 0x828   :  { %v6565_v38 = vpop.xlane.xlu0 %6564  ;;  %16069 = vpow2.f32 %v6690_v59  ;;  %v6622_v14 = vsub.f32 %v18856_v53, %v6568_v13  ;;  %6783 = vadd.xlane.f32.xlu1 %v6782_v55  ;;  %v6779_v12 = vsel %vm1549_vm3, %v19051_v37, 0.0 }
 0x829   :  { %v6621_v28 = vsub.f32 %v18850_v36, %v6565_v38  ;;  %16071 = vpow2.f32 %v6688_v25  ;;  %6780 = vadd.xlane.f32.xlu0 %v6779_v12 }
 0x82a   :  { %v19059_v57 = vpop.eup %16061  ;;  %v6694_v35 = vmul.f32 1.442695, %v6622_v14 }
 0x82b   :  { %v6692_v5 = vmul.f32 1.442695, %v6621_v28  ;;  %v19061_v33 = vpop.eup %16063  ;;  %v6574_v3 = vpop.xlane.xlu1 %6573  ;;  %v6788_v39 = vsel %vm1549_vm3, %v19059_v57, 0.0 }
 0x82c   :  { %v6571_v34 = vpop.xlane.xlu0 %6570  ;;  %16073 = vpow2.f32 %v6694_v35  ;;  %v6624_v53 = vsub.f32 %v18864_v2, %v6574_v3  ;;  %6789 = vadd.xlane.f32.xlu1 %v6788_v39  ;;  %v6785_v26 = vsel %vm1549_vm3, %v19061_v33, 0.0 }
 0x82d   :  { %v6623_v36 = vsub.f32 %v18858_v24, %v6571_v34  ;;  %16075 = vpow2.f32 %v6692_v5  ;;  %6786 = vadd.xlane.f32.xlu0 %v6785_v26 }
 0x82e   :  { %v19069_v9 = vpop.eup %16065  ;;  %v6698_v30 = vmul.f32 1.442695, %v6624_v53 }
 0x82f   :  { %v6696_v4 = vmul.f32 1.442695, %v6623_v36  ;;  %v19071_v31 = vpop.eup %16067  ;;  %v6580_v59 = vpop.xlane.xlu1 %6579  ;;  %v6794_v13 = vsel %vm1549_vm3, %v19069_v9, 0.0 }
 0x830   :  { %v6577_v25 = vpop.xlane.xlu0 %6576  ;;  %16077 = vpow2.f32 %v6698_v30  ;;  %v6626_v2 = vsub.f32 %v18872_v15, %v6580_v59  ;;  %6795 = vadd.xlane.f32.xlu1 %v6794_v13  ;;  %v6791_v38 = vsel %vm1549_vm3, %v19071_v31, 0.0 }
 0x831   :  { %v6625_v24 = vsub.f32 %v18866_v11, %v6577_v25  ;;  %16079 = vpow2.f32 %v6696_v4  ;;  %6792 = vadd.xlane.f32.xlu0 %v6791_v38 }
 0x832   :  { %v19079_v55 = vpop.eup %16069  ;;  %v6702_v14 = vmul.f32 1.442695, %v6626_v2 }
 0x833   :  { %v6700_v28 = vmul.f32 1.442695, %v6625_v24  ;;  %v19081_v12 = vpop.eup %16071  ;;  %v6586_v35 = vpop.xlane.xlu1 %6585  ;;  %v6800_v3 = vsel %vm1549_vm3, %v19079_v55, 0.0 }
 0x834   :  { %v6583_v5 = vpop.xlane.xlu0 %6582  ;;  %16081 = vpow2.f32 %v6702_v14  ;;  %v6628_v15 = vsub.f32 %v18880_v43, %v6586_v35  ;;  %6801 = vadd.xlane.f32.xlu1 %v6800_v3  ;;  %v6797_v34 = vsel %vm1549_vm3, %v19081_v12, 0.0 }
 0x835   :  { %v6627_v11 = vsub.f32 %v18874_v23, %v6583_v5  ;;  %16083 = vpow2.f32 %v6700_v28  ;;  %6798 = vadd.xlane.f32.xlu0 %v6797_v34 }
 0x836   :  { %v19089_v39 = vpop.eup %16073  ;;  %v6706_v53 = vmul.f32 1.442695, %v6628_v15 }
 0x837   :  { %v6704_v36 = vmul.f32 1.442695, %v6627_v11  ;;  %v19091_v26 = vpop.eup %16075  ;;  %v6806_v4 = vsel %vm1549_vm3, %v19089_v39, 0.0 }
 0x838   :  { %v6589_v30 = vpop.xlane.xlu0 %6588  ;;  %16085 = vpow2.f32 %v6706_v53  ;;  %6807 = vadd.xlane.f32.xlu1 %v6806_v4  ;;  %v6803_v23 = vsel %vm1549_vm3, %v19091_v26, 0.0  ;;  %v22690_v53 = vld [vmem:[#allocation6_spill] sm:$0xff]  ;;  %v22693_v4 = vld [vmem:[#allocation8_spill] sm:$0xff] }
 0x839   :  { %v6629_v43 = vsub.f32 %v18882_v10, %v6589_v30  ;;  %16087 = vpow2.f32 %v6704_v36  ;;  %6804 = vadd.xlane.f32.xlu0 %v6803_v23  ;;  %v22691_v36 = vld [vmem:[#allocation5_spill] sm:$0xff]  ;;  %v19166_v30 = vpop.permute.xlu1 %7823 }
 0x83a   :  { %v19098_v59 = vpop.eup %16077  ;;  %22692 = vst [vmem:[#allocation6_spill] sm:$0xff] %v19166_v30 }
 0x83b   :  { %22683 = vst [vmem:[#allocation111_spill] sm:$0xff] %v19098_v59  ;;  %v6708_v25 = vmul.f32 1.442695, %v6629_v43  ;;  %v19100_v13 = vpop.eup %16079  ;;  %v6812_v2 = vsel %vm1549_vm3, %v19098_v59, 0.0 }
 0x83c   :  { %22684 = vst [vmem:[#allocation112_spill] sm:$0xff] %v19100_v13  ;;  %6813 = vadd.xlane.f32.xlu1 %v6812_v2  ;;  %v6809_v24 = vsel %vm1549_vm3, %v19100_v13, 0.0  ;;  %v19170_v43 = vpop.permute.xlu0 %7776 }
 0x83d   :  { %16089 = vpow2.f32 %v6708_v25  ;;  %6810 = vadd.xlane.f32.xlu0 %v6809_v24  ;;  %22694 = vst [vmem:[#allocation5_spill] sm:$0xff] %v19170_v43  ;;  %v22695_v25 = vld [vmem:[#allocation7_spill] sm:$0xff]  ;;  %v22696_v24 = vld [vmem:[#allocation10_spill] sm:$0xff] }
 0x83e   :  { %v19106_v10 = vpop.eup %16081 }
 0x83f   :  { %22685 = vst [vmem:[#allocation113_spill] sm:$0xff] %v19106_v10  ;;  %v19108_v38 = vpop.eup %16083  ;;  %v6818_v14 = vsel %vm1549_vm3, %v19106_v10, 0.0 }
 0x840   :  { %22686 = vst [vmem:[#allocation114_spill] sm:$0xff] %v19108_v38  ;;  %6819 = vadd.xlane.f32.xlu1 %v6818_v14  ;;  %v6815_v28 = vsel %vm1549_vm3, %v19108_v38, 0.0 }
 0x841   :  { %6816 = vadd.xlane.f32.xlu0 %v6815_v28  ;;  %v22697_v28 = vld [vmem:[#allocation9_spill] sm:$0xff] }
 0x842   :  { %v19114_v35 = vpop.eup %16085 }
 0x843   :  { %22687 = vst [vmem:[#allocation115_spill] sm:$0xff] %v19114_v35  ;;  %v19116_v5 = vpop.eup %16087  ;;  %v6824_v3 = vsel %vm1549_vm3, %v19114_v35, 0.0 }
 0x844   :  { %22688 = vst [vmem:[#allocation116_spill] sm:$0xff] %v19116_v5  ;;  %6825 = vadd.xlane.f32.xlu1 %v6824_v3  ;;  %v6821_v15 = vsel %vm1549_vm3, %v19116_v5, 0.0 }
 0x845   :  { %6822 = vadd.xlane.f32.xlu0 %v6821_v15 }
 0x847   :  { %v19122_v11 = vpop.eup %16089 }
 0x848   :  { %22689 = vst [vmem:[#allocation117_spill] sm:$0xff] %v19122_v11  ;;  %v6827_v34 = vsel %vm1549_vm3, %v19122_v11, 0.0 }
 0x849   :  { %6828 = vadd.xlane.f32.xlu0 %v6827_v34 }
 0x855   :  { %7923 = vrot.lane.b32.xlu1 %v16704_v40, %s16545_s12 }
 0x859   :  { %7974 = vrot.lane.b32.xlu1 %v16728_v62, %s16545_s12 }
 0x85d   :  { %8025 = vrot.lane.b32.xlu1 %v16724_v60, %s16545_s12 }
 0x85f   :  { %7872 = vrot.lane.b32.xlu0 %v16708_v42, %s16545_s12 }
 0x861   :  { %8076 = vrot.lane.b32.xlu1 %v16748_v18, %s16545_s12 }
 0x863   :  { %7870 = vrot.lane.b32.xlu0 %v16708_v42, %s16546_s13 }
 0x865   :  { %8127 = vrot.lane.b32.xlu1 %v16744_v16, %s16545_s12 }
 0x867   :  { %7921 = vrot.lane.b32.xlu0 %v16704_v40, %s16546_s13 }
 0x869   :  { %8178 = vrot.lane.b32.xlu1 %v16768_v44, %s16545_s12 }
 0x86b   :  { %7972 = vrot.lane.b32.xlu0 %v16728_v62, %s16546_s13 }
 0x86d   :  { %8229 = vrot.lane.b32.xlu1 %v22520_v41, %s16545_s12 }
 0x86f   :  { %8023 = vrot.lane.b32.xlu0 %v16724_v60, %s16546_s13 }
 0x871   :  { %8280 = vrot.lane.b32.xlu1 %v22494_v61, %s16545_s12 }
 0x873   :  { %8074 = vrot.lane.b32.xlu0 %v16748_v18, %s16546_s13 }
 0x875   :  { %8331 = vrot.lane.b32.xlu1 %v22496_v54, %s16545_s12 }
 0x877   :  { %8125 = vrot.lane.b32.xlu0 %v16744_v16, %s16546_s13 }
 0x879   :  { %8382 = vrot.lane.b32.xlu1 %v22690_v53, %s16545_s12 }
 0x87b   :  { %8176 = vrot.lane.b32.xlu0 %v16768_v44, %s16546_s13 }
 0x87d   :  { %8433 = vrot.lane.b32.xlu1 %v22691_v36, %s16545_s12 }
 0x87f   :  { %8227 = vrot.lane.b32.xlu0 %v22520_v41, %s16546_s13 }
 0x881   :  { %8484 = vrot.lane.b32.xlu1 %v22693_v4, %s16545_s12 }
 0x883   :  { %8278 = vrot.lane.b32.xlu0 %v22494_v61, %s16546_s13 }
 0x885   :  { %v6712_v23 = vpop.xlane.xlu1 %6711  ;;  %8535 = vrot.lane.b32.xlu1 %v22695_v25, %s16545_s12 }
 0x886   :  { %16091 = vrcp.f32 %v6712_v23  ;;  %v22698_v23 = vld [vmem:[#allocation13_spill] sm:$0xff] }
 0x887   :  { %8329 = vrot.lane.b32.xlu0 %v22496_v54, %s16546_s13  ;;  %v6715_v2 = vpop.xlane.xlu0 %6714 }
 0x888   :  { %16093 = vrcp.f32 %v6715_v2 }
 0x889   :  { %8586 = vrot.lane.b32.xlu1 %v22696_v24, %s16545_s12  ;;  %v6718_v14 = vpop.xlane.xlu1 %6717 }
 0x88a   :  { %16095 = vrcp.f32 %v6718_v14 }
 0x88b   :  { %8380 = vrot.lane.b32.xlu0 %v22690_v53, %s16546_s13 }
 0x88d   :  { %8637 = vrot.lane.b32.xlu1 %v22697_v28, %s16545_s12  ;;  %v6724_v3 = vpop.xlane.xlu1 %6723 }
 0x88e   :  { %v6721_v15 = vpop.xlane.xlu0 %6720 }
 0x88f   :  { %16097 = vrcp.f32 %v6721_v15  ;;  %8431 = vrot.lane.b32.xlu0 %v22691_v36, %s16546_s13  ;;  %v22699_v15 = vld [vmem:[#allocation12_spill] sm:$0xff] }
 0x890   :  { %v16092_v34 = vpop.eup %16091  ;;  %16099 = vrcp.f32 %v6724_v3 }
 0x891   :  { %8688 = vrot.lane.b32.xlu1 %v22698_v23, %s16545_s12  ;;  %v6730_v2 = vpop.xlane.xlu1 %6729  ;;  %v6870_v30 = vmul.f32 %v16092_v34, %v18933_v46  ;;  %v22700_v46 = vld [vmem:[#allocation95_spill] sm:$0xff] }
 0x892   :  { %v16094_v11 = vpop.eup %16093  ;;  %v6727_v35 = vpop.xlane.xlu0 %6726 }
 0x893   :  { %v6871_v14 = vmul.f32 %v16094_v11, %v18937_v21  ;;  %16101 = vrcp.f32 %v6727_v35  ;;  %8482 = vrot.lane.b32.xlu0 %v22693_v4, %s16546_s13  ;;  %v22701_v21 = vmov 0.0   ;;  %v22702_v11 = vld [vmem:[#allocation17_spill] sm:$0xff] }
 0x894   :  { %16103 = vrcp.f32 %v6730_v2  ;;  %v16096_v43 = vpop.eup %16095 }
 0x895   :  { %8739 = vrot.lane.b32.xlu1 %v22699_v15, %s16545_s12  ;;  %v6736_v5 = vpop.xlane.xlu1 %6735  ;;  %v6910_v3 = vpack.c.bf16 %v6871_v14, %v6870_v30 }
 0x896   :  { %v6733_v10 = vpop.xlane.xlu0 %6732 }
 0x897   :  { %16105 = vrcp.f32 %v6733_v10  ;;  %8533 = vrot.lane.b32.xlu0 %v22695_v25, %s16546_s13  ;;  %14811 = vmatmul.mubr.msk.bf16.vlgmr.msra.gmra.mrb[200].mxu0 %vm1549_vm3, %v6910_v3  ;;  %v6872_v10 = vmul.f32 %v16096_v43, %v18943_v0  ;;  %v22704_v43 = vld [vmem:[#allocation97_spill] sm:$0xff] }
 0x898   :  { %14821 = vmatpush3.bf16.msra.mxu0 %v22700_v46  ;;  %14822 = vmatprep.mubr.msk.bf16.mxu0 %vm16536_vm1, %v22701_v21  ;;  %16107 = vrcp.f32 %v6736_v5  ;;  %v22703_v5 = vld [vmem:[#allocation15_spill] sm:$0xff] }
 0x899   :  { %v16098_v35 = vpop.eup %16097  ;;  %8790 = vrot.lane.b32.xlu1 %v22702_v11, %s16545_s12  ;;  %v6742_v34 = vpop.xlane.xlu1 %6741  ;;  %14832 = vmatprep.subr.bf16.mxu0 %v22701_v21 }
 0x89a   :  { %v6873_v30 = vmul.f32 %v16098_v35, %v18951_v20  ;;  %v6739_v2 = vpop.xlane.xlu0 %6738  ;;  %v16100_v14 = vpop.eup %16099 }
 0x89b   :  { %16109 = vrcp.f32 %v6739_v2  ;;  %8584 = vrot.lane.b32.xlu0 %v22696_v24, %s16546_s13  ;;  %v6874_v59 = vmul.f32 %v16100_v14, %v18949_v17 }
 0x89c   :  { %v6911_v3 = vpack.c.bf16 %v6873_v30, %v6872_v10  ;;  %16111 = vrcp.f32 %v6742_v34 }
 0x89d   :  { %v16102_v46 = vpop.eup %16101  ;;  %8841 = vrot.lane.b32.xlu1 %v22703_v5, %s16545_s12  ;;  %v6748_v38 = vpop.xlane.xlu1 %6747 }
 0x89e   :  { %v6875_v13 = vmul.f32 %v16102_v46, %v18961_v22  ;;  %14817 = vmatmul.mubr.msk.bf16.vlgmr.msra.gmra.mrb[240].mxu1 %vm1549_vm3, %v6911_v3  ;;  %v6745_v0 = vpop.xlane.xlu0 %6744  ;;  %v16104_v20 = vpop.eup %16103 }
 0x89f   :  { %14827 = vmatpush3.bf16.msra.mxu1 %v22704_v43  ;;  %16113 = vrcp.f32 %v6745_v0  ;;  %8635 = vrot.lane.b32.xlu0 %v22697_v28, %s16546_s13  ;;  %v6876_v22 = vmul.f32 %v16104_v20, %v18959_v19  ;;  %v22706_v0 = vld [vmem:[#allocation99_spill] sm:$0xff] }
 0x8a0   :  { %v6912_v35 = vpack.c.bf16 %v6875_v13, %v6874_v59  ;;  %14828 = vmatprep.mubr.msk.bf16.mxu1 %vm16536_vm1, %v22701_v21  ;;  %14838 = vmatprep.subr.bf16.mxu1 %v22701_v21  ;;  %16115 = vrcp.f32 %v6748_v38  ;;  %v22705_v59 = vld [vmem:[#allocation96_spill] sm:$0xff] }
 0x8a1   :  { %v16106_v34 = vpop.eup %16105  ;;  %8839 = vrot.lane.b32.xlu1 %v22703_v5, %s16546_s13  ;;  %v6754_v17 = vpop.xlane.xlu1 %6753 }
 0x8a2   :  { %v6877_v10 = vmul.f32 %v16106_v34, %v18971_v56  ;;  %14823 = vmatmul.mubr.msk.bf16.vlgmr.msra.gmra.mrb[204].mxu0 %vm1549_vm3, %v6912_v35  ;;  %v6751_v30 = vpop.xlane.xlu0 %6750  ;;  %v16108_v2 = vpop.eup %16107 }
 0x8a3   :  { %14833 = vmatpush3.bf16.msra.mxu0 %v22705_v59  ;;  %16117 = vrcp.f32 %v6751_v30  ;;  %8686 = vrot.lane.b32.xlu0 %v22698_v23, %s16546_s13  ;;  %v6878_v56 = vmul.f32 %v16108_v2, %v18969_v27  ;;  %v22708_v59 = vld [vmem:[#allocation101_spill] sm:$0xff] }
 0x8a4   :  { %v6913_v13 = vpack.c.bf16 %v6877_v10, %v6876_v22  ;;  %14834 = vmatprep.mubr.msk.bf16.mxu0 %vm16536_vm1, %v22701_v21  ;;  %14844 = vmatprep.subr.bf16.mxu0 %v22701_v21  ;;  %16119 = vrcp.f32 %v6754_v17  ;;  %v22707_v17 = vld [vmem:[#allocation98_spill] sm:$0xff] }
 0x8a5   :  { %v16110_v38 = vpop.eup %16109  ;;  %9390 = vrot.lane.b32.xlu1 %v16708_v42, %s16547_s14  ;;  %v6760_v19 = vpop.xlane.xlu1 %6759 }
 0x8a6   :  { %v6879_v14 = vmul.f32 %v16110_v38, %v18981_v48  ;;  %14829 = vmatmul.mubr.msk.bf16.vlgmr.msra.gmra.mrb[244].mxu1 %vm1549_vm3, %v6913_v13  ;;  %v6757_v3 = vpop.xlane.xlu0 %6756  ;;  %v16112_v46 = vpop.eup %16111 }
 0x8a7   :  { %14839 = vmatpush3.bf16.msra.mxu1 %v22706_v0  ;;  %16121 = vrcp.f32 %v6757_v3  ;;  %8737 = vrot.lane.b32.xlu0 %v22699_v15, %s16546_s13  ;;  %v6880_v48 = vmul.f32 %v16112_v46, %v18979_v8  ;;  %v22710_v0 = vld [vmem:[#allocation103_spill] sm:$0xff] }
 0x8a8   :  { %v6914_v20 = vpack.c.bf16 %v6879_v14, %v6878_v56  ;;  %14840 = vmatprep.mubr.msk.bf16.mxu1 %vm16536_vm1, %v22701_v21  ;;  %14850 = vmatprep.subr.bf16.mxu1 %v22701_v21  ;;  %16123 = vrcp.f32 %v6760_v19  ;;  %v22709_v56 = vld [vmem:[#allocation100_spill] sm:$0xff] }
 0x8a9   :  { %v16114_v42 = vpop.eup %16113  ;;  %9484 = vrot.lane.b32.xlu1 %v16728_v62, %s16547_s14  ;;  %v6766_v27 = vpop.xlane.xlu1 %6765 }
 0x8aa   :  { %v6881_v43 = vmul.f32 %v16114_v42, %v18991_v1  ;;  %14835 = vmatmul.mubr.msk.bf16.vlgmr.msra.gmra.mrb[208].mxu0 %vm1549_vm3, %v6914_v20  ;;  %v6763_v35 = vpop.xlane.xlu0 %6762  ;;  %v16116_v34 = vpop.eup %16115 }
 0x8ab   :  { %14845 = vmatpush3.bf16.msra.mxu0 %v22707_v17  ;;  %16125 = vrcp.f32 %v6763_v35  ;;  %8788 = vrot.lane.b32.xlu0 %v22702_v11, %s16546_s13  ;;  %v6882_v1 = vmul.f32 %v16116_v34, %v18989_v6  ;;  %v22712_v17 = vld [vmem:[#allocation105_spill] sm:$0xff] }
 0x8ac   :  { %v6915_v22 = vpack.c.bf16 %v6881_v43, %v6880_v48  ;;  %14846 = vmatprep.mubr.msk.bf16.mxu0 %vm16536_vm1, %v22701_v21  ;;  %14856 = vmatprep.subr.bf16.mxu0 %v22701_v21  ;;  %16127 = vrcp.f32 %v6766_v27  ;;  %v22711_v48 = vld [vmem:[#allocation102_spill] sm:$0xff] }
 0x8ad   :  { %v16118_v62 = vpop.eup %16117  ;;  %9578 = vrot.lane.b32.xlu1 %v16748_v18, %s16547_s14  ;;  %v6772_v8 = vpop.xlane.xlu1 %6771 }
 0x8ae   :  { %v6883_v10 = vmul.f32 %v16118_v62, %v19001_v49  ;;  %14841 = vmatmul.mubr.msk.bf16.vlgmr.msra.gmra.mrb[248].mxu1 %vm1549_vm3, %v6915_v22  ;;  %v6769_v30 = vpop.xlane.xlu0 %6768  ;;  %v16120_v2 = vpop.eup %16119 }
 0x8af   :  { %14851 = vmatpush3.bf16.msra.mxu1 %v22708_v59  ;;  %16129 = vrcp.f32 %v6769_v30  ;;  %9437 = vrot.lane.b32.xlu0 %v16704_v40, %s16547_s14  ;;  %v6884_v49 = vmul.f32 %v16120_v2, %v18999_v50  ;;  %v22714_v59 = vld [vmem:[#allocation107_spill] sm:$0xff] }
 0x8b0   :  { %v6916_v13 = vpack.c.bf16 %v6883_v10, %v6882_v1  ;;  %14852 = vmatprep.mubr.msk.bf16.mxu1 %vm16536_vm1, %v22701_v21  ;;  %14862 = vmatprep.subr.bf16.mxu1 %v22701_v21  ;;  %16131 = vrcp.f32 %v6772_v8  ;;  %v22713_v1 = vld [vmem:[#allocation104_spill] sm:$0xff] }
 0x8b1   :  { %v16122_v18 = vpop.eup %16121  ;;  %9672 = vrot.lane.b32.xlu1 %v16768_v44, %s16547_s14  ;;  %v6778_v6 = vpop.xlane.xlu1 %6777 }
 0x8b2   :  { %v6885_v38 = vmul.f32 %v16122_v18, %v19011_v63  ;;  %14847 = vmatmul.mubr.msk.bf16.vlgmr.msra.gmra.mrb[212].mxu0 %vm1549_vm3, %v6916_v13  ;;  %v6775_v19 = vpop.xlane.xlu0 %6774  ;;  %v16124_v40 = vpop.eup %16123 }
 0x8b3   :  { %14857 = vmatpush3.bf16.msra.mxu0 %v22709_v56  ;;  %16133 = vrcp.f32 %v6775_v19  ;;  %9531 = vrot.lane.b32.xlu0 %v16724_v60, %s16547_s14  ;;  %v6886_v63 = vmul.f32 %v16124_v40, %v19009_v45 }
 0x8b4   :  { %v6917_v14 = vpack.c.bf16 %v6885_v38, %v6884_v49  ;;  %14858 = vmatprep.mubr.msk.bf16.mxu0 %vm16536_vm1, %v22701_v21  ;;  %14868 = vmatprep.subr.bf16.mxu0 %v22701_v21  ;;  %16135 = vrcp.f32 %v6778_v6  ;;  %v22715_v38 = vld [vmem:[#allocation106_spill] sm:$0xff] }
 0x8b5   :  { %v16126_v44 = vpop.eup %16125  ;;  %9766 = vrot.lane.b32.xlu1 %v22494_v61, %s16547_s14  ;;  %v6784_v50 = vpop.xlane.xlu1 %6783 }
 0x8b6   :  { %v6887_v3 = vmul.f32 %v16126_v44, %v19021_v52  ;;  %14853 = vmatmul.mubr.msk.bf16.vlgmr.msra.gmra.mrb[252].mxu1 %vm1549_vm3, %v6917_v14  ;;  %v6781_v46 = vpop.xlane.xlu0 %6780  ;;  %v16128_v60 = vpop.eup %16127  ;;  %v22716_v44 = vld [vmem:[#allocation108_spill] sm:$0xff] }
 0x8b7   :  { %14863 = vmatpush3.bf16.msra.mxu1 %v22710_v0  ;;  %16137 = vrcp.f32 %v6781_v46  ;;  %9625 = vrot.lane.b32.xlu0 %v16744_v16, %s16547_s14  ;;  %v6888_v52 = vmul.f32 %v16128_v60, %v19019_v32  ;;  %v22717_v0 = vld [vmem:[#allocation109_spill] sm:$0xff] }
 0x8b8   :  { %v6918_v20 = vpack.c.bf16 %v6887_v3, %v6886_v63  ;;  %14864 = vmatprep.mubr.msk.bf16.mxu1 %vm16536_vm1, %v22701_v21  ;;  %14874 = vmatprep.subr.bf16.mxu1 %v22701_v21  ;;  %16139 = vrcp.f32 %v6784_v50 }
 0x8b9   :  { %v16130_v61 = vpop.eup %16129  ;;  %9860 = vrot.lane.b32.xlu1 %v22690_v53, %s16547_s14  ;;  %v6790_v45 = vpop.xlane.xlu1 %6789 }
 0x8ba   :  { %v6889_v42 = vmul.f32 %v16130_v61, %v19031_v47  ;;  %14859 = vmatmul.mubr.msk.bf16.vlgmr.msra.gmra.mrb[216].mxu0 %vm1549_vm3, %v6918_v20  ;;  %v6787_v27 = vpop.xlane.xlu0 %6786  ;;  %v16132_v16 = vpop.eup %16131 }
 0x8bb   :  { %14869 = vmatpush3.bf16.msra.mxu0 %v22711_v48  ;;  %16141 = vrcp.f32 %v6787_v27  ;;  %9719 = vrot.lane.b32.xlu0 %v22520_v41, %s16547_s14  ;;  %v6890_v47 = vmul.f32 %v16132_v16, %v19029_v29  ;;  %v22719_v16 = vld [vmem:[#allocation110_spill] sm:$0xff] }
 0x8bc   :  { %v6919_v43 = vpack.c.bf16 %v6889_v42, %v6888_v52  ;;  %14870 = vmatprep.mubr.msk.bf16.mxu0 %vm16536_vm1, %v22701_v21  ;;  %14880 = vmatprep.subr.bf16.mxu0 %v22701_v21  ;;  %16143 = vrcp.f32 %v6790_v45  ;;  %v22718_v52 = vld [vmem:[#allocation112_spill] sm:$0xff] }
 0x8bd   :  { %v16134_v53 = vpop.eup %16133  ;;  %9954 = vrot.lane.b32.xlu1 %v22693_v4, %s16547_s14  ;;  %v6796_v32 = vpop.xlane.xlu1 %6795 }
 0x8be   :  { %v6891_v35 = vmul.f32 %v16134_v53, %v19041_v7  ;;  %14865 = vmatmul.mubr.msk.bf16.vlgmr.msra.gmra.mrb[0].mxu1 %vm1549_vm3, %v6919_v43  ;;  %v6793_v34 = vpop.xlane.xlu0 %6792  ;;  %v16136_v41 = vpop.eup %16135 }
 0x8bf   :  { %14875 = vmatpush3.bf16.msra.mxu1 %v22712_v17  ;;  %16145 = vrcp.f32 %v6793_v34  ;;  %9813 = vrot.lane.b32.xlu0 %v22496_v54, %s16547_s14  ;;  %v6892_v7 = vmul.f32 %v16136_v41, %v19039_v51  ;;  %v22722_v17 = vld [vmem:[#allocation5_spill] sm:$0xff] }
 0x8c0   :  { %v6920_v22 = vpack.c.bf16 %v6891_v35, %v6890_v47  ;;  %14876 = vmatprep.mubr.msk.bf16.mxu1 %vm16536_vm1, %v22701_v21  ;;  %14886 = vmatprep.subr.bf16.mxu1 %v22701_v21  ;;  %16147 = vrcp.f32 %v6796_v32  ;;  %v22720_v32 = vld [vmem:[#allocation111_spill] sm:$0xff] }
 0x8c1   :  { %v16138_v4 = vpop.eup %16137  ;;  %10048 = vrot.lane.b32.xlu1 %v22696_v24, %s16547_s14  ;;  %v6802_v29 = vpop.xlane.xlu1 %6801 }
 0x8c2   :  { %v6893_v62 = vmul.f32 %v16138_v4, %v19051_v37  ;;  %14871 = vmatmul.mubr.msk.bf16.vlgmr.msra.gmra.mrb[220].mxu0 %vm1549_vm3, %v6920_v22  ;;  %v6799_v8 = vpop.xlane.xlu0 %6798  ;;  %v16140_v54 = vpop.eup %16139 }
 0x8c3   :  { %14881 = vmatpush3.bf16.msra.mxu0 %v22713_v1  ;;  %16149 = vrcp.f32 %v6799_v8  ;;  %9907 = vrot.lane.b32.xlu0 %v22691_v36, %s16547_s14  ;;  %v6894_v37 = vmul.f32 %v16140_v54, %v19049_v58  ;;  %v22724_v8 = vld [vmem:[#allocation116_spill] sm:$0xff] }
 0x8c4   :  { %v6921_v10 = vpack.c.bf16 %v6893_v62, %v6892_v7  ;;  %14882 = vmatprep.mubr.msk.bf16.mxu0 %vm16536_vm1, %v22701_v21  ;;  %14892 = vmatprep.subr.bf16.mxu0 %v22701_v21  ;;  %16151 = vrcp.f32 %v6802_v29  ;;  %v22723_v7 = vld [vmem:[#allocation113_spill] sm:$0xff] }
 0x8c5   :  { %v16142_v24 = vpop.eup %16141  ;;  %10095 = vrot.lane.b32.xlu1 %v22697_v28, %s16547_s14  ;;  %v6808_v51 = vpop.xlane.xlu1 %6807 }
 0x8c6   :  { %v6895_v30 = vmul.f32 %v16142_v24, %v19061_v33  ;;  %14877 = vmatmul.mubr.msk.bf16.vlgmr.msra.gmra.mrb[4].mxu1 %vm1549_vm3, %v6921_v10  ;;  %v6805_v2 = vpop.xlane.xlu0 %6804  ;;  %v16144_v36 = vpop.eup %16143  ;;  %v22725_v24 = vld [vmem:[#allocation6_spill] sm:$0xff] }
 0x8c7   :  { %14887 = vmatpush3.bf16.msra.mxu1 %v22714_v59  ;;  %16153 = vrcp.f32 %v6805_v2  ;;  %10001 = vrot.lane.b32.xlu0 %v22695_v25, %s16547_s14  ;;  %v6896_v33 = vmul.f32 %v16144_v36, %v19059_v57  ;;  %v22726_v2 = vld [vmem:[#allocation115_spill] sm:$0xff]  ;;  %v22727_v59 = vld [vmem:[#allocation117_spill] sm:$0xff] }
 0x8c8   :  { %v6922_v13 = vpack.c.bf16 %v6895_v30, %v6894_v37  ;;  %14888 = vmatprep.mubr.msk.bf16.mxu1 %vm16536_vm1, %v22701_v21  ;;  %14898 = vmatprep.subr.bf16.mxu1 %v22701_v21  ;;  %16155 = vrcp.f32 %v6808_v51 }
 0x8c9   :  { %v16146_v28 = vpop.eup %16145  ;;  %v6814_v58 = vpop.xlane.xlu1 %6813 }
 0x8ca   :  { %v6897_v18 = vmul.f32 %v16146_v28, %v19071_v31  ;;  %14883 = vmatmul.mubr.msk.bf16.vlgmr.msra.gmra.mrb[224].mxu0 %vm1549_vm3, %v6922_v13  ;;  %v6811_v6 = vpop.xlane.xlu0 %6810  ;;  %v16148_v49 = vpop.eup %16147 }
 0x8cb   :  { %14893 = vmatpush3.bf16.msra.mxu0 %v22715_v38  ;;  %16157 = vrcp.f32 %v6811_v6  ;;  %14894 = vmatprep.mubr.msk.bf16.mxu0 %vm16536_vm1, %v22701_v21  ;;  %v6898_v57 = vmul.f32 %v16148_v49, %v19069_v9 }
 0x8cc   :  { %v6923_v25 = vpack.c.bf16 %v6897_v18, %v6896_v33  ;;  %14904 = vmatprep.subr.bf16.mxu0 %v22701_v21  ;;  %16159 = vrcp.f32 %v6814_v58 }
 0x8cd   :  { %v16150_v19 = vpop.eup %16149  ;;  %v6820_v40 = vpop.xlane.xlu1 %6819 }
 0x8ce   :  { %v6899_v31 = vmul.f32 %v16150_v19, %v19081_v12  ;;  %14889 = vmatmul.mubr.msk.bf16.vlgmr.msra.gmra.mrb[8].mxu1 %vm1549_vm3, %v6923_v25  ;;  %v6817_v56 = vpop.xlane.xlu0 %6816  ;;  %v16152_v14 = vpop.eup %16151 }
 0x8cf   :  { %14899 = vmatpush3.bf16.msra.mxu1 %v22716_v44  ;;  %16161 = vrcp.f32 %v6817_v56  ;;  %14900 = vmatprep.mubr.msk.bf16.mxu1 %vm16536_vm1, %v22701_v21  ;;  %v6900_v9 = vmul.f32 %v16152_v14, %v19079_v55 }
 0x8d0   :  { %v6924_v50 = vpack.c.bf16 %v6899_v31, %v6898_v57  ;;  %14910 = vmatprep.subr.bf16.mxu1 %v22701_v21  ;;  %16163 = vrcp.f32 %v6820_v40 }
 0x8d1   :  { %v16154_v63 = vpop.eup %16153  ;;  %v6826_v3 = vpop.xlane.xlu1 %6825 }
 0x8d2   :  { %v6901_v12 = vmul.f32 %v16154_v63, %v19091_v26  ;;  %14895 = vmatmul.mubr.msk.bf16.vlgmr.msra.gmra.mrb[228].mxu0 %vm1549_vm3, %v6924_v50  ;;  %v6823_v46 = vpop.xlane.xlu0 %6822  ;;  %v16156_v60 = vpop.eup %16155 }
 0x8d3   :  { %14905 = vmatpush3.bf16.msra.mxu0 %v22717_v0  ;;  %16165 = vrcp.f32 %v6823_v46  ;;  %14906 = vmatprep.mubr.msk.bf16.mxu0 %vm16536_vm1, %v22701_v21  ;;  %v6902_v55 = vmul.f32 %v16156_v60, %v19089_v39  ;;  %v22721_v39 = vld [vmem:[#allocation114_spill] sm:$0xff] }
 0x8d4   :  { %v6925_v20 = vpack.c.bf16 %v6901_v12, %v6900_v9  ;;  %14916 = vmatprep.subr.bf16.mxu0 %v22701_v21  ;;  %16167 = vrcp.f32 %v6826_v3 }
 0x8d5   :  { %v16158_v61 = vpop.eup %16157  ;;  %v7924_v45 = vpop.permute.xlu1 %7923 }
 0x8d6   :  { %v6903_v26 = vmul.f32 %v16158_v61, %v22718_v52  ;;  %14901 = vmatmul.mubr.msk.bf16.vlgmr.msra.gmra.mrb[12].mxu1 %vm1549_vm3, %v6925_v20  ;;  %v6829_v42 = vpop.xlane.xlu0 %6828  ;;  %v16160_v27 = vpop.eup %16159  ;;  %v7929_v49 = vsel %vm511_vm2, %v7924_v45, 0 }
 0x8d7   :  { %14911 = vmatpush3.bf16.msra.mxu1 %v22719_v16  ;;  %16169 = vrcp.f32 %v6829_v42  ;;  %14912 = vmatprep.mubr.msk.bf16.mxu1 %vm16536_vm1, %v22701_v21  ;;  %v6904_v47 = vmul.f32 %v16160_v27, %v22720_v32 }
 0x8d8   :  { %v6926_v48 = vpack.c.bf16 %v6903_v26, %v6902_v55  ;;  %14922 = vmatprep.subr.bf16.mxu1 %v22701_v21 }
 0x8d9   :  { %v16162_v43 = vpop.eup %16161  ;;  %v7975_v53 = vpop.permute.xlu1 %7974 }
 0x8da   :  { %v6905_v35 = vmul.f32 %v16162_v43, %v22721_v39  ;;  %14907 = vmatmul.mubr.msk.bf16.vlgmr.msra.gmra.mrb[232].mxu0 %vm1549_vm3, %v6926_v48  ;;  %v7873_v34 = vpop.permute.xlu0 %7872  ;;  %v16164_v41 = vpop.eup %16163  ;;  %v7980_v19 = vsel %vm511_vm2, %v7975_v53, 0 }
 0x8db   :  { %14917 = vmatpush3.bf16.msra.mxu0 %v22722_v17  ;;  %14918 = vmatprep.mubr.msk.bf16.mxu0 %vm16536_vm1, %v22701_v21  ;;  %v6906_v62 = vmul.f32 %v16164_v41, %v22723_v7  ;;  %v7878_v58 = vsel %vm511_vm2, %v7873_v34, 0 }
 0x8dc   :  { %v6927_v22 = vpack.c.bf16 %v6905_v35, %v6904_v47  ;;  %14928 = vmatprep.subr.bf16.mxu0 %v22701_v21 }
 0x8dd   :  { %v16166_v4 = vpop.eup %16165  ;;  %v8026_v29 = vpop.permute.xlu1 %8025 }
 0x8de   :  { %v6907_v54 = vmul.f32 %v16166_v4, %v22724_v8  ;;  %14913 = vmatmul.mubr.msk.bf16.vlgmr.msra.gmra.mrb[16].mxu1 %vm1549_vm3, %v6927_v22  ;;  %v7871_v1 = vpop.permute.xlu0 %7870  ;;  %v16168_v10 = vpop.eup %16167  ;;  %v8031_v31 = vsel %vm511_vm2, %v8026_v29, 0 }
 0x8df   :  { %14923 = vmatpush3.bf16.msra.mxu1 %v22725_v24  ;;  %14924 = vmatprep.mubr.msk.bf16.mxu1 %vm16536_vm1, %v22701_v21  ;;  %v6908_v36 = vmul.f32 %v16168_v10, %v22726_v2 }
 0x8e0   :  { %v6928_v51 = vpack.c.bf16 %v6907_v54, %v6906_v62  ;;  %14934 = vmatprep.subr.bf16.mxu1 %v22701_v21 }
 0x8e1   :  { %v16170_v37 = vpop.eup %16169  ;;  %v8077_v30 = vpop.permute.xlu1 %8076 }
 0x8e2   :  { %v6909_v13 = vmul.f32 %v16170_v37, %v22727_v59  ;;  %14919 = vmatmul.mubr.msk.bf16.vlgmr.msra.gmra.mrb[236].mxu0 %vm1549_vm3, %v6928_v51  ;;  %v7922_v28 = vpop.permute.xlu0 %7921  ;;  %v8082_v44 = vsel %vm511_vm2, %v8077_v30, 0 }
 0x8e3   :  { %14930 = vmatprep.mubr.msk.bf16.mxu0 %vm16536_vm1, %v22701_v21 }
 0x8e4   :  { %v6929_v33 = vpack.c.bf16 %v6909_v13, %v6908_v36  ;;  %14929 = vmatpush3.bf16.xpose.msra.mxu0 %v7878_v58 }
 0x8e5   :  { %v8128_v18 = vpop.permute.xlu1 %8127  ;;  %14940 = vmatprep.subr.bf16.mxu0 %v22701_v21 }
 0x8e6   :  { %14925 = vmatmul.mubr.msk.bf16.vlgmr.msra.gmra.mrb[20].mxu1 %vm1549_vm3, %v6929_v33  ;;  %v7973_v6 = vpop.permute.xlu0 %7972  ;;  %v8133_v3 = vsel %vm511_vm2, %v8128_v18, 0 }
 0x8e7   :  { %14936 = vmatprep.mubr.msk.bf16.mxu1 %vm16536_vm1, %v22701_v21 }
 0x8e8   :  { %14935 = vmatpush3.bf16.xpose.msra.mxu1 %v7929_v49 }
 0x8e9   :  { %v8179_v38 = vpop.permute.xlu1 %8178  ;;  %14946 = vmatprep.subr.bf16.mxu1 %v22701_v21 }
 0x8ea   :  { %v8024_v25 = vpop.permute.xlu0 %8023  ;;  %v8184_v46 = vsel %vm511_vm2, %v8179_v38, 0 }
 0x8eb   :  { %14931 = vmatmul.mubr.msk.bf16.vlgmr.msra.gmra.mrb[240].mxu0 %vm511_vm2, %v7871_v1 }
 0x8ec   :  { %14941 = vmatpush3.bf16.xpose.msra.mxu0 %v7980_v19  ;;  %14942 = vmatprep.mubr.msk.bf16.mxu0 %vm16536_vm1, %v22701_v21 }
 0x8ed   :  { %v8230_v40 = vpop.permute.xlu1 %8229  ;;  %14952 = vmatprep.subr.bf16.mxu0 %v22701_v21 }
 0x8ee   :  { %v8075_v57 = vpop.permute.xlu0 %8074  ;;  %v8235_v20 = vsel %vm511_vm2, %v8230_v40, 0 }
 0x8ef   :  { %14937 = vmatmul.mubr.msk.bf16.vlgmr.msra.gmra.mrb[24].mxu1 %vm511_vm2, %v7922_v28 }
 0x8f0   :  { %14947 = vmatpush3.bf16.xpose.msra.mxu1 %v8031_v31  ;;  %14948 = vmatprep.mubr.msk.bf16.mxu1 %vm16536_vm1, %v22701_v21 }
 0x8f1   :  { %v8281_v56 = vpop.permute.xlu1 %8280  ;;  %14958 = vmatprep.subr.bf16.mxu1 %v22701_v21 }
 0x8f2   :  { %v8126_v14 = vpop.permute.xlu0 %8125  ;;  %v8286_v55 = vsel %vm511_vm2, %v8281_v56, 0 }
 0x8f3   :  { %14943 = vmatmul.mubr.msk.bf16.vlgmr.msra.gmra.mrb[244].mxu0 %vm511_vm2, %v7973_v6 }
 0x8f4   :  { %14953 = vmatpush3.bf16.xpose.msra.mxu0 %v8082_v44  ;;  %14954 = vmatprep.mubr.msk.bf16.mxu0 %vm16536_vm1, %v22701_v21 }
 0x8f5   :  { %v8332_v50 = vpop.permute.xlu1 %8331  ;;  %14964 = vmatprep.subr.bf16.mxu0 %v22701_v21 }
 0x8f6   :  { %v8177_v63 = vpop.permute.xlu0 %8176  ;;  %v8337_v42 = vsel %vm511_vm2, %v8332_v50, 0 }
 0x8f7   :  { %14949 = vmatmul.mubr.msk.bf16.vlgmr.msra.gmra.mrb[28].mxu1 %vm511_vm2, %v8024_v25 }
 0x8f8   :  { %14959 = vmatpush3.bf16.xpose.msra.mxu1 %v8133_v3  ;;  %14960 = vmatprep.mubr.msk.bf16.mxu1 %vm16536_vm1, %v22701_v21 }
 0x8f9   :  { %v8383_v9 = vpop.permute.xlu1 %8382  ;;  %14970 = vmatprep.subr.bf16.mxu1 %v22701_v21 }
 0x8fa   :  { %v8228_v12 = vpop.permute.xlu0 %8227  ;;  %v8388_v48 = vsel %vm511_vm2, %v8383_v9, 0 }
 0x8fb   :  { %14955 = vmatmul.mubr.msk.bf16.vlgmr.msra.gmra.mrb[248].mxu0 %vm511_vm2, %v8075_v57 }
 0x8fc   :  { %14965 = vmatpush3.bf16.xpose.msra.mxu0 %v8184_v46  ;;  %14966 = vmatprep.mubr.msk.bf16.mxu0 %vm16536_vm1, %v22701_v21 }
 0x8fd   :  { %v8434_v60 = vpop.permute.xlu1 %8433  ;;  %14976 = vmatprep.subr.bf16.mxu0 %v22701_v21 }
 0x8fe   :  { %v8279_v0 = vpop.permute.xlu0 %8278  ;;  %v8439_v53 = vsel %vm511_vm2, %v8434_v60, 0 }
 0x8ff   :  { %14961 = vmatmul.mubr.msk.bf16.vlgmr.msra.gmra.mrb[32].mxu1 %vm511_vm2, %v8126_v14 }
 0x900   :  { %14971 = vmatpush3.bf16.xpose.msra.mxu1 %v8235_v20  ;;  %14972 = vmatprep.mubr.msk.bf16.mxu1 %vm16536_vm1, %v22701_v21 }
 0x901   :  { %v8485_v61 = vpop.permute.xlu1 %8484  ;;  %14982 = vmatprep.subr.bf16.mxu1 %v22701_v21 }
 0x902   :  { %v8330_v45 = vpop.permute.xlu0 %8329  ;;  %v8490_v47 = vsel %vm511_vm2, %v8485_v61, 0 }
 0x903   :  { %14967 = vmatmul.mubr.msk.bf16.vlgmr.msra.gmra.mrb[252].mxu0 %vm511_vm2, %v8177_v63 }
 0x904   :  { %14977 = vmatpush3.bf16.xpose.msra.mxu0 %v8286_v55  ;;  %14978 = vmatprep.mubr.msk.bf16.mxu0 %vm16536_vm1, %v22701_v21 }
 0x905   :  { %v8536_v52 = vpop.permute.xlu1 %8535  ;;  %14988 = vmatprep.subr.bf16.mxu0 %v22701_v21 }
 0x906   :  { %v8381_v26 = vpop.permute.xlu0 %8380  ;;  %v8541_v34 = vsel %vm511_vm2, %v8536_v52, 0 }
 0x907   :  { %14973 = vmatmul.mubr.msk.bf16.vlgmr.msra.gmra.mrb[36].mxu1 %vm511_vm2, %v8228_v12 }
 0x908   :  { %14983 = vmatpush3.bf16.xpose.msra.mxu1 %v8337_v42  ;;  %14984 = vmatprep.mubr.msk.bf16.mxu1 %vm16536_vm1, %v22701_v21 }
 0x909   :  { %v8587_v27 = vpop.permute.xlu1 %8586  ;;  %14994 = vmatprep.subr.bf16.mxu1 %v22701_v21 }
 0x90a   :  { %v8432_v16 = vpop.permute.xlu0 %8431  ;;  %v8592_v17 = vsel %vm511_vm2, %v8587_v27, 0 }
 0x90b   :  { %14979 = vmatmul.mubr.msk.bf16.vlgmr.msra.gmra.mrb[0].mxu0 %vm511_vm2, %v8279_v0 }
 0x90c   :  { %14989 = vmatpush3.bf16.xpose.msra.mxu0 %v8388_v48  ;;  %14990 = vmatprep.mubr.msk.bf16.mxu0 %vm16536_vm1, %v22701_v21 }
 0x90d   :  { %15000 = vmatprep.subr.bf16.mxu0 %v22701_v21  ;;  %v8638_v32 = vpop.permute.xlu1 %8637 }
 0x90e   :  { %v8483_v43 = vpop.permute.xlu0 %8482  ;;  %v8643_v4 = vsel %vm511_vm2, %v8638_v32, 0 }
 0x90f   :  { %14985 = vmatmul.mubr.msk.bf16.vlgmr.msra.gmra.mrb[40].mxu1 %vm511_vm2, %v8330_v45 }
 0x910   :  { %14995 = vmatpush3.bf16.xpose.msra.mxu1 %v8439_v53  ;;  %14996 = vmatprep.mubr.msk.bf16.mxu1 %vm16536_vm1, %v22701_v21 }
 0x911   :  { %15006 = vmatprep.subr.bf16.mxu1 %v22701_v21  ;;  %v8689_v35 = vpop.permute.xlu1 %8688 }
 0x912   :  { %v8534_v39 = vpop.permute.xlu0 %8533  ;;  %v8694_v62 = vsel %vm511_vm2, %v8689_v35, 0 }
 0x913   :  { %14991 = vmatmul.mubr.msk.bf16.vlgmr.msra.gmra.mrb[4].mxu0 %vm511_vm2, %v8381_v26 }
 0x914   :  { %15001 = vmatpush3.bf16.xpose.msra.mxu0 %v8490_v47  ;;  %15002 = vmatprep.mubr.msk.bf16.mxu0 %vm16536_vm1, %v22701_v21 }
 0x915   :  { %15012 = vmatprep.subr.bf16.mxu0 %v22701_v21  ;;  %v8740_v22 = vpop.permute.xlu1 %8739 }
 0x916   :  { %v8585_v41 = vpop.permute.xlu0 %8584  ;;  %v8745_v54 = vsel %vm511_vm2, %v8740_v22, 0 }
 0x917   :  { %14997 = vmatmul.mubr.msk.bf16.vlgmr.msra.gmra.mrb[44].mxu1 %vm511_vm2, %v8432_v16 }
 0x918   :  { %15007 = vmatpush3.bf16.xpose.msra.mxu1 %v8541_v34  ;;  %15008 = vmatprep.mubr.msk.bf16.mxu1 %vm16536_vm1, %v22701_v21 }
 0x919   :  { %15018 = vmatprep.subr.bf16.mxu1 %v22701_v21  ;;  %v8791_v7 = vpop.permute.xlu1 %8790 }
 0x91a   :  { %v8636_v29 = vpop.permute.xlu0 %8635  ;;  %v8796_v10 = vsel %vm511_vm2, %v8791_v7, 0 }
 0x91b   :  { %15003 = vmatmul.mubr.msk.bf16.vlgmr.msra.gmra.mrb[8].mxu0 %vm511_vm2, %v8483_v43 }
 0x91c   :  { %15013 = vmatpush3.bf16.xpose.msra.mxu0 %v8592_v17  ;;  %15014 = vmatprep.mubr.msk.bf16.mxu0 %vm16536_vm1, %v22701_v21 }
 0x91d   :  { %15024 = vmatprep.subr.bf16.mxu0 %v22701_v21  ;;  %v8842_v1 = vpop.permute.xlu1 %8841 }
 0x91e   :  { %v8687_v8 = vpop.permute.xlu0 %8686  ;;  %v8847_v37 = vsel %vm511_vm2, %v8842_v1, 0 }
 0x91f   :  { %15009 = vmatmul.mubr.msk.bf16.vlgmr.msra.gmra.mrb[48].mxu1 %vm511_vm2, %v8534_v39 }
 0x920   :  { %15019 = vmatpush3.bf16.xpose.msra.mxu1 %v8643_v4  ;;  %15020 = vmatprep.mubr.msk.bf16.mxu1 %vm16536_vm1, %v22701_v21 }
 0x921   :  { %15030 = vmatprep.subr.bf16.mxu1 %v22701_v21  ;;  %v8840_v51 = vpop.permute.xlu1 %8839 }
 0x922   :  { %v8738_v24 = vpop.permute.xlu0 %8737 }
 0x923   :  { %15015 = vmatmul.mubr.msk.bf16.vlgmr.msra.gmra.mrb[12].mxu0 %vm511_vm2, %v8585_v41 }
 0x924   :  { %15025 = vmatpush3.bf16.xpose.msra.mxu0 %v8694_v62  ;;  %15026 = vmatprep.mubr.msk.bf16.mxu0 %vm16536_vm1, %v22701_v21 }
 0x925   :  { %15036 = vmatprep.subr.bf16.mxu0 %v22701_v21  ;;  %v9391_v2 = vpop.permute.xlu1 %9390 }
 0x926   :  { %v8789_v30 = vpop.permute.xlu0 %8788 }
 0x927   :  { %15021 = vmatmul.mubr.msk.bf16.vlgmr.msra.gmra.mrb[52].mxu1 %vm511_vm2, %v8636_v29 }
 0x928   :  { %15031 = vmatpush3.bf16.xpose.msra.mxu1 %v8745_v54  ;;  %15032 = vmatprep.mubr.msk.bf16.mxu1 %vm16536_vm1, %v22701_v21 }
 0x929   :  { %15042 = vmatprep.subr.bf16.mxu1 %v22701_v21 }
 0x92a   :  { %v9438_v36 = vpop.permute.xlu0 %9437 }
 0x92b   :  { %15027 = vmatmul.mubr.msk.bf16.vlgmr.msra.gmra.mrb[16].mxu0 %vm511_vm2, %v8687_v8 }
 0x92c   :  { %15037 = vmatpush3.bf16.xpose.msra.mxu0 %v8796_v10  ;;  %15038 = vmatprep.mubr.msk.bf16.mxu0 %vm16536_vm1, %v22701_v21 }
 0x92d   :  { %15048 = vmatprep.subr.bf16.mxu0 %v22701_v21 }
 0x92f   :  { %15033 = vmatmul.mubr.msk.bf16.vlgmr.msra.gmra.mrb[56].mxu1 %vm511_vm2, %v8738_v24 }
 0x930   :  { %15043 = vmatpush3.bf16.xpose.msra.mxu1 %v8847_v37  ;;  %15044 = vmatprep.mubr.msk.bf16.mxu1 %vm16536_vm1, %v22701_v21 }
 0x931   :  { %15054 = vmatprep.subr.bf16.mxu1 %v22701_v21 }
 0x933   :  { %15039 = vmatmul.mubr.msk.bf16.vlgmr.msra.gmra.mrb[20].mxu0 %vm511_vm2, %v8789_v30 }
 0x934   :  { %15049 = vmatpush3.bf16.msra.mxu0 %v9391_v2  ;;  %15050 = vmatprep.mubr.msk.bf16.mxu0 %vm16536_vm1, %v22701_v21 }
 0x935   :  { %15060 = vmatprep.subr.bf16.mxu0 %v22701_v21 }
 0x937   :  { %15045 = vmatmul.mubr.msk.bf16.vlgmr.msra.gmra.mrb[60].mxu1 %vm511_vm2, %v8840_v51 }
 0x938   :  { %15055 = vmatpush3.bf16.msra.mxu1 %v9438_v36  ;;  %15056 = vmatprep.mubr.msk.bf16.mxu1 %vm16536_vm1, %v22701_v21 }
 0x939   :  { %15066 = vmatprep.subr.bf16.mxu1 %v22701_v21 }
 0x96a   :  { %v19480_v59 = vpop.f32.mrb[200].mxu0 }
 0x96b   :  { %v14812_v13 = vpop.f32.mrb[201].mxu0 }
 0x96c   :  { %v19482_v28 = vpop.f32.mrb[202].mxu0 }
 0x96d   :  { %v14813_v33 = vpop.f32.mrb[203].mxu0 }
 0x971   :  { %v19486_v18 = vpop.f32.mrb[240].mxu1 }
 0x972   :  { %v14818_v6 = vpop.f32.mrb[241].mxu1 }
 0x973   :  { %v19488_v49 = vpop.f32.mrb[242].mxu1 }
 0x974   :  { %v14819_v25 = vpop.f32.mrb[243].mxu1 }
 0x975   :  { %v19492_v19 = vpop.f32.mrb[204].mxu0 }
 0x976   :  { %22728 = vst [vmem:[#allocation8_spill] sm:$0xff] %v19492_v19  ;;  %v14824_v40 = vpop.f32.mrb[205].mxu0 }
 0x977   :  { %v19494_v57 = vpop.f32.mrb[206].mxu0 }
 0x978   :  { %22729 = vst [vmem:[#allocation7_spill] sm:$0xff] %v19494_v57  ;;  %v14825_v56 = vpop.f32.mrb[207].mxu0 }
 0x979   :  { %v19498_v14 = vpop.f32.mrb[244].mxu1 }
 0x97a   :  { %v14830_v44 = vpop.f32.mrb[245].mxu1 }
 0x97b   :  { %v19500_v50 = vpop.f32.mrb[246].mxu1 }
 0x97c   :  { %v14831_v3 = vpop.f32.mrb[247].mxu1 }
 0x97d   :  { %v19504_v9 = vpop.f32.mrb[208].mxu0 }
 0x97e   :  { %22730 = vst [vmem:[#allocation10_spill] sm:$0xff] %v19504_v9  ;;  %v14836_v12 = vpop.f32.mrb[209].mxu0 }
 0x97f   :  { %v19506_v46 = vpop.f32.mrb[210].mxu0 }
 0x980   :  { %22731 = vst [vmem:[#allocation9_spill] sm:$0xff] %v19506_v46  ;;  %v14837_v0 = vpop.f32.mrb[211].mxu0 }
 0x981   :  { %v19510_v20 = vpop.f32.mrb[248].mxu1 }
 0x982   :  { %v14842_v61 = vpop.f32.mrb[249].mxu1 }
 0x983   :  { %v19512_v45 = vpop.f32.mrb[250].mxu1 }
 0x984   :  { %v14843_v52 = vpop.f32.mrb[251].mxu1 }
 0x985   :  { %v19516_v26 = vpop.f32.mrb[212].mxu0 }
 0x986   :  { %22732 = vst [vmem:[#allocation13_spill] sm:$0xff] %v19516_v26  ;;  %v14848_v42 = vpop.f32.mrb[213].mxu0 }
 0x987   :  { %v19518_v27 = vpop.f32.mrb[214].mxu0 }
 0x988   :  { %22733 = vst [vmem:[#allocation12_spill] sm:$0xff] %v19518_v27  ;;  %v14849_v48 = vpop.f32.mrb[215].mxu0 }
 0x989   :  { %v19522_v43 = vpop.f32.mrb[252].mxu1 }
 0x98a   :  { %22734 = vst [vmem:[#allocation95_spill] sm:$0xff] %v19522_v43  ;;  %v14854_v53 = vpop.f32.mrb[253].mxu1 }
 0x98b   :  { %v19524_v32 = vpop.f32.mrb[254].mxu1 }
 0x98c   :  { %22735 = vst [vmem:[#allocation17_spill] sm:$0xff] %v19524_v32  ;;  %v14855_v39 = vpop.f32.mrb[255].mxu1 }
 0x98d   :  { %v19528_v35 = vpop.f32.mrb[216].mxu0 }
 0x98e   :  { %22736 = vst [vmem:[#allocation15_spill] sm:$0xff] %v19528_v35  ;;  %v14860_v34 = vpop.f32.mrb[217].mxu0 }
 0x98f   :  { %v19530_v41 = vpop.f32.mrb[218].mxu0 }
 0x990   :  { %22737 = vst [vmem:[#allocation97_spill] sm:$0xff] %v19530_v41  ;;  %v14861_v22 = vpop.f32.mrb[219].mxu0 }
 0x991   :  { %v19534_v4 = vpop.f32.mrb[0].mxu1 }
 0x992   :  { %22738 = vst [vmem:[#allocation96_spill] sm:$0xff] %v19534_v4  ;;  %v14866_v29 = vpop.f32.mrb[1].mxu1 }
 0x993   :  { %v19536_v7 = vpop.f32.mrb[2].mxu1 }
 0x994   :  { %22739 = vst [vmem:[#allocation99_spill] sm:$0xff] %v19536_v7  ;;  %v14867_v8 = vpop.f32.mrb[3].mxu1 }
 0x995   :  { %v19540_v54 = vpop.f32.mrb[220].mxu0 }
 0x996   :  { %22740 = vst [vmem:[#allocation98_spill] sm:$0xff] %v19540_v54  ;;  %v14872_v1 = vpop.f32.mrb[221].mxu0 }
 0x997   :  { %v19542_v10 = vpop.f32.mrb[222].mxu0 }
 0x998   :  { %22741 = vst [vmem:[#allocation101_spill] sm:$0xff] %v19542_v10  ;;  %v14873_v51 = vpop.f32.mrb[223].mxu0 }
 0x999   :  { %v19546_v37 = vpop.f32.mrb[4].mxu1 }
 0x99a   :  { %22742 = vst [vmem:[#allocation100_spill] sm:$0xff] %v19546_v37  ;;  %v14878_v30 = vpop.f32.mrb[5].mxu1 }
 0x99b   :  { %v19548_v2 = vpop.f32.mrb[6].mxu1 }
 0x99c   :  { %22743 = vst [vmem:[#allocation103_spill] sm:$0xff] %v19548_v2  ;;  %v14879_v13 = vpop.f32.mrb[7].mxu1 }
 0x99d   :  { %v19552_v33 = vpop.f32.mrb[224].mxu0 }
 0x99e   :  { %22744 = vst [vmem:[#allocation102_spill] sm:$0xff] %v19552_v33  ;;  %v14884_v6 = vpop.f32.mrb[225].mxu0 }
 0x99f   :  { %v19554_v25 = vpop.f32.mrb[226].mxu0 }
 0x9a0   :  { %22745 = vst [vmem:[#allocation105_spill] sm:$0xff] %v19554_v25  ;;  %v14885_v56 = vpop.f32.mrb[227].mxu0 }
 0x9a1   :  { %v19558_v44 = vpop.f32.mrb[8].mxu1 }
 0x9a2   :  { %22746 = vst [vmem:[#allocation104_spill] sm:$0xff] %v19558_v44  ;;  %v14890_v3 = vpop.f32.mrb[9].mxu1 }
 0x9a3   :  { %v19560_v12 = vpop.f32.mrb[10].mxu1 }
 0x9a4   :  { %22747 = vst [vmem:[#allocation107_spill] sm:$0xff] %v19560_v12  ;;  %v14891_v61 = vpop.f32.mrb[11].mxu1 }
 0x9a5   :  { %v19564_v52 = vpop.f32.mrb[228].mxu0 }
 0x9a6   :  { %22748 = vst [vmem:[#allocation106_spill] sm:$0xff] %v19564_v52  ;;  %v14896_v42 = vpop.f32.mrb[229].mxu0 }
 0x9a7   :  { %v19566_v48 = vpop.f32.mrb[230].mxu0 }
 0x9a8   :  { %22749 = vst [vmem:[#allocation108_spill] sm:$0xff] %v19566_v48  ;;  %v14897_v39 = vpop.f32.mrb[231].mxu0 }
 0x9a9   :  { %v19570_v34 = vpop.f32.mrb[12].mxu1 }
 0x9aa   :  { %22750 = vst [vmem:[#allocation109_spill] sm:$0xff] %v19570_v34  ;;  %v14902_v22 = vpop.f32.mrb[13].mxu1 }
 0x9ab   :  { %v19572_v29 = vpop.f32.mrb[14].mxu1 }
 0x9ac   :  { %22751 = vst [vmem:[#allocation112_spill] sm:$0xff] %v19572_v29  ;;  %v14903_v1 = vpop.f32.mrb[15].mxu1 }
 0x9ad   :  { %v19576_v51 = vpop.f32.mrb[232].mxu0 }
 0x9ae   :  { %22752 = vst [vmem:[#allocation110_spill] sm:$0xff] %v19576_v51  ;;  %v14908_v30 = vpop.f32.mrb[233].mxu0 }
 0x9af   :  { %v19578_v13 = vpop.f32.mrb[234].mxu0 }
 0x9b0   :  { %22753 = vst [vmem:[#allocation111_spill] sm:$0xff] %v19578_v13  ;;  %v14909_v56 = vpop.f32.mrb[235].mxu0 }
 0x9b1   :  { %v19582_v3 = vpop.f32.mrb[16].mxu1 }
 0x9b2   :  { %22754 = vst [vmem:[#allocation114_spill] sm:$0xff] %v19582_v3  ;;  %v14914_v61 = vpop.f32.mrb[17].mxu1 }
 0x9b3   :  { %v19584_v42 = vpop.f32.mrb[18].mxu1 }
 0x9b4   :  { %22755 = vst [vmem:[#allocation5_spill] sm:$0xff] %v19584_v42  ;;  %v14915_v22 = vpop.f32.mrb[19].mxu1 }
 0x9b5   :  { %v19588_v8 = vpop.f32.mrb[236].mxu0 }
 0x9b6   :  { %22756 = vst [vmem:[#allocation113_spill] sm:$0xff] %v19588_v8  ;;  %v14920_v1 = vpop.f32.mrb[237].mxu0 }
 0x9b7   :  { %v19590_v53 = vpop.f32.mrb[238].mxu0 }
 0x9b8   :  { %22757 = vst [vmem:[#allocation116_spill] sm:$0xff] %v19590_v53  ;;  %v14921_v0 = vpop.f32.mrb[239].mxu0 }
 0x9b9   :  { %v19594_v6 = vpop.f32.mrb[20].mxu1 }
 0x9ba   :  { %22758 = vst [vmem:[#allocation6_spill] sm:$0xff] %v19594_v6  ;;  %v14926_v56 = vpop.f32.mrb[21].mxu1 }
 0x9bb   :  { %v19596_v40 = vpop.f32.mrb[22].mxu1 }
 0x9bc   :  { %22759 = vst [vmem:[#allocation115_spill] sm:$0xff] %v19596_v40  ;;  %v14927_v36 = vpop.f32.mrb[23].mxu1 }
 0x9be   :  { %v7914_v39 = vpop.f32.mrb[240].mxu0 }
 0x9bf   :  { %v19600_v22 = vmul.f32 0.35355338, %v7914_v39  ;;  %v14932_v24 = vpop.f32.mrb[241].mxu0 }
 0x9c0   :  { %v7917_v1 = vpop.f32.mrb[242].mxu0 }
 0x9c1   :  { %v19602_v17 = vmul.f32 0.35355338, %v7917_v1  ;;  %v14933_v16 = vpop.f32.mrb[243].mxu0  ;;  %v8930_v0 = vsel %vm1549_vm3, %v19600_v22, -inf }
 0x9c2   :  { %8931 = vmax.xlane.f32.xlu0 %v8930_v0  ;;  %v7965_v30 = vpop.f32.mrb[24].mxu1 }
 0x9c3   :  { %v19606_v56 = vmul.f32 0.35355338, %v7965_v30  ;;  %v14938_v62 = vpop.f32.mrb[25].mxu1  ;;  %v8933_v61 = vsel %vm1549_vm3, %v19602_v17, -inf }
 0x9c4   :  { %8934 = vmax.xlane.f32.xlu1 %v8933_v61  ;;  %v7968_v36 = vpop.f32.mrb[26].mxu1 }
 0x9c5   :  { %v19610_v39 = vmul.f32 0.35355338, %v7968_v36  ;;  %v14939_v24 = vpop.f32.mrb[27].mxu1  ;;  %v8936_v1 = vsel %vm1549_vm3, %v19606_v56, -inf }
 0x9c6   :  { %8937 = vmax.xlane.f32.xlu0 %v8936_v1  ;;  %v8016_v16 = vpop.f32.mrb[244].mxu0 }
 0x9c7   :  { %v19614_v60 = vmul.f32 0.35355338, %v8016_v16  ;;  %v14944_v0 = vpop.f32.mrb[245].mxu0  ;;  %v8939_v31 = vsel %vm1549_vm3, %v19610_v39, -inf }
 0x9c8   :  { %v8019_v47 = vpop.f32.mrb[246].mxu0 }
 0x9c9   :  { %v19616_v30 = vmul.f32 0.35355338, %v8019_v47  ;;  %v14945_v62 = vpop.f32.mrb[247].mxu0  ;;  %v8942_v61 = vsel %vm1549_vm3, %v19614_v60, -inf }
 0x9ca   :  { %8940 = vmax.xlane.f32.xlu0 %v8939_v31  ;;  %8943 = vmax.xlane.f32.xlu1 %v8942_v61  ;;  %v8067_v36 = vpop.f32.mrb[28].mxu1 }
 0x9cb   :  { %v19622_v24 = vmul.f32 0.35355338, %v8067_v36  ;;  %v14950_v1 = vpop.f32.mrb[29].mxu1  ;;  %v8945_v47 = vsel %vm1549_vm3, %v19616_v30, -inf }
 0x9cc   :  { %v8070_v55 = vpop.f32.mrb[30].mxu1 }
 0x9cd   :  { %v19624_v16 = vmul.f32 0.35355338, %v8070_v55  ;;  %v14951_v0 = vpop.f32.mrb[31].mxu1  ;;  %v8948_v62 = vsel %vm1549_vm3, %v19622_v24, -inf }
 0x9ce   :  { %8946 = vmax.xlane.f32.xlu0 %v8945_v47  ;;  %8949 = vmax.xlane.f32.xlu1 %v8948_v62  ;;  %v8118_v58 = vpop.f32.mrb[248].mxu0 }
 0x9cf   :  { %v19630_v63 = vmul.f32 0.35355338, %v8118_v58  ;;  %v14956_v31 = vpop.f32.mrb[249].mxu0  ;;  %v8951_v55 = vsel %vm1549_vm3, %v19624_v16, -inf }
 0x9d0   :  { %v8121_v61 = vpop.f32.mrb[250].mxu0 }
 0x9d1   :  { %v19632_v36 = vmul.f32 0.35355338, %v8121_v61  ;;  %v14957_v1 = vpop.f32.mrb[251].mxu0  ;;  %v8954_v0 = vsel %vm1549_vm3, %v19630_v63, -inf }
 0x9d2   :  { %8952 = vmax.xlane.f32.xlu0 %v8951_v55  ;;  %8955 = vmax.xlane.f32.xlu1 %v8954_v0  ;;  %v8169_v38 = vpop.f32.mrb[32].mxu1 }
 0x9d3   :  { %v19638_v6 = vmul.f32 0.35355338, %v8169_v38  ;;  %v14962_v47 = vpop.f32.mrb[33].mxu1  ;;  %v8957_v61 = vsel %vm1549_vm3, %v19632_v36, -inf }
 0x9d4   :  { %v8172_v62 = vpop.f32.mrb[34].mxu1 }
 0x9d5   :  { %v19640_v58 = vmul.f32 0.35355338, %v8172_v62  ;;  %v14963_v31 = vpop.f32.mrb[35].mxu1  ;;  %v8960_v1 = vsel %vm1549_vm3, %v19638_v6, -inf }
 0x9d6   :  { %8958 = vmax.xlane.f32.xlu0 %v8957_v61  ;;  %8961 = vmax.xlane.f32.xlu1 %v8960_v1  ;;  %v8220_v40 = vpop.f32.mrb[252].mxu0 }
 0x9d7   :  { %v19646_v8 = vmul.f32 0.35355338, %v8220_v40  ;;  %v14968_v55 = vpop.f32.mrb[253].mxu0  ;;  %v8963_v62 = vsel %vm1549_vm3, %v19640_v58, -inf }
 0x9d8   :  { %v8223_v0 = vpop.f32.mrb[254].mxu0 }
 0x9d9   :  { %v19648_v38 = vmul.f32 0.35355338, %v8223_v0  ;;  %v14969_v47 = vpop.f32.mrb[255].mxu0  ;;  %v8966_v31 = vsel %vm1549_vm3, %v19646_v8, -inf }
 0x9da   :  { %8964 = vmax.xlane.f32.xlu0 %v8963_v62  ;;  %8967 = vmax.xlane.f32.xlu1 %v8966_v31  ;;  %v8271_v53 = vpop.f32.mrb[36].mxu1 }
 0x9db   :  { %v19654_v3 = vmul.f32 0.35355338, %v8271_v53  ;;  %v14974_v61 = vpop.f32.mrb[37].mxu1  ;;  %v8969_v0 = vsel %vm1549_vm3, %v19648_v38, -inf }
 0x9dc   :  { %v8274_v1 = vpop.f32.mrb[38].mxu1 }
 0x9dd   :  { %v19656_v40 = vmul.f32 0.35355338, %v8274_v1  ;;  %v14975_v55 = vpop.f32.mrb[39].mxu1  ;;  %v8972_v47 = vsel %vm1549_vm3, %v19654_v3, -inf }
 0x9de   :  { %8970 = vmax.xlane.f32.xlu0 %v8969_v0  ;;  %8973 = vmax.xlane.f32.xlu1 %v8972_v47  ;;  %v8322_v42 = vpop.f32.mrb[0].mxu0 }
 0x9df   :  { %v19662_v51 = vmul.f32 0.35355338, %v8322_v42  ;;  %v14980_v62 = vpop.f32.mrb[1].mxu0  ;;  %v8975_v1 = vsel %vm1549_vm3, %v19656_v40, -inf }
 0x9e0   :  { %v8325_v31 = vpop.f32.mrb[2].mxu0 }
 0x9e1   :  { %v19664_v53 = vmul.f32 0.35355338, %v8325_v31  ;;  %v14981_v61 = vpop.f32.mrb[3].mxu0  ;;  %v8978_v55 = vsel %vm1549_vm3, %v19662_v51, -inf }
 0x9e2   :  { %8976 = vmax.xlane.f32.xlu0 %v8975_v1  ;;  %8979 = vmax.xlane.f32.xlu1 %v8978_v55  ;;  %v8373_v13 = vpop.f32.mrb[40].mxu1 }
 0x9e3   :  { %v19670_v34 = vmul.f32 0.35355338, %v8373_v13  ;;  %v14986_v0 = vpop.f32.mrb[41].mxu1  ;;  %v8981_v31 = vsel %vm1549_vm3, %v19664_v53, -inf }
 0x9e4   :  { %v8376_v47 = vpop.f32.mrb[42].mxu1 }
 0x9e5   :  { %v19672_v42 = vmul.f32 0.35355338, %v8376_v47  ;;  %v14987_v62 = vpop.f32.mrb[43].mxu1  ;;  %v8984_v61 = vsel %vm1549_vm3, %v19670_v34, -inf }
 0x9e6   :  { %8982 = vmax.xlane.f32.xlu0 %v8981_v31  ;;  %8985 = vmax.xlane.f32.xlu1 %v8984_v61  ;;  %v8424_v29 = vpop.f32.mrb[4].mxu0 }
 0x9e7   :  { %v19678_v52 = vmul.f32 0.35355338, %v8424_v29  ;;  %v14992_v1 = vpop.f32.mrb[5].mxu0  ;;  %v8987_v47 = vsel %vm1549_vm3, %v19672_v42, -inf }
 0x9e8   :  { %v8427_v55 = vpop.f32.mrb[6].mxu0 }
 0x9e9   :  { %v19680_v13 = vmul.f32 0.35355338, %v8427_v55  ;;  %v14993_v0 = vpop.f32.mrb[7].mxu0  ;;  %v8990_v62 = vsel %vm1549_vm3, %v19678_v52, -inf }
 0x9ea   :  { %8988 = vmax.xlane.f32.xlu0 %v8987_v47  ;;  %8991 = vmax.xlane.f32.xlu1 %v8990_v62  ;;  %v8475_v48 = vpop.f32.mrb[44].mxu1 }
 0x9eb   :  { %v19686_v44 = vmul.f32 0.35355338, %v8475_v48  ;;  %v14998_v31 = vpop.f32.mrb[45].mxu1  ;;  %v8993_v55 = vsel %vm1549_vm3, %v19680_v13, -inf }
 0x9ec   :  { %v8478_v61 = vpop.f32.mrb[46].mxu1 }
 0x9ed   :  { %v19688_v29 = vmul.f32 0.35355338, %v8478_v61  ;;  %v14999_v1 = vpop.f32.mrb[47].mxu1  ;;  %v8996_v0 = vsel %vm1549_vm3, %v19686_v44, -inf }
 0x9ee   :  { %8994 = vmax.xlane.f32.xlu0 %v8993_v55  ;;  %8997 = vmax.xlane.f32.xlu1 %v8996_v0  ;;  %v8526_v12 = vpop.f32.mrb[8].mxu0 }
 0x9ef   :  { %v19694_v33 = vmul.f32 0.35355338, %v8526_v12  ;;  %v15004_v47 = vpop.f32.mrb[9].mxu0  ;;  %v8999_v61 = vsel %vm1549_vm3, %v19688_v29, -inf }
 0x9f0   :  { %v8529_v62 = vpop.f32.mrb[10].mxu0 }
 0x9f1   :  { %v19696_v48 = vmul.f32 0.35355338, %v8529_v62  ;;  %v15005_v31 = vpop.f32.mrb[11].mxu0  ;;  %v9002_v1 = vsel %vm1549_vm3, %v19694_v33, -inf }
 0x9f2   :  { %9000 = vmax.xlane.f32.xlu0 %v8999_v61  ;;  %9003 = vmax.xlane.f32.xlu1 %v9002_v1  ;;  %v8577_v25 = vpop.f32.mrb[48].mxu1 }
 0x9f3   :  { %v19702_v37 = vmul.f32 0.35355338, %v8577_v25  ;;  %v15010_v55 = vpop.f32.mrb[49].mxu1  ;;  %v9005_v62 = vsel %vm1549_vm3, %v19696_v48, -inf }
 0x9f4   :  { %v8580_v0 = vpop.f32.mrb[50].mxu1 }
 0x9f5   :  { %v19704_v12 = vmul.f32 0.35355338, %v8580_v0  ;;  %v15011_v47 = vpop.f32.mrb[51].mxu1  ;;  %v9008_v31 = vsel %vm1549_vm3, %v19702_v37, -inf }
 0x9f6   :  { %9006 = vmax.xlane.f32.xlu0 %v9005_v62  ;;  %9009 = vmax.xlane.f32.xlu1 %v9008_v31  ;;  %v8628_v2 = vpop.f32.mrb[12].mxu0 }
 0x9f7   :  { %v19710_v54 = vmul.f32 0.35355338, %v8628_v2  ;;  %v15016_v61 = vpop.f32.mrb[13].mxu0  ;;  %v9011_v0 = vsel %vm1549_vm3, %v19704_v12, -inf }
 0x9f8   :  { %v8631_v1 = vpop.f32.mrb[14].mxu0 }
 0x9f9   :  { %v19712_v25 = vmul.f32 0.35355338, %v8631_v1  ;;  %v15017_v55 = vpop.f32.mrb[15].mxu0  ;;  %v9014_v47 = vsel %vm1549_vm3, %v19710_v54, -inf }
 0x9fa   :  { %9012 = vmax.xlane.f32.xlu0 %v9011_v0  ;;  %9015 = vmax.xlane.f32.xlu1 %v9014_v47  ;;  %v8679_v10 = vpop.f32.mrb[52].mxu1 }
 0x9fb   :  { %v19718_v21 = vmul.f32 0.35355338, %v8679_v10  ;;  %v15022_v62 = vpop.f32.mrb[53].mxu1  ;;  %v9017_v1 = vsel %vm1549_vm3, %v19712_v25, -inf }
 0x9fc   :  { %v8682_v31 = vpop.f32.mrb[54].mxu1 }
 0x9fd   :  { %v19720_v2 = vmul.f32 0.35355338, %v8682_v31  ;;  %v15023_v61 = vpop.f32.mrb[55].mxu1  ;;  %v9020_v55 = vsel %vm1549_vm3, %v19718_v21, -inf }
 0x9fe   :  { %9018 = vmax.xlane.f32.xlu0 %v9017_v1  ;;  %9021 = vmax.xlane.f32.xlu1 %v9020_v55  ;;  %v8730_v35 = vpop.f32.mrb[16].mxu0 }
 0x9ff   :  { %v19726_v41 = vmul.f32 0.35355338, %v8730_v35  ;;  %v15028_v0 = vpop.f32.mrb[17].mxu0  ;;  %v9023_v31 = vsel %vm1549_vm3, %v19720_v2, -inf }
 0xa00   :  { %v8733_v47 = vpop.f32.mrb[18].mxu0 }
 0xa01   :  { %v19728_v10 = vmul.f32 0.35355338, %v8733_v47  ;;  %v15029_v62 = vpop.f32.mrb[19].mxu0  ;;  %v9026_v61 = vsel %vm1549_vm3, %v19726_v41, -inf }
 0xa02   :  { %9024 = vmax.xlane.f32.xlu0 %v9023_v31  ;;  %9027 = vmax.xlane.f32.xlu1 %v9026_v61  ;;  %v8781_v26 = vpop.f32.mrb[56].mxu1 }
 0xa03   :  { %v19734_v27 = vmul.f32 0.35355338, %v8781_v26  ;;  %v15034_v1 = vpop.f32.mrb[57].mxu1  ;;  %v9029_v47 = vsel %vm1549_vm3, %v19728_v10, -inf }
 0xa04   :  { %v8784_v55 = vpop.f32.mrb[58].mxu1 }
 0xa05   :  { %v19736_v35 = vmul.f32 0.35355338, %v8784_v55  ;;  %v15035_v0 = vpop.f32.mrb[59].mxu1  ;;  %v9032_v62 = vsel %vm1549_vm3, %v19734_v27, -inf }
 0xa06   :  { %9030 = vmax.xlane.f32.xlu0 %v9029_v47  ;;  %9033 = vmax.xlane.f32.xlu1 %v9032_v62  ;;  %v8832_v4 = vpop.f32.mrb[20].mxu0 }
 0xa07   :  { %v19742_v7 = vmul.f32 0.35355338, %v8832_v4  ;;  %v15040_v31 = vpop.f32.mrb[21].mxu0  ;;  %v9035_v55 = vsel %vm1549_vm3, %v19736_v35, -inf }
 0xa08   :  { %v8835_v61 = vpop.f32.mrb[22].mxu0 }
 0xa09   :  { %v19744_v26 = vmul.f32 0.35355338, %v8835_v61  ;;  %v15041_v1 = vpop.f32.mrb[23].mxu0  ;;  %v9038_v0 = vsel %vm1549_vm3, %v19742_v7, -inf }
 0xa0a   :  { %9036 = vmax.xlane.f32.xlu0 %v9035_v55  ;;  %v8883_v9 = vpop.f32.mrb[60].mxu1  ;;  %9039 = vmax.xlane.f32.xlu1 %v9038_v0 }
 0xa0b   :  { %v19750_v46 = vmul.f32 0.35355338, %v8883_v9  ;;  %v15046_v47 = vpop.f32.mrb[61].mxu1  ;;  %v9041_v1 = vsel %vm1549_vm3, %v19744_v26, -inf  ;;  %v19762_v9 = vpop.permute.xlu1 %9484 }
 0xa0c   :  { %v8886_v62 = vpop.f32.mrb[62].mxu1  ;;  %22760 = vst [vmem:[#allocation117_spill] sm:$0xff] %v19762_v9  ;;  %v19768_v47 = vpop.permute.xlu0 %9531 }
 0xa0d   :  { %v19752_v4 = vmul.f32 0.35355338, %v8886_v62  ;;  %v15047_v31 = vpop.f32.mrb[63].mxu1  ;;  %v9044_v61 = vsel %vm1549_vm3, %v19750_v46, -inf  ;;  %22762 = vst [vmem:[#allocation119_spill] sm:$0xff] %v19768_v47 }
 0xa0e   :  { %9045 = vmax.xlane.f32.xlu1 %v9044_v61  ;;  %9042 = vmax.xlane.f32.xlu0 %v9041_v1 }
 0xa0f   :  { %v9047_v55 = vsel %vm1549_vm3, %v19752_v4, -inf  ;;  %v19766_v0 = vpop.permute.xlu1 %9578 }
 0xa10   :  { %22761 = vst [vmem:[#allocation118_spill] sm:$0xff] %v19766_v0  ;;  %v19772_v31 = vpop.permute.xlu0 %9625 }
 0xa11   :  { %22764 = vst [vmem:[#allocation121_spill] sm:$0xff] %v19772_v31 }
 0xa12   :  { %9048 = vmax.xlane.f32.xlu0 %v9047_v55 }
 0xa13   :  { %v19770_v62 = vpop.permute.xlu1 %9672 }
 0xa14   :  { %22763 = vst [vmem:[#allocation120_spill] sm:$0xff] %v19770_v62  ;;  %v19776_v1 = vpop.permute.xlu0 %9719 }
 0xa15   :  { %22766 = vst [vmem:[#allocation123_spill] sm:$0xff] %v19776_v1 }
 0xa17   :  { %v19774_v61 = vpop.permute.xlu1 %9766 }
 0xa18   :  { %22765 = vst [vmem:[#allocation122_spill] sm:$0xff] %v19774_v61 }
 0xa1b   :  { %v19778_v55 = vpop.permute.xlu1 %9860 }
 0xa1c   :  { %22767 = vst [vmem:[#allocation124_spill] sm:$0xff] %v19778_v55 }
 0xa1f   :  { %10189 = vrot.lane.b32.xlu1 %v22699_v15, %s16547_s14  ;;  %v19780_v15 = vpop.permute.xlu0 %9813  ;;  %v19782_v9 = vpop.permute.xlu1 %9954 }
 0xa20   :  { %22768 = vst [vmem:[#allocation125_spill] sm:$0xff] %v19780_v15  ;;  %22769 = vst [vmem:[#allocation126_spill] sm:$0xff] %v19782_v9 }
 0xa23   :  { %v19784_v43 = vpop.permute.xlu0 %9907 }
 0xa24   :  { %22770 = vst [vmem:[#allocation127_spill] sm:$0xff] %v19784_v43 }
 0xa27   :  { %v19788_v0 = vpop.permute.xlu0 %10001 }
 0xa28   :  { %10142 = vrot.lane.b32.xlu0 %v22698_v23, %s16547_s14  ;;  %v19786_v23 = vpop.permute.xlu1 %10048  ;;  %22772 = vst [vmem:[#allocation129_spill] sm:$0xff] %v19788_v0 }
 0xa29   :  { %22771 = vst [vmem:[#allocation128_spill] sm:$0xff] %v19786_v23 }
 0xa2c   :  { %v19790_v47 = vpop.permute.xlu1 %10095 }
 0xa2d   :  { %22773 = vst [vmem:[#allocation130_spill] sm:$0xff] %v19790_v47 }
 0xa4f   :  { %v8932_v62 = vpop.xlane.xlu0 %8931 }
 0xa50   :  { %v9050_v31 = vsub.f32 %v19600_v22, %v8932_v62 }
 0xa51   :  { %v8935_v61 = vpop.xlane.xlu1 %8934 }
 0xa52   :  { %v9090_v32 = vmul.f32 1.442695, %v9050_v31  ;;  %v9051_v1 = vsub.f32 %v19602_v17, %v8935_v61 }
 0xa53   :  { %v8938_v55 = vpop.xlane.xlu0 %8937 }
 0xa54   :  { %16171 = vpow2.f32 %v9090_v32  ;;  %v9092_v15 = vmul.f32 1.442695, %v9051_v1  ;;  %v9052_v9 = vsub.f32 %v19606_v56, %v8938_v55 }
 0xa56   :  { %16173 = vpow2.f32 %v9092_v15  ;;  %v9094_v43 = vmul.f32 1.442695, %v9052_v9 }
 0xa57   :  { %v8944_v19 = vpop.xlane.xlu1 %8943  ;;  %v8941_v23 = vpop.xlane.xlu0 %8940 }
 0xa58   :  { %16175 = vpow2.f32 %v9094_v43  ;;  %v9054_v0 = vsub.f32 %v19614_v60, %v8944_v19  ;;  %v9053_v47 = vsub.f32 %v19610_v39, %v8941_v23 }
 0xa5a   :  { %v9098_v57 = vmul.f32 1.442695, %v9054_v0  ;;  %v9096_v22 = vmul.f32 1.442695, %v9053_v47 }
 0xa5b   :  { %v8950_v62 = vpop.xlane.xlu1 %8949  ;;  %v8947_v31 = vpop.xlane.xlu0 %8946 }
 0xa5c   :  { %16177 = vpow2.f32 %v9098_v57  ;;  %v9056_v17 = vsub.f32 %v19622_v24, %v8950_v62  ;;  %v9055_v32 = vsub.f32 %v19616_v30, %v8947_v31 }
 0xa5d   :  { %16179 = vpow2.f32 %v9096_v22 }
 0xa5e   :  { %v19799_v56 = vpop.eup %16171  ;;  %v9102_v9 = vmul.f32 1.442695, %v9056_v17  ;;  %v9100_v61 = vmul.f32 1.442695, %v9055_v32 }
 0xa5f   :  { %v8956_v1 = vpop.xlane.xlu1 %8955  ;;  %v8953_v43 = vpop.xlane.xlu0 %8952  ;;  %v9170_v19 = vsel %vm1549_vm3, %v19799_v56, 0.0 }
 0xa60   :  { %v19803_v60 = vpop.eup %16173  ;;  %16181 = vpow2.f32 %v9102_v9  ;;  %v9058_v39 = vsub.f32 %v19630_v63, %v8956_v1  ;;  %v9057_v57 = vsub.f32 %v19624_v16, %v8953_v43  ;;  %9171 = vadd.xlane.f32.xlu1 %v9170_v19 }
 0xa61   :  { %16183 = vpow2.f32 %v9100_v61  ;;  %v9173_v30 = vsel %vm1549_vm3, %v19803_v60, 0.0 }
 0xa62   :  { %v19809_v24 = vpop.eup %16175  ;;  %v9106_v0 = vmul.f32 1.442695, %v9058_v39  ;;  %v9104_v47 = vmul.f32 1.442695, %v9057_v57  ;;  %9174 = vadd.xlane.f32.xlu0 %v9173_v30 }
 0xa63   :  { %v8962_v55 = vpop.xlane.xlu1 %8961  ;;  %v8959_v15 = vpop.xlane.xlu0 %8958  ;;  %v9176_v23 = vsel %vm1549_vm3, %v19809_v24, 0.0 }
 0xa64   :  { %16185 = vpow2.f32 %v9106_v0  ;;  %v9060_v63 = vsub.f32 %v19638_v6, %v8962_v55  ;;  %v9059_v16 = vsub.f32 %v19632_v36, %v8959_v15  ;;  %9177 = vadd.xlane.f32.xlu1 %v9176_v23 }
 0xa65   :  { %16187 = vpow2.f32 %v9104_v47 }
 0xa66   :  { %v19815_v22 = vpop.eup %16177  ;;  %v9110_v62 = vmul.f32 1.442695, %v9060_v63  ;;  %v9108_v31 = vmul.f32 1.442695, %v9059_v16 }
 0xa67   :  { %v19817_v17 = vpop.eup %16179  ;;  %v8968_v32 = vpop.xlane.xlu1 %8967  ;;  %v9182_v61 = vsel %vm1549_vm3, %v19815_v22, 0.0 }
 0xa68   :  { %v8965_v9 = vpop.xlane.xlu0 %8964  ;;  %16189 = vpow2.f32 %v9110_v62  ;;  %v9062_v1 = vsub.f32 %v19646_v8, %v8968_v32  ;;  %9183 = vadd.xlane.f32.xlu1 %v9182_v61  ;;  %v9179_v36 = vsel %vm1549_vm3, %v19817_v17, 0.0 }
 0xa69   :  { %v9061_v6 = vsub.f32 %v19640_v58, %v8965_v9  ;;  %16191 = vpow2.f32 %v9108_v31  ;;  %9180 = vadd.xlane.f32.xlu0 %v9179_v36 }
 0xa6a   :  { %v19825_v43 = vpop.eup %16181  ;;  %v9114_v19 = vmul.f32 1.442695, %v9062_v1 }
 0xa6b   :  { %v9112_v39 = vmul.f32 1.442695, %v9061_v6  ;;  %v19827_v57 = vpop.eup %16183  ;;  %v8974_v30 = vpop.xlane.xlu1 %8973  ;;  %v9188_v47 = vsel %vm1549_vm3, %v19825_v43, 0.0 }
 0xa6c   :  { %v8971_v0 = vpop.xlane.xlu0 %8970  ;;  %16193 = vpow2.f32 %v9114_v19  ;;  %v9064_v8 = vsub.f32 %v19654_v3, %v8974_v30  ;;  %9189 = vadd.xlane.f32.xlu1 %v9188_v47  ;;  %v9185_v55 = vsel %vm1549_vm3, %v19827_v57, 0.0 }
 0xa6d   :  { %v9063_v58 = vsub.f32 %v19648_v38, %v8971_v0  ;;  %16195 = vpow2.f32 %v9112_v39  ;;  %9186 = vadd.xlane.f32.xlu0 %v9185_v55 }
 0xa6e   :  { %v19835_v15 = vpop.eup %16185  ;;  %v9118_v23 = vmul.f32 1.442695, %v9064_v8 }
 0xa6f   :  { %v9116_v63 = vmul.f32 1.442695, %v9063_v58  ;;  %v19837_v16 = vpop.eup %16187  ;;  %v8980_v62 = vpop.xlane.xlu1 %8979  ;;  %v9194_v32 = vsel %vm1549_vm3, %v19835_v15, 0.0 }
 0xa70   :  { %v8977_v31 = vpop.xlane.xlu0 %8976  ;;  %16197 = vpow2.f32 %v9118_v23  ;;  %v9066_v3 = vsub.f32 %v19662_v51, %v8980_v62  ;;  %9195 = vadd.xlane.f32.xlu1 %v9194_v32  ;;  %v9191_v9 = vsel %vm1549_vm3, %v19837_v16, 0.0 }
 0xa71   :  { %v9065_v38 = vsub.f32 %v19656_v40, %v8977_v31  ;;  %16199 = vpow2.f32 %v9116_v63  ;;  %9192 = vadd.xlane.f32.xlu0 %v9191_v9 }
 0xa72   :  { %v19845_v61 = vpop.eup %16189  ;;  %v9122_v1 = vmul.f32 1.442695, %v9066_v3 }
 0xa73   :  { %v9120_v6 = vmul.f32 1.442695, %v9065_v38  ;;  %v19847_v36 = vpop.eup %16191  ;;  %v8986_v19 = vpop.xlane.xlu1 %8985  ;;  %v9200_v30 = vsel %vm1549_vm3, %v19845_v61, 0.0 }
 0xa74   :  { %v8983_v39 = vpop.xlane.xlu0 %8982  ;;  %16201 = vpow2.f32 %v9122_v1  ;;  %v9068_v51 = vsub.f32 %v19670_v34, %v8986_v19  ;;  %9201 = vadd.xlane.f32.xlu1 %v9200_v30  ;;  %v9197_v0 = vsel %vm1549_vm3, %v19847_v36, 0.0 }
 0xa75   :  { %v9067_v40 = vsub.f32 %v19664_v53, %v8983_v39  ;;  %16203 = vpow2.f32 %v9120_v6  ;;  %9198 = vadd.xlane.f32.xlu0 %v9197_v0 }
 0xa76   :  { %v19855_v47 = vpop.eup %16193  ;;  %v9126_v8 = vmul.f32 1.442695, %v9068_v51 }
 0xa77   :  { %v9124_v58 = vmul.f32 1.442695, %v9067_v40  ;;  %v19857_v55 = vpop.eup %16195  ;;  %v8992_v23 = vpop.xlane.xlu1 %8991  ;;  %v9206_v62 = vsel %vm1549_vm3, %v19855_v47, 0.0 }
 0xa78   :  { %v8989_v63 = vpop.xlane.xlu0 %8988  ;;  %16205 = vpow2.f32 %v9126_v8  ;;  %v9070_v34 = vsub.f32 %v19678_v52, %v8992_v23  ;;  %9207 = vadd.xlane.f32.xlu1 %v9206_v62  ;;  %v9203_v31 = vsel %vm1549_vm3, %v19857_v55, 0.0 }
 0xa79   :  { %v9069_v53 = vsub.f32 %v19672_v42, %v8989_v63  ;;  %16207 = vpow2.f32 %v9124_v58  ;;  %9204 = vadd.xlane.f32.xlu0 %v9203_v31 }
 0xa7a   :  { %v19865_v32 = vpop.eup %16197  ;;  %v9130_v3 = vmul.f32 1.442695, %v9070_v34 }
 0xa7b   :  { %v9128_v38 = vmul.f32 1.442695, %v9069_v53  ;;  %v19867_v9 = vpop.eup %16199  ;;  %v8998_v1 = vpop.xlane.xlu1 %8997  ;;  %v9212_v19 = vsel %vm1549_vm3, %v19865_v32, 0.0 }
 0xa7c   :  { %v8995_v6 = vpop.xlane.xlu0 %8994  ;;  %16209 = vpow2.f32 %v9130_v3  ;;  %v9072_v52 = vsub.f32 %v19686_v44, %v8998_v1  ;;  %9213 = vadd.xlane.f32.xlu1 %v9212_v19  ;;  %v9209_v39 = vsel %vm1549_vm3, %v19867_v9, 0.0 }
 0xa7d   :  { %v9071_v42 = vsub.f32 %v19680_v13, %v8995_v6  ;;  %16211 = vpow2.f32 %v9128_v38  ;;  %9210 = vadd.xlane.f32.xlu0 %v9209_v39 }
 0xa7e   :  { %v19875_v30 = vpop.eup %16201  ;;  %v9134_v51 = vmul.f32 1.442695, %v9072_v52 }
 0xa7f   :  { %v9132_v40 = vmul.f32 1.442695, %v9071_v42  ;;  %v19877_v0 = vpop.eup %16203  ;;  %v9004_v8 = vpop.xlane.xlu1 %9003  ;;  %v9218_v23 = vsel %vm1549_vm3, %v19875_v30, 0.0 }
 0xa80   :  { %v9001_v58 = vpop.xlane.xlu0 %9000  ;;  %16213 = vpow2.f32 %v9134_v51  ;;  %v9074_v44 = vsub.f32 %v19694_v33, %v9004_v8  ;;  %9219 = vadd.xlane.f32.xlu1 %v9218_v23  ;;  %v9215_v63 = vsel %vm1549_vm3, %v19877_v0, 0.0 }
 0xa81   :  { %v9073_v13 = vsub.f32 %v19688_v29, %v9001_v58  ;;  %16215 = vpow2.f32 %v9132_v40  ;;  %9216 = vadd.xlane.f32.xlu0 %v9215_v63 }
 0xa82   :  { %v19885_v62 = vpop.eup %16205  ;;  %v9138_v34 = vmul.f32 1.442695, %v9074_v44 }
 0xa83   :  { %v9136_v53 = vmul.f32 1.442695, %v9073_v13  ;;  %v19887_v31 = vpop.eup %16207  ;;  %v9010_v3 = vpop.xlane.xlu1 %9009  ;;  %v9224_v1 = vsel %vm1549_vm3, %v19885_v62, 0.0 }
 0xa84   :  { %v9007_v38 = vpop.xlane.xlu0 %9006  ;;  %16217 = vpow2.f32 %v9138_v34  ;;  %v9076_v33 = vsub.f32 %v19702_v37, %v9010_v3  ;;  %9225 = vadd.xlane.f32.xlu1 %v9224_v1  ;;  %v9221_v6 = vsel %vm1549_vm3, %v19887_v31, 0.0 }
 0xa85   :  { %v9075_v29 = vsub.f32 %v19696_v48, %v9007_v38  ;;  %16219 = vpow2.f32 %v9136_v53  ;;  %9222 = vadd.xlane.f32.xlu0 %v9221_v6 }
 0xa86   :  { %v19895_v19 = vpop.eup %16209  ;;  %v9142_v52 = vmul.f32 1.442695, %v9076_v33 }
 0xa87   :  { %v9140_v42 = vmul.f32 1.442695, %v9075_v29  ;;  %v19897_v39 = vpop.eup %16211  ;;  %v9016_v51 = vpop.xlane.xlu1 %9015  ;;  %v9230_v8 = vsel %vm1549_vm3, %v19895_v19, 0.0 }
 0xa88   :  { %v9013_v40 = vpop.xlane.xlu0 %9012  ;;  %16221 = vpow2.f32 %v9142_v52  ;;  %v9078_v37 = vsub.f32 %v19710_v54, %v9016_v51  ;;  %9231 = vadd.xlane.f32.xlu1 %v9230_v8  ;;  %v9227_v58 = vsel %vm1549_vm3, %v19897_v39, 0.0 }
 0xa89   :  { %v9077_v48 = vsub.f32 %v19704_v12, %v9013_v40  ;;  %16223 = vpow2.f32 %v9140_v42  ;;  %9228 = vadd.xlane.f32.xlu0 %v9227_v58 }
 0xa8a   :  { %v19905_v23 = vpop.eup %16213  ;;  %v9146_v44 = vmul.f32 1.442695, %v9078_v37 }
 0xa8b   :  { %v9144_v13 = vmul.f32 1.442695, %v9077_v48  ;;  %v19907_v63 = vpop.eup %16215  ;;  %v9022_v34 = vpop.xlane.xlu1 %9021  ;;  %v9236_v3 = vsel %vm1549_vm3, %v19905_v23, 0.0 }
 0xa8c   :  { %v9019_v53 = vpop.xlane.xlu0 %9018  ;;  %16225 = vpow2.f32 %v9146_v44  ;;  %v9080_v54 = vsub.f32 %v19718_v21, %v9022_v34  ;;  %9237 = vadd.xlane.f32.xlu1 %v9236_v3  ;;  %v9233_v38 = vsel %vm1549_vm3, %v19907_v63, 0.0 }
 0xa8d   :  { %v9079_v12 = vsub.f32 %v19712_v25, %v9019_v53  ;;  %16227 = vpow2.f32 %v9144_v13  ;;  %9234 = vadd.xlane.f32.xlu0 %v9233_v38 }
 0xa8e   :  { %v19915_v1 = vpop.eup %16217  ;;  %v9150_v33 = vmul.f32 1.442695, %v9080_v54 }
 0xa8f   :  { %v9148_v29 = vmul.f32 1.442695, %v9079_v12  ;;  %v19917_v6 = vpop.eup %16219  ;;  %v9028_v52 = vpop.xlane.xlu1 %9027  ;;  %v9242_v51 = vsel %vm1549_vm3, %v19915_v1, 0.0 }
 0xa90   :  { %v9025_v42 = vpop.xlane.xlu0 %9024  ;;  %16229 = vpow2.f32 %v9150_v33  ;;  %v9082_v21 = vsub.f32 %v19726_v41, %v9028_v52  ;;  %9243 = vadd.xlane.f32.xlu1 %v9242_v51  ;;  %v9239_v40 = vsel %vm1549_vm3, %v19917_v6, 0.0 }
 0xa91   :  { %v9081_v25 = vsub.f32 %v19720_v2, %v9025_v42  ;;  %16231 = vpow2.f32 %v9148_v29  ;;  %9240 = vadd.xlane.f32.xlu0 %v9239_v40 }
 0xa92   :  { %v19925_v8 = vpop.eup %16221  ;;  %v9154_v37 = vmul.f32 1.442695, %v9082_v21 }
 0xa93   :  { %v9152_v48 = vmul.f32 1.442695, %v9081_v25  ;;  %v19927_v58 = vpop.eup %16223  ;;  %v9034_v44 = vpop.xlane.xlu1 %9033  ;;  %v9248_v34 = vsel %vm1549_vm3, %v19925_v8, 0.0 }
 0xa94   :  { %v9031_v13 = vpop.xlane.xlu0 %9030  ;;  %16233 = vpow2.f32 %v9154_v37  ;;  %v9084_v41 = vsub.f32 %v19734_v27, %v9034_v44  ;;  %9249 = vadd.xlane.f32.xlu1 %v9248_v34  ;;  %v9245_v53 = vsel %vm1549_vm3, %v19927_v58, 0.0 }
 0xa95   :  { %v9083_v2 = vsub.f32 %v19728_v10, %v9031_v13  ;;  %16235 = vpow2.f32 %v9152_v48  ;;  %9246 = vadd.xlane.f32.xlu0 %v9245_v53 }
 0xa96   :  { %v19935_v3 = vpop.eup %16225  ;;  %v9158_v54 = vmul.f32 1.442695, %v9084_v41 }
 0xa97   :  { %v9156_v12 = vmul.f32 1.442695, %v9083_v2  ;;  %v19937_v38 = vpop.eup %16227  ;;  %v9040_v33 = vpop.xlane.xlu1 %9039  ;;  %v9254_v52 = vsel %vm1549_vm3, %v19935_v3, 0.0 }
 0xa98   :  { %v9037_v29 = vpop.xlane.xlu0 %9036  ;;  %16237 = vpow2.f32 %v9158_v54  ;;  %v9086_v27 = vsub.f32 %v19742_v7, %v9040_v33  ;;  %9255 = vadd.xlane.f32.xlu1 %v9254_v52  ;;  %v9251_v42 = vsel %vm1549_vm3, %v19937_v38, 0.0 }
 0xa99   :  { %v9085_v10 = vsub.f32 %v19736_v35, %v9037_v29  ;;  %16239 = vpow2.f32 %v9156_v12  ;;  %9252 = vadd.xlane.f32.xlu0 %v9251_v42 }
 0xa9a   :  { %v19945_v51 = vpop.eup %16229  ;;  %v9162_v21 = vmul.f32 1.442695, %v9086_v27 }
 0xa9b   :  { %v9160_v25 = vmul.f32 1.442695, %v9085_v10  ;;  %v19947_v40 = vpop.eup %16231  ;;  %v9046_v37 = vpop.xlane.xlu1 %9045  ;;  %v9260_v44 = vsel %vm1549_vm3, %v19945_v51, 0.0 }
 0xa9c   :  { %v9043_v48 = vpop.xlane.xlu0 %9042  ;;  %16241 = vpow2.f32 %v9162_v21  ;;  %v9088_v7 = vsub.f32 %v19750_v46, %v9046_v37  ;;  %9261 = vadd.xlane.f32.xlu1 %v9260_v44  ;;  %v9257_v13 = vsel %vm1549_vm3, %v19947_v40, 0.0 }
 0xa9d   :  { %v9087_v35 = vsub.f32 %v19744_v26, %v9043_v48  ;;  %16243 = vpow2.f32 %v9160_v25  ;;  %9258 = vadd.xlane.f32.xlu0 %v9257_v13 }
 0xa9e   :  { %v19955_v34 = vpop.eup %16233  ;;  %v9166_v41 = vmul.f32 1.442695, %v9088_v7 }
 0xa9f   :  { %v9164_v2 = vmul.f32 1.442695, %v9087_v35  ;;  %v19957_v53 = vpop.eup %16235  ;;  %v9266_v12 = vsel %vm1549_vm3, %v19955_v34, 0.0 }
 0xaa0   :  { %v9049_v54 = vpop.xlane.xlu0 %9048  ;;  %16245 = vpow2.f32 %v9166_v41  ;;  %9267 = vadd.xlane.f32.xlu1 %v9266_v12  ;;  %v9263_v26 = vsel %vm1549_vm3, %v19957_v53, 0.0  ;;  %v22774_v41 = vld [vmem:[#allocation59_spill] sm:$0xff]  ;;  %v22777_v12 = vpack.i.bf16 %v19488_v49, %v19486_v18  ;;  %v22785_v18 = vpack.i.bf16 %v19482_v28, %v19480_v59  ;;  %v22787_v49 = vld [vmem:[#allocation64_spill] sm:$0xff] }
 0xaa1   :  { %v9089_v46 = vsub.f32 %v19752_v4, %v9049_v54  ;;  %16247 = vpow2.f32 %v9164_v2  ;;  %9264 = vadd.xlane.f32.xlu0 %v9263_v26  ;;  %v22775_v2 = vld [vmem:[#allocation56_spill] sm:$0xff] }
 0xaa2   :  { %v19964_v33 = vpop.eup %16237  ;;  %v22776_v54 = vpack.i.bf16 %v22774_v41, %v22775_v2  ;;  %v22779_v26 = vld [vmem:[#allocation60_spill] sm:$0xff]  ;;  %v22797_v2 = vld [vmem:[#allocation69_spill] sm:$0xff] }
 0xaa3   :  { %v9168_v29 = vmul.f32 1.442695, %v9089_v46  ;;  %v19966_v52 = vpop.eup %16239  ;;  %v9272_v27 = vsel %vm1549_vm3, %v19964_v33, 0.0  ;;  %v22778_v46 = vld [vmem:[#allocation63_spill] sm:$0xff]  ;;  %v22794_v41 = vld [vmem:[#allocation8_spill] sm:$0xff] }
 0xaa4   :  { %9273 = vadd.xlane.f32.xlu1 %v9272_v27  ;;  %v9269_v10 = vsel %vm1549_vm3, %v19966_v52, 0.0  ;;  %v22782_v27 = vld [vmem:[#allocation55_spill] sm:$0xff]  ;;  %v22796_v28 = vld [vmem:[#allocation72_spill] sm:$0xff] }
 0xaa5   :  { %16249 = vpow2.f32 %v9168_v29  ;;  %9270 = vadd.xlane.f32.xlu0 %v9269_v10  ;;  %v22780_v29 = vpack.i.bf16 %v22778_v46, %v22779_v26  ;;  %v22800_v46 = vld [vmem:[#allocation62_spill] sm:$0xff] }
 0xaa6   :  { %v19972_v4 = vpop.eup %16241 }
 0xaa7   :  { %v19974_v42 = vpop.eup %16243  ;;  %v9278_v21 = vsel %vm1549_vm3, %v19972_v4, 0.0 }
 0xaa8   :  { %9279 = vadd.xlane.f32.xlu1 %v9278_v21  ;;  %v9275_v25 = vsel %vm1549_vm3, %v19974_v42, 0.0  ;;  %v22784_v21 = vpack.i.bf16 %v19500_v50, %v19498_v14  ;;  %v22792_v14 = vpack.i.bf16 %v19512_v45, %v19510_v20  ;;  %v22793_v50 = vld [vmem:[#allocation7_spill] sm:$0xff]  ;;  %v22805_v45 = vld [vmem:[#allocation9_spill] sm:$0xff] }
 0xaa9   :  { %9276 = vadd.xlane.f32.xlu0 %v9275_v25  ;;  %v22795_v59 = vpack.i.bf16 %v22793_v50, %v22794_v41  ;;  %v22817_v50 = vld [vmem:[#allocation12_spill] sm:$0xff]  ;;  %v22818_v41 = vld [vmem:[#allocation13_spill] sm:$0xff] }
 0xaaa   :  { %v19980_v37 = vpop.eup %16245 }
 0xaab   :  { %v19982_v48 = vpop.eup %16247  ;;  %v9284_v44 = vsel %vm1549_vm3, %v19980_v37, 0.0 }
 0xaac   :  { %9285 = vadd.xlane.f32.xlu1 %v9284_v44  ;;  %v9281_v7 = vsel %vm1549_vm3, %v19982_v48, 0.0  ;;  %v22789_v44 = vld [vmem:[#allocation61_spill] sm:$0xff] }
 0xaad   :  { %9282 = vadd.xlane.f32.xlu0 %v9281_v7  ;;  %v22790_v7 = vld [vmem:[#allocation58_spill] sm:$0xff] }
 0xaaf   :  { %v19988_v35 = vpop.eup %16249 }
 0xab0   :  { %v9287_v13 = vsel %vm1549_vm3, %v19988_v35, 0.0 }
 0xab1   :  { %9288 = vadd.xlane.f32.xlu0 %v9287_v13  ;;  %v22791_v13 = vpack.i.bf16 %v22789_v44, %v22790_v7  ;;  %v22814_v7 = vld [vmem:[#allocation99_spill] sm:$0xff] }
 0xabd   :  { %10283 = vrot.lane.b32.xlu1 %v22703_v5, %s16547_s14  ;;  %v22781_v5 = vld [vmem:[#allocation57_spill] sm:$0xff] }
 0xabe   :  { %v22783_v10 = vpack.i.bf16 %v22781_v5, %v22782_v27  ;;  %v22803_v5 = vld [vmem:[#allocation95_spill] sm:$0xff]  ;;  %v22806_v27 = vld [vmem:[#allocation10_spill] sm:$0xff] }
 0xac1   :  { %15341 = vrot.lane.b32.xlu1 %v22776_v54, %s16548_s1  ;;  %v22798_v54 = vpack.i.bf16 %v22796_v28, %v22797_v2  ;;  %v20068_v28 = vpop.permute.xlu1 %10189  ;;  %v22820_v2 = vld [vmem:[#allocation75_spill] sm:$0xff] }
 0xac5   :  { %15351 = vrot.lane.b32.xlu1 %v22777_v12, %s16549_s15  ;;  %v22799_v12 = vld [vmem:[#allocation65_spill] sm:$0xff] }
 0xac6   :  { %v22801_v26 = vpack.i.bf16 %v22799_v12, %v22800_v46  ;;  %v20074_v46 = vpop.permute.xlu0 %10142 }
 0xac7   :  { %10236 = vrot.lane.b32.xlu0 %v22702_v11, %s16547_s14  ;;  %v22786_v11 = vld [vmem:[#allocation67_spill] sm:$0xff] }
 0xac8   :  { %v22788_v25 = vpack.i.bf16 %v22786_v11, %v22787_v49  ;;  %v22811_v49 = vld [vmem:[#allocation68_spill] sm:$0xff] }
 0xac9   :  { %15361 = vrot.lane.b32.xlu1 %v22780_v29, %s16548_s1  ;;  %v22802_v29 = vld [vmem:[#allocation17_spill] sm:$0xff] }
 0xaca   :  { %v22804_v20 = vpack.i.bf16 %v22802_v29, %v22803_v5  ;;  %v22824_v29 = vld [vmem:[#allocation70_spill] sm:$0xff] }
 0xacb   :  { %15336 = vrot.lane.b32.xlu0 %v22783_v10, %s16548_s1  ;;  %v22807_v10 = vpack.i.bf16 %v22805_v45, %v22806_v27  ;;  %v22826_v45 = vld [vmem:[#allocation97_spill] sm:$0xff]  ;;  %v22827_v27 = vld [vmem:[#allocation15_spill] sm:$0xff] }
 0xacd   :  { %15371 = vrot.lane.b32.xlu1 %v22784_v21, %s16549_s15  ;;  %v22808_v21 = vld [vmem:[#allocation79_spill] sm:$0xff] }
 0xacf   :  { %15346 = vrot.lane.b32.xlu0 %v22785_v18, %s16549_s15  ;;  %v22809_v18 = vld [vmem:[#allocation74_spill] sm:$0xff] }
 0xad0   :  { %v22810_v11 = vpack.i.bf16 %v22808_v21, %v22809_v18 }
 0xad1   :  { %15381 = vrot.lane.b32.xlu1 %v22788_v25, %s16548_s1  ;;  %v22812_v25 = vld [vmem:[#allocation66_spill] sm:$0xff] }
 0xad2   :  { %v22813_v44 = vpack.i.bf16 %v22811_v49, %v22812_v25  ;;  %v22830_v49 = vld [vmem:[#allocation73_spill] sm:$0xff] }
 0xad3   :  { %15356 = vrot.lane.b32.xlu0 %v22791_v13, %s16548_s1  ;;  %v22815_v13 = vld [vmem:[#allocation96_spill] sm:$0xff] }
 0xad5   :  { %15391 = vrot.lane.b32.xlu1 %v22792_v14, %s16549_s15  ;;  %v22816_v14 = vpack.i.bf16 %v22814_v7, %v22815_v13 }
 0xad7   :  { %15366 = vrot.lane.b32.xlu0 %v22795_v59, %s16549_s15  ;;  %v22819_v59 = vpack.i.bf16 %v22817_v50, %v22818_v41 }
 0xad9   :  { %15401 = vrot.lane.b32.xlu1 %v22798_v54, %s16548_s1  ;;  %v22821_v54 = vld [vmem:[#allocation78_spill] sm:$0xff] }
 0xada   :  { %v22822_v12 = vpack.i.bf16 %v22820_v2, %v22821_v54 }
 0xadb   :  { %15376 = vrot.lane.b32.xlu0 %v22801_v26, %s16548_s1  ;;  %v22823_v26 = vld [vmem:[#allocation71_spill] sm:$0xff] }
 0xadc   :  { %v22825_v5 = vpack.i.bf16 %v22823_v26, %v22824_v29 }
 0xadd   :  { %15411 = vrot.lane.b32.xlu1 %v22804_v20, %s16549_s15 }
 0xadf   :  { %15386 = vrot.lane.b32.xlu0 %v22807_v10, %s16549_s15  ;;  %v22828_v10 = vpack.i.bf16 %v22826_v45, %v22827_v27 }
 0xae1   :  { %15421 = vrot.lane.b32.xlu1 %v22810_v11, %s16548_s1  ;;  %v22829_v11 = vld [vmem:[#allocation76_spill] sm:$0xff] }
 0xae2   :  { %v22831_v25 = vpack.i.bf16 %v22829_v11, %v22830_v49 }
 0xae3   :  { %15396 = vrot.lane.b32.xlu0 %v22813_v44, %s16548_s1 }
 0xae5   :  { %15431 = vrot.lane.b32.xlu1 %v22816_v14, %s16549_s15 }
 0xae7   :  { %15406 = vrot.lane.b32.xlu0 %v22819_v59, %s16549_s15 }
 0xae9   :  { %15441 = vrot.lane.b32.xlu1 %v22822_v12, %s16548_s1 }
 0xaeb   :  { %15416 = vrot.lane.b32.xlu0 %v22825_v5, %s16548_s1  ;;  %v22832_v5 = vld [vmem:[#allocation117_spill] sm:$0xff] }
 0xaed   :  { %v9172_v20 = vpop.xlane.xlu1 %9171 }
 0xaee   :  { %16251 = vrcp.f32 %v9172_v20  ;;  %v22833_v20 = vmov 0.0  }
 0xaef   :  { %15426 = vrot.lane.b32.xlu0 %v22828_v10, %s16549_s15  ;;  %v9175_v21 = vpop.xlane.xlu0 %9174 }
 0xaf0   :  { %16253 = vrcp.f32 %v9175_v21 }
 0xaf1   :  { %v9178_v18 = vpop.xlane.xlu1 %9177 }
 0xaf2   :  { %16255 = vrcp.f32 %v9178_v18 }
 0xaf3   :  { %15436 = vrot.lane.b32.xlu0 %v22831_v25, %s16548_s1 }
 0xaf5   :  { %v9184_v44 = vpop.xlane.xlu1 %9183 }
 0xaf6   :  { %v9181_v7 = vpop.xlane.xlu0 %9180 }
 0xaf7   :  { %16257 = vrcp.f32 %v9181_v7 }
 0xaf8   :  { %v16252_v13 = vpop.eup %16251  ;;  %16259 = vrcp.f32 %v9184_v44 }
 0xaf9   :  { %v9190_v14 = vpop.xlane.xlu1 %9189  ;;  %v9330_v59 = vmul.f32 %v16252_v13, %v19799_v56 }
 0xafa   :  { %v16254_v50 = vpop.eup %16253  ;;  %v9187_v41 = vpop.xlane.xlu0 %9186 }
 0xafb   :  { %v9331_v2 = vmul.f32 %v16254_v50, %v19803_v60  ;;  %16261 = vrcp.f32 %v9187_v41 }
 0xafc   :  { %16263 = vrcp.f32 %v9190_v14  ;;  %v16256_v29 = vpop.eup %16255  ;;  %v22834_v14 = vld [vmem:[#allocation119_spill] sm:$0xff] }
 0xafd   :  { %v9370_v54 = vpack.c.bf16 %v9331_v2, %v9330_v59  ;;  %v9196_v12 = vpop.xlane.xlu1 %9195  ;;  %v9332_v56 = vmul.f32 %v16256_v29, %v19809_v24  ;;  %v22835_v2 = vld [vmem:[#allocation118_spill] sm:$0xff] }
 0xafe   :  { %v9193_v26 = vpop.xlane.xlu0 %9192 }
 0xaff   :  { %16265 = vrcp.f32 %v9193_v26  ;;  %15051 = vmatmul.mubr.msk.bf16.vlgmr.msra.gmra.mrb[24].mxu0 %vm1549_vm3, %v9370_v54 }
 0xb00   :  { %15061 = vmatpush3.bf16.msra.mxu0 %v22832_v5  ;;  %15062 = vmatprep.mubr.msk.bf16.mxu0 %vm16536_vm1, %v22833_v20  ;;  %16267 = vrcp.f32 %v9196_v12 }
 0xb01   :  { %v16258_v45 = vpop.eup %16257  ;;  %v9202_v27 = vpop.xlane.xlu1 %9201  ;;  %15072 = vmatprep.subr.bf16.mxu0 %v22833_v20 }
 0xb02   :  { %v9333_v60 = vmul.f32 %v16258_v45, %v19817_v17  ;;  %v9199_v10 = vpop.xlane.xlu0 %9198  ;;  %v16260_v21 = vpop.eup %16259  ;;  %v22836_v45 = vld [vmem:[#allocation121_spill] sm:$0xff] }
 0xb03   :  { %16269 = vrcp.f32 %v9199_v10  ;;  %v9334_v25 = vmul.f32 %v16260_v21, %v19815_v22 }
 0xb04   :  { %v9371_v18 = vpack.c.bf16 %v9333_v60, %v9332_v56  ;;  %16271 = vrcp.f32 %v9202_v27 }
 0xb05   :  { %v16262_v11 = vpop.eup %16261  ;;  %v9208_v49 = vpop.xlane.xlu1 %9207 }
 0xb06   :  { %v9335_v44 = vmul.f32 %v16262_v11, %v19827_v57  ;;  %15057 = vmatmul.mubr.msk.bf16.vlgmr.msra.gmra.mrb[64].mxu1 %vm1549_vm3, %v9371_v18  ;;  %v9205_v7 = vpop.xlane.xlu0 %9204  ;;  %v16264_v13 = vpop.eup %16263  ;;  %v22837_v18 = vld [vmem:[#allocation120_spill] sm:$0xff] }
 0xb07   :  { %15067 = vmatpush3.bf16.msra.mxu1 %v22834_v14  ;;  %16273 = vrcp.f32 %v9205_v7  ;;  %15068 = vmatprep.mubr.msk.bf16.mxu1 %vm16536_vm1, %v22833_v20  ;;  %v9336_v22 = vmul.f32 %v16264_v13, %v19825_v43  ;;  %v22838_v13 = vld [vmem:[#allocation123_spill] sm:$0xff] }
 0xb08   :  { %v9372_v24 = vpack.c.bf16 %v9335_v44, %v9334_v25  ;;  %15078 = vmatprep.subr.bf16.mxu1 %v22833_v20  ;;  %16275 = vrcp.f32 %v9208_v49 }
 0xb09   :  { %v16266_v17 = vpop.eup %16265  ;;  %v9214_v50 = vpop.xlane.xlu1 %9213 }
 0xb0a   :  { %v9337_v57 = vmul.f32 %v16266_v17, %v19837_v16  ;;  %15063 = vmatmul.mubr.msk.bf16.vlgmr.msra.gmra.mrb[28].mxu0 %vm1549_vm3, %v9372_v24  ;;  %v9211_v41 = vpop.xlane.xlu0 %9210  ;;  %v16268_v59 = vpop.eup %16267 }
 0xb0b   :  { %15073 = vmatpush3.bf16.msra.mxu0 %v22835_v2  ;;  %16277 = vrcp.f32 %v9211_v41  ;;  %15074 = vmatprep.mubr.msk.bf16.mxu0 %vm16536_vm1, %v22833_v20  ;;  %v9338_v43 = vmul.f32 %v16268_v59, %v19835_v15 }
 0xb0c   :  { %v9373_v54 = vpack.c.bf16 %v9337_v57, %v9336_v22  ;;  %15084 = vmatprep.subr.bf16.mxu0 %v22833_v20  ;;  %16279 = vrcp.f32 %v9214_v50  ;;  %v22839_v57 = vld [vmem:[#allocation122_spill] sm:$0xff] }
 0xb0d   :  { %v16270_v12 = vpop.eup %16269  ;;  %v9220_v26 = vpop.xlane.xlu1 %9219 }
 0xb0e   :  { %v9339_v16 = vmul.f32 %v16270_v12, %v19847_v36  ;;  %15069 = vmatmul.mubr.msk.bf16.vlgmr.msra.gmra.mrb[68].mxu1 %vm1549_vm3, %v9373_v54  ;;  %v9217_v29 = vpop.xlane.xlu0 %9216  ;;  %v16272_v5 = vpop.eup %16271 }
 0xb0f   :  { %15079 = vmatpush3.bf16.msra.mxu1 %v22836_v45  ;;  %16281 = vrcp.f32 %v9217_v29  ;;  %15080 = vmatprep.mubr.msk.bf16.mxu1 %vm16536_vm1, %v22833_v20  ;;  %v9340_v15 = vmul.f32 %v16272_v5, %v19845_v61 }
 0xb10   :  { %v9374_v27 = vpack.c.bf16 %v9339_v16, %v9338_v43  ;;  %15090 = vmatprep.subr.bf16.mxu1 %v22833_v20  ;;  %16283 = vrcp.f32 %v9220_v26  ;;  %v22840_v26 = vld [vmem:[#allocation125_spill] sm:$0xff] }
 0xb11   :  { %v16274_v56 = vpop.eup %16273  ;;  %v9226_v60 = vpop.xlane.xlu1 %9225 }
 0xb12   :  { %v9341_v36 = vmul.f32 %v16274_v56, %v19857_v55  ;;  %15075 = vmatmul.mubr.msk.bf16.vlgmr.msra.gmra.mrb[32].mxu0 %vm1549_vm3, %v9374_v27  ;;  %v9223_v10 = vpop.xlane.xlu0 %9222  ;;  %v16276_v21 = vpop.eup %16275  ;;  %v22841_v27 = vld [vmem:[#allocation124_spill] sm:$0xff] }
 0xb13   :  { %15085 = vmatpush3.bf16.msra.mxu0 %v22837_v18  ;;  %16285 = vrcp.f32 %v9223_v10  ;;  %15086 = vmatprep.mubr.msk.bf16.mxu0 %vm16536_vm1, %v22833_v20  ;;  %v9342_v61 = vmul.f32 %v16276_v21, %v19855_v47  ;;  %v22842_v21 = vld [vmem:[#allocation127_spill] sm:$0xff] }
 0xb14   :  { %v9375_v11 = vpack.c.bf16 %v9341_v36, %v9340_v15  ;;  %15096 = vmatprep.subr.bf16.mxu0 %v22833_v20  ;;  %16287 = vrcp.f32 %v9226_v60 }
 0xb15   :  { %v16278_v49 = vpop.eup %16277  ;;  %v9232_v25 = vpop.xlane.xlu1 %9231 }
 0xb16   :  { %v9343_v55 = vmul.f32 %v16278_v49, %v19867_v9  ;;  %15081 = vmatmul.mubr.msk.bf16.vlgmr.msra.gmra.mrb[72].mxu1 %vm1549_vm3, %v9375_v11  ;;  %v9229_v44 = vpop.xlane.xlu0 %9228  ;;  %v16280_v7 = vpop.eup %16279 }
 0xb17   :  { %15091 = vmatpush3.bf16.msra.mxu1 %v22838_v13  ;;  %16289 = vrcp.f32 %v9229_v44  ;;  %15092 = vmatprep.mubr.msk.bf16.mxu1 %vm16536_vm1, %v22833_v20  ;;  %v9344_v47 = vmul.f32 %v16280_v7, %v19865_v32 }
 0xb18   :  { %v9376_v14 = vpack.c.bf16 %v9343_v55, %v9342_v61  ;;  %15102 = vmatprep.subr.bf16.mxu1 %v22833_v20  ;;  %16291 = vrcp.f32 %v9232_v25  ;;  %v22843_v55 = vld [vmem:[#allocation126_spill] sm:$0xff] }
 0xb19   :  { %v16282_v24 = vpop.eup %16281  ;;  %v9238_v17 = vpop.xlane.xlu1 %9237 }
 0xb1a   :  { %v9345_v9 = vmul.f32 %v16282_v24, %v19877_v0  ;;  %15087 = vmatmul.mubr.msk.bf16.vlgmr.msra.gmra.mrb[36].mxu0 %vm1549_vm3, %v9376_v14  ;;  %v9235_v50 = vpop.xlane.xlu0 %9234  ;;  %v16284_v22 = vpop.eup %16283 }
 0xb1b   :  { %15097 = vmatpush3.bf16.msra.mxu0 %v22839_v57  ;;  %16293 = vrcp.f32 %v9235_v50  ;;  %15098 = vmatprep.mubr.msk.bf16.mxu0 %vm16536_vm1, %v22833_v20  ;;  %v9346_v32 = vmul.f32 %v16284_v22, %v19875_v30 }
 0xb1c   :  { %v9377_v41 = vpack.c.bf16 %v9345_v9, %v9344_v47  ;;  %15108 = vmatprep.subr.bf16.mxu0 %v22833_v20  ;;  %16295 = vrcp.f32 %v9238_v17  ;;  %v22844_v17 = vld [vmem:[#allocation129_spill] sm:$0xff] }
 0xb1d   :  { %v16286_v59 = vpop.eup %16285  ;;  %v9244_v2 = vpop.xlane.xlu1 %9243 }
 0xb1e   :  { %v9347_v0 = vmul.f32 %v16286_v59, %v19887_v31  ;;  %15093 = vmatmul.mubr.msk.bf16.vlgmr.msra.gmra.mrb[76].mxu1 %vm1549_vm3, %v9377_v41  ;;  %v9241_v54 = vpop.xlane.xlu0 %9240  ;;  %v16288_v12 = vpop.eup %16287  ;;  %v22845_v41 = vld [vmem:[#allocation128_spill] sm:$0xff] }
 0xb1f   :  { %15103 = vmatpush3.bf16.msra.mxu1 %v22840_v26  ;;  %16297 = vrcp.f32 %v9241_v54  ;;  %15104 = vmatprep.mubr.msk.bf16.mxu1 %vm16536_vm1, %v22833_v20  ;;  %v9348_v30 = vmul.f32 %v16288_v12, %v19885_v62  ;;  %v22846_v12 = vld [vmem:[#allocation130_spill] sm:$0xff] }
 0xb20   :  { %v9378_v43 = vpack.c.bf16 %v9347_v0, %v9346_v32  ;;  %15114 = vmatprep.subr.bf16.mxu1 %v22833_v20  ;;  %16299 = vrcp.f32 %v9244_v2 }
 0xb21   :  { %v16290_v16 = vpop.eup %16289  ;;  %v9250_v29 = vpop.xlane.xlu1 %9249 }
 0xb22   :  { %v9349_v31 = vmul.f32 %v16290_v16, %v19897_v39  ;;  %15099 = vmatmul.mubr.msk.bf16.vlgmr.msra.gmra.mrb[40].mxu0 %vm1549_vm3, %v9378_v43  ;;  %v9247_v5 = vpop.xlane.xlu0 %9246  ;;  %v16292_v45 = vpop.eup %16291 }
 0xb23   :  { %15109 = vmatpush3.bf16.msra.mxu0 %v22841_v27  ;;  %16301 = vrcp.f32 %v9247_v5  ;;  %15110 = vmatprep.mubr.msk.bf16.mxu0 %vm16536_vm1, %v22833_v20  ;;  %v9350_v62 = vmul.f32 %v16292_v45, %v19895_v19 }
 0xb24   :  { %v9379_v56 = vpack.c.bf16 %v9349_v31, %v9348_v30  ;;  %15120 = vmatprep.subr.bf16.mxu0 %v22833_v20  ;;  %16303 = vrcp.f32 %v9250_v29 }
 0xb25   :  { %v16294_v60 = vpop.eup %16293  ;;  %v9256_v15 = vpop.xlane.xlu1 %9255 }
 0xb26   :  { %v9351_v39 = vmul.f32 %v16294_v60, %v19907_v63  ;;  %15105 = vmatmul.mubr.msk.bf16.vlgmr.msra.gmra.mrb[80].mxu1 %vm1549_vm3, %v9379_v56  ;;  %v9253_v36 = vpop.xlane.xlu0 %9252  ;;  %v16296_v10 = vpop.eup %16295 }
 0xb27   :  { %15115 = vmatpush3.bf16.msra.mxu1 %v22842_v21  ;;  %16305 = vrcp.f32 %v9253_v36  ;;  %15116 = vmatprep.mubr.msk.bf16.mxu1 %vm16536_vm1, %v22833_v20  ;;  %v9352_v19 = vmul.f32 %v16296_v10, %v19905_v23 }
 0xb28   :  { %v9380_v18 = vpack.c.bf16 %v9351_v39, %v9350_v62  ;;  %15126 = vmatprep.subr.bf16.mxu1 %v22833_v20  ;;  %16307 = vrcp.f32 %v9256_v15 }
 0xb29   :  { %v16298_v11 = vpop.eup %16297  ;;  %v9262_v49 = vpop.xlane.xlu1 %9261 }
 0xb2a   :  { %v9353_v63 = vmul.f32 %v16298_v11, %v19917_v6  ;;  %15111 = vmatmul.mubr.msk.bf16.vlgmr.msra.gmra.mrb[44].mxu0 %vm1549_vm3, %v9380_v18  ;;  %v9259_v25 = vpop.xlane.xlu0 %9258  ;;  %v16300_v61 = vpop.eup %16299 }
 0xb2b   :  { %15121 = vmatpush3.bf16.msra.mxu0 %v22843_v55  ;;  %16309 = vrcp.f32 %v9259_v25  ;;  %15122 = vmatprep.mubr.msk.bf16.mxu0 %vm16536_vm1, %v22833_v20  ;;  %v9354_v23 = vmul.f32 %v16300_v61, %v19915_v1 }
 0xb2c   :  { %v9381_v44 = vpack.c.bf16 %v9353_v63, %v9352_v19  ;;  %15132 = vmatprep.subr.bf16.mxu0 %v22833_v20  ;;  %16311 = vrcp.f32 %v9262_v49 }
 0xb2d   :  { %v16302_v7 = vpop.eup %16301  ;;  %v9268_v13 = vpop.xlane.xlu1 %9267 }
 0xb2e   :  { %v9355_v6 = vmul.f32 %v16302_v7, %v19927_v58  ;;  %15117 = vmatmul.mubr.msk.bf16.vlgmr.msra.gmra.mrb[84].mxu1 %vm1549_vm3, %v9381_v44  ;;  %v9265_v14 = vpop.xlane.xlu0 %9264  ;;  %v16304_v24 = vpop.eup %16303  ;;  %v22847_v44 = vld [vmem:[#allocation101_spill] sm:$0xff]  ;;  %v22848_v7 = vld [vmem:[#allocation98_spill] sm:$0xff] }
 0xb2f   :  { %15127 = vmatpush3.bf16.msra.mxu1 %v22844_v17  ;;  %16313 = vrcp.f32 %v9265_v14  ;;  %15128 = vmatprep.mubr.msk.bf16.mxu1 %vm16536_vm1, %v22833_v20  ;;  %v9356_v1 = vmul.f32 %v16304_v24, %v19925_v8 }
 0xb30   :  { %v9382_v47 = vpack.c.bf16 %v9355_v6, %v9354_v23  ;;  %15138 = vmatprep.subr.bf16.mxu1 %v22833_v20  ;;  %16315 = vrcp.f32 %v9268_v13  ;;  %v22849_v13 = vpack.i.bf16 %v22847_v44, %v22848_v7 }
 0xb31   :  { %v16306_v9 = vpop.eup %16305  ;;  %v9274_v50 = vpop.xlane.xlu1 %9273 }
 0xb32   :  { %v9357_v58 = vmul.f32 %v16306_v9, %v19937_v38  ;;  %15123 = vmatmul.mubr.msk.bf16.vlgmr.msra.gmra.mrb[48].mxu0 %vm1549_vm3, %v9382_v47  ;;  %v9271_v22 = vpop.xlane.xlu0 %9270  ;;  %v16308_v57 = vpop.eup %16307 }
 0xb33   :  { %15133 = vmatpush3.bf16.msra.mxu0 %v22845_v41  ;;  %16317 = vrcp.f32 %v9271_v22  ;;  %15134 = vmatprep.mubr.msk.bf16.mxu0 %vm16536_vm1, %v22833_v20  ;;  %v9358_v8 = vmul.f32 %v16308_v57, %v19935_v3 }
 0xb34   :  { %v9383_v59 = vpack.c.bf16 %v9357_v58, %v9356_v1  ;;  %15144 = vmatprep.subr.bf16.mxu0 %v22833_v20  ;;  %16319 = vrcp.f32 %v9274_v50  ;;  %v22850_v1 = vld [vmem:[#allocation103_spill] sm:$0xff]  ;;  %v22851_v58 = vld [vmem:[#allocation100_spill] sm:$0xff] }
 0xb35   :  { %v16310_v2 = vpop.eup %16309  ;;  %v9280_v32 = vpop.xlane.xlu1 %9279  ;;  %v22852_v22 = vpack.i.bf16 %v22850_v1, %v22851_v58  ;;  %v22874_v1 = vld [vmem:[#allocation112_spill] sm:$0xff]  ;;  %v22875_v58 = vld [vmem:[#allocation109_spill] sm:$0xff] }
 0xb36   :  { %v9359_v38 = vmul.f32 %v16310_v2, %v19947_v40  ;;  %15129 = vmatmul.mubr.msk.bf16.vlgmr.msra.gmra.mrb[88].mxu1 %vm1549_vm3, %v9383_v59  ;;  %v9277_v0 = vpop.xlane.xlu0 %9276  ;;  %v16312_v54 = vpop.eup %16311 }
 0xb37   :  { %15139 = vmatpush3.bf16.msra.mxu1 %v22846_v12  ;;  %16321 = vrcp.f32 %v9277_v0  ;;  %15140 = vmatprep.mubr.msk.bf16.mxu1 %vm16536_vm1, %v22833_v20  ;;  %v9360_v16 = vmul.f32 %v16312_v54, %v19945_v51 }
 0xb38   :  { %v9384_v26 = vpack.c.bf16 %v9359_v38, %v9358_v8  ;;  %15150 = vmatprep.subr.bf16.mxu1 %v22833_v20  ;;  %16323 = vrcp.f32 %v9280_v32  ;;  %v22853_v8 = vld [vmem:[#allocation80_spill] sm:$0xff]  ;;  %v22854_v38 = vld [vmem:[#allocation77_spill] sm:$0xff] }
 0xb39   :  { %v16314_v43 = vpop.eup %16313  ;;  %v9286_v40 = vpop.xlane.xlu1 %9285  ;;  %v22855_v0 = vpack.i.bf16 %v22853_v8, %v22854_v38  ;;  %v22877_v8 = vld [vmem:[#allocation88_spill] sm:$0xff]  ;;  %v22878_v38 = vld [vmem:[#allocation87_spill] sm:$0xff] }
 0xb3a   :  { %v9361_v3 = vmul.f32 %v16314_v43, %v19957_v53  ;;  %15135 = vmatmul.mubr.msk.bf16.vlgmr.msra.gmra.mrb[52].mxu0 %vm1549_vm3, %v9384_v26  ;;  %v9283_v29 = vpop.xlane.xlu0 %9282  ;;  %v16316_v30 = vpop.eup %16315 }
 0xb3b   :  { %15145 = vmatpush3.bf16.msra.mxu0 %v20074_v46  ;;  %16325 = vrcp.f32 %v9283_v29  ;;  %15146 = vmatprep.mubr.msk.bf16.mxu0 %vm16536_vm1, %v22833_v20  ;;  %v9362_v51 = vmul.f32 %v16316_v30, %v19955_v34 }
 0xb3c   :  { %v9385_v31 = vpack.c.bf16 %v9361_v3, %v9360_v16  ;;  %15156 = vmatprep.subr.bf16.mxu0 %v22833_v20  ;;  %16327 = vrcp.f32 %v9286_v40  ;;  %v22856_v3 = vld [vmem:[#allocation82_spill] sm:$0xff]  ;;  %v22857_v40 = vld [vmem:[#allocation81_spill] sm:$0xff] }
 0xb3d   :  { %v16318_v5 = vpop.eup %16317  ;;  %v10284_v10 = vpop.permute.xlu1 %10283  ;;  %v22858_v29 = vpack.i.bf16 %v22856_v3, %v22857_v40  ;;  %v22880_v40 = vld [vmem:[#allocation90_spill] sm:$0xff] }
 0xb3e   :  { %v9363_v53 = vmul.f32 %v16318_v5, %v19966_v52  ;;  %15141 = vmatmul.mubr.msk.bf16.vlgmr.msra.gmra.mrb[92].mxu1 %vm1549_vm3, %v9385_v31  ;;  %v9289_v45 = vpop.xlane.xlu0 %9288  ;;  %v16320_v27 = vpop.eup %16319 }
 0xb3f   :  { %15151 = vmatpush3.bf16.msra.mxu1 %v20068_v28  ;;  %16329 = vrcp.f32 %v9289_v45  ;;  %15152 = vmatprep.mubr.msk.bf16.mxu1 %vm16536_vm1, %v22833_v20  ;;  %v9364_v60 = vmul.f32 %v16320_v27, %v19964_v33  ;;  %v22859_v45 = vld [vmem:[#allocation105_spill] sm:$0xff]  ;;  %v22860_v27 = vld [vmem:[#allocation102_spill] sm:$0xff] }
 0xb40   :  { %v9386_v46 = vpack.c.bf16 %v9363_v53, %v9362_v51  ;;  %15162 = vmatprep.subr.bf16.mxu1 %v22833_v20 }
 0xb41   :  { %v16322_v56 = vpop.eup %16321 }
 0xb42   :  { %v9365_v34 = vmul.f32 %v16322_v56, %v19974_v42  ;;  %15147 = vmatmul.mubr.msk.bf16.vlgmr.msra.gmra.mrb[56].mxu0 %vm1549_vm3, %v9386_v46  ;;  %v10237_v52 = vpop.permute.xlu0 %10236  ;;  %v16324_v15 = vpop.eup %16323  ;;  %v22861_v46 = vpack.i.bf16 %v22859_v45, %v22860_v27  ;;  %v22883_v27 = vld [vmem:[#allocation111_spill] sm:$0xff] }
 0xb43   :  { %15157 = vmatpush3.bf16.msra.mxu0 %v10237_v52  ;;  %15158 = vmatprep.mubr.msk.bf16.mxu0 %vm16536_vm1, %v22833_v20  ;;  %v9366_v39 = vmul.f32 %v16324_v15, %v19972_v4  ;;  %v15659_v4 = vld [vmem:[%s22310_s3] sm:$0xff]  }
 0xb44   :  { %v9387_v28 = vpack.c.bf16 %v9365_v34, %v9364_v60  ;;  %15168 = vmatprep.subr.bf16.mxu0 %v15659_v4 }
 0xb45   :  { %v16326_v62 = vpop.eup %16325 }
 0xb46   :  { %v9367_v36 = vmul.f32 %v16326_v62, %v19982_v48  ;;  %15153 = vmatmul.mubr.msk.bf16.vlgmr.msra.gmra.mrb[96].mxu1 %vm1549_vm3, %v9387_v28  ;;  %v16328_v33 = vpop.eup %16327  ;;  %v15660_v48 = vld [vmem:[%s22310_s3 + $0x8] sm:$0xff]   ;;  %v22863_v62 = vld [vmem:[#allocation104_spill] sm:$0xff]  ;;  %s16552_s3 = smov [#allocation2]  }
 0xb47   :  { %15163 = vmatpush3.bf16.msra.mxu1 %v10284_v10  ;;  %15164 = vmatprep.mubr.msk.bf16.mxu1 %vm16536_vm1, %v22833_v20  ;;  %v9368_v18 = vmul.f32 %v16328_v33, %v19980_v37  ;;  %v22862_v28 = vld [vmem:[#allocation107_spill] sm:$0xff]  ;;  %s13475_s21 = sshll.u32 %s16552_s3, 4  ;;  %s13476_s21 = int_to_ptr.vmem [resolvable:$true] %s13475_s21 }
 0xb48   :  { %v9388_v42 = vpack.c.bf16 %v9367_v36, %v9366_v39  ;;  %v22864_v39 = vpack.i.bf16 %v22862_v28, %v22863_v62  ;;  %s16511_s22 = scalar_lea.vmem %s13476_s21, 384  ;;  %p16516_p1 = scmp.lt.s32.totalorder %s13476_s21, %s13476_s21 }
 0xb49   :  { %v16330_v21 = vpop.eup %16329  ;;  %p16512_p0 = scmp.ne.s32.totalorder %s13476_s21, %s16511_s22  ;;  %p16517_p2 = scmp.lt.s32.totalorder %s16511_s22, %s16511_s22 }
 0xb4a   :  { %v9369_v11 = vmul.f32 %v16330_v21, %v19988_v35  ;;  %15159 = vmatmul.mubr.msk.bf16.vlgmr.msra.gmra.mrb[60].mxu0 %vm1549_vm3, %v9388_v42 }
 0xb4b   :  { %15169 = vmatpush3.bf16.msra.mxu0 %v15659_v4  ;;  %p16518_p3 = por %p16517_p2, %p16516_p1 }
 0xb4c   :  { %v9389_v49 = vpack.c.bf16 %v9369_v11, %v9368_v18  ;;  %15170 = vmatprep.subr.bf16.mxu0 %v15660_v48  ;;  %v22865_v18 = vld [vmem:[#allocation84_spill] sm:$0xff]  ;;  %v22866_v11 = vld [vmem:[#allocation83_spill] sm:$0xff] }
 0xb4d   :  { %p16519_p4 = pnand %p16518_p3, %p16512_p0 }
 0xb4e   :  { %15165 = vmatmul.mubr.msk.bf16.vlgmr.msra.gmra.mrb[100].mxu1 %vm1549_vm3, %v9389_v49  ;;  %v22867_v49 = vpack.i.bf16 %v22865_v18, %v22866_v11 }
 0xb4f   :  { %15171 = vmatpush3.bf16.msra.mxu0 %v15660_v48 }
 0xbd2   :  { %v9430_v20 = vpop.f32.mrb[24].mxu0 }
 0xbd3   :  { %v15052_v19 = vpop.f32.mrb[25].mxu0 }
 0xbd4   :  { %v9433_v37 = vpop.f32.mrb[26].mxu0 }
 0xbd5   :  { %v15445_v35 = vpack.i.bf16 %v9433_v37, %v9430_v20  ;;  %v15053_v63 = vpop.f32.mrb[27].mxu0 }
 0xbd6   :  { %v22869_v63 = vld [vmem:[#allocation85_spill] sm:$0xff] }
 0xbd7   :  { %15446 = vrot.lane.b32.xlu0 %v15445_v35, %s16550_s20  ;;  %v22868_v35 = vld [vmem:[#allocation86_spill] sm:$0xff] }
 0xbd9   :  { %v9477_v25 = vpop.f32.mrb[64].mxu1 }
 0xbda   :  { %v15058_v61 = vpop.f32.mrb[65].mxu1 }
 0xbdb   :  { %v9480_v55 = vpop.f32.mrb[66].mxu1  ;;  %15451 = vrot.lane.b32.xlu0 %v22849_v13, %s16549_s15 }
 0xbdc   :  { %v15455_v23 = vpack.i.bf16 %v9480_v55, %v9477_v25  ;;  %v15059_v6 = vpop.f32.mrb[67].mxu1  ;;  %v22870_v25 = vpack.i.bf16 %v22868_v35, %v22869_v63 }
 0xbdd   :  { %v9524_v14 = vpop.f32.mrb[28].mxu0  ;;  %v22872_v6 = vld [vmem:[#allocation106_spill] sm:$0xff] }
 0xbde   :  { %15456 = vrot.lane.b32.xlu1 %v15455_v23, %s16550_s20  ;;  %v15064_v24 = vpop.f32.mrb[29].mxu0  ;;  %v22871_v23 = vld [vmem:[#allocation108_spill] sm:$0xff] }
 0xbdf   :  { %v9527_v17 = vpop.f32.mrb[30].mxu0 }
 0xbe0   :  { %v15465_v47 = vpack.i.bf16 %v9527_v17, %v9524_v14  ;;  %v15065_v9 = vpop.f32.mrb[31].mxu0  ;;  %v22873_v14 = vpack.i.bf16 %v22871_v23, %v22872_v6 }
 0xbe1   :  { %v9571_v50 = vpop.f32.mrb[68].mxu1 }
 0xbe2   :  { %15461 = vrot.lane.b32.xlu1 %v22852_v22, %s16549_s15  ;;  %15466 = vrot.lane.b32.xlu0 %v15465_v47, %s16550_s20  ;;  %v15070_v57 = vpop.f32.mrb[69].mxu1  ;;  %v22876_v22 = vpack.i.bf16 %v22874_v1, %v22875_v58  ;;  %v22896_v1 = vld [vmem:[#allocation113_spill] sm:$0xff] }
 0xbe3   :  { %v9574_v41 = vpop.f32.mrb[70].mxu1 }
 0xbe4   :  { %v15475_v59 = vpack.i.bf16 %v9574_v41, %v9571_v50  ;;  %v15071_v2 = vpop.f32.mrb[71].mxu1 }
 0xbe5   :  { %v9618_v32 = vpop.f32.mrb[32].mxu0 }
 0xbe6   :  { %15471 = vrot.lane.b32.xlu0 %v22855_v0, %s16548_s1  ;;  %15476 = vrot.lane.b32.xlu1 %v15475_v59, %s16550_s20  ;;  %v15076_v54 = vpop.f32.mrb[33].mxu0  ;;  %v22879_v0 = vpack.i.bf16 %v22877_v8, %v22878_v38  ;;  %v22898_v38 = vld [vmem:[#allocation115_spill] sm:$0xff] }
 0xbe7   :  { %v9621_v12 = vpop.f32.mrb[34].mxu0 }
 0xbe8   :  { %v15485_v26 = vpack.i.bf16 %v9621_v12, %v9618_v32  ;;  %v15077_v43 = vpop.f32.mrb[35].mxu0 }
 0xbe9   :  { %v9665_v16 = vpop.f32.mrb[72].mxu1 }
 0xbea   :  { %15481 = vrot.lane.b32.xlu1 %v22858_v29, %s16548_s1  ;;  %15486 = vrot.lane.b32.xlu0 %v15485_v26, %s16550_s20  ;;  %v15082_v30 = vpop.f32.mrb[73].mxu1  ;;  %v22881_v29 = vld [vmem:[#allocation89_spill] sm:$0xff] }
 0xbeb   :  { %v9668_v31 = vpop.f32.mrb[74].mxu1  ;;  %v22882_v30 = vpack.i.bf16 %v22880_v40, %v22881_v29 }
 0xbec   :  { %v15495_v5 = vpack.i.bf16 %v9668_v31, %v9665_v16  ;;  %v15083_v51 = vpop.f32.mrb[75].mxu1  ;;  %v20278_v16 = vpop.permute.xlu0 %15336 }
 0xbed   :  { %v9712_v53 = vpop.f32.mrb[36].mxu0 }
 0xbee   :  { %15491 = vrot.lane.b32.xlu0 %v22861_v46, %s16549_s15  ;;  %15496 = vrot.lane.b32.xlu1 %v15495_v5, %s16550_s20  ;;  %v15088_v56 = vpop.f32.mrb[37].mxu0  ;;  %v22884_v46 = vld [vmem:[#allocation110_spill] sm:$0xff] }
 0xbef   :  { %v9715_v60 = vpop.f32.mrb[38].mxu0  ;;  %v22885_v56 = vpack.i.bf16 %v22883_v27, %v22884_v46 }
 0xbf0   :  { %v15505_v34 = vpack.i.bf16 %v9715_v60, %v9712_v53  ;;  %v15089_v52 = vpop.f32.mrb[39].mxu0 }
 0xbf1   :  { %v9759_v15 = vpop.f32.mrb[76].mxu1 }
 0xbf2   :  { %15501 = vrot.lane.b32.xlu1 %v22864_v39, %s16549_s15  ;;  %15506 = vrot.lane.b32.xlu0 %v15505_v34, %s16550_s20  ;;  %v15094_v36 = vpop.f32.mrb[77].mxu1  ;;  %v20290_v34 = vpop.permute.xlu0 %15346 }
 0xbf3   :  { %v9762_v10 = vpop.f32.mrb[78].mxu1  ;;  %v22886_v36 = vld [vmem:[#allocation5_spill] sm:$0xff] }
 0xbf4   :  { %v15515_v33 = vpack.i.bf16 %v9762_v10, %v9759_v15  ;;  %v15095_v42 = vpop.f32.mrb[79].mxu1  ;;  %v20292_v15 = vpop.permute.xlu1 %15341  ;;  %v22887_v10 = vld [vmem:[#allocation114_spill] sm:$0xff] }
 0xbf5   :  { %v9806_v21 = vpop.f32.mrb[40].mxu0 }
 0xbf6   :  { %15511 = vrot.lane.b32.xlu0 %v22867_v49, %s16548_s1  ;;  %15516 = vrot.lane.b32.xlu1 %v15515_v33, %s16550_s20  ;;  %v15100_v4 = vpop.f32.mrb[41].mxu0  ;;  %v22888_v33 = vpack.i.bf16 %v22886_v36, %v22887_v10  ;;  %v20299_v49 = vpop.permute.xlu0 %15356  ;;  %v22901_v10 = vld [vmem:[#allocation18_spill] sm:$0xff] }
 0xbf7   :  { %v9809_v48 = vpop.f32.mrb[42].mxu0 }
 0xbf8   :  { %v15525_v20 = vpack.i.bf16 %v9809_v48, %v9806_v21  ;;  %v15101_v19 = vpop.f32.mrb[43].mxu0  ;;  %v20301_v48 = vpop.permute.xlu1 %15351 }
 0xbf9   :  { %v9853_v37 = vpop.f32.mrb[80].mxu1  ;;  %v22890_v19 = vld [vmem:[#allocation91_spill] sm:$0xff] }
 0xbfa   :  { %15521 = vrot.lane.b32.xlu1 %v22870_v25, %s16548_s1  ;;  %15526 = vrot.lane.b32.xlu0 %v15525_v20, %s16550_s20  ;;  %v15106_v61 = vpop.f32.mrb[81].mxu1  ;;  %v22889_v20 = vld [vmem:[#allocation92_spill] sm:$0xff]  ;;  %v20313_v6 = vpop.permute.xlu0 %15366 }
 0xbfb   :  { %v9856_v55 = vpop.f32.mrb[82].mxu1 }
 0xbfc   :  { %v15535_v44 = vpack.i.bf16 %v9856_v55, %v9853_v37  ;;  %v15107_v7 = vpop.f32.mrb[83].mxu1  ;;  %v22891_v37 = vpack.i.bf16 %v22889_v20, %v22890_v19  ;;  %v15344_v20 = vunpack.i.h.bf16 %v20292_v15  ;;  %v15343_v19 = vunpack.i.l.bf16 %v20292_v15 }
 0xbfd   :  { %v9900_v13 = vpop.f32.mrb[44].mxu0  ;;  %v22893_v7 = vld [vmem:[#allocation93_spill] sm:$0xff] }
 0xbfe   :  { %15531 = vrot.lane.b32.xlu0 %v22873_v14, %s16549_s15  ;;  %15536 = vrot.lane.b32.xlu1 %v15535_v44, %s16550_s20  ;;  %v15112_v24 = vpop.f32.mrb[45].mxu0  ;;  %v22892_v44 = vld [vmem:[#allocation94_spill] sm:$0xff] }
 0xbff   :  { %v9903_v17 = vpop.f32.mrb[46].mxu0  ;;  %v20315_v24 = vpop.permute.xlu1 %15361 }
 0xc00   :  { %v15545_v47 = vpack.i.bf16 %v9903_v17, %v9900_v13  ;;  %v15113_v9 = vpop.f32.mrb[47].mxu0  ;;  %v22894_v13 = vpack.i.bf16 %v22892_v44, %v22893_v7  ;;  %v22904_v7 = vld [vmem:[#allocation14_spill] sm:$0xff] }
 0xc01   :  { %v9947_v50 = vpop.f32.mrb[84].mxu1 }
 0xc02   :  { %15541 = vrot.lane.b32.xlu1 %v22876_v22, %s16549_s15  ;;  %15546 = vrot.lane.b32.xlu0 %v15545_v47, %s16550_s20  ;;  %v15118_v57 = vpop.f32.mrb[85].mxu1 }
 0xc03   :  { %v9950_v41 = vpop.f32.mrb[86].mxu1  ;;  %v20324_v8 = vpop.permute.xlu1 %15371 }
 0xc04   :  { %v15555_v59 = vpack.i.bf16 %v9950_v41, %v9947_v50  ;;  %v15119_v2 = vpop.f32.mrb[87].mxu1  ;;  %v22895_v50 = vld [vmem:[#allocation116_spill] sm:$0xff] }
 0xc05   :  { %v9994_v32 = vpop.f32.mrb[48].mxu0  ;;  %v22897_v58 = vpack.i.bf16 %v22895_v50, %v22896_v1  ;;  %v20322_v2 = vpop.permute.xlu0 %15376  ;;  %v15369_v1 = vunpack.i.h.bf16 %v20313_v6 }
 0xc06   :  { %15551 = vrot.lane.b32.xlu0 %v22879_v0, %s16548_s1  ;;  %15556 = vrot.lane.b32.xlu1 %v15555_v59, %s16550_s20  ;;  %v15124_v54 = vpop.f32.mrb[49].mxu0  ;;  %v22899_v0 = vld [vmem:[#allocation6_spill] sm:$0xff] }
 0xc07   :  { %v9997_v12 = vpop.f32.mrb[50].mxu0  ;;  %v22900_v54 = vpack.i.bf16 %v22898_v38, %v22899_v0  ;;  %v20334_v29 = vpop.permute.xlu1 %15381  ;;  %v22905_v0 = vld [vmem:[#allocation25_spill] sm:$0xff] }
 0xc08   :  { %v15565_v26 = vpack.i.bf16 %v9997_v12, %v9994_v32  ;;  %v15125_v43 = vpop.f32.mrb[51].mxu0 }
 0xc09   :  { %v10041_v3 = vpop.f32.mrb[88].mxu1  ;;  %v20332_v40 = vpop.permute.xlu0 %15386 }
 0xc0a   :  { %15561 = vrot.lane.b32.xlu1 %v22882_v30, %s16548_s1  ;;  %15566 = vrot.lane.b32.xlu0 %v15565_v26, %s16550_s20  ;;  %v15130_v31 = vpop.f32.mrb[89].mxu1 }
 0xc0b   :  { %v10044_v5 = vpop.f32.mrb[90].mxu1  ;;  %v20338_v31 = vpop.permute.xlu1 %15391 }
 0xc0c   :  { %v15575_v51 = vpack.i.bf16 %v10044_v5, %v10041_v3  ;;  %v15131_v53 = vpop.f32.mrb[91].mxu1 }
 0xc0d   :  { %v10088_v45 = vpop.f32.mrb[52].mxu0  ;;  %v20336_v30 = vpop.permute.xlu0 %15396 }
 0xc0e   :  { %15571 = vrot.lane.b32.xlu0 %v22885_v56, %s16549_s15  ;;  %15576 = vrot.lane.b32.xlu1 %v15575_v51, %s16550_s20  ;;  %v15136_v60 = vpop.f32.mrb[53].mxu0 }
 0xc0f   :  { %v10091_v52 = vpop.f32.mrb[54].mxu0  ;;  %v20342_v51 = vpop.permute.xlu1 %15401  ;;  %v15339_v60 = vunpack.i.h.bf16 %v20278_v16 }
 0xc10   :  { %v15585_v28 = vpack.i.bf16 %v10091_v52, %v10088_v45  ;;  %v15137_v62 = vpop.f32.mrb[55].mxu0  ;;  %v15338_v52 = vunpack.i.l.bf16 %v20278_v16 }
 0xc11   :  { %v10135_v39 = vpop.f32.mrb[92].mxu1  ;;  %v20340_v5 = vpop.permute.xlu0 %15406  ;;  %v15349_v62 = vunpack.i.h.bf16 %v20290_v34 }
 0xc12   :  { %15581 = vrot.lane.b32.xlu1 %v22888_v33, %s16549_s15  ;;  %15586 = vrot.lane.b32.xlu0 %v15585_v28, %s16550_s20  ;;  %v15142_v42 = vpop.f32.mrb[93].mxu1  ;;  %v10811_v33 = vsel %vm511_vm2, %v22901_v10, %v15339_v60  ;;  %v15373_v60 = vunpack.i.l.bf16 %v20324_v8 }
 0xc13   :  { %v10138_v21 = vpop.f32.mrb[94].mxu1  ;;  %v20346_v45 = vpop.permute.xlu1 %15411  ;;  %v22902_v42 = vld [vmem:[#allocation16_spill] sm:$0xff]  ;;  %v10851_v16 = vsel %vm1549_vm3, %v10811_v33, %v15349_v62 }
 0xc14   :  { %v15595_v18 = vpack.i.bf16 %v10138_v21, %v10135_v39  ;;  %v15143_v11 = vpop.f32.mrb[95].mxu1  ;;  %v15348_v39 = vunpack.i.l.bf16 %v20290_v34  ;;  %v10810_v21 = vsel %vm511_vm2, %v22902_v42, %v15338_v52  ;;  %v22908_v33 = vld [vmem:[#allocation20_spill] sm:$0xff] }
 0xc15   :  { %v10182_v4 = vpop.f32.mrb[56].mxu0  ;;  %v20344_v53 = vpop.permute.xlu0 %15416 }
 0xc16   :  { %15591 = vrot.lane.b32.xlu0 %v22891_v37, %s16548_s1  ;;  %15596 = vrot.lane.b32.xlu1 %v15595_v18, %s16550_s20  ;;  %v15148_v35 = vpop.f32.mrb[57].mxu0 }
 0xc17   :  { %v10185_v63 = vpop.f32.mrb[58].mxu0  ;;  %v20350_v46 = vpop.permute.xlu1 %15421 }
 0xc18   :  { %v15605_v25 = vpack.i.bf16 %v10185_v63, %v10182_v4  ;;  %v15149_v61 = vpop.f32.mrb[59].mxu0  ;;  %v10850_v4 = vsel %vm1549_vm3, %v10810_v21, %v15348_v39 }
 0xc19   :  { %v10229_v55 = vpop.f32.mrb[96].mxu1  ;;  %v20348_v27 = vpop.permute.xlu0 %15426  ;;  %v15353_v61 = vunpack.i.l.bf16 %v20301_v48 }
 0xc1a   :  { %15601 = vrot.lane.b32.xlu1 %v22894_v13, %s16548_s1  ;;  %15606 = vrot.lane.b32.xlu0 %v15605_v25, %s16550_s20  ;;  %v15154_v23 = vpop.f32.mrb[97].mxu1  ;;  %v15354_v25 = vunpack.i.h.bf16 %v20301_v48  ;;  %v10812_v13 = vsel %vm511_vm2, %v22904_v7, %v15343_v19 }
 0xc1b   :  { %v10232_v14 = vpop.f32.mrb[98].mxu1  ;;  %v20356_v28 = vpop.permute.xlu1 %15431  ;;  %v10852_v50 = vsel %vm1549_vm3, %v10812_v13, %v15353_v61 }
 0xc1c   :  { %v15615_v17 = vpack.i.bf16 %v10232_v14, %v10229_v55  ;;  %v15155_v47 = vpop.f32.mrb[99].mxu1  ;;  %v22903_v55 = vld [vmem:[#allocation23_spill] sm:$0xff]  ;;  %v15359_v14 = vunpack.i.h.bf16 %v20299_v49 }
 0xc1d   :  { %v10276_v9 = vpop.f32.mrb[60].mxu0  ;;  %v20352_v56 = vpop.permute.xlu0 %15436  ;;  %v10813_v44 = vsel %vm511_vm2, %v22903_v55, %v15344_v20  ;;  %v15384_v55 = vunpack.i.h.bf16 %v20334_v29 }
 0xc1e   :  { %15611 = vrot.lane.b32.xlu0 %v22897_v58, %s16549_s15  ;;  %15616 = vrot.lane.b32.xlu1 %v15615_v17, %s16550_s20  ;;  %v15160_v22 = vpop.f32.mrb[61].mxu0  ;;  %v15358_v17 = vunpack.i.l.bf16 %v20299_v49  ;;  %v10853_v48 = vsel %vm1549_vm3, %v10813_v44, %v15354_v25  ;;  %v15368_v58 = vunpack.i.l.bf16 %v20313_v6 }
 0xc1f   :  { %v10279_v57 = vpop.f32.mrb[62].mxu0  ;;  %v20368_v37 = vpop.permute.xlu1 %15441 }
 0xc20   :  { %v15625_v41 = vpack.i.bf16 %v10279_v57, %v10276_v9  ;;  %v15161_v59 = vpop.f32.mrb[63].mxu0 }
 0xc21   :  { %v10323_v32 = vpop.f32.mrb[100].mxu1  ;;  %v15363_v59 = vunpack.i.l.bf16 %v20315_v24 }
 0xc22   :  { %15621 = vrot.lane.b32.xlu1 %v22900_v54, %s16549_s15  ;;  %v15166_v12 = vpop.f32.mrb[101].mxu1  ;;  %15626 = vrot.lane.b32.xlu0 %v15625_v41, %s16550_s20  ;;  %v15364_v41 = vunpack.i.h.bf16 %v20315_v24  ;;  %v10815_v54 = vsel %vm511_vm2, %v22905_v0, %v15359_v14 }
 0xc23   :  { %v10326_v26 = vpop.f32.mrb[102].mxu1  ;;  %v22906_v12 = vld [vmem:[#allocation19_spill] sm:$0xff]  ;;  %v10855_v24 = vsel %vm1549_vm3, %v10815_v54, %v15369_v1  ;;  %v10816_v42 = vsel %vm511_vm2, %v22908_v33, %v15363_v59  ;;  %v22912_v59 = vld [vmem:[#allocation22_spill] sm:$0xff]  ;;  %v15399_v54 = vunpack.i.h.bf16 %v20336_v30 }
 0xc24   :  { %v15630_v43 = vpack.i.bf16 %v10326_v26, %v10323_v32  ;;  %v15167_v3 = vpop.f32.mrb[103].mxu1  ;;  %v10814_v26 = vsel %vm511_vm2, %v22906_v12, %v15358_v17  ;;  %v10856_v19 = vsel %vm1549_vm3, %v10816_v42, %v15373_v60  ;;  %v22910_v17 = vld [vmem:[#allocation21_spill] sm:$0xff]  ;;  %v15398_v12 = vunpack.i.l.bf16 %v20336_v30 }
 0xc25   :  { %v15374_v3 = vunpack.i.h.bf16 %v20324_v8  ;;  %v10854_v52 = vsel %vm1549_vm3, %v10814_v26, %v15368_v58  ;;  %v15409_v60 = vunpack.i.h.bf16 %v20340_v5  ;;  %v15403_v30 = vunpack.i.l.bf16 %v20342_v51  ;;  %v22913_v42 = vld [vmem:[#allocation29_spill] sm:$0xff] }
 0xc26   :  { %15631 = vrot.lane.b32.xlu1 %v15630_v43, %s16550_s20 }
 0xc49   :  { %v15447_v36 = vpop.permute.xlu0 %15446 }
 0xc4a   :  { %v15449_v18 = vunpack.i.h.bf16 %v15447_v36  ;;  %v15448_v11 = vunpack.i.l.bf16 %v15447_v36  ;;  %v22907_v36 = vld [vmem:[#allocation32_spill] sm:$0xff] }
 0xc4b   :  { %v10817_v10 = vsel %vm511_vm2, %v22907_v36, %v15364_v41 }
 0xc4c   :  { %v10891_v34 = vsel %vm10890_vm4, %v10850_v4, %v15448_v11  ;;  %v10892_v35 = vsel %vm10890_vm4, %v10851_v16, %v15449_v18  ;;  %v15379_v11 = vunpack.i.h.bf16 %v20322_v2  ;;  %v15378_v4 = vunpack.i.l.bf16 %v20322_v2 }
 0xc4d   :  { %v10931_v63 = vpack.c.bf16 %v10892_v35, %v10891_v34  ;;  %v20379_v15 = vpop.permute.xlu0 %15451  ;;  %v10857_v34 = vsel %vm1549_vm3, %v10817_v10, %v15374_v3  ;;  %v15389_v35 = vunpack.i.h.bf16 %v20332_v40  ;;  %v15383_v2 = vunpack.i.l.bf16 %v20334_v29 }
 0xc4f   :  { %15172 = vmatprep.mubr.msk.bf16.mxu0 %vm234_vm0, %v10931_v63  ;;  %v15388_v63 = vunpack.i.l.bf16 %v20332_v40  ;;  %v10818_v40 = vsel %vm511_vm2, %v22910_v17, %v15378_v4 }
 0xc50   :  { %v15457_v23 = vpop.permute.xlu1 %15456 }
 0xc51   :  { %v15459_v47 = vunpack.i.h.bf16 %v15457_v23  ;;  %v15458_v9 = vunpack.i.l.bf16 %v15457_v23  ;;  %v22909_v23 = vld [vmem:[#allocation27_spill] sm:$0xff]  ;;  %v10858_v1 = vsel %vm1549_vm3, %v10818_v40, %v15388_v63  ;;  %v22915_v63 = vld [vmem:[#allocation26_spill] sm:$0xff] }
 0xc52   :  { %v10819_v14 = vsel %vm511_vm2, %v22909_v23, %v15379_v11  ;;  %v15418_v23 = vunpack.i.l.bf16 %v20344_v53 }
 0xc53   :  { %v10894_v22 = vsel %vm10890_vm4, %v10853_v48, %v15459_v47  ;;  %v10893_v57 = vsel %vm10890_vm4, %v10852_v50, %v15458_v9  ;;  %v15394_v50 = vunpack.i.h.bf16 %v20338_v31  ;;  %v15393_v48 = vunpack.i.l.bf16 %v20338_v31 }
 0xc54   :  { %v10932_v32 = vpack.c.bf16 %v10894_v22, %v10893_v57  ;;  %v20391_v49 = vpop.permute.xlu1 %15461  ;;  %v15467_v38 = vpop.permute.xlu0 %15466  ;;  %v10859_v29 = vsel %vm1549_vm3, %v10819_v14, %v15389_v35  ;;  %v22911_v57 = vld [vmem:[#allocation28_spill] sm:$0xff] }
 0xc55   :  { %v15469_v43 = vunpack.i.h.bf16 %v15467_v38  ;;  %v15468_v6 = vunpack.i.l.bf16 %v15467_v38  ;;  %v10821_v41 = vsel %vm511_vm2, %v22911_v57, %v15384_v55 }
 0xc56   :  { %15173 = vmatmul.mubr.msk.bf16.vlgmr.msra.gmra.mrb[64].mxu0 %vm234_vm0, %v10932_v32  ;;  %v10820_v32 = vsel %vm511_vm2, %v22912_v59, %v15383_v2  ;;  %v10861_v3 = vsel %vm1549_vm3, %v10821_v41, %v15394_v50  ;;  %v15428_v50 = vunpack.i.l.bf16 %v20348_v27  ;;  %v22917_v41 = vld [vmem:[#allocation36_spill] sm:$0xff] }
 0xc57   :  { %v10895_v62 = vsel %vm10890_vm4, %v10854_v52, %v15468_v6  ;;  %v10896_v39 = vsel %vm10890_vm4, %v10855_v24, %v15469_v43  ;;  %v10860_v6 = vsel %vm1549_vm3, %v10820_v32, %v15393_v48  ;;  %v15408_v52 = vunpack.i.l.bf16 %v20340_v5  ;;  %v22918_v32 = vld [vmem:[#allocation31_spill] sm:$0xff] }
 0xc58   :  { %v15477_v21 = vpop.permute.xlu1 %15476  ;;  %v20408_v18 = vpop.permute.xlu0 %15471  ;;  %v10933_v8 = vpack.c.bf16 %v10896_v39, %v10895_v62  ;;  %v15404_v39 = vunpack.i.h.bf16 %v20342_v51 }
 0xc59   :  { %v15479_v16 = vunpack.i.h.bf16 %v15477_v21  ;;  %v15478_v20 = vunpack.i.l.bf16 %v15477_v21  ;;  %v10823_v21 = vsel %vm511_vm2, %v22913_v42, %v15399_v54  ;;  %v15434_v54 = vunpack.i.h.bf16 %v20356_v28 }
 0xc5a   :  { %15176 = vmatprep.mubr.msk.bf16.mxu0 %vm234_vm0, %v10933_v8  ;;  %v22914_v8 = vld [vmem:[#allocation24_spill] sm:$0xff]  ;;  %v10863_v51 = vsel %vm1549_vm3, %v10823_v21, %v15409_v60 }
 0xc5b   :  { %v10898_v25 = vsel %vm10890_vm4, %v10857_v34, %v15479_v16  ;;  %v10897_v61 = vsel %vm10890_vm4, %v10856_v19, %v15478_v20  ;;  %v10822_v5 = vsel %vm511_vm2, %v22914_v8, %v15398_v12  ;;  %v15414_v16 = vunpack.i.h.bf16 %v20346_v45 }
 0xc5c   :  { %v10934_v44 = vpack.c.bf16 %v10898_v25, %v10897_v61  ;;  %v20421_v7 = vpop.permute.xlu1 %15481  ;;  %v15487_v13 = vpop.permute.xlu0 %15486  ;;  %v15413_v20 = vunpack.i.l.bf16 %v20346_v45  ;;  %v10862_v19 = vsel %vm1549_vm3, %v10822_v5, %v15408_v52  ;;  %v10825_v25 = vsel %vm511_vm2, %v22915_v63, %v15404_v39  ;;  %v22916_v61 = vld [vmem:[#allocation30_spill] sm:$0xff]  ;;  %v22920_v52 = vld [vmem:[#allocation11_spill] sm:$0xff] }
 0xc5d   :  { %v15489_v47 = vunpack.i.h.bf16 %v15487_v13  ;;  %v15488_v9 = vunpack.i.l.bf16 %v15487_v13  ;;  %v10824_v55 = vsel %vm511_vm2, %v22916_v61, %v15403_v30  ;;  %v15419_v13 = vunpack.i.h.bf16 %v20344_v53 }
 0xc5e   :  { %15177 = vmatmul.mubr.msk.bf16.gmra.mrb[68].mxu0 %vm234_vm0, %v10934_v44  ;;  %v10864_v40 = vsel %vm1549_vm3, %v10824_v55, %v15413_v20  ;;  %v15423_v53 = vunpack.i.l.bf16 %v20350_v46  ;;  %v15433_v12 = vunpack.i.l.bf16 %v20356_v28  ;;  %v15439_v30 = vunpack.i.h.bf16 %v20352_v56 }
 0xc5f   :  { %v10899_v58 = vsel %vm10890_vm4, %v10858_v1, %v15488_v9  ;;  %v10900_v22 = vsel %vm10890_vm4, %v10859_v29, %v15489_v47  ;;  %v10865_v47 = vsel %vm1549_vm3, %v10825_v25, %v15414_v16  ;;  %v15429_v9 = vunpack.i.h.bf16 %v20348_v27  ;;  %v22922_v25 = vld [vmem:[#allocation34_spill] sm:$0xff] }
 0xc60   :  { %v15497_v38 = vpop.permute.xlu1 %15496  ;;  %v20438_v0 = vpop.permute.xlu0 %15491  ;;  %v10935_v31 = vpack.c.bf16 %v10900_v22, %v10899_v58  ;;  %v15424_v29 = vunpack.i.h.bf16 %v20350_v46  ;;  %v10827_v59 = vsel %vm511_vm2, %v22917_v41, %v15419_v13  ;;  %v10826_v27 = vsel %vm511_vm2, %v22918_v32, %v15418_v23 }
 0xc61   :  { %v15499_v26 = vunpack.i.h.bf16 %v15497_v38  ;;  %v15498_v43 = vunpack.i.l.bf16 %v15497_v38  ;;  %v10867_v46 = vsel %vm1549_vm3, %v10827_v59, %v15429_v9  ;;  %v15454_v5 = vunpack.i.h.bf16 %v20379_v15 }
 0xc62   :  { %15180 = vmatprep.mubr.msk.bf16.mxu0 %vm234_vm0, %v10935_v31  ;;  %v15444_v20 = vunpack.i.h.bf16 %v20368_v37  ;;  %v15464_v13 = vunpack.i.h.bf16 %v20391_v49  ;;  %v15494_v59 = vunpack.i.h.bf16 %v20438_v0 }
 0xc63   :  { %v10902_v24 = vsel %vm10890_vm4, %v10861_v3, %v15499_v26  ;;  %v10901_v62 = vsel %vm10890_vm4, %v10860_v6, %v15498_v43  ;;  %v10866_v26 = vsel %vm1549_vm3, %v10826_v27, %v15428_v50  ;;  %v22919_v3 = vld [vmem:[#allocation35_spill] sm:$0xff] }
 0xc64   :  { %v10936_v36 = vpack.c.bf16 %v10902_v24, %v10901_v62  ;;  %v20451_v10 = vpop.permute.xlu1 %15501  ;;  %v15507_v33 = vpop.permute.xlu0 %15506  ;;  %v10829_v60 = vsel %vm511_vm2, %v22919_v3, %v15424_v29  ;;  %v10828_v24 = vsel %vm511_vm2, %v22920_v52, %v15423_v53  ;;  %v22924_v29 = vld [vmem:[#allocation37_spill] sm:$0xff] }
 0xc65   :  { %v15509_v11 = vunpack.i.h.bf16 %v15507_v33  ;;  %v15508_v4 = vunpack.i.l.bf16 %v15507_v33  ;;  %v10868_v21 = vsel %vm1549_vm3, %v10828_v24, %v15433_v12  ;;  %v10869_v8 = vsel %vm1549_vm3, %v10829_v60, %v15434_v54  ;;  %v22926_v54 = vld [vmem:[#allocation39_spill] sm:$0xff] }
 0xc66   :  { %15181 = vmatmul.mubr.msk.bf16.gmra.mrb[72].mxu0 %vm234_vm0, %v10936_v36  ;;  %v15438_v36 = vunpack.i.l.bf16 %v20352_v56  ;;  %v15443_v56 = vunpack.i.l.bf16 %v20368_v37  ;;  %v15463_v37 = vunpack.i.l.bf16 %v20391_v49 }
 0xc67   :  { %v10903_v34 = vsel %vm10890_vm4, %v10862_v19, %v15508_v4  ;;  %v10904_v35 = vsel %vm10890_vm4, %v10863_v51, %v15509_v11  ;;  %v15453_v11 = vunpack.i.l.bf16 %v20379_v15 }
 0xc68   :  { %v15517_v2 = vpop.permute.xlu1 %15516  ;;  %v20468_v44 = vpop.permute.xlu0 %15511  ;;  %v10937_v45 = vpack.c.bf16 %v10904_v35, %v10903_v34  ;;  %v22921_v35 = vld [vmem:[#allocation33_spill] sm:$0xff]  ;;  %v10830_v15 = vsel %vm511_vm2, %v22922_v25, %v15438_v36  ;;  %v10832_v49 = vsel %vm511_vm2, %v22924_v29, %v15443_v56  ;;  %v22929_v25 = vld [vmem:[#allocation44_spill] sm:$0xff] }
 0xc69   :  { %v15519_v14 = vunpack.i.h.bf16 %v15517_v2  ;;  %v15518_v17 = vunpack.i.l.bf16 %v15517_v2  ;;  %v10831_v63 = vsel %vm511_vm2, %v22921_v35, %v15439_v30  ;;  %v10870_v2 = vsel %vm1549_vm3, %v10830_v15, %v15453_v11 }
 0xc6a   :  { %15184 = vmatprep.mubr.msk.bf16.mxu0 %vm234_vm0, %v10937_v45  ;;  %v10871_v45 = vsel %vm1549_vm3, %v10831_v63, %v15454_v5  ;;  %v10872_v41 = vsel %vm1549_vm3, %v10832_v49, %v15463_v37  ;;  %v22927_v5 = vld [vmem:[#allocation42_spill] sm:$0xff] }
 0xc6b   :  { %v10906_v48 = vsel %vm10890_vm4, %v10865_v47, %v15519_v14  ;;  %v10905_v1 = vsel %vm10890_vm4, %v10864_v40, %v15518_v17  ;;  %v15474_v17 = vunpack.i.h.bf16 %v20408_v18  ;;  %v15473_v40 = vunpack.i.l.bf16 %v20408_v18 }
 0xc6c   :  { %v10938_v58 = vpack.c.bf16 %v10906_v48, %v10905_v1  ;;  %v20481_v22 = vpop.permute.xlu1 %15521  ;;  %v15527_v57 = vpop.permute.xlu0 %15526  ;;  %v22923_v48 = vld [vmem:[#allocation38_spill] sm:$0xff]  ;;  %v15493_v18 = vunpack.i.l.bf16 %v20438_v0  ;;  %v15483_v0 = vunpack.i.l.bf16 %v20421_v7 }
 0xc6d   :  { %v15529_v38 = vunpack.i.h.bf16 %v15527_v57  ;;  %v15528_v31 = vunpack.i.l.bf16 %v15527_v57  ;;  %v10833_v1 = vsel %vm511_vm2, %v22923_v48, %v15444_v20  ;;  %v10834_v12 = vsel %vm511_vm2, %v22926_v54, %v15473_v40 }
 0xc6e   :  { %15185 = vmatmul.mubr.msk.bf16.gmra.mrb[76].mxu0 %vm234_vm0, %v10938_v58  ;;  %v10873_v57 = vsel %vm1549_vm3, %v10833_v1, %v15464_v13  ;;  %v10874_v52 = vsel %vm1549_vm3, %v10834_v12, %v15493_v18  ;;  %v15524_v37 = vunpack.i.h.bf16 %v20481_v22 }
 0xc6f   :  { %v10907_v43 = vsel %vm10890_vm4, %v10866_v26, %v15528_v31  ;;  %v10908_v6 = vsel %vm10890_vm4, %v10867_v46, %v15529_v38  ;;  %v22925_v38 = vld [vmem:[#allocation40_spill] sm:$0xff] }
 0xc70   :  { %v15537_v62 = vpop.permute.xlu1 %15536  ;;  %v20498_v39 = vpop.permute.xlu0 %15531  ;;  %v10939_v28 = vpack.c.bf16 %v10908_v6, %v10907_v43  ;;  %v10835_v31 = vsel %vm511_vm2, %v22925_v38, %v15474_v17  ;;  %v15484_v6 = vunpack.i.h.bf16 %v20421_v7  ;;  %v15513_v7 = vunpack.i.l.bf16 %v20468_v44 }
 0xc71   :  { %v15539_v33 = vunpack.i.h.bf16 %v15537_v62  ;;  %v15538_v42 = vunpack.i.l.bf16 %v15537_v62  ;;  %v10875_v24 = vsel %vm1549_vm3, %v10835_v31, %v15494_v59  ;;  %v15504_v62 = vunpack.i.h.bf16 %v20451_v10  ;;  %v22932_v59 = vld [vmem:[#allocation45_spill] sm:$0xff] }
 0xc72   :  { %15188 = vmatprep.mubr.msk.bf16.mxu0 %vm234_vm0, %v10939_v28  ;;  %v15503_v28 = vunpack.i.l.bf16 %v20451_v10  ;;  %v10837_v11 = vsel %vm511_vm2, %v22927_v5, %v15484_v6  ;;  %v15533_v35 = vunpack.i.l.bf16 %v20498_v39  ;;  %v22934_v6 = vld [vmem:[#allocation47_spill] sm:$0xff] }
 0xc73   :  { %v10910_v4 = vsel %vm10890_vm4, %v10869_v8, %v15539_v33  ;;  %v10909_v16 = vsel %vm10890_vm4, %v10868_v21, %v15538_v42  ;;  %v15514_v33 = vunpack.i.h.bf16 %v20468_v44  ;;  %v10877_v56 = vsel %vm1549_vm3, %v10837_v11, %v15504_v62 }
 0xc74   :  { %v10940_v19 = vpack.c.bf16 %v10910_v4, %v10909_v16  ;;  %v20511_v51 = vpop.permute.xlu1 %15541  ;;  %v15547_v34 = vpop.permute.xlu0 %15546  ;;  %v22928_v4 = vld [vmem:[#allocation41_spill] sm:$0xff] }
 0xc75   :  { %v15549_v61 = vunpack.i.h.bf16 %v15547_v34  ;;  %v15548_v55 = vunpack.i.l.bf16 %v15547_v34  ;;  %v10836_v16 = vsel %vm511_vm2, %v22928_v4, %v15483_v0  ;;  %v15534_v34 = vunpack.i.h.bf16 %v20498_v39 }
 0xc76   :  { %15189 = vmatmul.mubr.msk.bf16.gmra.mrb[80].mxu0 %vm234_vm0, %v10940_v19  ;;  %v10876_v19 = vsel %vm1549_vm3, %v10836_v16, %v15503_v28  ;;  %v10839_v15 = vsel %vm511_vm2, %v22929_v25, %v15514_v33 }
 0xc77   :  { %v10911_v23 = vsel %vm10890_vm4, %v10870_v2, %v15548_v55  ;;  %v10912_v14 = vsel %vm10890_vm4, %v10871_v45, %v15549_v61  ;;  %v22930_v61 = vld [vmem:[#allocation43_spill] sm:$0xff]  ;;  %v10879_v40 = vsel %vm1549_vm3, %v10839_v15, %v15534_v34 }
 0xc78   :  { %v15557_v47 = vpop.permute.xlu1 %15556  ;;  %v20526_v9 = vpop.permute.xlu0 %15551  ;;  %v10941_v50 = vpack.c.bf16 %v10912_v14, %v10911_v23  ;;  %v10838_v55 = vsel %vm511_vm2, %v22930_v61, %v15513_v7  ;;  %v15523_v23 = vunpack.i.l.bf16 %v20481_v22 }
 0xc79   :  { %v15559_v53 = vunpack.i.h.bf16 %v15557_v47  ;;  %v15558_v58 = vunpack.i.l.bf16 %v15557_v47  ;;  %v10878_v17 = vsel %vm1549_vm3, %v10838_v55, %v15533_v35  ;;  %v15544_v47 = vunpack.i.h.bf16 %v20511_v51 }
 0xc7a   :  { %15192 = vmatprep.mubr.msk.bf16.mxu0 %vm234_vm0, %v10941_v50  ;;  %v15543_v50 = vunpack.i.l.bf16 %v20511_v51  ;;  %v15554_v29 = vunpack.i.h.bf16 %v20526_v9  ;;  %v15553_v22 = vunpack.i.l.bf16 %v20526_v9  ;;  %v10840_v18 = vsel %vm511_vm2, %v22932_v59, %v15523_v23 }
 0xc7b   :  { %v10914_v32 = vsel %vm10890_vm4, %v10873_v57, %v15559_v53  ;;  %v10913_v27 = vsel %vm10890_vm4, %v10872_v41, %v15558_v58  ;;  %v22931_v57 = vld [vmem:[#allocation46_spill] sm:$0xff] }
 0xc7c   :  { %v10942_v26 = vpack.c.bf16 %v10914_v32, %v10913_v27  ;;  %v20543_v46 = vpop.permute.xlu1 %15561  ;;  %v15567_v43 = vpop.permute.xlu0 %15566  ;;  %v10841_v41 = vsel %vm511_vm2, %v22931_v57, %v15524_v37  ;;  %v10880_v38 = vsel %vm1549_vm3, %v10840_v18, %v15543_v50  ;;  %v10842_v0 = vsel %vm511_vm2, %v22934_v6, %v15553_v22  ;;  %v22940_v18 = vld [vmem:[#allocation53_spill] sm:$0xff] }
 0xc7d   :  { %v15569_v3 = vunpack.i.h.bf16 %v15567_v43  ;;  %v15568_v60 = vunpack.i.l.bf16 %v15567_v43  ;;  %v10881_v27 = vsel %vm1549_vm3, %v10841_v41, %v15544_v47  ;;  %v15563_v62 = vunpack.i.l.bf16 %v20543_v46  ;;  %v22939_v41 = vld [vmem:[#allocation54_spill] sm:$0xff] }
 0xc7e   :  { %15193 = vmatmul.mubr.msk.bf16.gmra.mrb[84].mxu0 %vm234_vm0, %v10942_v26  ;;  %v22933_v26 = vld [vmem:[#allocation48_spill] sm:$0xff] }
 0xc7f   :  { %v10915_v30 = vsel %vm10890_vm4, %v10874_v52, %v15568_v60  ;;  %v10916_v36 = vsel %vm10890_vm4, %v10875_v24, %v15569_v3  ;;  %v10843_v43 = vsel %vm511_vm2, %v22933_v26, %v15554_v29  ;;  %v15564_v24 = vunpack.i.h.bf16 %v20543_v46  ;;  %v22935_v46 = vld [vmem:[#allocation50_spill] sm:$0xff] }
 0xc80   :  { %v15577_v42 = vpop.permute.xlu1 %15576  ;;  %v15572_v21 = vpop.permute.xlu0 %15571  ;;  %v10943_v8 = vpack.c.bf16 %v10916_v36, %v10915_v30  ;;  %v20633_v26 = vld [vmem:[%s22314_s7] ss:$0 sm:$0xff] }
 0xc81   :  { %v15579_v10 = vunpack.i.h.bf16 %v15577_v42  ;;  %v15578_v20 = vunpack.i.l.bf16 %v15577_v42  ;;  %v15574_v31 = vunpack.i.h.bf16 %v15572_v21  ;;  %v15573_v54 = vunpack.i.l.bf16 %v15572_v21 }
 0xc82   :  { %15196 = vmatprep.mubr.msk.bf16.mxu0 %vm234_vm0, %v10943_v8 }
 0xc83   :  { %v10918_v44 = vsel %vm10890_vm4, %v10877_v56, %v15579_v10  ;;  %v10917_v63 = vsel %vm10890_vm4, %v10876_v19, %v15578_v20  ;;  %v10882_v36 = vsel %vm1549_vm3, %v10842_v0, %v15573_v54  ;;  %v10883_v33 = vsel %vm1549_vm3, %v10843_v43, %v15574_v31  ;;  %v22936_v56 = vld [vmem:[#allocation49_spill] sm:$0xff]  ;;  %v16491_v43 = vld [vmem:[%s22307_s0 + $0x8] sm:$0xff]   ;;  %v16492_v0 = vld [vmem:[%s22307_s0] sm:$0xff]  }
 0xc84   :  { %v10944_v2 = vpack.c.bf16 %v10918_v44, %v10917_v63  ;;  %v15582_v45 = vpop.permute.xlu1 %15581  ;;  %v15587_v13 = vpop.permute.xlu0 %15586  ;;  %v10845_v20 = vsel %vm511_vm2, %v22935_v46, %v15564_v24  ;;  %v10844_v19 = vsel %vm511_vm2, %v22936_v56, %v15563_v62  ;;  %v73_v6 = vunpack.c.l.bf16 %v16491_v43  ;;  %v16494_v46 = vld [vmem:[%s22307_s0 + $0x10] sm:$0xff]  }
 0xc85   :  { %v15589_v39 = vunpack.i.h.bf16 %v15587_v13  ;;  %v15588_v14 = vunpack.i.l.bf16 %v15587_v13  ;;  %v15584_v7 = vunpack.i.h.bf16 %v15582_v45  ;;  %v15583_v42 = vunpack.i.l.bf16 %v15582_v45  ;;  %v22938_v13 = vld [vmem:[#allocation51_spill] sm:$0xff] }
 0xc86   :  { %15197 = vmatmul.mubr.msk.bf16.gmra.mrb[88].mxu0 %vm234_vm0, %v10944_v2  ;;  %v22937_v2 = vld [vmem:[#allocation52_spill] sm:$0xff]  ;;  %v72_v62 = vunpack.c.h.bf16 %v16492_v0 }
 0xc87   :  { %v10919_v48 = vsel %vm10890_vm4, %v10878_v17, %v15588_v14  ;;  %v10920_v1 = vsel %vm10890_vm4, %v10879_v40, %v15589_v39  ;;  %v10885_v44 = vsel %vm1549_vm3, %v10845_v20, %v15584_v7  ;;  %v10884_v63 = vsel %vm1549_vm3, %v10844_v19, %v15583_v42 }
 0xc88   :  { %v15597_v49 = vpop.permute.xlu1 %15596  ;;  %v15592_v53 = vpop.permute.xlu0 %15591  ;;  %v10945_v58 = vpack.c.bf16 %v10920_v1, %v10919_v48  ;;  %v75_v20 = vunpack.c.l.bf16 %v16494_v46 }
 0xc89   :  { %v15599_v51 = vunpack.i.h.bf16 %v15597_v49  ;;  %v15598_v32 = vunpack.i.l.bf16 %v15597_v49  ;;  %v15594_v5 = vunpack.i.h.bf16 %v15592_v53  ;;  %v15593_v11 = vunpack.i.l.bf16 %v15592_v53 }
 0xc8a   :  { %15200 = vmatprep.mubr.msk.bf16.mxu0 %vm234_vm0, %v10945_v58 }
 0xc8b   :  { %v10922_v9 = vsel %vm10890_vm4, %v10881_v27, %v15599_v51  ;;  %v10921_v12 = vsel %vm10890_vm4, %v10880_v38, %v15598_v32  ;;  %v10847_v45 = vsel %vm511_vm2, %v22937_v2, %v15594_v5  ;;  %v10846_v37 = vsel %vm511_vm2, %v22938_v13, %v15593_v11 }
 0xc8c   :  { %v10946_v3 = vpack.c.bf16 %v10922_v9, %v10921_v12  ;;  %v15602_v60 = vpop.permute.xlu1 %15601  ;;  %v15607_v52 = vpop.permute.xlu0 %15606 }
 0xc8d   :  { %v15609_v28 = vunpack.i.h.bf16 %v15607_v52  ;;  %v15608_v30 = vunpack.i.l.bf16 %v15607_v52  ;;  %v15604_v17 = vunpack.i.h.bf16 %v15602_v60  ;;  %v15603_v40 = vunpack.i.l.bf16 %v15602_v60 }
 0xc8e   :  { %15201 = vmatmul.mubr.msk.bf16.gmra.mrb[92].mxu0 %vm234_vm0, %v10946_v3  ;;  %v71_v3 = vunpack.c.l.bf16 %v16492_v0  ;;  %v16498_v0 = vld [vmem:[%s22307_s0 + $0x30] sm:$0xff]  }
 0xc8f   :  { %v10923_v21 = vsel %vm10890_vm4, %v10882_v36, %v15608_v30  ;;  %v10924_v8 = vsel %vm10890_vm4, %v10883_v33, %v15609_v28  ;;  %v10849_v59 = vsel %vm511_vm2, %v22939_v41, %v15604_v17  ;;  %v10848_v51 = vsel %vm511_vm2, %v22940_v18, %v15603_v40  ;;  %v16495_v17 = vld [vmem:[%s22307_s0 + $0x28] sm:$0xff]  }
 0xc90   :  { %v15617_v4 = vpop.permute.xlu1 %15616  ;;  %v15612_v16 = vpop.permute.xlu0 %15611  ;;  %v10947_v10 = vpack.c.bf16 %v10924_v8, %v10923_v21  ;;  %v74_v21 = vunpack.c.h.bf16 %v16491_v43  ;;  %v81_v40 = vunpack.c.l.bf16 %v16495_v17 }
 0xc91   :  { %v15619_v34 = vunpack.i.h.bf16 %v15617_v4  ;;  %v15618_v35 = vunpack.i.l.bf16 %v15617_v4  ;;  %v15614_v25 = vunpack.i.h.bf16 %v15612_v16  ;;  %v15613_v15 = vunpack.i.l.bf16 %v15612_v16  ;;  %v16493_v4 = vld [vmem:[%s22307_s0 + $0x18] sm:$0xff]  }
 0xc92   :  { %15204 = vmatprep.mubr.msk.bf16.mxu0 %vm234_vm0, %v10947_v10  ;;  %v77_v16 = vunpack.c.l.bf16 %v16493_v4 }
 0xc93   :  { %v10926_v61 = vsel %vm10890_vm4, %v10885_v44, %v15619_v34  ;;  %v10925_v55 = vsel %vm10890_vm4, %v10884_v63, %v15618_v35  ;;  %v10886_v48 = vsel %vm1549_vm3, %v10846_v37, %v15613_v15  ;;  %v10887_v1 = vsel %vm1549_vm3, %v10847_v45, %v15614_v25 }
 0xc94   :  { %v10948_v23 = vpack.c.bf16 %v10926_v61, %v10925_v55  ;;  %v15622_v39 = vpop.permute.xlu1 %15621  ;;  %v15627_v14 = vpop.permute.xlu0 %15626  ;;  %v78_v44 = vunpack.c.h.bf16 %v16493_v4  ;;  %v76_v45 = vunpack.c.h.bf16 %v16494_v46  ;;  %v84_v4 = vunpack.c.h.bf16 %v16498_v0 }
 0xc95   :  { %v15629_v47 = vunpack.i.h.bf16 %v15627_v14  ;;  %v15628_v50 = vunpack.i.l.bf16 %v15627_v14  ;;  %v15624_v29 = vunpack.i.h.bf16 %v15622_v39  ;;  %v15623_v22 = vunpack.i.l.bf16 %v15622_v39 }
 0xc96   :  { %15205 = vmatmul.mubr.msk.bf16.gmra.mrb[96].mxu0 %vm234_vm0, %v10948_v23 }
 0xc97   :  { %v10927_v49 = vsel %vm10890_vm4, %v10886_v48, %v15628_v50  ;;  %v10928_v53 = vsel %vm10890_vm4, %v10887_v1, %v15629_v47  ;;  %v10889_v38 = vsel %vm1549_vm3, %v10849_v59, %v15624_v29  ;;  %v10888_v31 = vsel %vm1549_vm3, %v10848_v51, %v15623_v22  ;;  %v16496_v48 = vld [vmem:[%s22307_s0 + $0x20] sm:$0xff]  }
 0xc98   :  { %v15632_v58 = vpop.permute.xlu1 %15631  ;;  %v10949_v57 = vpack.c.bf16 %v10928_v53, %v10927_v49  ;;  %v79_v1 = vunpack.c.l.bf16 %v16496_v48  ;;  %v82_v49 = vunpack.c.h.bf16 %v16495_v17 }
 0xc99   :  { %v15634_v32 = vunpack.i.h.bf16 %v15632_v58  ;;  %v15633_v27 = vunpack.i.l.bf16 %v15632_v58 }
 0xc9a   :  { %15208 = vmatprep.mubr.msk.bf16.mxu0 %vm234_vm0, %v10949_v57 }
 0xc9b   :  { %v10930_v54 = vsel %vm10890_vm4, %v10889_v38, %v15634_v32  ;;  %v10929_v9 = vsel %vm10890_vm4, %v10888_v31, %v15633_v27  ;;  %v80_v32 = vunpack.c.h.bf16 %v16496_v48 }
 0xc9c   :  { %v10950_v12 = vpack.c.bf16 %v10930_v54, %v10929_v9 }
 0xc9e   :  { %15209 = vmatmul.mubr.msk.bf16.gmra.mrb[100].mxu0 %vm234_vm0, %v10950_v12  ;;  %v16497_v12 = vld [vmem:[%s22307_s0 + $0x38] sm:$0xff]  }
 0xc9f   :  { %v85_v43 = vunpack.c.l.bf16 %v16497_v12 }
 0xd29   :  { %v15174_v60 = vpop.f32.mrb[64].mxu0 }
 0xd2a   :  { %v11075_v52 = vadd.f32 %v15174_v60, %v20633_v26  ;;  %v11066_v24 = vpop.f32.mrb[65].mxu0  ;;  %v86_v60 = vunpack.c.h.bf16 %v16497_v12 }
 0xd2b   :  { %v11067_v28 = vadd.f32 %v20633_v26, %v11066_v24  ;;  %v15175_v30 = vpop.f32.mrb[66].mxu0 }
 0xd2c   :  { %v20643_v36 = vadd.f32 %v11075_v52, %v73_v6  ;;  %v11069_v33 = vpop.f32.mrb[67].mxu0  ;;  %v11078_v8 = vadd.f32 %v15175_v30, %v20633_v26 }
 0xd2d   :  { %v20645_v7 = vadd.f32 %v11067_v28, %v71_v3  ;;  %v11070_v42 = vadd.f32 %v20633_v26, %v11069_v33  ;;  %v83_v3 = vunpack.c.l.bf16 %v16498_v0 }
 0xd2e   :  { %v11273_v5 = vsel %vm234_vm0, %v20643_v36, 0.0  ;;  %v20661_v19 = vadd.f32 %v11078_v8, %v74_v21 }
 0xd2f   :  { %v20651_v11 = vadd.f32 %v11070_v42, %v72_v62  ;;  %11274 = vadd.xlane.f32.xlu0 %v11273_v5  ;;  %v11267_v63 = vsel %vm234_vm0, %v20645_v7, 0.0 }
 0xd30   :  { %v11276_v14 = vsel %vm234_vm0, %v20661_v19, 0.0 }
 0xd31   :  { %v15178_v10 = vpop.f32.mrb[68].mxu0  ;;  %v11270_v56 = vsel %vm234_vm0, %v20651_v11, 0.0 }
 0xd32   :  { %v11091_v34 = vadd.f32 %v15178_v10, %v20633_v26  ;;  %v11082_v35 = vpop.f32.mrb[69].mxu0  ;;  %11271 = vadd.xlane.f32.xlu1 %v11270_v56 }
 0xd33   :  { %v11083_v25 = vadd.f32 %v20633_v26, %v11082_v35  ;;  %v15179_v15 = vpop.f32.mrb[70].mxu0  ;;  %11268 = vadd.xlane.f32.xlu0 %v11267_v63 }
 0xd34   :  { %v20667_v61 = vadd.f32 %v11091_v34, %v77_v16  ;;  %v11094_v55 = vadd.f32 %v15179_v15, %v20633_v26  ;;  %v11085_v2 = vpop.f32.mrb[71].mxu0  ;;  %v16499_v34 = vld [vmem:[%s22307_s0 + $0x48] sm:$0xff]  }
 0xd35   :  { %v11086_v13 = vadd.f32 %v20633_v26, %v11085_v2  ;;  %v20671_v37 = vadd.f32 %v11083_v25, %v75_v20  ;;  %v89_v35 = vunpack.c.l.bf16 %v16499_v34  ;;  %v16500_v25 = vld [vmem:[%s22307_s0 + $0x40] sm:$0xff]  }
 0xd36   :  { %v20673_v23 = vadd.f32 %v11094_v55, %v78_v44  ;;  %v11285_v39 = vsel %vm234_vm0, %v20667_v61, 0.0  ;;  %v87_v15 = vunpack.c.l.bf16 %v16500_v25 }
 0xd37   :  { %11286 = vadd.xlane.f32.xlu1 %v11285_v39  ;;  %11277 = vadd.xlane.f32.xlu0 %v11276_v14  ;;  %v20682_v47 = vadd.f32 %v11086_v13, %v76_v45  ;;  %v11279_v53 = vsel %vm234_vm0, %v20671_v37, 0.0  ;;  %v90_v45 = vunpack.c.h.bf16 %v16499_v34  ;;  %v16504_v34 = vld [vmem:[%s22307_s0 + $0x60] sm:$0xff]  }
 0xd38   :  { %v11288_v58 = vsel %vm234_vm0, %v20673_v23, 0.0 }
 0xd39   :  { %v15182_v50 = vpop.f32.mrb[72].mxu0  ;;  %v11282_v27 = vsel %vm234_vm0, %v20682_v47, 0.0 }
 0xd3a   :  { %v11107_v29 = vadd.f32 %v15182_v50, %v20633_v26  ;;  %v11098_v22 = vpop.f32.mrb[73].mxu0 }
 0xd3b   :  { %v11099_v57 = vadd.f32 %v20633_v26, %v11098_v22  ;;  %v15183_v41 = vpop.f32.mrb[74].mxu0  ;;  %11280 = vadd.xlane.f32.xlu1 %v11279_v53  ;;  %11289 = vadd.xlane.f32.xlu0 %v11288_v58 }
 0xd3c   :  { %v20693_v59 = vadd.f32 %v11107_v29, %v81_v40  ;;  %v11110_v18 = vadd.f32 %v15183_v41, %v20633_v26  ;;  %v11101_v51 = vpop.f32.mrb[75].mxu0 }
 0xd3d   :  { %v20698_v38 = vadd.f32 %v11099_v57, %v79_v1  ;;  %v11102_v54 = vadd.f32 %v20633_v26, %v11101_v51  ;;  %v88_v1 = vunpack.c.h.bf16 %v16500_v25  ;;  %v16501_v57 = vld [vmem:[%s22307_s0 + $0x58] sm:$0xff]  }
 0xd3e   :  { %v20700_v31 = vadd.f32 %v11110_v18, %v82_v49  ;;  %v11297_v9 = vsel %vm234_vm0, %v20693_v59, 0.0  ;;  %v93_v41 = vunpack.c.l.bf16 %v16501_v57  ;;  %v16502_v18 = vld [vmem:[%s22307_s0 + $0x50] sm:$0xff]  }
 0xd3f   :  { %11298 = vadd.xlane.f32.xlu1 %v11297_v9  ;;  %11283 = vadd.xlane.f32.xlu0 %v11282_v27  ;;  %v20711_v52 = vadd.f32 %v11102_v54, %v80_v32  ;;  %v11291_v28 = vsel %vm234_vm0, %v20698_v38, 0.0  ;;  %v91_v51 = vunpack.c.l.bf16 %v16502_v18  ;;  %v94_v27 = vunpack.c.h.bf16 %v16501_v57  ;;  %v16505_v57 = vld [vmem:[%s22307_s0 + $0x78] sm:$0xff]  }
 0xd40   :  { %v11300_v30 = vsel %vm234_vm0, %v20700_v31, 0.0  ;;  %v92_v0 = vunpack.c.h.bf16 %v16502_v18 }
 0xd41   :  { %v15186_v6 = vpop.f32.mrb[76].mxu0  ;;  %v11294_v56 = vsel %vm234_vm0, %v20711_v52, 0.0 }
 0xd42   :  { %v11123_v24 = vadd.f32 %v15186_v6, %v20633_v26  ;;  %v11114_v62 = vpop.f32.mrb[77].mxu0 }
 0xd43   :  { %v11115_v33 = vadd.f32 %v20633_v26, %v11114_v62  ;;  %v15187_v42 = vpop.f32.mrb[78].mxu0  ;;  %11292 = vadd.xlane.f32.xlu1 %v11291_v28  ;;  %11301 = vadd.xlane.f32.xlu0 %v11300_v30 }
 0xd44   :  { %v20719_v21 = vadd.f32 %v11123_v24, %v85_v43  ;;  %v11126_v8 = vadd.f32 %v15187_v42, %v20633_v26  ;;  %v11117_v5 = vpop.f32.mrb[79].mxu0 }
 0xd45   :  { %v11118_v16 = vadd.f32 %v20633_v26, %v11117_v5  ;;  %v20723_v10 = vadd.f32 %v11115_v33, %v83_v3 }
 0xd46   :  { %v20725_v46 = vadd.f32 %v11126_v8, %v86_v60  ;;  %v11309_v20 = vsel %vm234_vm0, %v20719_v21, 0.0 }
 0xd47   :  { %11310 = vadd.xlane.f32.xlu1 %v11309_v20  ;;  %11295 = vadd.xlane.f32.xlu0 %v11294_v56  ;;  %v20734_v44 = vadd.f32 %v11118_v16, %v84_v4  ;;  %v11303_v13 = vsel %vm234_vm0, %v20723_v10, 0.0  ;;  %v16503_v16 = vld [vmem:[%s22307_s0 + $0x68] sm:$0xff]  }
 0xd48   :  { %v11312_v39 = vsel %vm234_vm0, %v20725_v46, 0.0  ;;  %v97_v20 = vunpack.c.l.bf16 %v16503_v16 }
 0xd49   :  { %v15190_v63 = vpop.f32.mrb[80].mxu0  ;;  %v11306_v29 = vsel %vm234_vm0, %v20734_v44, 0.0 }
 0xd4a   :  { %v11139_v55 = vadd.f32 %v15190_v63, %v20633_v26  ;;  %v11130_v2 = vpop.f32.mrb[81].mxu0 }
 0xd4b   :  { %v11131_v14 = vadd.f32 %v20633_v26, %v11130_v2  ;;  %v15191_v17 = vpop.f32.mrb[82].mxu0  ;;  %11304 = vadd.xlane.f32.xlu1 %v11303_v13  ;;  %11313 = vadd.xlane.f32.xlu0 %v11312_v39 }
 0xd4c   :  { %v20745_v40 = vadd.f32 %v11139_v55, %v89_v35  ;;  %v11142_v50 = vadd.f32 %v15191_v17, %v20633_v26  ;;  %v11133_v48 = vpop.f32.mrb[83].mxu0  ;;  %v95_v35 = vunpack.c.l.bf16 %v16504_v34 }
 0xd4d   :  { %v20750_v22 = vadd.f32 %v11131_v14, %v87_v15  ;;  %v11134_v53 = vadd.f32 %v20633_v26, %v11133_v48  ;;  %v98_v15 = vunpack.c.h.bf16 %v16503_v16 }
 0xd4e   :  { %v20752_v49 = vadd.f32 %v11142_v50, %v90_v45  ;;  %v11321_v58 = vsel %vm234_vm0, %v20745_v40, 0.0  ;;  %v96_v50 = vunpack.c.h.bf16 %v16504_v34 }
 0xd4f   :  { %11322 = vadd.xlane.f32.xlu1 %v11321_v58  ;;  %11307 = vadd.xlane.f32.xlu0 %v11306_v29  ;;  %v20763_v54 = vadd.f32 %v11134_v53, %v88_v1  ;;  %v11315_v43 = vsel %vm234_vm0, %v20750_v22, 0.0 }
 0xd50   :  { %v11324_v6 = vsel %vm234_vm0, %v20752_v49, 0.0 }
 0xd51   :  { %v15194_v32 = vpop.f32.mrb[84].mxu0  ;;  %v11318_v5 = vsel %vm234_vm0, %v20763_v54, 0.0 }
 0xd52   :  { %v11155_v9 = vadd.f32 %v15194_v32, %v20633_v26  ;;  %v11146_v12 = vpop.f32.mrb[85].mxu0  ;;  %v16506_v32 = vld [vmem:[%s22307_s0 + $0x70] sm:$0xff]  }
 0xd53   :  { %v11147_v3 = vadd.f32 %v20633_v26, %v11146_v12  ;;  %v15195_v60 = vpop.f32.mrb[86].mxu0  ;;  %11316 = vadd.xlane.f32.xlu1 %v11315_v43  ;;  %11325 = vadd.xlane.f32.xlu0 %v11324_v6  ;;  %v102_v43 = vunpack.c.h.bf16 %v16505_v57 }
 0xd54   :  { %v20771_v24 = vadd.f32 %v11155_v9, %v93_v41  ;;  %v11158_v62 = vadd.f32 %v15195_v60, %v20633_v26  ;;  %v11149_v28 = vpop.f32.mrb[87].mxu0  ;;  %v101_v41 = vunpack.c.l.bf16 %v16505_v57 }
 0xd55   :  { %v20774_v30 = vadd.f32 %v11147_v3, %v91_v51  ;;  %v11150_v33 = vadd.f32 %v20633_v26, %v11149_v28 }
 0xd56   :  { %v20777_v42 = vadd.f32 %v11158_v62, %v94_v27  ;;  %v11333_v8 = vsel %vm234_vm0, %v20771_v24, 0.0  ;;  %v99_v27 = vunpack.c.l.bf16 %v16506_v32 }
 0xd57   :  { %v20783_v4 = vadd.f32 %v11150_v33, %v92_v0  ;;  %11334 = vadd.xlane.f32.xlu1 %v11333_v8  ;;  %11319 = vadd.xlane.f32.xlu0 %v11318_v5  ;;  %v11327_v55 = vsel %vm234_vm0, %v20774_v30, 0.0  ;;  %v100_v8 = vunpack.c.h.bf16 %v16506_v32 }
 0xd58   :  { %v11336_v2 = vsel %vm234_vm0, %v20777_v42, 0.0 }
 0xd59   :  { %v15198_v56 = vpop.f32.mrb[88].mxu0  ;;  %v11330_v58 = vsel %vm234_vm0, %v20783_v4, 0.0 }
 0xd5a   :  { %v11171_v63 = vadd.f32 %v15198_v56, %v20633_v26  ;;  %v11162_v25 = vpop.f32.mrb[89].mxu0 }
 0xd5b   :  { %v11163_v45 = vadd.f32 %v20633_v26, %v11162_v25  ;;  %v15199_v13 = vpop.f32.mrb[90].mxu0  ;;  %11328 = vadd.xlane.f32.xlu1 %v11327_v55  ;;  %11337 = vadd.xlane.f32.xlu0 %v11336_v2 }
 0xd5c   :  { %v20797_v39 = vadd.f32 %v11171_v63, %v97_v20  ;;  %v11174_v14 = vadd.f32 %v15199_v13, %v20633_v26  ;;  %v11165_v17 = vpop.f32.mrb[91].mxu0 }
 0xd5d   :  { %v11166_v48 = vadd.f32 %v20633_v26, %v11165_v17  ;;  %v20801_v1 = vadd.f32 %v11163_v45, %v95_v35  ;;  %v16507_v35 = vld [vmem:[%s22307_s0 + $0x88] sm:$0xff]  }
 0xd5e   :  { %v20803_v29 = vadd.f32 %v11174_v14, %v98_v15  ;;  %v11345_v53 = vsel %vm234_vm0, %v20797_v39, 0.0  ;;  %v105_v63 = vunpack.c.l.bf16 %v16507_v35  ;;  %v16508_v15 = vld [vmem:[%s22307_s0 + $0x80] sm:$0xff]   ;;  %v106_v2 = vunpack.c.h.bf16 %v16507_v35 }
 0xd5f   :  { %11346 = vadd.xlane.f32.xlu1 %v11345_v53  ;;  %11331 = vadd.xlane.f32.xlu0 %v11330_v58  ;;  %v20812_v18 = vadd.f32 %v11166_v48, %v96_v50  ;;  %v11339_v6 = vsel %vm234_vm0, %v20801_v1, 0.0  ;;  %v103_v55 = vunpack.c.l.bf16 %v16508_v15 }
 0xd60   :  { %v11348_v0 = vsel %vm234_vm0, %v20803_v29, 0.0 }
 0xd61   :  { %v15202_v51 = vpop.f32.mrb[92].mxu0  ;;  %v11342_v5 = vsel %vm234_vm0, %v20812_v18, 0.0 }
 0xd62   :  { %v11187_v9 = vadd.f32 %v15202_v51, %v20633_v26  ;;  %v11178_v12 = vpop.f32.mrb[93].mxu0  ;;  %v104_v51 = vunpack.c.h.bf16 %v16508_v15 }
 0xd63   :  { %v11179_v3 = vadd.f32 %v20633_v26, %v11178_v12  ;;  %v15203_v60 = vpop.f32.mrb[94].mxu0  ;;  %11340 = vadd.xlane.f32.xlu1 %v11339_v6  ;;  %11349 = vadd.xlane.f32.xlu0 %v11348_v0  ;;  %v16509_v6 = vld [vmem:[%s22307_s0 + $0x98] sm:$0xff]  }
 0xd64   :  { %v20823_v62 = vadd.f32 %v11187_v9, %v101_v41  ;;  %v11190_v28 = vadd.f32 %v15203_v60, %v20633_v26  ;;  %v11181_v33 = vpop.f32.mrb[95].mxu0  ;;  %v109_v0 = vunpack.c.l.bf16 %v16509_v6 }
 0xd65   :  { %v20828_v16 = vadd.f32 %v11179_v3, %v99_v27  ;;  %v11182_v56 = vadd.f32 %v20633_v26, %v11181_v33 }
 0xd66   :  { %v20830_v20 = vadd.f32 %v11190_v28, %v102_v43  ;;  %v11357_v34 = vsel %vm234_vm0, %v20823_v62, 0.0  ;;  %v16510_v28 = vld [vmem:[%s22307_s0 + $0x90] sm:$0xff]  }
 0xd67   :  { %11358 = vadd.xlane.f32.xlu1 %v11357_v34  ;;  %11343 = vadd.xlane.f32.xlu0 %v11342_v5  ;;  %v20841_v45 = vadd.f32 %v11182_v56, %v100_v8  ;;  %v11351_v17 = vsel %vm234_vm0, %v20828_v16, 0.0  ;;  %v107_v33 = vunpack.c.l.bf16 %v16510_v28  ;;  %v110_v56 = vunpack.c.h.bf16 %v16509_v6 }
 0xd68   :  { %v11360_v50 = vsel %vm234_vm0, %v20830_v20, 0.0 }
 0xd69   :  { %v15206_v25 = vpop.f32.mrb[96].mxu0  ;;  %v11354_v43 = vsel %vm234_vm0, %v20841_v45, 0.0 }
 0xd6a   :  { %v11203_v13 = vadd.f32 %v15206_v25, %v20633_v26  ;;  %v11194_v14 = vpop.f32.mrb[97].mxu0 }
 0xd6b   :  { %v11195_v48 = vadd.f32 %v20633_v26, %v11194_v14  ;;  %v15207_v53 = vpop.f32.mrb[98].mxu0  ;;  %11352 = vadd.xlane.f32.xlu1 %v11351_v17  ;;  %11361 = vadd.xlane.f32.xlu0 %v11360_v50 }
 0xd6c   :  { %v20849_v58 = vadd.f32 %v11203_v13, %v105_v63  ;;  %v11206_v57 = vadd.f32 %v15207_v53, %v20633_v26  ;;  %v11197_v41 = vpop.f32.mrb[99].mxu0  ;;  %v108_v13 = vunpack.c.h.bf16 %v16510_v28 }
 0xd6d   :  { %v11198_v32 = vadd.f32 %v20633_v26, %v11197_v41  ;;  %v20853_v27 = vadd.f32 %v11195_v48, %v103_v55 }
 0xd6e   :  { %v20855_v9 = vadd.f32 %v11206_v57, %v106_v2  ;;  %v11369_v12 = vsel %vm234_vm0, %v20849_v58, 0.0 }
 0xd6f   :  { %11370 = vadd.xlane.f32.xlu1 %v11369_v12  ;;  %11355 = vadd.xlane.f32.xlu0 %v11354_v43  ;;  %v20864_v3 = vadd.f32 %v11198_v32, %v104_v51  ;;  %v11363_v34 = vsel %vm234_vm0, %v20853_v27, 0.0 }
 0xd70   :  { %v11372_v35 = vsel %vm234_vm0, %v20855_v9, 0.0 }
 0xd71   :  { %v15210_v60 = vpop.f32.mrb[100].mxu0  ;;  %v11366_v14 = vsel %vm234_vm0, %v20864_v3, 0.0 }
 0xd72   :  { %v11219_v8 = vadd.f32 %v15210_v60, %v20633_v26  ;;  %v11210_v5 = vpop.f32.mrb[101].mxu0 }
 0xd73   :  { %v11211_v63 = vadd.f32 %v20633_v26, %v11210_v5  ;;  %v15211_v25 = vpop.f32.mrb[102].mxu0  ;;  %11364 = vadd.xlane.f32.xlu1 %v11363_v34  ;;  %11373 = vadd.xlane.f32.xlu0 %v11372_v35 }
 0xd74   :  { %v20875_v15 = vadd.f32 %v11219_v8, %v109_v0  ;;  %v11222_v55 = vadd.f32 %v15211_v25, %v20633_v26  ;;  %v11213_v2 = vpop.f32.mrb[103].mxu0 }
 0xd75   :  { %v20880_v17 = vadd.f32 %v11211_v63, %v107_v33  ;;  %v11214_v48 = vadd.f32 %v20633_v26, %v11213_v2 }
 0xd76   :  { %v20882_v50 = vadd.f32 %v11222_v55, %v110_v56  ;;  %v11381_v53 = vsel %vm234_vm0, %v20875_v15, 0.0 }
 0xd77   :  { %11382 = vadd.xlane.f32.xlu1 %v11381_v53  ;;  %11367 = vadd.xlane.f32.xlu0 %v11366_v14  ;;  %v20887_v57 = vadd.f32 %v11214_v48, %v108_v13  ;;  %v11375_v41 = vsel %vm234_vm0, %v20880_v17, 0.0 }
 0xd78   :  { %v11384_v51 = vsel %vm234_vm0, %v20882_v50, 0.0 }
 0xd79   :  { %v11378_v32 = vsel %vm234_vm0, %v20887_v57, 0.0 }
 0xd7b   :  { %11376 = vadd.xlane.f32.xlu1 %v11375_v41  ;;  %11385 = vadd.xlane.f32.xlu0 %v11384_v51 }
 0xd7f   :  { %11379 = vadd.xlane.f32.xlu0 %v11378_v32 }
 0xdbc   :  { %v11275_v26 = vpop.xlane.xlu0 %11274 }
 0xdbd   :  { %v11390_v12 = vmul.f32 0.03125, %v11275_v26 }
 0xdbf   :  { %v11272_v43 = vpop.xlane.xlu1 %11271  ;;  %v20896_v28 = vsub.f32 %v20643_v36, %v11390_v12 }
 0xdc0   :  { %v11389_v6 = vmul.f32 0.03125, %v11272_v43  ;;  %v11269_v0 = vpop.xlane.xlu0 %11268 }
 0xdc1   :  { %v11388_v60 = vmul.f32 0.03125, %v11269_v0  ;;  %v11470_v36 = vmul.f32 %v20896_v28, %v20896_v28 }
 0xdc2   :  { %v20899_v33 = vsub.f32 %v20651_v11, %v11389_v6 }
 0xdc3   :  { %v20902_v8 = vsub.f32 %v20645_v7, %v11388_v60  ;;  %v11514_v53 = vsel %vm234_vm0, %v11470_v36, 0.0 }
 0xdc4   :  { %v11287_v5 = vpop.xlane.xlu1 %11286  ;;  %v11278_v56 = vpop.xlane.xlu0 %11277  ;;  %v11469_v34 = vmul.f32 %v20899_v33, %v20899_v33 }
 0xdc5   :  { %v11391_v35 = vmul.f32 0.03125, %v11278_v56  ;;  %v11468_v63 = vmul.f32 %v20902_v8, %v20902_v8  ;;  %v11394_v55 = vmul.f32 0.03125, %v11287_v5 }
 0xdc6   :  { %v11511_v25 = vsel %vm234_vm0, %v11469_v34, 0.0 }
 0xdc7   :  { %v20912_v11 = vsub.f32 %v20661_v19, %v11391_v35  ;;  %11512 = vadd.xlane.f32.xlu0 %v11511_v25  ;;  %v11508_v7 = vsel %vm234_vm0, %v11468_v63, 0.0  ;;  %v20919_v41 = vsub.f32 %v20667_v61, %v11394_v55 }
 0xdc8   :  { %v11281_v2 = vpop.xlane.xlu1 %11280  ;;  %11509 = vadd.xlane.f32.xlu1 %v11508_v7  ;;  %v11290_v13 = vpop.xlane.xlu0 %11289 }
 0xdc9   :  { %v11392_v14 = vmul.f32 0.03125, %v11281_v2  ;;  %v11471_v48 = vmul.f32 %v20912_v11, %v20912_v11  ;;  %v11395_v19 = vmul.f32 0.03125, %v11290_v13  ;;  %v11474_v5 = vmul.f32 %v20919_v41, %v20919_v41 }
 0xdcb   :  { %v20922_v51 = vsub.f32 %v20671_v37, %v11392_v14  ;;  %v11517_v32 = vsel %vm234_vm0, %v11471_v48, 0.0  ;;  %v20928_v60 = vsub.f32 %v20673_v23, %v11395_v19 }
 0xdcc   :  { %v11299_v26 = vpop.xlane.xlu1 %11298  ;;  %11515 = vadd.xlane.f32.xlu1 %v11514_v53  ;;  %11518 = vadd.xlane.f32.xlu0 %v11517_v32  ;;  %v11284_v12 = vpop.xlane.xlu0 %11283 }
 0xdcd   :  { %v11393_v43 = vmul.f32 0.03125, %v11284_v12  ;;  %v11472_v6 = vmul.f32 %v20922_v51, %v20922_v51  ;;  %v11398_v0 = vmul.f32 0.03125, %v11299_v26  ;;  %v11475_v7 = vmul.f32 %v20928_v60, %v20928_v60 }
 0xdcf   :  { %v20931_v61 = vsub.f32 %v20682_v47, %v11393_v43  ;;  %v11520_v37 = vsel %vm234_vm0, %v11472_v6, 0.0  ;;  %v20939_v25 = vsub.f32 %v20693_v59, %v11398_v0  ;;  %v11526_v47 = vsel %vm234_vm0, %v11474_v5, 0.0 }
 0xdd0   :  { %v11293_v56 = vpop.xlane.xlu1 %11292  ;;  %11521 = vadd.xlane.f32.xlu1 %v11520_v37  ;;  %v11302_v34 = vpop.xlane.xlu0 %11301  ;;  %v11529_v26 = vsel %vm234_vm0, %v11475_v7, 0.0 }
 0xdd1   :  { %v11396_v35 = vmul.f32 0.03125, %v11293_v56  ;;  %v11473_v63 = vmul.f32 %v20931_v61, %v20931_v61  ;;  %v11399_v23 = vmul.f32 0.03125, %v11302_v34 }
 0xdd3   :  { %v20942_v36 = vsub.f32 %v20698_v38, %v11396_v35  ;;  %v11523_v55 = vsel %vm234_vm0, %v11473_v63, 0.0  ;;  %v20951_v48 = vsub.f32 %v20700_v31, %v11399_v23  ;;  %v11478_v38 = vmul.f32 %v20939_v25, %v20939_v25 }
 0xdd4   :  { %v11311_v2 = vpop.xlane.xlu1 %11310  ;;  %11527 = vadd.xlane.f32.xlu1 %v11526_v47  ;;  %11524 = vadd.xlane.f32.xlu0 %v11523_v55  ;;  %v11296_v13 = vpop.xlane.xlu0 %11295 }
 0xdd5   :  { %v11397_v14 = vmul.f32 0.03125, %v11296_v13  ;;  %v11476_v59 = vmul.f32 %v20942_v36, %v20942_v36  ;;  %v11402_v53 = vmul.f32 0.03125, %v11311_v2  ;;  %v11538_v0 = vsel %vm234_vm0, %v11478_v38, 0.0 }
 0xdd6   :  { %v11479_v37 = vmul.f32 %v20951_v48, %v20951_v48 }
 0xdd7   :  { %v20956_v19 = vsub.f32 %v20711_v52, %v11397_v14  ;;  %v11532_v32 = vsel %vm234_vm0, %v11476_v59, 0.0  ;;  %v20966_v52 = vsub.f32 %v20719_v21, %v11402_v53 }
 0xdd8   :  { %v11305_v12 = vpop.xlane.xlu1 %11304  ;;  %11533 = vadd.xlane.f32.xlu1 %v11532_v32  ;;  %11530 = vadd.xlane.f32.xlu0 %v11529_v26  ;;  %v11314_v43 = vpop.xlane.xlu0 %11313  ;;  %v11541_v7 = vsel %vm234_vm0, %v11479_v37, 0.0 }
 0xdd9   :  { %v11400_v6 = vmul.f32 0.03125, %v11305_v12  ;;  %v11477_v31 = vmul.f32 %v20956_v19, %v20956_v19  ;;  %v11403_v56 = vmul.f32 0.03125, %v11314_v43  ;;  %v11482_v13 = vmul.f32 %v20966_v52, %v20966_v52 }
 0xddb   :  { %v20969_v5 = vsub.f32 %v20723_v10, %v11400_v6  ;;  %v11535_v34 = vsel %vm234_vm0, %v11477_v31, 0.0  ;;  %v20976_v21 = vsub.f32 %v20725_v46, %v11403_v56  ;;  %v11550_v26 = vsel %vm234_vm0, %v11482_v13, 0.0 }
 0xddc   :  { %v11323_v35 = vpop.xlane.xlu1 %11322  ;;  %11539 = vadd.xlane.f32.xlu1 %v11538_v0  ;;  %11536 = vadd.xlane.f32.xlu0 %v11535_v34  ;;  %v11308_v63 = vpop.xlane.xlu0 %11307 }
 0xddd   :  { %v11401_v23 = vmul.f32 0.03125, %v11308_v63  ;;  %v11480_v47 = vmul.f32 %v20969_v5, %v20969_v5  ;;  %v11406_v55 = vmul.f32 0.03125, %v11323_v35  ;;  %v11483_v43 = vmul.f32 %v20976_v21, %v20976_v21 }
 0xddf   :  { %v20979_v10 = vsub.f32 %v20734_v44, %v11401_v23  ;;  %v11544_v2 = vsel %vm234_vm0, %v11480_v47, 0.0  ;;  %v20987_v32 = vsub.f32 %v20745_v40, %v11406_v55  ;;  %v11553_v63 = vsel %vm234_vm0, %v11483_v43, 0.0 }
 0xde0   :  { %v11317_v14 = vpop.xlane.xlu1 %11316  ;;  %11545 = vadd.xlane.f32.xlu1 %v11544_v2  ;;  %11542 = vadd.xlane.f32.xlu0 %v11541_v7  ;;  %v11326_v59 = vpop.xlane.xlu0 %11325 }
 0xde1   :  { %v11404_v38 = vmul.f32 0.03125, %v11317_v14  ;;  %v11481_v53 = vmul.f32 %v20979_v10, %v20979_v10  ;;  %v11407_v46 = vmul.f32 0.03125, %v11326_v59 }
 0xde3   :  { %v20990_v44 = vsub.f32 %v20750_v22, %v11404_v38  ;;  %v11547_v12 = vsel %vm234_vm0, %v11481_v53, 0.0  ;;  %v20999_v37 = vsub.f32 %v20752_v49, %v11407_v46  ;;  %v11486_v22 = vmul.f32 %v20987_v32, %v20987_v32  ;;  %v15661_v49 = vld [vmem:[%s22311_s4] sm:$0xff]  }
 0xde4   :  { %v11335_v6 = vpop.xlane.xlu1 %11334  ;;  %11551 = vadd.xlane.f32.xlu1 %v11550_v26  ;;  %11548 = vadd.xlane.f32.xlu0 %v11547_v12  ;;  %v11320_v31 = vpop.xlane.xlu0 %11319  ;;  %v15662_v26 = vld [vmem:[%s22311_s4 + $0x8] sm:$0xff]  }
 0xde5   :  { %v11405_v0 = vmul.f32 0.03125, %v11320_v31  ;;  %v11484_v40 = vmul.f32 %v20990_v44, %v20990_v44  ;;  %v11410_v56 = vmul.f32 0.03125, %v11335_v6  ;;  %v11562_v2 = vsel %vm234_vm0, %v11486_v22, 0.0  ;;  %15212 = vmatprep.subr.bf16.mxu1 %v15661_v49 }
 0xde6   :  { %15213 = vmatpush3.bf16.msra.mxu1 %v15661_v49 }
 0xde7   :  { %v21004_v34 = vsub.f32 %v20763_v54, %v11405_v0  ;;  %v11556_v35 = vsel %vm234_vm0, %v11484_v40, 0.0  ;;  %v11487_v54 = vmul.f32 %v20999_v37, %v20999_v37  ;;  %v21017_v13 = vsub.f32 %v20771_v24, %v11410_v56  ;;  %15214 = vmatprep.subr.bf16.mxu1 %v15662_v26 }
 0xde8   :  { %v11329_v23 = vpop.xlane.xlu1 %11328  ;;  %11557 = vadd.xlane.f32.xlu1 %v11556_v35  ;;  %11554 = vadd.xlane.f32.xlu0 %v11553_v63  ;;  %v11338_v47 = vpop.xlane.xlu0 %11337 }
 0xde9   :  { %v11408_v55 = vmul.f32 0.03125, %v11329_v23  ;;  %v11485_v7 = vmul.f32 %v21004_v34, %v21004_v34  ;;  %v11411_v59 = vmul.f32 0.03125, %v11338_v47  ;;  %v11490_v40 = vmul.f32 %v21017_v13, %v21017_v13 }
 0xdea   :  { %15215 = vmatpush3.bf16.msra.mxu1 %v15662_v26 }
 0xdeb   :  { %v21020_v14 = vsub.f32 %v20774_v30, %v11408_v55  ;;  %v11559_v38 = vsel %vm234_vm0, %v11485_v7, 0.0  ;;  %v11565_v30 = vsel %vm234_vm0, %v11487_v54, 0.0  ;;  %v21030_v6 = vsub.f32 %v20777_v42, %v11411_v59 }
 0xdec   :  { %v11347_v53 = vpop.xlane.xlu1 %11346  ;;  %11563 = vadd.xlane.f32.xlu1 %v11562_v2  ;;  %11560 = vadd.xlane.f32.xlu0 %v11559_v38  ;;  %v11332_v46 = vpop.xlane.xlu0 %11331  ;;  %v11574_v47 = vsel %vm234_vm0, %v11490_v40, 0.0 }
 0xded   :  { %v11409_v12 = vmul.f32 0.03125, %v11332_v46  ;;  %v11488_v24 = vmul.f32 %v21020_v14, %v21020_v14  ;;  %v11414_v43 = vmul.f32 0.03125, %v11347_v53  ;;  %v11491_v55 = vmul.f32 %v21030_v6, %v21030_v6 }
 0xdef   :  { %v21033_v31 = vsub.f32 %v20783_v4, %v11409_v12  ;;  %v11568_v0 = vsel %vm234_vm0, %v11488_v24, 0.0  ;;  %v21041_v42 = vsub.f32 %v20797_v39, %v11414_v43  ;;  %v11577_v26 = vsel %vm234_vm0, %v11491_v55, 0.0 }
 0xdf0   :  { %v11341_v22 = vpop.xlane.xlu1 %11340  ;;  %11569 = vadd.xlane.f32.xlu1 %v11568_v0  ;;  %11566 = vadd.xlane.f32.xlu0 %v11565_v30  ;;  %v11350_v56 = vpop.xlane.xlu0 %11349 }
 0xdf1   :  { %v11412_v35 = vmul.f32 0.03125, %v11341_v22  ;;  %v11489_v63 = vmul.f32 %v21033_v31, %v21033_v31  ;;  %v11415_v23 = vmul.f32 0.03125, %v11350_v56 }
 0xdf3   :  { %v21044_v4 = vsub.f32 %v20801_v1, %v11412_v35  ;;  %v11571_v49 = vsel %vm234_vm0, %v11489_v63, 0.0  ;;  %v21053_v59 = vsub.f32 %v20803_v29, %v11415_v23  ;;  %v11494_v1 = vmul.f32 %v21041_v42, %v21041_v42 }
 0xdf4   :  { %v11359_v7 = vpop.xlane.xlu1 %11358  ;;  %11575 = vadd.xlane.f32.xlu1 %v11574_v47  ;;  %11572 = vadd.xlane.f32.xlu0 %v11571_v49  ;;  %v11344_v2 = vpop.xlane.xlu0 %11343 }
 0xdf5   :  { %v11413_v54 = vmul.f32 0.03125, %v11344_v2  ;;  %v11492_v39 = vmul.f32 %v21044_v4, %v21044_v4  ;;  %v11418_v38 = vmul.f32 0.03125, %v11359_v7  ;;  %v11586_v30 = vsel %vm234_vm0, %v11494_v1, 0.0 }
 0xdf6   :  { %v11495_v0 = vmul.f32 %v21053_v59, %v21053_v59 }
 0xdf7   :  { %v21058_v53 = vsub.f32 %v20812_v18, %v11413_v54  ;;  %v11580_v46 = vsel %vm234_vm0, %v11492_v39, 0.0  ;;  %v21068_v18 = vsub.f32 %v20823_v62, %v11418_v38 }
 0xdf8   :  { %v11353_v12 = vpop.xlane.xlu1 %11352  ;;  %11581 = vadd.xlane.f32.xlu1 %v11580_v46  ;;  %11578 = vadd.xlane.f32.xlu0 %v11577_v26  ;;  %v11362_v24 = vpop.xlane.xlu0 %11361  ;;  %v11589_v55 = vsel %vm234_vm0, %v11495_v0, 0.0 }
 0xdf9   :  { %v11416_v43 = vmul.f32 0.03125, %v11353_v12  ;;  %v11493_v29 = vmul.f32 %v21058_v53, %v21058_v53  ;;  %v11419_v22 = vmul.f32 0.03125, %v11362_v24  ;;  %v11498_v2 = vmul.f32 %v21068_v18, %v21068_v18 }
 0xdfb   :  { %v21071_v40 = vsub.f32 %v20828_v16, %v11416_v43  ;;  %v11583_v56 = vsel %vm234_vm0, %v11493_v29, 0.0  ;;  %v21078_v62 = vsub.f32 %v20830_v20, %v11419_v22  ;;  %v11598_v26 = vsel %vm234_vm0, %v11498_v2, 0.0 }
 0xdfc   :  { %v11371_v35 = vpop.xlane.xlu1 %11370  ;;  %11587 = vadd.xlane.f32.xlu1 %v11586_v30  ;;  %11584 = vadd.xlane.f32.xlu0 %v11583_v56  ;;  %v11356_v63 = vpop.xlane.xlu0 %11355 }
 0xdfd   :  { %v11417_v23 = vmul.f32 0.03125, %v11356_v63  ;;  %v11496_v47 = vmul.f32 %v21071_v40, %v21071_v40  ;;  %v11422_v49 = vmul.f32 0.03125, %v11371_v35  ;;  %v11499_v24 = vmul.f32 %v21078_v62, %v21078_v62 }
 0xdff   :  { %v21081_v16 = vsub.f32 %v20841_v45, %v11417_v23  ;;  %v11592_v7 = vsel %vm234_vm0, %v11496_v47, 0.0  ;;  %v21089_v46 = vsub.f32 %v20849_v58, %v11422_v49  ;;  %v11601_v63 = vsel %vm234_vm0, %v11499_v24, 0.0 }
 0xe00   :  { %v11365_v54 = vpop.xlane.xlu1 %11364  ;;  %11593 = vadd.xlane.f32.xlu1 %v11592_v7  ;;  %11590 = vadd.xlane.f32.xlu0 %v11589_v55  ;;  %v11374_v39 = vpop.xlane.xlu0 %11373 }
 0xe01   :  { %v11420_v1 = vmul.f32 0.03125, %v11365_v54  ;;  %v11497_v38 = vmul.f32 %v21081_v16, %v21081_v16  ;;  %v11423_v20 = vmul.f32 0.03125, %v11374_v39 }
 0xe03   :  { %v21092_v45 = vsub.f32 %v20853_v27, %v11420_v1  ;;  %v11595_v12 = vsel %vm234_vm0, %v11497_v38, 0.0  ;;  %v21101_v0 = vsub.f32 %v20855_v9, %v11423_v20  ;;  %v11502_v27 = vmul.f32 %v21089_v46, %v21089_v46 }
 0xe04   :  { %v11383_v43 = vpop.xlane.xlu1 %11382  ;;  %11599 = vadd.xlane.f32.xlu1 %v11598_v26  ;;  %11596 = vadd.xlane.f32.xlu0 %v11595_v12  ;;  %v11368_v29 = vpop.xlane.xlu0 %11367 }
 0xe05   :  { %v11421_v30 = vmul.f32 0.03125, %v11368_v29  ;;  %v11500_v58 = vmul.f32 %v21092_v45, %v21092_v45  ;;  %v11426_v22 = vmul.f32 0.03125, %v11383_v43  ;;  %v11610_v55 = vsel %vm234_vm0, %v11502_v27, 0.0  ;;  %v15664_v27 = vld [vmem:[%s22313_s6 + $0x8] sm:$0xff]  }
 0xe06   :  { %v11503_v7 = vmul.f32 %v21101_v0, %v21101_v0 }
 0xe07   :  { %v21106_v56 = vsub.f32 %v20864_v3, %v11421_v30  ;;  %v11604_v35 = vsel %vm234_vm0, %v11500_v58, 0.0  ;;  %v21116_v3 = vsub.f32 %v20875_v15, %v11426_v22  ;;  %v15663_v58 = vld [vmem:[%s22313_s6] sm:$0xff]   ;;  %v15665_v22 = vld [vmem:[%s22313_s6 + $0x10] sm:$0xff]  }
 0xe08   :  { %v11377_v23 = vpop.xlane.xlu1 %11376  ;;  %11605 = vadd.xlane.f32.xlu1 %v11604_v35  ;;  %11602 = vadd.xlane.f32.xlu0 %v11601_v63  ;;  %v11386_v47 = vpop.xlane.xlu0 %11385  ;;  %v11613_v26 = vsel %vm234_vm0, %v11503_v7, 0.0  ;;  %v15666_v35 = vld [vmem:[%s22313_s6 + $0x18] sm:$0xff]   ;;  %v15667_v63 = vld [vmem:[%s22313_s6 + $0x20] sm:$0xff]  }
 0xe09   :  { %v11424_v49 = vmul.f32 0.03125, %v11377_v23  ;;  %v11501_v9 = vmul.f32 %v21106_v56, %v21106_v56  ;;  %v11427_v54 = vmul.f32 0.03125, %v11386_v47  ;;  %v11506_v24 = vmul.f32 %v21116_v3, %v21116_v3  ;;  %15256 = vmatprep.subr.bf16.mxu0 %v15663_v58  ;;  %v15668_v23 = vld [vmem:[%s22313_s6 + $0x28] sm:$0xff]  }
 0xe0a   :  { %15257 = vmatpush3.bf16.msra.mxu0 %v15663_v58 }
 0xe0b   :  { %v21119_v2 = vsub.f32 %v20880_v17, %v11424_v49  ;;  %v11607_v39 = vsel %vm234_vm0, %v11501_v9, 0.0  ;;  %v21126_v12 = vsub.f32 %v20882_v50, %v11427_v54  ;;  %v11622_v29 = vsel %vm234_vm0, %v11506_v24, 0.0  ;;  %15258 = vmatprep.subr.bf16.mxu0 %v15664_v27 }
 0xe0c   :  { %11611 = vadd.xlane.f32.xlu1 %v11610_v55  ;;  %11608 = vadd.xlane.f32.xlu0 %v11607_v39  ;;  %v11380_v1 = vpop.xlane.xlu0 %11379 }
 0xe0d   :  { %v11425_v38 = vmul.f32 0.03125, %v11380_v1  ;;  %v11504_v20 = vmul.f32 %v21119_v2, %v21119_v2  ;;  %v11507_v50 = vmul.f32 %v21126_v12, %v21126_v12 }
 0xe0e   :  { %15259 = vmatpush3.bf16.msra.mxu0 %v15664_v27 }
 0xe0f   :  { %v21129_v15 = vsub.f32 %v20887_v57, %v11425_v38  ;;  %v11616_v17 = vsel %vm234_vm0, %v11504_v20, 0.0  ;;  %v11625_v57 = vsel %vm234_vm0, %v11507_v50, 0.0  ;;  %15260 = vmatprep.subr.bf16.mxu0 %v15665_v22 }
 0xe10   :  { %11617 = vadd.xlane.f32.xlu1 %v11616_v17  ;;  %11614 = vadd.xlane.f32.xlu0 %v11613_v26 }
 0xe11   :  { %v11505_v43 = vmul.f32 %v21129_v15, %v21129_v15 }
 0xe12   :  { %15261 = vmatpush3.bf16.msra.mxu0 %v15665_v22  ;;  %v21162_v22 = vld [vmem:[%s22314_s7 + $0x1] ss:$0 sm:$0xff] }
 0xe13   :  { %v11619_v30 = vsel %vm234_vm0, %v11505_v43, 0.0  ;;  %15262 = vmatprep.subr.bf16.mxu0 %v15666_v35 }
 0xe14   :  { %11623 = vadd.xlane.f32.xlu1 %v11622_v29  ;;  %11620 = vadd.xlane.f32.xlu0 %v11619_v30 }
 0xe16   :  { %15263 = vmatpush3.bf16.msra.mxu0 %v15666_v35 }
 0xe17   :  { %15264 = vmatprep.subr.bf16.mxu0 %v15667_v63 }
 0xe18   :  { %11626 = vadd.xlane.f32.xlu0 %v11625_v57 }
 0xe1a   :  { %15265 = vmatpush3.bf16.msra.mxu0 %v15667_v63 }
 0xe1b   :  { %15266 = vmatprep.subr.bf16.mxu0 %v15668_v23 }
 0xe1e   :  { %15267 = vmatpush3.bf16.msra.mxu0 %v15668_v23 }
 0xe54   :  { %v11513_v47 = vpop.xlane.xlu0 %11512 }
 0xe55   :  { %v11629_v49 = vmul.f32 0.03125, %v11513_v47  ;;  %v11510_v9 = vpop.xlane.xlu1 %11509 }
 0xe56   :  { %v11628_v55 = vmul.f32 0.03125, %v11510_v9 }
 0xe57   :  { %v11669_v7 = vadd.f32 1e-05, %v11629_v49  ;;  %v21168_v49 = vld [vmem:[%s22314_s7 + $0x2] ss:$0 sm:$0xff] }
 0xe58   :  { %v11668_v54 = vadd.f32 1e-05, %v11628_v55 }
 0xe59   :  { %16331 = vrsqrt.f32 %v11669_v7  ;;  %v11516_v39 = vpop.xlane.xlu1 %11515  ;;  %v11519_v1 = vpop.xlane.xlu0 %11518 }
 0xe5a   :  { %16333 = vrsqrt.f32 %v11668_v54  ;;  %v11630_v38 = vmul.f32 0.03125, %v11516_v39  ;;  %v11631_v20 = vmul.f32 0.03125, %v11519_v1 }
 0xe5c   :  { %v11670_v26 = vadd.f32 1e-05, %v11630_v38  ;;  %v11671_v17 = vadd.f32 1e-05, %v11631_v20 }
 0xe5d   :  { %v11522_v24 = vpop.xlane.xlu1 %11521 }
 0xe5e   :  { %16335 = vrsqrt.f32 %v11670_v26  ;;  %v11632_v43 = vmul.f32 0.03125, %v11522_v24 }
 0xe5f   :  { %16337 = vrsqrt.f32 %v11671_v17 }
 0xe60   :  { %v11672_v29 = vadd.f32 1e-05, %v11632_v43 }
 0xe61   :  { %v11528_v30 = vpop.xlane.xlu1 %11527  ;;  %v11525_v50 = vpop.xlane.xlu0 %11524 }
 0xe62   :  { %16339 = vrsqrt.f32 %v11672_v29  ;;  %v11634_v57 = vmul.f32 0.03125, %v11528_v30  ;;  %v11633_v58 = vmul.f32 0.03125, %v11525_v50 }
 0xe63   :  { %v16332_v27 = vpop.eup %16331 }
 0xe64   :  { %v16334_v35 = vpop.eup %16333  ;;  %v11674_v63 = vadd.f32 1e-05, %v11634_v57  ;;  %v11673_v23 = vadd.f32 1e-05, %v11633_v58  ;;  %v11749_v47 = vmul.f32 %v16332_v27, %v20899_v33 }
 0xe65   :  { %v11534_v9 = vpop.xlane.xlu1 %11533  ;;  %v11531_v55 = vpop.xlane.xlu0 %11530  ;;  %v11748_v7 = vmul.f32 %v16334_v35, %v20902_v8 }
 0xe66   :  { %16341 = vrsqrt.f32 %v11674_v63  ;;  %v11636_v54 = vmul.f32 0.03125, %v11534_v9  ;;  %v11635_v39 = vmul.f32 0.03125, %v11531_v55  ;;  %v11793_v1 = vmul.f32 %v21162_v22, %v11749_v47 }
 0xe67   :  { %16343 = vrsqrt.f32 %v11673_v23  ;;  %v11792_v38 = vmul.f32 %v21162_v22, %v11748_v7 }
 0xe68   :  { %v16336_v20 = vpop.eup %16335  ;;  %v11676_v26 = vadd.f32 1e-05, %v11636_v54  ;;  %v11675_v33 = vadd.f32 1e-05, %v11635_v39  ;;  %v21174_v17 = vadd.f32 %v21168_v49, %v11793_v1 }
 0xe69   :  { %v16338_v24 = vpop.eup %16337  ;;  %v11750_v43 = vmul.f32 %v16336_v20, %v20896_v28  ;;  %v11540_v29 = vpop.xlane.xlu1 %11539  ;;  %v21178_v8 = vadd.f32 %v21168_v49, %v11792_v38 }
 0xe6a   :  { %v11537_v30 = vpop.xlane.xlu0 %11536  ;;  %v11751_v50 = vmul.f32 %v16338_v24, %v20912_v11  ;;  %16345 = vrsqrt.f32 %v11676_v26  ;;  %v11638_v57 = vmul.f32 0.03125, %v11540_v29 }
 0xe6b   :  { %v11637_v58 = vmul.f32 0.03125, %v11537_v30  ;;  %v11794_v27 = vmul.f32 %v21162_v22, %v11750_v43  ;;  %16347 = vrsqrt.f32 %v11675_v33  ;;  %v11876_v35 = vpack.c.bf16 %v21174_v17, %v21178_v8 }
 0xe6c   :  { %v16340_v63 = vpop.eup %16339  ;;  %v11795_v23 = vmul.f32 %v21162_v22, %v11751_v50  ;;  %v11678_v28 = vadd.f32 1e-05, %v11638_v57 }
 0xe6d   :  { %v11677_v47 = vadd.f32 1e-05, %v11637_v58  ;;  %v21186_v9 = vadd.f32 %v21168_v49, %v11794_v27  ;;  %v11546_v55 = vpop.xlane.xlu1 %11545  ;;  %15216 = vmatprep.mubr.msk.bf16.mxu1 %vm234_vm0, %v11876_v35  ;;  %v11752_v1 = vmul.f32 %v16340_v63, %v20922_v51 }
 0xe6e   :  { %v11543_v11 = vpop.xlane.xlu0 %11542  ;;  %v21190_v7 = vadd.f32 %v21168_v49, %v11795_v23  ;;  %16349 = vrsqrt.f32 %v11678_v28  ;;  %v11640_v54 = vmul.f32 0.03125, %v11546_v55 }
 0xe6f   :  { %v11639_v39 = vmul.f32 0.03125, %v11543_v11  ;;  %16351 = vrsqrt.f32 %v11677_v47  ;;  %v11796_v51 = vmul.f32 %v21162_v22, %v11752_v1 }
 0xe70   :  { %v16342_v38 = vpop.eup %16341  ;;  %v11877_v20 = vpack.c.bf16 %v21190_v7, %v21186_v9  ;;  %v11680_v26 = vadd.f32 1e-05, %v11640_v54 }
 0xe71   :  { %v11679_v33 = vadd.f32 1e-05, %v11639_v39  ;;  %v16344_v24 = vpop.eup %16343  ;;  %v11754_v43 = vmul.f32 %v16342_v38, %v20919_v41  ;;  %v11552_v29 = vpop.xlane.xlu1 %11551 }
 0xe72   :  { %v11549_v30 = vpop.xlane.xlu0 %11548  ;;  %16353 = vrsqrt.f32 %v11680_v26  ;;  %v11642_v50 = vmul.f32 0.03125, %v11552_v29  ;;  %15217 = vmatmul.mubr.msk.bf16.vlgmr.msra.gmra.mrb[104].mxu1 %vm234_vm0, %v11877_v20  ;;  %v11753_v58 = vmul.f32 %v16344_v24, %v20931_v61  ;;  %v21203_v61 = vadd.f32 %v21168_v49, %v11796_v51 }
 0xe73   :  { %v11641_v57 = vmul.f32 0.03125, %v11549_v30  ;;  %16355 = vrsqrt.f32 %v11679_v33  ;;  %v11798_v41 = vmul.f32 %v21162_v22, %v11754_v43 }
 0xe74   :  { %v16346_v27 = vpop.eup %16345  ;;  %v11682_v35 = vadd.f32 1e-05, %v11642_v50  ;;  %v11797_v23 = vmul.f32 %v21162_v22, %v11753_v58 }
 0xe75   :  { %v11681_v63 = vadd.f32 1e-05, %v11641_v57  ;;  %v16348_v28 = vpop.eup %16347  ;;  %v11558_v47 = vpop.xlane.xlu1 %11557  ;;  %v11756_v38 = vmul.f32 %v16346_v27, %v20942_v36 }
 0xe76   :  { %v11555_v55 = vpop.xlane.xlu0 %11554  ;;  %v11755_v11 = vmul.f32 %v16348_v28, %v20928_v60  ;;  %16357 = vrsqrt.f32 %v11682_v35  ;;  %v11644_v54 = vmul.f32 0.03125, %v11558_v47  ;;  %v21206_v1 = vadd.f32 %v21168_v49, %v11797_v23 }
 0xe77   :  { %v11643_v39 = vmul.f32 0.03125, %v11555_v55  ;;  %16359 = vrsqrt.f32 %v11681_v63  ;;  %v21211_v60 = vadd.f32 %v21168_v49, %v11798_v41  ;;  %v11800_v35 = vmul.f32 %v21162_v22, %v11756_v38 }
 0xe78   :  { %v16350_v20 = vpop.eup %16349  ;;  %v11799_v26 = vmul.f32 %v21162_v22, %v11755_v11  ;;  %v11684_v33 = vadd.f32 1e-05, %v11644_v54  ;;  %v11878_v50 = vpack.c.bf16 %v21206_v1, %v21203_v61 }
 0xe79   :  { %v11683_v24 = vadd.f32 1e-05, %v11643_v39  ;;  %v16352_v43 = vpop.eup %16351  ;;  %v11758_v29 = vmul.f32 %v16350_v20, %v20939_v25  ;;  %v11564_v30 = vpop.xlane.xlu1 %11563  ;;  %v21229_v38 = vadd.f32 %v21168_v49, %v11800_v35 }
 0xe7a   :  { %v11561_v57 = vpop.xlane.xlu0 %11560  ;;  %v21217_v58 = vadd.f32 %v21168_v49, %v11799_v26  ;;  %16361 = vrsqrt.f32 %v11684_v33  ;;  %v11646_v36 = vmul.f32 0.03125, %v11564_v30  ;;  %15220 = vmatprep.mubr.msk.bf16.mxu1 %vm234_vm0, %v11878_v50  ;;  %v11757_v27 = vmul.f32 %v16352_v43, %v20956_v19 }
 0xe7b   :  { %v11645_v51 = vmul.f32 0.03125, %v11561_v57  ;;  %16363 = vrsqrt.f32 %v11683_v24  ;;  %v11802_v47 = vmul.f32 %v21162_v22, %v11758_v29 }
 0xe7c   :  { %v16354_v63 = vpop.eup %16353  ;;  %v11879_v25 = vpack.c.bf16 %v21217_v58, %v21211_v60  ;;  %v11686_v23 = vadd.f32 1e-05, %v11646_v36  ;;  %v11801_v54 = vmul.f32 %v21162_v22, %v11757_v27 }
 0xe7d   :  { %v11685_v28 = vadd.f32 1e-05, %v11645_v51  ;;  %v16356_v41 = vpop.eup %16355  ;;  %v11570_v55 = vpop.xlane.xlu1 %11569  ;;  %v11760_v33 = vmul.f32 %v16354_v63, %v20969_v5  ;;  %v21237_v50 = vadd.f32 %v21168_v49, %v11802_v47 }
 0xe7e   :  { %v11567_v11 = vpop.xlane.xlu0 %11566  ;;  %v11759_v39 = vmul.f32 %v16356_v41, %v20951_v48  ;;  %16365 = vrsqrt.f32 %v11686_v23  ;;  %v11648_v20 = vmul.f32 0.03125, %v11570_v55  ;;  %15221 = vmatmul.mubr.msk.bf16.gmra.mrb[108].mxu1 %vm234_vm0, %v11879_v25  ;;  %v21232_v26 = vadd.f32 %v21168_v49, %v11801_v54 }
 0xe7f   :  { %v11647_v19 = vmul.f32 0.03125, %v11567_v11  ;;  %16367 = vrsqrt.f32 %v11685_v28  ;;  %v11804_v23 = vmul.f32 %v21162_v22, %v11760_v33 }
 0xe80   :  { %v16358_v24 = vpop.eup %16357  ;;  %v11803_v43 = vmul.f32 %v21162_v22, %v11759_v39  ;;  %v11688_v29 = vadd.f32 1e-05, %v11648_v20  ;;  %v11880_v51 = vpack.c.bf16 %v21232_v26, %v21229_v38 }
 0xe81   :  { %v11687_v30 = vadd.f32 1e-05, %v11647_v19  ;;  %v16360_v48 = vpop.eup %16359  ;;  %v11762_v57 = vmul.f32 %v16358_v24, %v20966_v52  ;;  %v11576_v36 = vpop.xlane.xlu1 %11575  ;;  %v21255_v33 = vadd.f32 %v21168_v49, %v11804_v23 }
 0xe82   :  { %v11573_v27 = vpop.xlane.xlu0 %11572  ;;  %v21243_v35 = vadd.f32 %v21168_v49, %v11803_v43  ;;  %16369 = vrsqrt.f32 %v11688_v29  ;;  %v11650_v5 = vmul.f32 0.03125, %v11576_v36  ;;  %15224 = vmatprep.mubr.msk.bf16.mxu1 %vm234_vm0, %v11880_v51  ;;  %v11761_v25 = vmul.f32 %v16360_v48, %v20979_v10 }
 0xe83   :  { %v11649_v63 = vmul.f32 0.03125, %v11573_v27  ;;  %16371 = vrsqrt.f32 %v11687_v30  ;;  %v11806_v11 = vmul.f32 %v21162_v22, %v11762_v57 }
 0xe84   :  { %v16362_v28 = vpop.eup %16361  ;;  %v11881_v52 = vpack.c.bf16 %v21243_v35, %v21237_v50  ;;  %v11690_v41 = vadd.f32 1e-05, %v11650_v5  ;;  %v11805_v20 = vmul.f32 %v21162_v22, %v11761_v25 }
 0xe85   :  { %v11689_v47 = vadd.f32 1e-05, %v11649_v63  ;;  %v16364_v55 = vpop.eup %16363  ;;  %v11582_v54 = vpop.xlane.xlu1 %11581  ;;  %v11764_v29 = vmul.f32 %v16362_v28, %v20990_v44  ;;  %v21263_v51 = vadd.f32 %v21168_v49, %v11806_v11 }
 0xe86   :  { %v11579_v39 = vpop.xlane.xlu0 %11578  ;;  %v11763_v19 = vmul.f32 %v16364_v55, %v20976_v21  ;;  %16373 = vrsqrt.f32 %v11690_v41  ;;  %v11652_v24 = vmul.f32 0.03125, %v11582_v54  ;;  %15225 = vmatmul.mubr.msk.bf16.gmra.mrb[112].mxu1 %vm234_vm0, %v11881_v52  ;;  %v21258_v43 = vadd.f32 %v21168_v49, %v11805_v20 }
 0xe87   :  { %v11651_v10 = vmul.f32 0.03125, %v11579_v39  ;;  %16375 = vrsqrt.f32 %v11689_v47  ;;  %v11808_v41 = vmul.f32 %v21162_v22, %v11764_v29 }
 0xe88   :  { %v16366_v30 = vpop.eup %16365  ;;  %v11807_v48 = vmul.f32 %v21162_v22, %v11763_v19  ;;  %v11692_v57 = vadd.f32 1e-05, %v11652_v24  ;;  %v11882_v63 = vpack.c.bf16 %v21258_v43, %v21255_v33 }
 0xe89   :  { %v11691_v36 = vadd.f32 1e-05, %v11651_v10  ;;  %v16368_v21 = vpop.eup %16367  ;;  %v11766_v27 = vmul.f32 %v16366_v30, %v20987_v32  ;;  %v11588_v5 = vpop.xlane.xlu1 %11587  ;;  %v21281_v29 = vadd.f32 %v21168_v49, %v11808_v41 }
 0xe8a   :  { %v11585_v25 = vpop.xlane.xlu0 %11584  ;;  %v21269_v23 = vadd.f32 %v21168_v49, %v11807_v48  ;;  %16377 = vrsqrt.f32 %v11692_v57  ;;  %v11654_v44 = vmul.f32 0.03125, %v11588_v5  ;;  %15228 = vmatprep.mubr.msk.bf16.mxu1 %vm234_vm0, %v11882_v63  ;;  %v11765_v52 = vmul.f32 %v16368_v21, %v21004_v34 }
 0xe8b   :  { %v11653_v28 = vmul.f32 0.03125, %v11585_v25  ;;  %16379 = vrsqrt.f32 %v11691_v36  ;;  %v11810_v39 = vmul.f32 %v21162_v22, %v11766_v27 }
 0xe8c   :  { %v16370_v47 = vpop.eup %16369  ;;  %v11883_v32 = vpack.c.bf16 %v21269_v23, %v21263_v51  ;;  %v11694_v55 = vadd.f32 1e-05, %v11654_v44  ;;  %v11809_v24 = vmul.f32 %v21162_v22, %v11765_v52 }
 0xe8d   :  { %v11693_v11 = vadd.f32 1e-05, %v11653_v28  ;;  %v16372_v54 = vpop.eup %16371  ;;  %v11594_v20 = vpop.xlane.xlu1 %11593  ;;  %v11768_v57 = vmul.f32 %v16370_v47, %v21020_v14  ;;  %v21289_v63 = vadd.f32 %v21168_v49, %v11810_v39 }
 0xe8e   :  { %v11591_v19 = vpop.xlane.xlu0 %11590  ;;  %v11767_v10 = vmul.f32 %v16372_v54, %v20999_v37  ;;  %16381 = vrsqrt.f32 %v11694_v55  ;;  %v11656_v30 = vmul.f32 0.03125, %v11594_v20  ;;  %15229 = vmatmul.mubr.msk.bf16.gmra.mrb[116].mxu1 %vm234_vm0, %v11883_v32  ;;  %v21284_v48 = vadd.f32 %v21168_v49, %v11809_v24 }
 0xe8f   :  { %v11655_v34 = vmul.f32 0.03125, %v11591_v19  ;;  %16383 = vrsqrt.f32 %v11693_v11  ;;  %v11812_v55 = vmul.f32 %v21162_v22, %v11768_v57 }
 0xe90   :  { %v16374_v36 = vpop.eup %16373  ;;  %v11811_v21 = vmul.f32 %v21162_v22, %v11767_v10  ;;  %v11696_v27 = vadd.f32 1e-05, %v11656_v30  ;;  %v11884_v28 = vpack.c.bf16 %v21284_v48, %v21281_v29 }
 0xe91   :  { %v11695_v5 = vadd.f32 1e-05, %v11655_v34  ;;  %v16376_v37 = vpop.eup %16375  ;;  %v11770_v25 = vmul.f32 %v16374_v36, %v21017_v13  ;;  %v11600_v44 = vpop.xlane.xlu1 %11599  ;;  %v21307_v57 = vadd.f32 %v21168_v49, %v11812_v55 }
 0xe92   :  { %v11597_v52 = vpop.xlane.xlu0 %11596  ;;  %v21295_v41 = vadd.f32 %v21168_v49, %v11811_v21  ;;  %16385 = vrsqrt.f32 %v11696_v27  ;;  %v11658_v14 = vmul.f32 0.03125, %v11600_v44  ;;  %15232 = vmatprep.mubr.msk.bf16.mxu1 %vm234_vm0, %v11884_v28  ;;  %v11769_v32 = vmul.f32 %v16376_v37, %v21033_v31 }
 0xe93   :  { %v11657_v47 = vmul.f32 0.03125, %v11597_v52  ;;  %16387 = vrsqrt.f32 %v11695_v5  ;;  %v11814_v19 = vmul.f32 %v21162_v22, %v11770_v25 }
 0xe94   :  { %v16378_v11 = vpop.eup %16377  ;;  %v11885_v13 = vpack.c.bf16 %v21295_v41, %v21289_v63  ;;  %v11698_v54 = vadd.f32 1e-05, %v11658_v14  ;;  %v11813_v30 = vmul.f32 %v21162_v22, %v11769_v32 }
 0xe95   :  { %v11697_v39 = vadd.f32 1e-05, %v11657_v47  ;;  %v16380_v20 = vpop.eup %16379  ;;  %v11606_v24 = vpop.xlane.xlu1 %11605  ;;  %v11772_v27 = vmul.f32 %v16378_v11, %v21044_v4  ;;  %v21315_v28 = vadd.f32 %v21168_v49, %v11814_v19 }
 0xe96   :  { %v11603_v10 = vpop.xlane.xlu0 %11602  ;;  %v11771_v34 = vmul.f32 %v16380_v20, %v21030_v6  ;;  %16389 = vrsqrt.f32 %v11698_v54  ;;  %v11660_v36 = vmul.f32 0.03125, %v11606_v24  ;;  %15233 = vmatmul.mubr.msk.bf16.gmra.mrb[120].mxu1 %vm234_vm0, %v11885_v13  ;;  %v21310_v21 = vadd.f32 %v21168_v49, %v11813_v30 }
 0xe97   :  { %v11659_v31 = vmul.f32 0.03125, %v11603_v10  ;;  %16391 = vrsqrt.f32 %v11697_v39  ;;  %v11816_v54 = vmul.f32 %v21162_v22, %v11772_v27 }
 0xe98   :  { %v16382_v5 = vpop.eup %16381  ;;  %v11815_v37 = vmul.f32 %v21162_v22, %v11771_v34  ;;  %v11700_v25 = vadd.f32 1e-05, %v11660_v36  ;;  %v11886_v47 = vpack.c.bf16 %v21310_v21, %v21307_v57 }
 0xe99   :  { %v11699_v44 = vadd.f32 1e-05, %v11659_v31  ;;  %v16384_v6 = vpop.eup %16383  ;;  %v11774_v52 = vmul.f32 %v16382_v5, %v21041_v42  ;;  %v11612_v14 = vpop.xlane.xlu1 %11611 }
 0xe9a   :  { %v11609_v32 = vpop.xlane.xlu0 %11608  ;;  %v21321_v55 = vadd.f32 %v21168_v49, %v11815_v37  ;;  %16393 = vrsqrt.f32 %v11700_v25  ;;  %v11662_v4 = vmul.f32 0.03125, %v11612_v14  ;;  %15236 = vmatprep.mubr.msk.bf16.mxu1 %vm234_vm0, %v11886_v47  ;;  %v11773_v13 = vmul.f32 %v16384_v6, %v21058_v53 }
 0xe9b   :  { %v11661_v11 = vmul.f32 0.03125, %v11609_v32  ;;  %16395 = vrsqrt.f32 %v11699_v44  ;;  %v11818_v10 = vmul.f32 %v21162_v22, %v11774_v52  ;;  %v21334_v37 = vadd.f32 %v21168_v49, %v11816_v54 }
 0xe9c   :  { %v16386_v39 = vpop.eup %16385  ;;  %v11887_v42 = vpack.c.bf16 %v21321_v55, %v21315_v28  ;;  %v11702_v20 = vadd.f32 1e-05, %v11662_v4  ;;  %v11817_v36 = vmul.f32 %v21162_v22, %v11773_v13 }
 0xe9d   :  { %v11701_v19 = vadd.f32 1e-05, %v11661_v11  ;;  %v16388_v24 = vpop.eup %16387  ;;  %v11618_v30 = vpop.xlane.xlu1 %11617  ;;  %v11776_v31 = vmul.f32 %v16386_v39, %v21071_v40 }
 0xe9e   :  { %v11615_v34 = vpop.xlane.xlu0 %11614  ;;  %v11775_v5 = vmul.f32 %v16388_v24, %v21053_v59  ;;  %16397 = vrsqrt.f32 %v11702_v20  ;;  %v11664_v53 = vmul.f32 0.03125, %v11618_v30  ;;  %15237 = vmatmul.mubr.msk.bf16.gmra.mrb[124].mxu1 %vm234_vm0, %v11887_v42  ;;  %v21337_v25 = vadd.f32 %v21168_v49, %v11817_v36 }
 0xe9f   :  { %v11663_v27 = vmul.f32 0.03125, %v11615_v34  ;;  %16399 = vrsqrt.f32 %v11701_v19  ;;  %v21341_v59 = vadd.f32 %v21168_v49, %v11818_v10  ;;  %v11820_v13 = vmul.f32 %v21162_v22, %v11776_v31 }
 0xea0   :  { %v16390_v44 = vpop.eup %16389  ;;  %v11819_v6 = vmul.f32 %v21162_v22, %v11775_v5  ;;  %v11704_v52 = vadd.f32 1e-05, %v11664_v53  ;;  %v11888_v4 = vpack.c.bf16 %v21337_v25, %v21334_v37 }
 0xea1   :  { %v11703_v14 = vadd.f32 1e-05, %v11663_v27  ;;  %v16392_v40 = vpop.eup %16391  ;;  %v11778_v47 = vmul.f32 %v16390_v44, %v21068_v18  ;;  %v11624_v32 = vpop.xlane.xlu1 %11623  ;;  %v21358_v5 = vadd.f32 %v21168_v49, %v11820_v13 }
 0xea2   :  { %v11621_v11 = vpop.xlane.xlu0 %11620  ;;  %v21348_v54 = vadd.f32 %v21168_v49, %v11819_v6  ;;  %v11777_v39 = vmul.f32 %v16392_v40, %v21081_v16  ;;  %16401 = vrsqrt.f32 %v11704_v52  ;;  %v11666_v42 = vmul.f32 0.03125, %v11624_v32  ;;  %15240 = vmatprep.mubr.msk.bf16.mxu1 %vm234_vm0, %v11888_v4 }
 0xea3   :  { %16403 = vrsqrt.f32 %v11703_v14  ;;  %v11665_v20 = vmul.f32 0.03125, %v11621_v11  ;;  %v11822_v34 = vmul.f32 %v21162_v22, %v11778_v47 }
 0xea4   :  { %v16394_v19 = vpop.eup %16393  ;;  %v11889_v18 = vpack.c.bf16 %v21348_v54, %v21341_v59  ;;  %v11706_v24 = vadd.f32 1e-05, %v11666_v42  ;;  %v11821_v10 = vmul.f32 %v21162_v22, %v11777_v39 }
 0xea5   :  { %v16396_v30 = vpop.eup %16395  ;;  %v11780_v36 = vmul.f32 %v16394_v19, %v21092_v45  ;;  %v11705_v31 = vadd.f32 1e-05, %v11665_v20  ;;  %v21369_v47 = vadd.f32 %v21168_v49, %v11822_v34 }
 0xea6   :  { %v11627_v16 = vpop.xlane.xlu0 %11626  ;;  %v11779_v53 = vmul.f32 %v16396_v30, %v21078_v62  ;;  %16405 = vrsqrt.f32 %v11706_v24  ;;  %15241 = vmatmul.mubr.msk.bf16.gmra.mrb[128].mxu1 %vm234_vm0, %v11889_v18  ;;  %v21363_v44 = vadd.f32 %v21168_v49, %v11821_v10 }
 0xea7   :  { %v11667_v27 = vmul.f32 0.03125, %v11627_v16  ;;  %16407 = vrsqrt.f32 %v11705_v31  ;;  %v11824_v62 = vmul.f32 %v21162_v22, %v11780_v36 }
 0xea8   :  { %v16398_v6 = vpop.eup %16397  ;;  %v11823_v52 = vmul.f32 %v21162_v22, %v11779_v53  ;;  %v11890_v45 = vpack.c.bf16 %v21363_v44, %v21358_v5 }
 0xea9   :  { %v11707_v14 = vadd.f32 1e-05, %v11667_v27  ;;  %v16400_v40 = vpop.eup %16399  ;;  %v11782_v4 = vmul.f32 %v16398_v6, %v21089_v46  ;;  %v21382_v19 = vadd.f32 %v21168_v49, %v11824_v62 }
 0xeaa   :  { %v21373_v32 = vadd.f32 %v21168_v49, %v11823_v52  ;;  %v11781_v11 = vmul.f32 %v16400_v40, %v21106_v56  ;;  %15244 = vmatprep.mubr.msk.bf16.mxu1 %vm234_vm0, %v11890_v45 }
 0xeab   :  { %16409 = vrsqrt.f32 %v11707_v14  ;;  %v11826_v18 = vmul.f32 %v21162_v22, %v11782_v4 }
 0xeac   :  { %v16402_v13 = vpop.eup %16401  ;;  %v11891_v39 = vpack.c.bf16 %v21373_v32, %v21369_v47  ;;  %v11825_v42 = vmul.f32 %v21162_v22, %v11781_v11 }
 0xead   :  { %v16404_v20 = vpop.eup %16403  ;;  %v11784_v24 = vmul.f32 %v16402_v13, %v21119_v2  ;;  %v21396_v16 = vadd.f32 %v21168_v49, %v11826_v18  ;;  %v15670_v13 = vld [vmem:[%s22313_s6 + $0x38] sm:$0xff]  }
 0xeae   :  { %v11783_v46 = vmul.f32 %v16404_v20, %v21101_v0  ;;  %15245 = vmatmul.mubr.msk.bf16.gmra.mrb[132].mxu1 %vm234_vm0, %v11891_v39  ;;  %v21389_v56 = vadd.f32 %v21168_v49, %v11825_v42 }
 0xeaf   :  { %v11828_v53 = vmul.f32 %v21162_v22, %v11784_v24 }
 0xeb0   :  { %v16406_v10 = vpop.eup %16405  ;;  %v11827_v30 = vmul.f32 %v21162_v22, %v11783_v46  ;;  %v11892_v34 = vpack.c.bf16 %v21389_v56, %v21382_v19 }
 0xeb1   :  { %v16408_v36 = vpop.eup %16407  ;;  %v11786_v31 = vmul.f32 %v16406_v10, %v21116_v3  ;;  %v21411_v45 = vadd.f32 %v21168_v49, %v11828_v53 }
 0xeb2   :  { %v21399_v2 = vadd.f32 %v21168_v49, %v11827_v30  ;;  %v11785_v0 = vmul.f32 %v16408_v36, %v21129_v15  ;;  %15248 = vmatprep.mubr.msk.bf16.mxu1 %vm234_vm0, %v11892_v34 }
 0xeb3   :  { %v11830_v3 = vmul.f32 %v21162_v22, %v11786_v31 }
 0xeb4   :  { %v11893_v6 = vpack.c.bf16 %v21399_v2, %v21396_v16  ;;  %v11829_v52 = vmul.f32 %v21162_v22, %v11785_v0 }
 0xeb5   :  { %v16410_v27 = vpop.eup %16409  ;;  %v21420_v4 = vadd.f32 %v21168_v49, %v11830_v3 }
 0xeb6   :  { %v11787_v14 = vmul.f32 %v16410_v27, %v21126_v12  ;;  %15249 = vmatmul.mubr.msk.bf16.gmra.mrb[136].mxu1 %vm234_vm0, %v11893_v6  ;;  %v21414_v15 = vadd.f32 %v21168_v49, %v11829_v52 }
 0xeb8   :  { %v11831_v40 = vmul.f32 %v21162_v22, %v11787_v14  ;;  %v11894_v62 = vpack.c.bf16 %v21414_v15, %v21411_v45  ;;  %v15669_v22 = vld [vmem:[%s22313_s6 + $0x30] sm:$0xff]  }
 0xeb9   :  { %15268 = vmatprep.subr.bf16.mxu0 %v15669_v22 }
 0xeba   :  { %v21423_v11 = vadd.f32 %v21168_v49, %v11831_v40  ;;  %15252 = vmatprep.mubr.msk.bf16.mxu1 %vm234_vm0, %v11894_v62  ;;  %15269 = vmatpush3.bf16.msra.mxu0 %v15669_v22  ;;  %v21438_v49 = vld [vmem:[%s22312_s5] ss:$0 sm:$0xff] }
 0xebb   :  { %15270 = vmatprep.subr.bf16.mxu0 %v15670_v13 }
 0xebc   :  { %v11895_v12 = vpack.c.bf16 %v21423_v11, %v21420_v4 }
 0xebe   :  { %15253 = vmatmul.mubr.msk.bf16.gmra.mrb[140].mxu1 %vm234_vm0, %v11895_v12  ;;  %15271 = vmatpush3.bf16.msra.mxu0 %v15670_v13 }
 0xf45   :  { %v15218_v39 = vpop.f32.mrb[104].mxu1 }
 0xf46   :  { %v12022_v42 = vadd.f32 %v15218_v39, %v21438_v49  ;;  %v12013_v20 = vpop.f32.mrb[105].mxu1 }
 0xf47   :  { %v12014_v18 = vadd.f32 %v21438_v49, %v12013_v20  ;;  %v15219_v24 = vpop.f32.mrb[106].mxu1 }
 0xf48   :  { %v12025_v46 = vadd.f32 %v15219_v24, %v21438_v49  ;;  %v12016_v10 = vpop.f32.mrb[107].mxu1  ;;  %v12174_v34 = vmax.f32 %v12022_v42, 0.0 }
 0xf49   :  { %v12017_v30 = vadd.f32 %v21438_v49, %v12016_v10  ;;  %v12172_v31 = vmax.f32 %v12014_v18, 0.0 }
 0xf4a   :  { %v12175_v36 = vmax.f32 %v12025_v46, 0.0 }
 0xf4b   :  { %v12173_v0 = vmax.f32 %v12017_v30, 0.0 }
 0xf4c   :  { %v12213_v53 = vpack.c.bf16 %v12175_v36, %v12174_v34 }
 0xf4d   :  { %v12212_v27 = vpack.c.bf16 %v12173_v0, %v12172_v31 }
 0xf4f   :  { %15272 = vmatprep.mubr.bf16.mxu0 %v12212_v27 }
 0xf50   :  { %15273 = vmatmul.mubr.bf16.vlgmr.msra.gmra.mrb[104].mxu0 %v12213_v53 }
 0xf51   :  { %v15222_v6 = vpop.f32.mrb[108].mxu1 }
 0xf52   :  { %v12038_v52 = vadd.f32 %v15222_v6, %v21438_v49  ;;  %v12029_v3 = vpop.f32.mrb[109].mxu1 }
 0xf53   :  { %v12030_v14 = vadd.f32 %v21438_v49, %v12029_v3  ;;  %v15223_v40 = vpop.f32.mrb[110].mxu1 }
 0xf54   :  { %v12041_v62 = vadd.f32 %v15223_v40, %v21438_v49  ;;  %v12032_v12 = vpop.f32.mrb[111].mxu1  ;;  %v12178_v13 = vmax.f32 %v12038_v52, 0.0 }
 0xf55   :  { %v12033_v22 = vadd.f32 %v21438_v49, %v12032_v12  ;;  %v12176_v42 = vmax.f32 %v12030_v14, 0.0 }
 0xf56   :  { %v12179_v39 = vmax.f32 %v12041_v62, 0.0 }
 0xf57   :  { %v12177_v20 = vmax.f32 %v12033_v22, 0.0 }
 0xf58   :  { %v12215_v18 = vpack.c.bf16 %v12179_v39, %v12178_v13 }
 0xf59   :  { %v12214_v24 = vpack.c.bf16 %v12177_v20, %v12176_v42  ;;  %v15226_v46 = vpop.f32.mrb[112].mxu1 }
 0xf5a   :  { %v12054_v10 = vadd.f32 %v15226_v46, %v21438_v49  ;;  %v12045_v30 = vpop.f32.mrb[113].mxu1 }
 0xf5b   :  { %v12046_v34 = vadd.f32 %v21438_v49, %v12045_v30  ;;  %v15227_v36 = vpop.f32.mrb[114].mxu1  ;;  %15276 = vmatprep.mubr.bf16.mxu0 %v12214_v24 }
 0xf5c   :  { %v12057_v31 = vadd.f32 %v15227_v36, %v21438_v49  ;;  %v12048_v0 = vpop.f32.mrb[115].mxu1  ;;  %15277 = vmatmul.mubr.bf16.gmra.mrb[108].mxu0 %v12215_v18  ;;  %v12182_v27 = vmax.f32 %v12054_v10, 0.0 }
 0xf5d   :  { %v12049_v53 = vadd.f32 %v21438_v49, %v12048_v0  ;;  %v12180_v52 = vmax.f32 %v12046_v34, 0.0 }
 0xf5e   :  { %v12183_v6 = vmax.f32 %v12057_v31, 0.0 }
 0xf5f   :  { %v12181_v3 = vmax.f32 %v12049_v53, 0.0 }
 0xf60   :  { %v12217_v14 = vpack.c.bf16 %v12183_v6, %v12182_v27 }
 0xf61   :  { %v12216_v40 = vpack.c.bf16 %v12181_v3, %v12180_v52  ;;  %v15230_v62 = vpop.f32.mrb[116].mxu1 }
 0xf62   :  { %v12070_v12 = vadd.f32 %v15230_v62, %v21438_v49  ;;  %v12061_v22 = vpop.f32.mrb[117].mxu1 }
 0xf63   :  { %v12062_v13 = vadd.f32 %v21438_v49, %v12061_v22  ;;  %v15231_v39 = vpop.f32.mrb[118].mxu1  ;;  %15280 = vmatprep.mubr.bf16.mxu0 %v12216_v40 }
 0xf64   :  { %v12073_v42 = vadd.f32 %v15231_v39, %v21438_v49  ;;  %v12064_v20 = vpop.f32.mrb[119].mxu1  ;;  %15281 = vmatmul.mubr.bf16.gmra.mrb[112].mxu0 %v12217_v14  ;;  %v12186_v24 = vmax.f32 %v12070_v12, 0.0 }
 0xf65   :  { %v12065_v18 = vadd.f32 %v21438_v49, %v12064_v20  ;;  %v12184_v10 = vmax.f32 %v12062_v13, 0.0 }
 0xf66   :  { %v12187_v46 = vmax.f32 %v12073_v42, 0.0 }
 0xf67   :  { %v12185_v30 = vmax.f32 %v12065_v18, 0.0 }
 0xf68   :  { %v12219_v34 = vpack.c.bf16 %v12187_v46, %v12186_v24 }
 0xf69   :  { %v12218_v36 = vpack.c.bf16 %v12185_v30, %v12184_v10  ;;  %v15234_v31 = vpop.f32.mrb[120].mxu1 }
 0xf6a   :  { %v12086_v0 = vadd.f32 %v15234_v31, %v21438_v49  ;;  %v12077_v53 = vpop.f32.mrb[121].mxu1 }
 0xf6b   :  { %v12078_v27 = vadd.f32 %v21438_v49, %v12077_v53  ;;  %v15235_v6 = vpop.f32.mrb[122].mxu1  ;;  %15284 = vmatprep.mubr.bf16.mxu0 %v12218_v36 }
 0xf6c   :  { %v12089_v52 = vadd.f32 %v15235_v6, %v21438_v49  ;;  %v12080_v3 = vpop.f32.mrb[123].mxu1  ;;  %15285 = vmatmul.mubr.bf16.gmra.mrb[116].mxu0 %v12219_v34  ;;  %v12190_v40 = vmax.f32 %v12086_v0, 0.0 }
 0xf6d   :  { %v12081_v14 = vadd.f32 %v21438_v49, %v12080_v3  ;;  %v12188_v12 = vmax.f32 %v12078_v27, 0.0 }
 0xf6e   :  { %v12191_v62 = vmax.f32 %v12089_v52, 0.0 }
 0xf6f   :  { %v12189_v22 = vmax.f32 %v12081_v14, 0.0 }
 0xf70   :  { %v12221_v13 = vpack.c.bf16 %v12191_v62, %v12190_v40 }
 0xf71   :  { %v12220_v39 = vpack.c.bf16 %v12189_v22, %v12188_v12  ;;  %v15238_v42 = vpop.f32.mrb[124].mxu1 }
 0xf72   :  { %v12102_v20 = vadd.f32 %v15238_v42, %v21438_v49  ;;  %v12093_v18 = vpop.f32.mrb[125].mxu1 }
 0xf73   :  { %v12094_v24 = vadd.f32 %v21438_v49, %v12093_v18  ;;  %v15239_v46 = vpop.f32.mrb[126].mxu1  ;;  %15288 = vmatprep.mubr.bf16.mxu0 %v12220_v39 }
 0xf74   :  { %v12105_v10 = vadd.f32 %v15239_v46, %v21438_v49  ;;  %v12096_v30 = vpop.f32.mrb[127].mxu1  ;;  %15289 = vmatmul.mubr.bf16.gmra.mrb[120].mxu0 %v12221_v13  ;;  %v12194_v36 = vmax.f32 %v12102_v20, 0.0 }
 0xf75   :  { %v12097_v34 = vadd.f32 %v21438_v49, %v12096_v30  ;;  %v12192_v0 = vmax.f32 %v12094_v24, 0.0 }
 0xf76   :  { %v12195_v31 = vmax.f32 %v12105_v10, 0.0 }
 0xf77   :  { %v12193_v53 = vmax.f32 %v12097_v34, 0.0 }
 0xf78   :  { %v12223_v27 = vpack.c.bf16 %v12195_v31, %v12194_v36 }
 0xf79   :  { %v12222_v6 = vpack.c.bf16 %v12193_v53, %v12192_v0  ;;  %v15242_v52 = vpop.f32.mrb[128].mxu1 }
 0xf7a   :  { %v12118_v3 = vadd.f32 %v15242_v52, %v21438_v49  ;;  %v12109_v14 = vpop.f32.mrb[129].mxu1 }
 0xf7b   :  { %v12110_v40 = vadd.f32 %v21438_v49, %v12109_v14  ;;  %v15243_v62 = vpop.f32.mrb[130].mxu1  ;;  %15292 = vmatprep.mubr.bf16.mxu0 %v12222_v6 }
 0xf7c   :  { %v12121_v12 = vadd.f32 %v15243_v62, %v21438_v49  ;;  %v12112_v22 = vpop.f32.mrb[131].mxu1  ;;  %15293 = vmatmul.mubr.bf16.gmra.mrb[124].mxu0 %v12223_v27  ;;  %v12198_v39 = vmax.f32 %v12118_v3, 0.0 }
 0xf7d   :  { %v12113_v13 = vadd.f32 %v21438_v49, %v12112_v22  ;;  %v12196_v20 = vmax.f32 %v12110_v40, 0.0 }
 0xf7e   :  { %v12199_v42 = vmax.f32 %v12121_v12, 0.0 }
 0xf7f   :  { %v12197_v18 = vmax.f32 %v12113_v13, 0.0 }
 0xf80   :  { %v12225_v24 = vpack.c.bf16 %v12199_v42, %v12198_v39 }
 0xf81   :  { %v12224_v46 = vpack.c.bf16 %v12197_v18, %v12196_v20  ;;  %v15246_v10 = vpop.f32.mrb[132].mxu1 }
 0xf82   :  { %v12134_v30 = vadd.f32 %v15246_v10, %v21438_v49  ;;  %v12125_v34 = vpop.f32.mrb[133].mxu1 }
 0xf83   :  { %v12126_v36 = vadd.f32 %v21438_v49, %v12125_v34  ;;  %v15247_v31 = vpop.f32.mrb[134].mxu1  ;;  %15296 = vmatprep.mubr.bf16.mxu0 %v12224_v46 }
 0xf84   :  { %v12137_v0 = vadd.f32 %v15247_v31, %v21438_v49  ;;  %v12128_v53 = vpop.f32.mrb[135].mxu1  ;;  %15297 = vmatmul.mubr.bf16.gmra.mrb[128].mxu0 %v12225_v24  ;;  %v12202_v6 = vmax.f32 %v12134_v30, 0.0 }
 0xf85   :  { %v12129_v27 = vadd.f32 %v21438_v49, %v12128_v53  ;;  %v12200_v3 = vmax.f32 %v12126_v36, 0.0 }
 0xf86   :  { %v12203_v52 = vmax.f32 %v12137_v0, 0.0 }
 0xf87   :  { %v12201_v14 = vmax.f32 %v12129_v27, 0.0 }
 0xf88   :  { %v12227_v40 = vpack.c.bf16 %v12203_v52, %v12202_v6 }
 0xf89   :  { %v12226_v62 = vpack.c.bf16 %v12201_v14, %v12200_v3  ;;  %v15250_v12 = vpop.f32.mrb[136].mxu1 }
 0xf8a   :  { %v12150_v22 = vadd.f32 %v15250_v12, %v21438_v49  ;;  %v12141_v13 = vpop.f32.mrb[137].mxu1 }
 0xf8b   :  { %v12142_v39 = vadd.f32 %v21438_v49, %v12141_v13  ;;  %v15251_v42 = vpop.f32.mrb[138].mxu1  ;;  %15300 = vmatprep.mubr.bf16.mxu0 %v12226_v62 }
 0xf8c   :  { %v12153_v20 = vadd.f32 %v15251_v42, %v21438_v49  ;;  %v12144_v18 = vpop.f32.mrb[139].mxu1  ;;  %15301 = vmatmul.mubr.bf16.gmra.mrb[132].mxu0 %v12227_v40  ;;  %v12206_v46 = vmax.f32 %v12150_v22, 0.0 }
 0xf8d   :  { %v12145_v24 = vadd.f32 %v21438_v49, %v12144_v18  ;;  %v12204_v30 = vmax.f32 %v12142_v39, 0.0 }
 0xf8e   :  { %v12207_v10 = vmax.f32 %v12153_v20, 0.0  ;;  %v21483_v20 = vld [vmem:[%s22314_s7 + $0x3] ss:$0 sm:$0xff] }
 0xf8f   :  { %v12205_v34 = vmax.f32 %v12145_v24, 0.0 }
 0xf90   :  { %v12229_v36 = vpack.c.bf16 %v12207_v10, %v12206_v46 }
 0xf91   :  { %v12228_v31 = vpack.c.bf16 %v12205_v34, %v12204_v30  ;;  %v15254_v0 = vpop.f32.mrb[140].mxu1 }
 0xf92   :  { %v12166_v53 = vadd.f32 %v15254_v0, %v21438_v49  ;;  %v12157_v27 = vpop.f32.mrb[141].mxu1 }
 0xf93   :  { %v12158_v6 = vadd.f32 %v21438_v49, %v12157_v27  ;;  %v15255_v52 = vpop.f32.mrb[142].mxu1  ;;  %15304 = vmatprep.mubr.bf16.mxu0 %v12228_v31 }
 0xf94   :  { %v12169_v3 = vadd.f32 %v15255_v52, %v21438_v49  ;;  %v12160_v14 = vpop.f32.mrb[143].mxu1  ;;  %15305 = vmatmul.mubr.bf16.gmra.mrb[136].mxu0 %v12229_v36  ;;  %v12210_v62 = vmax.f32 %v12166_v53, 0.0 }
 0xf95   :  { %v12161_v40 = vadd.f32 %v21438_v49, %v12160_v14  ;;  %v12208_v22 = vmax.f32 %v12158_v6, 0.0 }
 0xf96   :  { %v12211_v12 = vmax.f32 %v12169_v3, 0.0 }
 0xf97   :  { %v12209_v13 = vmax.f32 %v12161_v40, 0.0 }
 0xf98   :  { %v12231_v39 = vpack.c.bf16 %v12211_v12, %v12210_v62 }
 0xf99   :  { %v12230_v42 = vpack.c.bf16 %v12209_v13, %v12208_v22 }
 0xf9b   :  { %15308 = vmatprep.mubr.bf16.mxu0 %v12230_v42 }
 0xf9c   :  { %15309 = vmatmul.mubr.bf16.gmra.mrb[140].mxu0 %v12231_v39 }
0x1023   :  { %v15274_v18 = vpop.f32.mrb[104].mxu0 }
0x1024   :  { %v12344_v24 = vadd.f32 %v15274_v18, %v21483_v20  ;;  %v12335_v46 = vpop.f32.mrb[105].mxu0 }
0x1025   :  { %v12336_v10 = vadd.f32 %v21483_v20, %v12335_v46  ;;  %v15275_v49 = vpop.f32.mrb[106].mxu0 }
0x1026   :  { %v21488_v30 = vadd.f32 %v12344_v24, %v21186_v9  ;;  %v12347_v34 = vadd.f32 %v15275_v49, %v21483_v20  ;;  %v12338_v36 = vpop.f32.mrb[107].mxu0 }
0x1027   :  { %v12339_v31 = vadd.f32 %v21483_v20, %v12338_v36  ;;  %v21493_v0 = vadd.f32 %v12336_v10, %v21178_v8 }
0x1028   :  { %v21496_v53 = vadd.f32 %v12347_v34, %v21190_v7  ;;  %v12542_v27 = vsel %vm234_vm0, %v21488_v30, 0.0 }
0x1029   :  { %12543 = vadd.xlane.f32.xlu1 %v12542_v27  ;;  %v21501_v6 = vadd.f32 %v12339_v31, %v21174_v17  ;;  %v12536_v52 = vsel %vm234_vm0, %v21493_v0, 0.0 }
0x102a   :  { %v12545_v9 = vsel %vm234_vm0, %v21496_v53, 0.0 }
0x102b   :  { %12546 = vadd.xlane.f32.xlu0 %v12545_v9  ;;  %v12539_v8 = vsel %vm234_vm0, %v21501_v6, 0.0 }
0x102d   :  { %12537 = vadd.xlane.f32.xlu1 %v12536_v52 }
0x102f   :  { %12540 = vadd.xlane.f32.xlu0 %v12539_v8  ;;  %v15278_v7 = vpop.f32.mrb[108].mxu0 }
0x1030   :  { %v12360_v3 = vadd.f32 %v15278_v7, %v21483_v20  ;;  %v12351_v14 = vpop.f32.mrb[109].mxu0 }
0x1031   :  { %v12352_v40 = vadd.f32 %v21483_v20, %v12351_v14  ;;  %v15279_v17 = vpop.f32.mrb[110].mxu0 }
0x1032   :  { %v21512_v62 = vadd.f32 %v12360_v3, %v21211_v60  ;;  %v12363_v12 = vadd.f32 %v15279_v17, %v21483_v20  ;;  %v12354_v22 = vpop.f32.mrb[111].mxu0 }
0x1033   :  { %v12355_v13 = vadd.f32 %v21483_v20, %v12354_v22  ;;  %v21517_v39 = vadd.f32 %v12352_v40, %v21203_v61 }
0x1034   :  { %v21520_v42 = vadd.f32 %v12363_v12, %v21217_v58  ;;  %v12554_v18 = vsel %vm234_vm0, %v21512_v62, 0.0 }
0x1035   :  { %12555 = vadd.xlane.f32.xlu1 %v12554_v18  ;;  %v21525_v24 = vadd.f32 %v12355_v13, %v21206_v1  ;;  %v12548_v61 = vsel %vm234_vm0, %v21517_v39, 0.0 }
0x1036   :  { %v12557_v60 = vsel %vm234_vm0, %v21520_v42, 0.0 }
0x1037   :  { %12558 = vadd.xlane.f32.xlu0 %v12557_v60  ;;  %v15282_v46 = vpop.f32.mrb[112].mxu0  ;;  %v12551_v27 = vsel %vm234_vm0, %v21525_v24, 0.0 }
0x1038   :  { %v12376_v10 = vadd.f32 %v15282_v46, %v21483_v20  ;;  %v12367_v49 = vpop.f32.mrb[113].mxu0 }
0x1039   :  { %v12368_v58 = vadd.f32 %v21483_v20, %v12367_v49  ;;  %12549 = vadd.xlane.f32.xlu1 %v12548_v61  ;;  %v15283_v34 = vpop.f32.mrb[114].mxu0 }
0x103a   :  { %v21534_v36 = vadd.f32 %v12376_v10, %v21237_v50  ;;  %v12379_v1 = vadd.f32 %v15283_v34, %v21483_v20  ;;  %v12370_v31 = vpop.f32.mrb[115].mxu0 }
0x103b   :  { %v12371_v9 = vadd.f32 %v21483_v20, %v12370_v31  ;;  %12552 = vadd.xlane.f32.xlu0 %v12551_v27  ;;  %v21541_v52 = vadd.f32 %v12368_v58, %v21229_v38 }
0x103c   :  { %v21544_v8 = vadd.f32 %v12379_v1, %v21243_v35  ;;  %v12566_v7 = vsel %vm234_vm0, %v21534_v36, 0.0 }
0x103d   :  { %12567 = vadd.xlane.f32.xlu1 %v12566_v7  ;;  %v21549_v50 = vadd.f32 %v12371_v9, %v21232_v26  ;;  %v12560_v38 = vsel %vm234_vm0, %v21541_v52, 0.0 }
0x103e   :  { %v12569_v3 = vsel %vm234_vm0, %v21544_v8, 0.0 }
0x103f   :  { %12570 = vadd.xlane.f32.xlu0 %v12569_v3  ;;  %v15286_v14 = vpop.f32.mrb[116].mxu0  ;;  %v12563_v18 = vsel %vm234_vm0, %v21549_v50, 0.0 }
0x1040   :  { %v12392_v40 = vadd.f32 %v15286_v14, %v21483_v20  ;;  %v12383_v17 = vpop.f32.mrb[117].mxu0 }
0x1041   :  { %v12384_v35 = vadd.f32 %v21483_v20, %v12383_v17  ;;  %12561 = vadd.xlane.f32.xlu1 %v12560_v38  ;;  %v15287_v12 = vpop.f32.mrb[118].mxu0 }
0x1042   :  { %v21558_v22 = vadd.f32 %v12392_v40, %v21263_v51  ;;  %v12395_v26 = vadd.f32 %v15287_v12, %v21483_v20  ;;  %v12386_v13 = vpop.f32.mrb[119].mxu0 }
0x1043   :  { %v12387_v60 = vadd.f32 %v21483_v20, %v12386_v13  ;;  %12564 = vadd.xlane.f32.xlu0 %v12563_v18  ;;  %v21565_v46 = vadd.f32 %v12384_v35, %v21255_v33 }
0x1044   :  { %v21568_v10 = vadd.f32 %v12395_v26, %v21269_v23  ;;  %v12578_v49 = vsel %vm234_vm0, %v21558_v22, 0.0 }
0x1045   :  { %12579 = vadd.xlane.f32.xlu1 %v12578_v49  ;;  %v21573_v51 = vadd.f32 %v12387_v60, %v21258_v43  ;;  %v12572_v33 = vsel %vm234_vm0, %v21565_v46, 0.0 }
0x1046   :  { %v12581_v61 = vsel %vm234_vm0, %v21568_v10, 0.0 }
0x1047   :  { %12582 = vadd.xlane.f32.xlu0 %v12581_v61  ;;  %v15290_v58 = vpop.f32.mrb[120].mxu0  ;;  %v12575_v7 = vsel %vm234_vm0, %v21573_v51, 0.0 }
0x1048   :  { %v12408_v34 = vadd.f32 %v15290_v58, %v21483_v20  ;;  %v12399_v1 = vpop.f32.mrb[121].mxu0 }
0x1049   :  { %v12400_v23 = vadd.f32 %v21483_v20, %v12399_v1  ;;  %12573 = vadd.xlane.f32.xlu1 %v12572_v33  ;;  %v15291_v31 = vpop.f32.mrb[122].mxu0 }
0x104a   :  { %v21582_v27 = vadd.f32 %v12408_v34, %v21289_v63  ;;  %v12411_v43 = vadd.f32 %v15291_v31, %v21483_v20  ;;  %v12402_v9 = vpop.f32.mrb[123].mxu0 }
0x104b   :  { %v12403_v3 = vadd.f32 %v21483_v20, %v12402_v9  ;;  %12576 = vadd.xlane.f32.xlu0 %v12575_v7  ;;  %v21589_v14 = vadd.f32 %v12400_v23, %v21281_v29 }
0x104c   :  { %v21592_v40 = vadd.f32 %v12411_v43, %v21295_v41  ;;  %v12590_v17 = vsel %vm234_vm0, %v21582_v27, 0.0 }
0x104d   :  { %12591 = vadd.xlane.f32.xlu1 %v12590_v17  ;;  %v21597_v63 = vadd.f32 %v12403_v3, %v21284_v48  ;;  %v12584_v29 = vsel %vm234_vm0, %v21589_v14, 0.0 }
0x104e   :  { %v12593_v38 = vsel %vm234_vm0, %v21592_v40, 0.0 }
0x104f   :  { %12594 = vadd.xlane.f32.xlu0 %v12593_v38  ;;  %v15294_v35 = vpop.f32.mrb[124].mxu0  ;;  %v12587_v49 = vsel %vm234_vm0, %v21597_v63, 0.0 }
0x1050   :  { %v12424_v12 = vadd.f32 %v15294_v35, %v21483_v20  ;;  %v12415_v26 = vpop.f32.mrb[125].mxu0 }
0x1051   :  { %v12416_v41 = vadd.f32 %v21483_v20, %v12415_v26  ;;  %12585 = vadd.xlane.f32.xlu1 %v12584_v29  ;;  %v15295_v13 = vpop.f32.mrb[126].mxu0 }
0x1052   :  { %v21606_v18 = vadd.f32 %v12424_v12, %v21315_v28  ;;  %v12427_v48 = vadd.f32 %v15295_v13, %v21483_v20  ;;  %v12418_v60 = vpop.f32.mrb[127].mxu0 }
0x1053   :  { %v12419_v61 = vadd.f32 %v21483_v20, %v12418_v60  ;;  %12588 = vadd.xlane.f32.xlu0 %v12587_v49  ;;  %v21613_v58 = vadd.f32 %v12416_v41, %v21307_v57 }
0x1054   :  { %v21616_v34 = vadd.f32 %v12427_v48, %v21321_v55  ;;  %v12602_v1 = vsel %vm234_vm0, %v21606_v18, 0.0 }
0x1055   :  { %12603 = vadd.xlane.f32.xlu1 %v12602_v1  ;;  %v21621_v28 = vadd.f32 %v12419_v61, %v21310_v21  ;;  %v12596_v57 = vsel %vm234_vm0, %v21613_v58, 0.0 }
0x1056   :  { %v12605_v33 = vsel %vm234_vm0, %v21616_v34, 0.0 }
0x1057   :  { %12606 = vadd.xlane.f32.xlu0 %v12605_v33  ;;  %v15298_v23 = vpop.f32.mrb[128].mxu0  ;;  %v12599_v17 = vsel %vm234_vm0, %v21621_v28, 0.0 }
0x1058   :  { %v12440_v31 = vadd.f32 %v15298_v23, %v21483_v20  ;;  %v12431_v43 = vpop.f32.mrb[129].mxu0 }
0x1059   :  { %v12432_v55 = vadd.f32 %v21483_v20, %v12431_v43  ;;  %12597 = vadd.xlane.f32.xlu1 %v12596_v57  ;;  %v15299_v9 = vpop.f32.mrb[130].mxu0 }
0x105a   :  { %v21630_v7 = vadd.f32 %v12440_v31, %v21341_v59  ;;  %v12443_v21 = vadd.f32 %v15299_v9, %v21483_v20  ;;  %v12434_v3 = vpop.f32.mrb[131].mxu0 }
0x105b   :  { %v12435_v38 = vadd.f32 %v21483_v20, %v12434_v3  ;;  %12600 = vadd.xlane.f32.xlu0 %v12599_v17  ;;  %v21637_v35 = vadd.f32 %v12432_v55, %v21334_v37 }
0x105c   :  { %v21640_v12 = vadd.f32 %v12443_v21, %v21348_v54  ;;  %v12614_v26 = vsel %vm234_vm0, %v21630_v7, 0.0 }
0x105d   :  { %12615 = vadd.xlane.f32.xlu1 %v12614_v26  ;;  %v21645_v59 = vadd.f32 %v12435_v38, %v21337_v25  ;;  %v12608_v37 = vsel %vm234_vm0, %v21637_v35, 0.0 }
0x105e   :  { %v12617_v29 = vsel %vm234_vm0, %v21640_v12, 0.0 }
0x105f   :  { %12618 = vadd.xlane.f32.xlu0 %v12617_v29  ;;  %v15302_v41 = vpop.f32.mrb[132].mxu0  ;;  %v12611_v1 = vsel %vm234_vm0, %v21645_v59, 0.0 }
0x1060   :  { %v12456_v13 = vadd.f32 %v15302_v41, %v21483_v20  ;;  %v12447_v48 = vpop.f32.mrb[133].mxu0 }
0x1061   :  { %v12448_v54 = vadd.f32 %v21483_v20, %v12447_v48  ;;  %12609 = vadd.xlane.f32.xlu1 %v12608_v37  ;;  %v15303_v60 = vpop.f32.mrb[134].mxu0 }
0x1062   :  { %v21654_v49 = vadd.f32 %v12456_v13, %v21369_v47  ;;  %v12459_v25 = vadd.f32 %v15303_v60, %v21483_v20  ;;  %v12450_v61 = vpop.f32.mrb[135].mxu0 }
0x1063   :  { %v12451_v33 = vadd.f32 %v21483_v20, %v12450_v61  ;;  %12612 = vadd.xlane.f32.xlu0 %v12611_v1  ;;  %v21661_v23 = vadd.f32 %v12448_v54, %v21358_v5 }
0x1064   :  { %v21664_v31 = vadd.f32 %v12459_v25, %v21373_v32  ;;  %v12626_v43 = vsel %vm234_vm0, %v21654_v49, 0.0 }
0x1065   :  { %12627 = vadd.xlane.f32.xlu1 %v12626_v43  ;;  %v21669_v47 = vadd.f32 %v12451_v33, %v21363_v44  ;;  %v12620_v5 = vsel %vm234_vm0, %v21661_v23, 0.0 }
0x1066   :  { %v12629_v57 = vsel %vm234_vm0, %v21664_v31, 0.0 }
0x1067   :  { %12630 = vadd.xlane.f32.xlu0 %v12629_v57  ;;  %v15306_v55 = vpop.f32.mrb[136].mxu0  ;;  %v12623_v26 = vsel %vm234_vm0, %v21669_v47, 0.0 }
0x1068   :  { %v12472_v9 = vadd.f32 %v15306_v55, %v21483_v20  ;;  %v12463_v21 = vpop.f32.mrb[137].mxu0 }
0x1069   :  { %v12464_v32 = vadd.f32 %v21483_v20, %v12463_v21  ;;  %12621 = vadd.xlane.f32.xlu1 %v12620_v5  ;;  %v15307_v3 = vpop.f32.mrb[138].mxu0 }
0x106a   :  { %v21678_v17 = vadd.f32 %v12472_v9, %v21396_v16  ;;  %v12475_v44 = vadd.f32 %v15307_v3, %v21483_v20  ;;  %v12466_v38 = vpop.f32.mrb[139].mxu0 }
0x106b   :  { %v12467_v29 = vadd.f32 %v21483_v20, %v12466_v38  ;;  %12624 = vadd.xlane.f32.xlu0 %v12623_v26  ;;  %v21685_v41 = vadd.f32 %v12464_v32, %v21382_v19 }
0x106c   :  { %v21688_v13 = vadd.f32 %v12475_v44, %v21399_v2  ;;  %v12638_v48 = vsel %vm234_vm0, %v21678_v17, 0.0 }
0x106d   :  { %12639 = vadd.xlane.f32.xlu1 %v12638_v48  ;;  %v21693_v16 = vadd.f32 %v12467_v29, %v21389_v56  ;;  %v12632_v19 = vsel %vm234_vm0, %v21685_v41, 0.0 }
0x106e   :  { %v12641_v37 = vsel %vm234_vm0, %v21688_v13, 0.0 }
0x106f   :  { %12642 = vadd.xlane.f32.xlu0 %v12641_v37  ;;  %v15310_v54 = vpop.f32.mrb[140].mxu0  ;;  %v12635_v43 = vsel %vm234_vm0, %v21693_v16, 0.0 }
0x1070   :  { %v12488_v60 = vadd.f32 %v15310_v54, %v21483_v20  ;;  %v12479_v25 = vpop.f32.mrb[141].mxu0 }
0x1071   :  { %v12480_v2 = vadd.f32 %v21483_v20, %v12479_v25  ;;  %12633 = vadd.xlane.f32.xlu1 %v12632_v19  ;;  %v15311_v61 = vpop.f32.mrb[142].mxu0 }
0x1072   :  { %v21702_v1 = vadd.f32 %v12488_v60, %v21420_v4  ;;  %v12491_v56 = vadd.f32 %v15311_v61, %v21483_v20  ;;  %v12482_v33 = vpop.f32.mrb[143].mxu0 }
0x1073   :  { %v12483_v57 = vadd.f32 %v21483_v20, %v12482_v33  ;;  %12636 = vadd.xlane.f32.xlu0 %v12635_v43  ;;  %v21709_v55 = vadd.f32 %v12480_v2, %v21411_v45 }
0x1074   :  { %v21712_v9 = vadd.f32 %v12491_v56, %v21423_v11  ;;  %v12650_v21 = vsel %vm234_vm0, %v21702_v1, 0.0 }
0x1075   :  { %12651 = vadd.xlane.f32.xlu1 %v12650_v21  ;;  %v21717_v4 = vadd.f32 %v12483_v57, %v21414_v15  ;;  %v12644_v20 = vsel %vm234_vm0, %v21709_v55, 0.0 }
0x1076   :  { %v12653_v5 = vsel %vm234_vm0, %v21712_v9, 0.0 }
0x1077   :  { %12654 = vadd.xlane.f32.xlu0 %v12653_v5  ;;  %v12647_v45 = vsel %vm234_vm0, %v21717_v4, 0.0 }
0x1079   :  { %12645 = vadd.xlane.f32.xlu1 %v12644_v20 }
0x107b   :  { %12648 = vadd.xlane.f32.xlu0 %v12647_v45 }
0x10b6   :  { %v12544_v11 = vpop.xlane.xlu1 %12543 }
0x10b7   :  { %v12658_v32 = vmul.f32 0.03125, %v12544_v11 }
0x10b8   :  { %v12547_v3 = vpop.xlane.xlu0 %12546 }
0x10b9   :  { %v21726_v44 = vsub.f32 %v21488_v30, %v12658_v32  ;;  %v12659_v15 = vmul.f32 0.03125, %v12547_v3 }
0x10ba   :  { %v12538_v38 = vpop.xlane.xlu1 %12537 }
0x10bb   :  { %v21729_v26 = vsub.f32 %v21496_v53, %v12659_v15  ;;  %v12656_v29 = vmul.f32 0.03125, %v12538_v38  ;;  %v12738_v48 = vmul.f32 %v21726_v44, %v21726_v44 }
0x10bc   :  { %v12541_v37 = vpop.xlane.xlu0 %12540 }
0x10bd   :  { %v21734_v54 = vsub.f32 %v21493_v0, %v12656_v29  ;;  %v12657_v60 = vmul.f32 0.03125, %v12541_v37  ;;  %v12782_v25 = vsel %vm234_vm0, %v12738_v48, 0.0  ;;  %v12739_v30 = vmul.f32 %v21729_v26, %v21729_v26 }
0x10be   :  { %12783 = vadd.xlane.f32.xlu1 %v12782_v25 }
0x10bf   :  { %v21740_v19 = vsub.f32 %v21501_v6, %v12657_v60  ;;  %v12785_v53 = vsel %vm234_vm0, %v12739_v30, 0.0  ;;  %v12736_v2 = vmul.f32 %v21734_v54, %v21734_v54 }
0x10c0   :  { %12786 = vadd.xlane.f32.xlu0 %v12785_v53 }
0x10c1   :  { %v12776_v61 = vsel %vm234_vm0, %v12736_v2, 0.0  ;;  %v12737_v0 = vmul.f32 %v21740_v19, %v21740_v19 }
0x10c2   :  { %v12556_v56 = vpop.xlane.xlu1 %12555  ;;  %12777 = vadd.xlane.f32.xlu1 %v12776_v61 }
0x10c3   :  { %v12662_v33 = vmul.f32 0.03125, %v12556_v56  ;;  %v12779_v43 = vsel %vm234_vm0, %v12737_v0, 0.0 }
0x10c4   :  { %12780 = vadd.xlane.f32.xlu0 %v12779_v43  ;;  %v12559_v57 = vpop.xlane.xlu0 %12558 }
0x10c5   :  { %v21750_v6 = vsub.f32 %v21512_v62, %v12662_v33  ;;  %v12663_v21 = vmul.f32 0.03125, %v12559_v57 }
0x10c6   :  { %v12550_v5 = vpop.xlane.xlu1 %12549 }
0x10c7   :  { %v21753_v20 = vsub.f32 %v21520_v42, %v12663_v21  ;;  %v12660_v45 = vmul.f32 0.03125, %v12550_v5  ;;  %v12742_v11 = vmul.f32 %v21750_v6, %v21750_v6 }
0x10c8   :  { %v12553_v32 = vpop.xlane.xlu0 %12552 }
0x10c9   :  { %v21758_v3 = vsub.f32 %v21517_v39, %v12660_v45  ;;  %v12661_v15 = vmul.f32 0.03125, %v12553_v32  ;;  %v12794_v38 = vsel %vm234_vm0, %v12742_v11, 0.0  ;;  %v12743_v62 = vmul.f32 %v21753_v20, %v21753_v20 }
0x10ca   :  { %v12568_v29 = vpop.xlane.xlu1 %12567  ;;  %12795 = vadd.xlane.f32.xlu1 %v12794_v38 }
0x10cb   :  { %v21764_v48 = vsub.f32 %v21525_v24, %v12661_v15  ;;  %v12666_v42 = vmul.f32 0.03125, %v12568_v29  ;;  %v12797_v37 = vsel %vm234_vm0, %v12743_v62, 0.0  ;;  %v12740_v60 = vmul.f32 %v21758_v3, %v21758_v3 }
0x10cc   :  { %12798 = vadd.xlane.f32.xlu0 %v12797_v37  ;;  %v12571_v39 = vpop.xlane.xlu0 %12570 }
0x10cd   :  { %v21770_v25 = vsub.f32 %v21534_v36, %v12666_v42  ;;  %v12667_v30 = vmul.f32 0.03125, %v12571_v39  ;;  %v12788_v53 = vsel %vm234_vm0, %v12740_v60, 0.0  ;;  %v12741_v2 = vmul.f32 %v21764_v48, %v21764_v48 }
0x10ce   :  { %v12562_v61 = vpop.xlane.xlu1 %12561  ;;  %12789 = vadd.xlane.f32.xlu1 %v12788_v53 }
0x10cf   :  { %v21776_v24 = vsub.f32 %v21544_v8, %v12667_v30  ;;  %v12664_v0 = vmul.f32 0.03125, %v12562_v61  ;;  %v12791_v56 = vsel %vm234_vm0, %v12741_v2, 0.0  ;;  %v12746_v33 = vmul.f32 %v21770_v25, %v21770_v25 }
0x10d0   :  { %12792 = vadd.xlane.f32.xlu0 %v12791_v56  ;;  %v12565_v36 = vpop.xlane.xlu0 %12564 }
0x10d1   :  { %v21782_v43 = vsub.f32 %v21541_v52, %v12664_v0  ;;  %v12665_v57 = vmul.f32 0.03125, %v12565_v36  ;;  %v12806_v21 = vsel %vm234_vm0, %v12746_v33, 0.0  ;;  %v12747_v5 = vmul.f32 %v21776_v24, %v21776_v24 }
0x10d2   :  { %v12580_v45 = vpop.xlane.xlu1 %12579  ;;  %12807 = vadd.xlane.f32.xlu1 %v12806_v21 }
0x10d3   :  { %v21788_v8 = vsub.f32 %v21549_v50, %v12665_v57  ;;  %v12670_v11 = vmul.f32 0.03125, %v12580_v45  ;;  %v12809_v32 = vsel %vm234_vm0, %v12747_v5, 0.0  ;;  %v12744_v15 = vmul.f32 %v21782_v43, %v21782_v43 }
0x10d4   :  { %12810 = vadd.xlane.f32.xlu0 %v12809_v32  ;;  %v12583_v52 = vpop.xlane.xlu0 %12582 }
0x10d5   :  { %v21794_v38 = vsub.f32 %v21558_v22, %v12670_v11  ;;  %v12671_v62 = vmul.f32 0.03125, %v12583_v52  ;;  %v12800_v29 = vsel %vm234_vm0, %v12744_v15, 0.0  ;;  %v12745_v42 = vmul.f32 %v21788_v8, %v21788_v8 }
0x10d6   :  { %v12574_v37 = vpop.xlane.xlu1 %12573  ;;  %12801 = vadd.xlane.f32.xlu1 %v12800_v29 }
0x10d7   :  { %v21800_v50 = vsub.f32 %v21568_v10, %v12671_v62  ;;  %v12668_v60 = vmul.f32 0.03125, %v12574_v37  ;;  %v12803_v39 = vsel %vm234_vm0, %v12745_v42, 0.0  ;;  %v12750_v30 = vmul.f32 %v21794_v38, %v21794_v38 }
0x10d8   :  { %12804 = vadd.xlane.f32.xlu0 %v12803_v39  ;;  %v12577_v22 = vpop.xlane.xlu0 %12576 }
0x10d9   :  { %v21806_v53 = vsub.f32 %v21565_v46, %v12668_v60  ;;  %v12669_v2 = vmul.f32 0.03125, %v12577_v22  ;;  %v12818_v61 = vsel %vm234_vm0, %v12750_v30, 0.0  ;;  %v12751_v0 = vmul.f32 %v21800_v50, %v21800_v50 }
0x10da   :  { %v12592_v56 = vpop.xlane.xlu1 %12591  ;;  %12819 = vadd.xlane.f32.xlu1 %v12818_v61 }
0x10db   :  { %v21812_v10 = vsub.f32 %v21573_v51, %v12669_v2  ;;  %v12674_v33 = vmul.f32 0.03125, %v12592_v56  ;;  %v12821_v36 = vsel %vm234_vm0, %v12751_v0, 0.0  ;;  %v12748_v57 = vmul.f32 %v21806_v53, %v21806_v53 }
0x10dc   :  { %12822 = vadd.xlane.f32.xlu0 %v12821_v36  ;;  %v12595_v46 = vpop.xlane.xlu0 %12594 }
0x10dd   :  { %v21818_v21 = vsub.f32 %v21582_v27, %v12674_v33  ;;  %v12675_v5 = vmul.f32 0.03125, %v12595_v46  ;;  %v12812_v45 = vsel %vm234_vm0, %v12748_v57, 0.0  ;;  %v12749_v11 = vmul.f32 %v21812_v10, %v21812_v10 }
0x10de   :  { %v12586_v32 = vpop.xlane.xlu1 %12585  ;;  %12813 = vadd.xlane.f32.xlu1 %v12812_v45 }
0x10df   :  { %v21824_v51 = vsub.f32 %v21592_v40, %v12675_v5  ;;  %v12672_v15 = vmul.f32 0.03125, %v12586_v32  ;;  %v12815_v52 = vsel %vm234_vm0, %v12749_v11, 0.0  ;;  %v12754_v62 = vmul.f32 %v21818_v21, %v21818_v21 }
0x10e0   :  { %12816 = vadd.xlane.f32.xlu0 %v12815_v52  ;;  %v12589_v27 = vpop.xlane.xlu0 %12588 }
0x10e1   :  { %v21830_v29 = vsub.f32 %v21589_v14, %v12672_v15  ;;  %v12673_v42 = vmul.f32 0.03125, %v12589_v27  ;;  %v12830_v37 = vsel %vm234_vm0, %v12754_v62, 0.0  ;;  %v12755_v60 = vmul.f32 %v21824_v51, %v21824_v51 }
0x10e2   :  { %v12604_v39 = vpop.xlane.xlu1 %12603  ;;  %12831 = vadd.xlane.f32.xlu1 %v12830_v37 }
0x10e3   :  { %v21836_v40 = vsub.f32 %v21597_v63, %v12673_v42  ;;  %v12678_v30 = vmul.f32 0.03125, %v12604_v39  ;;  %v12833_v22 = vsel %vm234_vm0, %v12755_v60, 0.0  ;;  %v12752_v2 = vmul.f32 %v21830_v29, %v21830_v29 }
0x10e4   :  { %12834 = vadd.xlane.f32.xlu0 %v12833_v22  ;;  %v12607_v14 = vpop.xlane.xlu0 %12606 }
0x10e5   :  { %v21842_v61 = vsub.f32 %v21606_v18, %v12678_v30  ;;  %v12679_v0 = vmul.f32 0.03125, %v12607_v14  ;;  %v12824_v56 = vsel %vm234_vm0, %v12752_v2, 0.0  ;;  %v12753_v33 = vmul.f32 %v21836_v40, %v21836_v40 }
0x10e6   :  { %v12598_v36 = vpop.xlane.xlu1 %12597  ;;  %12825 = vadd.xlane.f32.xlu1 %v12824_v56 }
0x10e7   :  { %v21848_v63 = vsub.f32 %v21616_v34, %v12679_v0  ;;  %v12676_v57 = vmul.f32 0.03125, %v12598_v36  ;;  %v12827_v46 = vsel %vm234_vm0, %v12753_v33, 0.0  ;;  %v12758_v5 = vmul.f32 %v21842_v61, %v21842_v61 }
0x10e8   :  { %12828 = vadd.xlane.f32.xlu0 %v12827_v46  ;;  %v12601_v18 = vpop.xlane.xlu0 %12600 }
0x10e9   :  { %v21854_v45 = vsub.f32 %v21613_v58, %v12676_v57  ;;  %v12677_v11 = vmul.f32 0.03125, %v12601_v18  ;;  %v12842_v32 = vsel %vm234_vm0, %v12758_v5, 0.0  ;;  %v12759_v15 = vmul.f32 %v21848_v63, %v21848_v63 }
0x10ea   :  { %v12616_v52 = vpop.xlane.xlu1 %12615  ;;  %12843 = vadd.xlane.f32.xlu1 %v12842_v32 }
0x10eb   :  { %v21860_v34 = vsub.f32 %v21621_v28, %v12677_v11  ;;  %v12682_v62 = vmul.f32 0.03125, %v12616_v52  ;;  %v12845_v27 = vsel %vm234_vm0, %v12759_v15, 0.0  ;;  %v12756_v42 = vmul.f32 %v21854_v45, %v21854_v45 }
0x10ec   :  { %12846 = vadd.xlane.f32.xlu0 %v12845_v27  ;;  %v12619_v58 = vpop.xlane.xlu0 %12618 }
0x10ed   :  { %v21866_v37 = vsub.f32 %v21630_v7, %v12682_v62  ;;  %v12683_v60 = vmul.f32 0.03125, %v12619_v58  ;;  %v12836_v39 = vsel %vm234_vm0, %v12756_v42, 0.0  ;;  %v12757_v30 = vmul.f32 %v21860_v34, %v21860_v34 }
0x10ee   :  { %v12610_v22 = vpop.xlane.xlu1 %12609  ;;  %12837 = vadd.xlane.f32.xlu1 %v12836_v39 }
0x10ef   :  { %v21872_v28 = vsub.f32 %v21640_v12, %v12683_v60  ;;  %v12680_v2 = vmul.f32 0.03125, %v12610_v22  ;;  %v12839_v14 = vsel %vm234_vm0, %v12757_v30, 0.0  ;;  %v12762_v0 = vmul.f32 %v21866_v37, %v21866_v37 }
0x10f0   :  { %12840 = vadd.xlane.f32.xlu0 %v12839_v14  ;;  %v12613_v7 = vpop.xlane.xlu0 %12612 }
0x10f1   :  { %v21878_v56 = vsub.f32 %v21637_v35, %v12680_v2  ;;  %v12681_v33 = vmul.f32 0.03125, %v12613_v7  ;;  %v12854_v36 = vsel %vm234_vm0, %v12762_v0, 0.0  ;;  %v12763_v57 = vmul.f32 %v21872_v28, %v21872_v28 }
0x10f2   :  { %v12628_v46 = vpop.xlane.xlu1 %12627  ;;  %12855 = vadd.xlane.f32.xlu1 %v12854_v36 }
0x10f3   :  { %v21884_v12 = vsub.f32 %v21645_v59, %v12681_v33  ;;  %v12686_v5 = vmul.f32 0.03125, %v12628_v46  ;;  %v12857_v18 = vsel %vm234_vm0, %v12763_v57, 0.0  ;;  %v12760_v11 = vmul.f32 %v21878_v56, %v21878_v56 }
0x10f4   :  { %12858 = vadd.xlane.f32.xlu0 %v12857_v18  ;;  %v12631_v35 = vpop.xlane.xlu0 %12630 }
0x10f5   :  { %v21890_v32 = vsub.f32 %v21654_v49, %v12686_v5  ;;  %v12687_v15 = vmul.f32 0.03125, %v12631_v35  ;;  %v12848_v52 = vsel %vm234_vm0, %v12760_v11, 0.0  ;;  %v12761_v62 = vmul.f32 %v21884_v12, %v21884_v12 }
0x10f6   :  { %v12622_v27 = vpop.xlane.xlu1 %12621  ;;  %12849 = vadd.xlane.f32.xlu1 %v12848_v52 }
0x10f7   :  { %v21896_v59 = vsub.f32 %v21664_v31, %v12687_v15  ;;  %v12684_v42 = vmul.f32 0.03125, %v12622_v27  ;;  %v12851_v58 = vsel %vm234_vm0, %v12761_v62, 0.0  ;;  %v12766_v60 = vmul.f32 %v21890_v32, %v21890_v32 }
0x10f8   :  { %12852 = vadd.xlane.f32.xlu0 %v12851_v58  ;;  %v12625_v49 = vpop.xlane.xlu0 %12624 }
0x10f9   :  { %v21902_v39 = vsub.f32 %v21661_v23, %v12684_v42  ;;  %v12685_v30 = vmul.f32 0.03125, %v12625_v49  ;;  %v12866_v22 = vsel %vm234_vm0, %v12766_v60, 0.0  ;;  %v12767_v2 = vmul.f32 %v21896_v59, %v21896_v59 }
0x10fa   :  { %v12640_v14 = vpop.xlane.xlu1 %12639  ;;  %12867 = vadd.xlane.f32.xlu1 %v12866_v22 }
0x10fb   :  { %v21908_v31 = vsub.f32 %v21669_v47, %v12685_v30  ;;  %v12690_v0 = vmul.f32 0.03125, %v12640_v14  ;;  %v12869_v7 = vsel %vm234_vm0, %v12767_v2, 0.0  ;;  %v12764_v33 = vmul.f32 %v21902_v39, %v21902_v39 }
0x10fc   :  { %12870 = vadd.xlane.f32.xlu0 %v12869_v7  ;;  %v12643_v23 = vpop.xlane.xlu0 %12642 }
0x10fd   :  { %v21914_v36 = vsub.f32 %v21678_v17, %v12690_v0  ;;  %v12691_v57 = vmul.f32 0.03125, %v12643_v23  ;;  %v12860_v46 = vsel %vm234_vm0, %v12764_v33, 0.0  ;;  %v12765_v5 = vmul.f32 %v21908_v31, %v21908_v31 }
0x10fe   :  { %v12634_v18 = vpop.xlane.xlu1 %12633  ;;  %12861 = vadd.xlane.f32.xlu1 %v12860_v46 }
0x10ff   :  { %v21920_v47 = vsub.f32 %v21688_v13, %v12691_v57  ;;  %v12688_v11 = vmul.f32 0.03125, %v12634_v18  ;;  %v12863_v35 = vsel %vm234_vm0, %v12765_v5, 0.0  ;;  %v12770_v15 = vmul.f32 %v21914_v36, %v21914_v36 }
0x1100   :  { %12864 = vadd.xlane.f32.xlu0 %v12863_v35  ;;  %v12637_v17 = vpop.xlane.xlu0 %12636 }
0x1101   :  { %v21926_v52 = vsub.f32 %v21685_v41, %v12688_v11  ;;  %v12689_v62 = vmul.f32 0.03125, %v12637_v17  ;;  %v12878_v27 = vsel %vm234_vm0, %v12770_v15, 0.0  ;;  %v12771_v42 = vmul.f32 %v21920_v47, %v21920_v47 }
0x1102   :  { %v12652_v58 = vpop.xlane.xlu1 %12651  ;;  %12879 = vadd.xlane.f32.xlu1 %v12878_v27 }
0x1103   :  { %v21932_v13 = vsub.f32 %v21693_v16, %v12689_v62  ;;  %v12881_v60 = vsel %vm234_vm0, %v12771_v42, 0.0  ;;  %v12768_v49 = vmul.f32 %v21926_v52, %v21926_v52  ;;  %v12694_v41 = vmul.f32 0.03125, %v12652_v58 }
0x1104   :  { %12882 = vadd.xlane.f32.xlu0 %v12881_v60  ;;  %v12655_v30 = vpop.xlane.xlu0 %12654 }
0x1105   :  { %v12872_v22 = vsel %vm234_vm0, %v12768_v49, 0.0  ;;  %v12769_v2 = vmul.f32 %v21932_v13, %v21932_v13  ;;  %v12695_v0 = vmul.f32 0.03125, %v12655_v30  ;;  %v21942_v23 = vsub.f32 %v21702_v1, %v12694_v41 }
0x1106   :  { %12873 = vadd.xlane.f32.xlu1 %v12872_v22  ;;  %v12646_v14 = vpop.xlane.xlu1 %12645 }
0x1107   :  { %v12692_v7 = vmul.f32 0.03125, %v12646_v14  ;;  %v12875_v16 = vsel %vm234_vm0, %v12769_v2, 0.0  ;;  %v21948_v5 = vsub.f32 %v21712_v9, %v12695_v0  ;;  %v12774_v1 = vmul.f32 %v21942_v23, %v21942_v23 }
0x1108   :  { %12876 = vadd.xlane.f32.xlu0 %v12875_v16  ;;  %v12649_v33 = vpop.xlane.xlu0 %12648 }
0x1109   :  { %v21945_v57 = vsub.f32 %v21709_v55, %v12692_v7  ;;  %v12693_v46 = vmul.f32 0.03125, %v12649_v33  ;;  %v12775_v9 = vmul.f32 %v21948_v5, %v21948_v5 }
0x110b   :  { %v21951_v18 = vsub.f32 %v21717_v4, %v12693_v46  ;;  %v12772_v11 = vmul.f32 %v21945_v57, %v21945_v57  ;;  %v12890_v4 = vsel %vm234_vm0, %v12774_v1, 0.0  ;;  %v12893_v17 = vsel %vm234_vm0, %v12775_v9, 0.0 }
0x110d   :  { %v12884_v35 = vsel %vm234_vm0, %v12772_v11, 0.0  ;;  %v12773_v15 = vmul.f32 %v21951_v18, %v21951_v18  ;;  %v21968_v11 = vld [vmem:[%s22314_s7 + $0x4] ss:$0 sm:$0xff] }
0x110e   :  { %12885 = vadd.xlane.f32.xlu1 %v12884_v35 }
0x110f   :  { %v12887_v55 = vsel %vm234_vm0, %v12773_v15, 0.0 }
0x1110   :  { %12888 = vadd.xlane.f32.xlu0 %v12887_v55 }
0x1112   :  { %12891 = vadd.xlane.f32.xlu1 %v12890_v4  ;;  %v21974_v4 = vld [vmem:[%s22314_s7 + $0x5] ss:$0 sm:$0xff] }
0x1114   :  { %12894 = vadd.xlane.f32.xlu0 %v12893_v17 }
0x114b   :  { %v12784_v62 = vpop.xlane.xlu1 %12783 }
0x114c   :  { %v12898_v27 = vmul.f32 0.03125, %v12784_v62 }
0x114d   :  { %v12787_v42 = vpop.xlane.xlu0 %12786 }
0x114e   :  { %v12938_v58 = vadd.f32 1e-05, %v12898_v27  ;;  %v12899_v60 = vmul.f32 0.03125, %v12787_v42 }
0x114f   :  { %v12778_v49 = vpop.xlane.xlu1 %12777 }
0x1150   :  { %16411 = vrsqrt.f32 %v12938_v58  ;;  %v12939_v30 = vadd.f32 1e-05, %v12899_v60  ;;  %v12896_v41 = vmul.f32 0.03125, %v12778_v49 }
0x1151   :  { %v12781_v22 = vpop.xlane.xlu0 %12780 }
0x1152   :  { %16413 = vrsqrt.f32 %v12939_v30  ;;  %v12936_v2 = vadd.f32 1e-05, %v12896_v41  ;;  %v12897_v14 = vmul.f32 0.03125, %v12781_v22 }
0x1154   :  { %16415 = vrsqrt.f32 %v12936_v2  ;;  %v12937_v0 = vadd.f32 1e-05, %v12897_v14 }
0x1156   :  { %16417 = vrsqrt.f32 %v12937_v0 }
0x1157   :  { %v12796_v7 = vpop.xlane.xlu1 %12795 }
0x1158   :  { %v12902_v16 = vmul.f32 0.03125, %v12796_v7 }
0x1159   :  { %v12799_v33 = vpop.xlane.xlu0 %12798 }
0x115a   :  { %v16412_v46 = vpop.eup %16411  ;;  %v12942_v35 = vadd.f32 1e-05, %v12902_v16  ;;  %v12903_v15 = vmul.f32 0.03125, %v12799_v33 }
0x115b   :  { %v13018_v1 = vmul.f32 %v16412_v46, %v21726_v44  ;;  %v12790_v55 = vpop.xlane.xlu1 %12789 }
0x115c   :  { %v16414_v9 = vpop.eup %16413  ;;  %16419 = vrsqrt.f32 %v12942_v35  ;;  %v12943_v17 = vadd.f32 1e-05, %v12903_v15  ;;  %v12900_v62 = vmul.f32 0.03125, %v12790_v55 }
0x115d   :  { %v13062_v27 = vmul.f32 %v21968_v11, %v13018_v1  ;;  %v13019_v42 = vmul.f32 %v16414_v9, %v21729_v26  ;;  %v12793_v58 = vpop.xlane.xlu0 %12792 }
0x115e   :  { %v16416_v60 = vpop.eup %16415  ;;  %16421 = vrsqrt.f32 %v12943_v17  ;;  %v12940_v49 = vadd.f32 1e-05, %v12900_v62  ;;  %v12901_v30 = vmul.f32 0.03125, %v12793_v58 }
0x115f   :  { %v13106_v44 = vadd.f32 %v21974_v4, %v13062_v27  ;;  %v13063_v41 = vmul.f32 %v21968_v11, %v13019_v42  ;;  %v13016_v22 = vmul.f32 %v16416_v60, %v21734_v54  ;;  %v12808_v2 = vpop.xlane.xlu1 %12807 }
0x1160   :  { %v16418_v14 = vpop.eup %16417  ;;  %16423 = vrsqrt.f32 %v12940_v49  ;;  %v12941_v0 = vadd.f32 1e-05, %v12901_v30  ;;  %v12906_v7 = vmul.f32 0.03125, %v12808_v2 }
0x1161   :  { %v13107_v16 = vadd.f32 %v21974_v4, %v13063_v41  ;;  %v13060_v26 = vmul.f32 %v21968_v11, %v13016_v22  ;;  %v13017_v33 = vmul.f32 %v16418_v14, %v21740_v19  ;;  %v12811_v46 = vpop.xlane.xlu0 %12810  ;;  %v13153_v1 = vsel %vm234_vm0, %v13106_v44, 0.0 }
0x1162   :  { %16425 = vrsqrt.f32 %v12941_v0  ;;  %v12946_v35 = vadd.f32 1e-05, %v12906_v7  ;;  %v12907_v15 = vmul.f32 0.03125, %v12811_v46 }
0x1163   :  { %v13154_v55 = vsel %vm234_vm0, %v13107_v16, 0.0  ;;  %v13104_v54 = vadd.f32 %v21974_v4, %v13060_v26  ;;  %v13061_v9 = vmul.f32 %v21968_v11, %v13017_v33  ;;  %v12802_v17 = vpop.xlane.xlu1 %12801 }
0x1164   :  { %v13155_v62 = vadd.f32 %v13154_v55, %v13153_v1  ;;  %16427 = vrsqrt.f32 %v12946_v35  ;;  %v12947_v27 = vadd.f32 1e-05, %v12907_v15  ;;  %v12904_v42 = vmul.f32 0.03125, %v12802_v17 }
0x1165   :  { %v13105_v58 = vadd.f32 %v21974_v4, %v13061_v9  ;;  %v12805_v19 = vpop.xlane.xlu0 %12804  ;;  %v13144_v44 = vsel %vm234_vm0, %v13104_v54, 0.0 }
0x1166   :  { %v16420_v60 = vpop.eup %16419  ;;  %v13156_v49 = vrot.slane %v13155_v62, 4  ;;  %16429 = vrsqrt.f32 %v12947_v27  ;;  %v12944_v30 = vadd.f32 1e-05, %v12904_v42  ;;  %v12905_v41 = vmul.f32 0.03125, %v12805_v19 }
0x1167   :  { %v13145_v22 = vsel %vm234_vm0, %v13105_v58, 0.0  ;;  %v13022_v2 = vmul.f32 %v16420_v60, %v21750_v6  ;;  %v12820_v14 = vpop.xlane.xlu1 %12819 }
0x1168   :  { %v16422_v0 = vpop.eup %16421  ;;  %v13157_v7 = vadd.f32 %v13156_v49, %v13155_v62  ;;  %v13146_v16 = vadd.f32 %v13145_v22, %v13144_v44  ;;  %16431 = vrsqrt.f32 %v12944_v30  ;;  %v12945_v26 = vadd.f32 1e-05, %v12905_v41 }
0x1169   :  { %v13066_v33 = vmul.f32 %v21968_v11, %v13022_v2  ;;  %v13023_v46 = vmul.f32 %v16422_v0, %v21753_v20  ;;  %v12910_v35 = vmul.f32 0.03125, %v12820_v14  ;;  %v12823_v15 = vpop.xlane.xlu0 %12822 }
0x116a   :  { %v16424_v1 = vpop.eup %16423  ;;  %v13158_v55 = vrot.slane %v13157_v7, 2  ;;  %v13147_v9 = vrot.slane %v13146_v16, 4  ;;  %16433 = vrsqrt.f32 %v12945_v26  ;;  %v12911_v54 = vmul.f32 0.03125, %v12823_v15 }
0x116b   :  { %v13110_v17 = vadd.f32 %v21974_v4, %v13066_v33  ;;  %v13067_v6 = vmul.f32 %v21968_v11, %v13023_v46  ;;  %v13020_v62 = vmul.f32 %v16424_v1, %v21758_v3  ;;  %v12950_v27 = vadd.f32 1e-05, %v12910_v35  ;;  %v12814_v42 = vpop.xlane.xlu1 %12813 }
0x116c   :  { %v16426_v58 = vpop.eup %16425  ;;  %v21997_v19 = vadd.f32 %v13158_v55, %v13157_v7  ;;  %v12951_v60 = vadd.f32 1e-05, %v12911_v54  ;;  %v12908_v20 = vmul.f32 0.03125, %v12814_v42  ;;  %v13148_v49 = vadd.f32 %v13147_v9, %v13146_v16 }
0x116d   :  { %v13111_v30 = vadd.f32 %v21974_v4, %v13067_v6  ;;  %v13064_v41 = vmul.f32 %v21968_v11, %v13020_v62  ;;  %v13021_v44 = vmul.f32 %v16426_v58, %v21764_v48  ;;  %v12817_v22 = vpop.xlane.xlu0 %12816  ;;  %v13171_v14 = vsel %vm234_vm0, %v13110_v17, 0.0 }
0x116e   :  { %v16428_v2 = vpop.eup %16427  ;;  %16435 = vrsqrt.f32 %v12950_v27  ;;  %v12948_v3 = vadd.f32 1e-05, %v12908_v20  ;;  %v13160_v35 = vrot.slane %v21997_v19, 1  ;;  %v12909_v48 = vmul.f32 0.03125, %v12817_v22 }
0x116f   :  { %v13172_v0 = vsel %vm234_vm0, %v13111_v30, 0.0  ;;  %v13108_v7 = vadd.f32 %v21974_v4, %v13064_v41  ;;  %v13065_v26 = vmul.f32 %v21968_v11, %v13021_v44  ;;  %v13026_v16 = vmul.f32 %v16428_v2, %v21770_v25  ;;  %v12832_v33 = vpop.xlane.xlu1 %12831 }
0x1170   :  { %v16430_v46 = vpop.eup %16429  ;;  %v13173_v15 = vadd.f32 %v13172_v0, %v13171_v14  ;;  %16437 = vrsqrt.f32 %v12951_v60  ;;  %v13149_v1 = vrot.slane %v13148_v49, 2  ;;  %v12949_v25 = vadd.f32 1e-05, %v12909_v48 }
0x1171   :  { %v13109_v55 = vadd.f32 %v21974_v4, %v13065_v26  ;;  %v13070_v9 = vmul.f32 %v21968_v11, %v13026_v16  ;;  %v13027_v54 = vmul.f32 %v16430_v46, %v21776_v24  ;;  %v12835_v17 = vpop.xlane.xlu0 %12834  ;;  %v13162_v62 = vsel %vm234_vm0, %v13108_v7, 0.0 }
0x1172   :  { %v16432_v6 = vpop.eup %16431  ;;  %16439 = vrsqrt.f32 %v12948_v3  ;;  %v12914_v27 = vmul.f32 0.03125, %v12832_v33  ;;  %v13174_v42 = vrot.slane %v13173_v15, 4  ;;  %v22016_v2 = vadd.f32 %v13149_v1, %v13148_v49 }
0x1173   :  { %v13163_v58 = vsel %vm234_vm0, %v13109_v55, 0.0  ;;  %v13071_v60 = vmul.f32 %v21968_v11, %v13027_v54  ;;  %v13024_v20 = vmul.f32 %v16432_v6, %v21782_v43  ;;  %v12826_v30 = vpop.xlane.xlu1 %12825  ;;  %v13114_v22 = vadd.f32 %v21974_v4, %v13070_v9 }
0x1174   :  { %v16434_v41 = vpop.eup %16433  ;;  %v13164_v44 = vadd.f32 %v13163_v58, %v13162_v62  ;;  %16441 = vrsqrt.f32 %v12949_v25  ;;  %v12954_v24 = vadd.f32 1e-05, %v12914_v27  ;;  %v12915_v16 = vmul.f32 0.03125, %v12835_v17 }
0x1175   :  { %v13115_v14 = vadd.f32 %v21974_v4, %v13071_v60  ;;  %v13068_v3 = vmul.f32 %v21968_v11, %v13024_v20  ;;  %v13025_v0 = vmul.f32 %v16434_v41, %v21788_v8  ;;  %v12829_v7 = vpop.xlane.xlu0 %12828  ;;  %v12912_v43 = vmul.f32 0.03125, %v12826_v30 }
0x1176   :  { %v13165_v26 = vrot.slane %v13164_v44, 4  ;;  %16443 = vrsqrt.f32 %v12954_v24  ;;  %v22021_v33 = vadd.f32 %v13174_v42, %v13173_v15  ;;  %v12913_v55 = vmul.f32 0.03125, %v12829_v7 }
0x1177   :  { %v13112_v46 = vadd.f32 %v21974_v4, %v13068_v3  ;;  %v13069_v48 = vmul.f32 %v21968_v11, %v13025_v0  ;;  %v12844_v49 = vpop.xlane.xlu1 %12843  ;;  %v13189_v9 = vsel %vm234_vm0, %v13114_v22, 0.0  ;;  %v13190_v54 = vsel %vm234_vm0, %v13115_v14, 0.0 }
0x1178   :  { %v16436_v1 = vpop.eup %16435  ;;  %v12955_v6 = vadd.f32 1e-05, %v12915_v16  ;;  %v12952_v8 = vadd.f32 1e-05, %v12912_v43  ;;  %v13166_v62 = vadd.f32 %v13165_v26, %v13164_v44  ;;  %v12953_v15 = vadd.f32 1e-05, %v12913_v55 }
0x1179   :  { %v13113_v25 = vadd.f32 %v21974_v4, %v13069_v48  ;;  %v13030_v17 = vmul.f32 %v16436_v1, %v21794_v38  ;;  %v12847_v27 = vpop.xlane.xlu0 %12846  ;;  %v13180_v58 = vsel %vm234_vm0, %v13112_v46, 0.0  ;;  %v12918_v60 = vmul.f32 0.03125, %v12844_v49 }
0x117a   :  { %v16438_v42 = vpop.eup %16437  ;;  %16445 = vrsqrt.f32 %v12955_v6  ;;  %v12919_v20 = vmul.f32 0.03125, %v12847_v27  ;;  %v22035_v0 = vadd.f32 %v13190_v54, %v13189_v9  ;;  %v13167_v48 = vrot.slane %v13166_v62, 2 }
0x117b   :  { %v13181_v30 = vsel %vm234_vm0, %v13113_v25, 0.0  ;;  %v13074_v41 = vmul.f32 %v21968_v11, %v13030_v17  ;;  %v13031_v22 = vmul.f32 %v16438_v42, %v21800_v50  ;;  %16447 = vrsqrt.f32 %v12952_v8  ;;  %v12838_v44 = vpop.xlane.xlu1 %12837 }
0x117c   :  { %v16440_v24 = vpop.eup %16439  ;;  %v22033_v14 = vadd.f32 %v13181_v30, %v13180_v58  ;;  %16449 = vrsqrt.f32 %v12953_v15  ;;  %v12958_v38 = vadd.f32 1e-05, %v12918_v60  ;;  %v12959_v3 = vadd.f32 1e-05, %v12919_v20 }
0x117d   :  { %v13075_v7 = vmul.f32 %v21968_v11, %v13031_v22  ;;  %v13028_v26 = vmul.f32 %v16440_v24, %v21806_v53  ;;  %v12916_v16 = vmul.f32 0.03125, %v12838_v44  ;;  %v12841_v43 = vpop.xlane.xlu0 %12840  ;;  %v22040_v50 = vadd.f32 %v21974_v4, %v13074_v41 }
0x117e   :  { %v16442_v46 = vpop.eup %16441  ;;  %16451 = vrsqrt.f32 %v12958_v38  ;;  %v12917_v55 = vmul.f32 0.03125, %v12841_v43  ;;  %v13151_v54 = vrot.slane %v22016_v2, 1  ;;  %v13183_v53 = vrot.slane %v22033_v14, 4 }
0x117f   :  { %v13072_v49 = vmul.f32 %v21968_v11, %v13028_v26  ;;  %v13029_v1 = vmul.f32 %v16442_v46, %v21812_v10  ;;  %16453 = vrsqrt.f32 %v12959_v3  ;;  %v12856_v9 = vpop.xlane.xlu1 %12855  ;;  %v12956_v8 = vadd.f32 1e-05, %v12916_v16 }
0x1180   :  { %v16444_v6 = vpop.eup %16443  ;;  %v12957_v25 = vadd.f32 1e-05, %v12917_v55  ;;  %v12922_v17 = vmul.f32 0.03125, %v12856_v9  ;;  %v22047_v15 = vadd.f32 %v21974_v4, %v13075_v7  ;;  %v22052_v30 = vadd.f32 %v13167_v48, %v13166_v62 }
0x1181   :  { %v13116_v27 = vadd.f32 %v21974_v4, %v13072_v49  ;;  %v13073_v42 = vmul.f32 %v21968_v11, %v13029_v1  ;;  %v13034_v58 = vmul.f32 %v16444_v6, %v21818_v21  ;;  %v12859_v10 = vpop.xlane.xlu0 %12858  ;;  %16455 = vrsqrt.f32 %v12956_v8 }
0x1182   :  { %v12962_v60 = vadd.f32 1e-05, %v12922_v17  ;;  %v12923_v20 = vmul.f32 0.03125, %v12859_v10  ;;  %16457 = vrsqrt.f32 %v12957_v25  ;;  %v22057_v24 = vadd.f32 %v13151_v54, %v22016_v2 }
0x1183   :  { %v13117_v41 = vadd.f32 %v21974_v4, %v13073_v42  ;;  %v13078_v22 = vmul.f32 %v21968_v11, %v13034_v58  ;;  %v12850_v44 = vpop.xlane.xlu1 %12849  ;;  %v22062_v21 = vadd.f32 %v13160_v35, %v21997_v19  ;;  %v22065_v26 = vsel %vm234_vm0, %v13116_v27, 0.0 }
0x1184   :  { %v16446_v38 = vpop.eup %16445  ;;  %16459 = vrsqrt.f32 %v12962_v60  ;;  %v12963_v3 = vadd.f32 1e-05, %v12923_v20  ;;  %v12920_v7 = vmul.f32 0.03125, %v12850_v44  ;;  %v13169_v2 = vrot.slane %v22052_v30, 1 }
0x1185   :  { %v16448_v62 = vpop.eup %16447  ;;  %v13122_v16 = vadd.f32 %v21974_v4, %v13078_v22  ;;  %v13035_v43 = vmul.f32 %v16446_v38, %v21824_v51  ;;  %v12853_v46 = vpop.xlane.xlu0 %12852  ;;  %v22072_v19 = vsel %vm234_vm0, %v13117_v41, 0.0  ;;  %v13176_v6 = vrot.slane %v22021_v33, 2 }
0x1186   :  { %v16450_v48 = vpop.eup %16449  ;;  %v13032_v55 = vmul.f32 %v16448_v62, %v21830_v29  ;;  %16461 = vrsqrt.f32 %v12963_v3  ;;  %v12960_v49 = vadd.f32 1e-05, %v12920_v7  ;;  %v12921_v1 = vmul.f32 0.03125, %v12853_v46 }
0x1187   :  { %v13079_v35 = vmul.f32 %v21968_v11, %v13035_v43  ;;  %v13033_v9 = vmul.f32 %v16450_v48, %v21836_v40  ;;  %v12868_v54 = vpop.xlane.xlu1 %12867  ;;  %v13225_v27 = vsel %vm234_vm0, %v13122_v16, 0.0 }
0x1188   :  { %v16452_v51 = vpop.eup %16451  ;;  %v13076_v8 = vmul.f32 %v21968_v11, %v13032_v55  ;;  %16463 = vrsqrt.f32 %v12960_v49  ;;  %v12961_v25 = vadd.f32 1e-05, %v12921_v1  ;;  %v12926_v17 = vmul.f32 0.03125, %v12868_v54 }
0x1189   :  { %v16454_v29 = vpop.eup %16453  ;;  %v13123_v42 = vadd.f32 %v21974_v4, %v13079_v35  ;;  %v13077_v58 = vmul.f32 %v21968_v11, %v13033_v9  ;;  %v13038_v10 = vmul.f32 %v16452_v51, %v21842_v61  ;;  %v12871_v60 = vpop.xlane.xlu0 %12870 }
0x118a   :  { %v13120_v40 = vadd.f32 %v21974_v4, %v13076_v8  ;;  %v13039_v20 = vmul.f32 %v16454_v29, %v21848_v63  ;;  %16465 = vrsqrt.f32 %v12961_v25  ;;  %v12966_v41 = vadd.f32 1e-05, %v12926_v17 }
0x118b   :  { %v13226_v22 = vsel %vm234_vm0, %v13123_v42, 0.0  ;;  %v13121_v44 = vadd.f32 %v21974_v4, %v13077_v58  ;;  %v13082_v38 = vmul.f32 %v21968_v11, %v13038_v10  ;;  %v12927_v3 = vmul.f32 0.03125, %v12871_v60  ;;  %v12862_v7 = vpop.xlane.xlu1 %12861  ;;  %v16456_v62 = vpop.eup %16455 }
0x118c   :  { %v13227_v16 = vadd.f32 %v13226_v22, %v13225_v27  ;;  %v13216_v43 = vsel %vm234_vm0, %v13120_v40, 0.0  ;;  %v13083_v61 = vmul.f32 %v21968_v11, %v13039_v20  ;;  %16467 = vrsqrt.f32 %v12966_v41  ;;  %v16458_v46 = vpop.eup %16457 }
0x118d   :  { %v13217_v63 = vsel %vm234_vm0, %v13121_v44, 0.0  ;;  %v13126_v48 = vadd.f32 %v21974_v4, %v13082_v38  ;;  %v13036_v55 = vmul.f32 %v16456_v62, %v21854_v45  ;;  %v12967_v49 = vadd.f32 1e-05, %v12927_v3  ;;  %v12865_v8 = vpop.xlane.xlu0 %12864 }
0x118e   :  { %v16460_v1 = vpop.eup %16459  ;;  %v13228_v35 = vrot.slane %v13227_v16, 4  ;;  %v13218_v9 = vadd.f32 %v13217_v63, %v13216_v43  ;;  %v13127_v54 = vadd.f32 %v21974_v4, %v13083_v61  ;;  %v13037_v51 = vmul.f32 %v16458_v46, %v21860_v34 }
0x118f   :  { %v13243_v25 = vsel %vm234_vm0, %v13126_v48, 0.0  ;;  %v13080_v17 = vmul.f32 %v21968_v11, %v13036_v55  ;;  %v13042_v29 = vmul.f32 %v16460_v1, %v21866_v37  ;;  %16469 = vrsqrt.f32 %v12967_v49  ;;  %v12880_v41 = vpop.xlane.xlu1 %12879 }
0x1190   :  { %v16462_v27 = vpop.eup %16461  ;;  %v13229_v42 = vadd.f32 %v13228_v35, %v13227_v16  ;;  %v13219_v58 = vrot.slane %v13218_v9, 4  ;;  %v13244_v45 = vsel %vm234_vm0, %v13127_v54, 0.0  ;;  %v13081_v10 = vmul.f32 %v21968_v11, %v13037_v51 }
0x1191   :  { %v13245_v60 = vadd.f32 %v13244_v45, %v13243_v25  ;;  %v13124_v40 = vadd.f32 %v21974_v4, %v13080_v17  ;;  %v13086_v34 = vmul.f32 %v21968_v11, %v13042_v29  ;;  %v13043_v20 = vmul.f32 %v16462_v27, %v21872_v28  ;;  %v12883_v49 = vpop.xlane.xlu0 %12882 }
0x1192   :  { %v16464_v22 = vpop.eup %16463  ;;  %v13230_v44 = vrot.slane %v13229_v42, 2  ;;  %v13220_v38 = vadd.f32 %v13219_v58, %v13218_v9  ;;  %v13125_v37 = vadd.f32 %v21974_v4, %v13081_v10  ;;  %v22106_v3 = vadd.f32 %v13169_v2, %v22052_v30 }
0x1193   :  { %v13246_v62 = vrot.slane %v13245_v60, 4  ;;  %v13130_v16 = vadd.f32 %v21974_v4, %v13086_v34  ;;  %v13087_v43 = vmul.f32 %v21968_v11, %v13043_v20  ;;  %v12924_v61 = vmul.f32 0.03125, %v12862_v7 }
0x1194   :  { %v16466_v46 = vpop.eup %16465  ;;  %v22110_v63 = vadd.f32 %v13230_v44, %v13229_v42  ;;  %v13234_v28 = vsel %vm234_vm0, %v13124_v40, 0.0  ;;  %v13235_v48 = vsel %vm234_vm0, %v13125_v37, 0.0  ;;  %v13040_v55 = vmul.f32 %v16464_v22, %v21878_v56  ;;  %v12874_v42 = vpop.xlane.xlu1 %12873 }
0x1195   :  { %v13221_v1 = vrot.slane %v13220_v38, 2  ;;  %v13236_v35 = vadd.f32 %v13235_v48, %v13234_v28  ;;  %v13131_v30 = vadd.f32 %v21974_v4, %v13087_v43  ;;  %v13177_v2 = vadd.f32 %v13176_v6, %v22021_v33  ;;  %v12877_v44 = vpop.xlane.xlu0 %12876 }
0x1196   :  { %v16468_v9 = vpop.eup %16467  ;;  %v22119_v7 = vadd.f32 %v13246_v62, %v13245_v60  ;;  %v13261_v54 = vsel %vm234_vm0, %v13130_v16, 0.0  ;;  %v13084_v51 = vmul.f32 %v21968_v11, %v13040_v55  ;;  %v13041_v25 = vmul.f32 %v16466_v46, %v21884_v12 }
0x1197   :  { %v13232_v56 = vrot.slane %v22110_v63, 1  ;;  %v13237_v17 = vrot.slane %v13236_v35, 4  ;;  %v13046_v29 = vmul.f32 %v16468_v9, %v21890_v32  ;;  %v12964_v27 = vadd.f32 1e-05, %v12924_v61 }
0x1198   :  { %v13262_v58 = vsel %vm234_vm0, %v13131_v30, 0.0  ;;  %v13128_v33 = vadd.f32 %v21974_v4, %v13084_v51  ;;  %v13085_v6 = vmul.f32 %v21968_v11, %v13041_v25  ;;  %v12925_v45 = vmul.f32 0.03125, %v12865_v8 }
0x1199   :  { %v16470_v10 = vpop.eup %16469  ;;  %v22129_v60 = vadd.f32 %v13237_v17, %v13236_v35  ;;  %v13090_v40 = vmul.f32 %v21968_v11, %v13046_v29  ;;  %16471 = vrsqrt.f32 %v12964_v27  ;;  %v12930_v12 = vmul.f32 0.03125, %v12880_v41 }
0x119a   :  { %v22132_v34 = vadd.f32 %v13221_v1, %v13220_v38  ;;  %v13129_v32 = vadd.f32 %v21974_v4, %v13085_v6  ;;  %v13047_v20 = vmul.f32 %v16470_v10, %v21896_v59  ;;  %v12965_v22 = vadd.f32 1e-05, %v12925_v45 }
0x119b   :  { %v22136_v37 = vadd.f32 %v13262_v58, %v13261_v54  ;;  %v13252_v62 = vsel %vm234_vm0, %v13128_v33, 0.0  ;;  %v12970_v8 = vadd.f32 1e-05, %v12930_v12  ;;  %v12931_v16 = vmul.f32 0.03125, %v12883_v49  ;;  %v12886_v43 = vpop.xlane.xlu1 %12885 }
0x119c   :  { %v13239_v61 = vrot.slane %v22129_v60, 2  ;;  %v13253_v46 = vsel %vm234_vm0, %v13129_v32, 0.0  ;;  %16473 = vrsqrt.f32 %v12965_v22  ;;  %v12928_v41 = vmul.f32 0.03125, %v12874_v42 }
0x119d   :  { %v22142_v38 = vadd.f32 %v21974_v4, %v13090_v40  ;;  %16475 = vrsqrt.f32 %v12970_v8  ;;  %v12971_v59 = vadd.f32 1e-05, %v12931_v16  ;;  %v12929_v28 = vmul.f32 0.03125, %v12877_v44 }
0x119e   :  { %v13091_v48 = vmul.f32 %v21968_v11, %v13047_v20  ;;  %v12968_v55 = vadd.f32 1e-05, %v12928_v41  ;;  %v12932_v1 = vmul.f32 0.03125, %v12886_v43  ;;  %v13178_v35 = vrot.slane %v13177_v2, 1 }
0x119f   :  { %v22145_v30 = vadd.f32 %v13253_v46, %v13252_v62  ;;  %16477 = vrsqrt.f32 %v12971_v59  ;;  %v12969_v49 = vadd.f32 1e-05, %v12929_v28  ;;  %v13184_v9 = vadd.f32 %v13183_v53, %v22033_v14 }
0x11a0   :  { %16479 = vrsqrt.f32 %v12968_v55  ;;  %v12972_v54 = vadd.f32 1e-05, %v12932_v1  ;;  %v13179_v51 = vadd.f32 %v13178_v35, %v13177_v2  ;;  %v13192_v25 = vrot.slane %v22035_v0, 4 }
0x11a1   :  { %16481 = vrsqrt.f32 %v12969_v49  ;;  %v13185_v17 = vrot.slane %v13184_v9, 2  ;;  %v13200_v29 = vadd.f32 %v22072_v19, %v22065_v26  ;;  %v13207_v27 = vsel %vm234_vm0, %v22040_v50, 0.0 }
0x11a2   :  { %16483 = vrsqrt.f32 %v12972_v54  ;;  %v13193_v42 = vadd.f32 %v13192_v25, %v22035_v0  ;;  %v13208_v58 = vsel %vm234_vm0, %v22047_v15, 0.0  ;;  %v13325_v14 = vmul.f32 0.0625, %v22057_v24  ;;  %v22169_v24 = vld [vmem:[%s22314_s7 + $0x6] ss:$0 sm:$0xff] }
0x11a3   :  { %v16472_v53 = vpop.eup %16471  ;;  %v22160_v2 = vadd.f32 %v21974_v4, %v13091_v48  ;;  %v13186_v33 = vadd.f32 %v13185_v17, %v13184_v9  ;;  %v13201_v6 = vrot.slane %v13200_v29, 4  ;;  %v13209_v45 = vadd.f32 %v13208_v58, %v13207_v27 }
0x11a4   :  { %v13044_v26 = vmul.f32 %v16472_v53, %v21902_v39  ;;  %v13194_v19 = vrot.slane %v13193_v42, 2  ;;  %v13326_v50 = vmul.f32 0.0625, %v22062_v21  ;;  %v13327_v10 = vmul.f32 0.0625, %v22106_v3 }
0x11a5   :  { %v13255_v0 = vrot.slane %v22145_v30, 4  ;;  %v13187_v40 = vrot.slane %v13186_v33, 1  ;;  %v13202_v15 = vadd.f32 %v13201_v6, %v13200_v29  ;;  %v13210_v12 = vrot.slane %v13209_v45, 4 }
0x11a6   :  { %v16474_v32 = vpop.eup %16473  ;;  %v13088_v20 = vmul.f32 %v21968_v11, %v13044_v26  ;;  %v13195_v22 = vadd.f32 %v13194_v19, %v13193_v42  ;;  %v13328_v39 = vmul.f32 0.0625, %v13179_v51  ;;  %v22173_v44 = vmul.f32 %v22169_v24, %v13325_v14 }
0x11a7   :  { %v16476_v21 = vpop.eup %16475  ;;  %v13045_v3 = vmul.f32 %v16474_v32, %v21908_v31  ;;  %v13188_v62 = vadd.f32 %v13187_v40, %v13186_v33  ;;  %v13203_v8 = vrot.slane %v13202_v15, 2  ;;  %v13211_v16 = vadd.f32 %v13210_v12, %v13209_v45 }
0x11a8   :  { %v13050_v43 = vmul.f32 %v16476_v21, %v21914_v36  ;;  %v13196_v46 = vrot.slane %v13195_v22, 1  ;;  %v22178_v41 = vmul.f32 %v22169_v24, %v13326_v50  ;;  %v22181_v59 = vmul.f32 %v22169_v24, %v13327_v10 }
0x11a9   :  { %v16478_v28 = vpop.eup %16477  ;;  %v13132_v48 = vadd.f32 %v21974_v4, %v13088_v20  ;;  %v13089_v55 = vmul.f32 %v21968_v11, %v13045_v3  ;;  %v13204_v1 = vadd.f32 %v13203_v8, %v13202_v15  ;;  %v13212_v35 = vrot.slane %v13211_v16, 2 }
0x11aa   :  { %v16480_v31 = vpop.eup %16479  ;;  %v13094_v49 = vmul.f32 %v21968_v11, %v13050_v43  ;;  %v13051_v36 = vmul.f32 %v16478_v28, %v21920_v47  ;;  %v13197_v9 = vadd.f32 %v13196_v46, %v13195_v22  ;;  %v13329_v54 = vmul.f32 0.0625, %v13188_v62  ;;  %v12889_v47 = vpop.xlane.xlu0 %12888 }
0x11ab   :  { %v16482_v51 = vpop.eup %16481  ;;  %v13133_v25 = vadd.f32 %v21974_v4, %v13089_v55  ;;  %v13048_v17 = vmul.f32 %v16480_v31, %v21926_v52  ;;  %v13205_v29 = vrot.slane %v13204_v1, 1  ;;  %v13213_v27 = vadd.f32 %v13212_v35, %v13211_v16 }
0x11ac   :  { %v16484_v42 = vpop.eup %16483  ;;  %v13095_v58 = vmul.f32 %v21968_v11, %v13051_v36  ;;  %v13049_v14 = vmul.f32 %v16482_v51, %v21932_v13  ;;  %v13330_v53 = vmul.f32 0.0625, %v13197_v9  ;;  %v13353_v33 = vmul.f32 %v22169_v24, %v13328_v39 }
0x11ad   :  { %v13138_v6 = vadd.f32 %v21974_v4, %v13094_v49  ;;  %v13092_v45 = vmul.f32 %v21968_v11, %v13048_v17  ;;  %v13052_v26 = vmul.f32 %v16484_v42, %v21945_v57  ;;  %v13206_v52 = vadd.f32 %v13205_v29, %v13204_v1 }
0x11ae   :  { %v22196_v19 = vsel %vm234_vm0, %v13132_v48, 0.0  ;;  %v13139_v50 = vadd.f32 %v21974_v4, %v13095_v58  ;;  %v13093_v13 = vmul.f32 %v21968_v11, %v13049_v14  ;;  %v13214_v10 = vrot.slane %v13213_v27, 1  ;;  %v12892_v48 = vpop.xlane.xlu1 %12891  ;;  %v12895_v55 = vpop.xlane.xlu0 %12894 }
0x11af   :  { %v13271_v40 = vsel %vm234_vm0, %v13133_v25, 0.0  ;;  %v13136_v15 = vadd.f32 %v21974_v4, %v13092_v45  ;;  %v13331_v12 = vmul.f32 0.0625, %v13206_v52  ;;  %v13354_v32 = vmul.f32 %v22169_v24, %v13329_v54 }
0x11b0   :  { %v13298_v57 = vsel %vm234_vm0, %v13139_v50, 0.0  ;;  %v13137_v20 = vadd.f32 %v21974_v4, %v13093_v13  ;;  %v13215_v22 = vadd.f32 %v13214_v10, %v13213_v27  ;;  %v13355_v39 = vmul.f32 %v22169_v24, %v13330_v53 }
0x11b1   :  { %v13297_v21 = vsel %vm234_vm0, %v13138_v6, 0.0  ;;  %v13288_v3 = vsel %vm234_vm0, %v13136_v15, 0.0  ;;  %v22209_v62 = vmul.f32 %v21968_v11, %v13052_v26  ;;  %v13356_v8 = vmul.f32 %v22169_v24, %v13331_v12 }
0x11b2   :  { %v13289_v16 = vsel %vm234_vm0, %v13137_v20, 0.0  ;;  %v13332_v43 = vmul.f32 0.0625, %v13215_v22  ;;  %v13390_v46 = vrot.slane %v22178_v41, 7  ;;  %v13393_v28 = vrot.slane %v22181_v59, 6 }
0x11b3   :  { %v22215_v1 = vadd.f32 %v13298_v57, %v13297_v21  ;;  %v22217_v35 = vadd.f32 %v13289_v16, %v13288_v3  ;;  %v13396_v31 = vrot.slane %v13353_v33, 5  ;;  %v13399_v49 = vrot.slane %v13354_v32, 4 }
0x11b4   :  { %v13357_v36 = vmul.f32 %v22169_v24, %v13332_v43  ;;  %v13392_v9 = vsel %vm13391_vm5, %v13390_v46, %v22173_v44  ;;  %v13402_v54 = vrot.slane %v13355_v39, 3  ;;  %v13405_v51 = vrot.slane %v13356_v8, 2 }
0x11b5   :  { %v13395_v25 = vsel %vm13394_vm6, %v13393_v28, %v13392_v9  ;;  %v12933_v41 = vmul.f32 0.03125, %v12889_v47  ;;  %v12934_v17 = vmul.f32 0.03125, %v12892_v48  ;;  %v12935_v59 = vmul.f32 0.03125, %v12895_v55 }
0x11b6   :  { %v13398_v29 = vsel %vm13397_vm7, %v13396_v31, %v13395_v25  ;;  %v13408_v27 = vrot.slane %v13357_v36, 1  ;;  %v13223_v42 = vrot.slane %v22132_v34, 1  ;;  %v13233_v58 = vadd.f32 %v13232_v56, %v22110_v63 }
0x11b7   :  { %v13401_v14 = vsel %vm13400_vm8, %v13399_v49, %v13398_v29  ;;  %v12973_v53 = vadd.f32 1e-05, %v12933_v41  ;;  %v12974_v44 = vadd.f32 1e-05, %v12934_v17  ;;  %v12975_v33 = vadd.f32 1e-05, %v12935_v59 }
0x11b8   :  { %v13404_v6 = vsel %vm13403_vm9, %v13402_v54, %v13401_v14  ;;  %v13224_v47 = vadd.f32 %v13223_v42, %v22132_v34  ;;  %v13240_v45 = vadd.f32 %v13239_v61, %v22129_v60  ;;  %v13248_v26 = vrot.slane %v22119_v7, 2 }
0x11b9   :  { %v13407_v52 = vsel %vm13406_vm10, %v13405_v51, %v13404_v6  ;;  %16485 = vrsqrt.f32 %v12973_v53  ;;  %v13256_v63 = vadd.f32 %v13255_v0, %v22145_v30  ;;  %v13264_v56 = vrot.slane %v22136_v37, 4 }
0x11ba   :  { %v13410_v50 = vsel %vm13409_vm11, %v13408_v27, %v13407_v52  ;;  %16487 = vrsqrt.f32 %v12974_v44  ;;  %v13241_v13 = vrot.slane %v13240_v45, 1  ;;  %v13249_v34 = vadd.f32 %v13248_v26, %v22119_v7 }
0x11bb   :  { %v13434_v10 = vsel %vm234_vm0, %v13410_v50, 0.0  ;;  %16489 = vrsqrt.f32 %v12975_v33  ;;  %v13257_v60 = vrot.slane %v13256_v63, 2  ;;  %v13265_v61 = vadd.f32 %v13264_v56, %v22136_v37 }
0x11bc   :  { %13435 = vadd.xlane.f32.xlu1 %v13434_v10  ;;  %v13242_v15 = vadd.f32 %v13241_v13, %v13240_v45  ;;  %v13250_v12 = vrot.slane %v13249_v34, 1  ;;  %v13272_v32 = vadd.f32 %v13271_v40, %v22196_v19  ;;  %v13279_v30 = vsel %vm234_vm0, %v22142_v38, 0.0 }
0x11bd   :  { %v13258_v0 = vadd.f32 %v13257_v60, %v13256_v63  ;;  %v13266_v57 = vrot.slane %v13265_v61, 2  ;;  %v13280_v20 = vsel %vm234_vm0, %v22160_v2, 0.0  ;;  %v13333_v7 = vmul.f32 0.0625, %v13224_v47 }
0x11be   :  { %v13251_v22 = vadd.f32 %v13250_v12, %v13249_v34  ;;  %v13273_v39 = vrot.slane %v13272_v32, 4  ;;  %v13281_v21 = vadd.f32 %v13280_v20, %v13279_v30  ;;  %v13334_v3 = vmul.f32 0.0625, %v13233_v58 }
0x11bf   :  { %v13259_v8 = vrot.slane %v13258_v0, 1  ;;  %v13267_v37 = vadd.f32 %v13266_v57, %v13265_v61  ;;  %v13335_v16 = vmul.f32 0.0625, %v13242_v15  ;;  %v13358_v43 = vmul.f32 %v22169_v24, %v13333_v7 }
0x11c0   :  { %v13274_v46 = vadd.f32 %v13273_v39, %v13272_v32  ;;  %v13282_v19 = vrot.slane %v13281_v21, 4  ;;  %v13336_v40 = vmul.f32 0.0625, %v13251_v22  ;;  %v13359_v38 = vmul.f32 %v22169_v24, %v13334_v3 }
0x11c1   :  { %v13260_v28 = vadd.f32 %v13259_v8, %v13258_v0  ;;  %v13268_v48 = vrot.slane %v13267_v37, 1  ;;  %v13360_v55 = vmul.f32 %v22169_v24, %v13335_v16  ;;  %v13291_v2 = vrot.slane %v22217_v35, 4 }
0x11c2   :  { %v13140_v31 = vadd.f32 %v21974_v4, %v22209_v62  ;;  %v13275_v49 = vrot.slane %v13274_v46, 2  ;;  %v13283_v36 = vadd.f32 %v13282_v19, %v13281_v21  ;;  %v13361_v9 = vmul.f32 %v22169_v24, %v13336_v40 }
0x11c3   :  { %v16486_v54 = vpop.eup %16485  ;;  %v13269_v51 = vadd.f32 %v13268_v48, %v13267_v37  ;;  %v13337_v25 = vmul.f32 0.0625, %v13260_v28  ;;  %v13411_v41 = vrot.slane %v13359_v38, 7  ;;  %v13413_v17 = vrot.slane %v13360_v55, 6 }
0x11c4   :  { %v16488_v59 = vpop.eup %16487  ;;  %v13053_v29 = vmul.f32 %v16486_v54, %v21951_v18  ;;  %v13276_v27 = vadd.f32 %v13275_v49, %v13274_v46  ;;  %v13284_v42 = vrot.slane %v13283_v36, 2  ;;  %v13292_v58 = vadd.f32 %v13291_v2, %v22217_v35 }
0x11c5   :  { %v16490_v14 = vpop.eup %16489  ;;  %v13054_v53 = vmul.f32 %v16488_v59, %v21942_v23  ;;  %v13338_v62 = vmul.f32 0.0625, %v13269_v51  ;;  %v13362_v44 = vmul.f32 %v22169_v24, %v13337_v25  ;;  %v13412_v33 = vsel %vm13391_vm5, %v13411_v41, %v13358_v43 }
0x11c6   :  { %v13097_v6 = vmul.f32 %v21968_v11, %v13053_v29  ;;  %v13055_v47 = vmul.f32 %v16490_v14, %v21948_v5  ;;  %v13277_v45 = vrot.slane %v13276_v27, 1  ;;  %v13285_v26 = vadd.f32 %v13284_v42, %v13283_v36 }
0x11c7   :  { %v13098_v18 = vmul.f32 %v21968_v11, %v13054_v53  ;;  %v13363_v52 = vmul.f32 %v22169_v24, %v13338_v62  ;;  %v13414_v35 = vsel %vm13394_vm6, %v13413_v17, %v13412_v33  ;;  %v13417_v63 = vrot.slane %v13362_v44, 4 }
0x11c8   :  { %v13141_v23 = vadd.f32 %v21974_v4, %v13097_v6  ;;  %v13099_v56 = vmul.f32 %v21968_v11, %v13055_v47  ;;  %v13278_v50 = vadd.f32 %v13277_v45, %v13276_v27  ;;  %v13286_v13 = vrot.slane %v13285_v26, 1 }
0x11c9   :  { %v13306_v34 = vsel %vm234_vm0, %v13140_v31, 0.0  ;;  %v13142_v10 = vadd.f32 %v21974_v4, %v13098_v18  ;;  %v13415_v5 = vrot.slane %v13361_v9, 5  ;;  %v13293_v60 = vrot.slane %v13292_v58, 2 }
0x11ca   :  { %v13307_v61 = vsel %vm234_vm0, %v13141_v23, 0.0  ;;  %v13143_v15 = vadd.f32 %v21974_v4, %v13099_v56  ;;  %v13287_v12 = vadd.f32 %v13286_v13, %v13285_v26  ;;  %v13339_v32 = vmul.f32 0.0625, %v13278_v50  ;;  %v13749_v50 = vld [vmem:[%s22314_s7 + $0x7] ss:$0 sm:$0xff] }
0x11cb   :  { %v13416_v30 = vsel %vm13397_vm7, %v13415_v5, %v13414_v35  ;;  %v13419_v0 = vrot.slane %v13363_v52, 3  ;;  %v13300_v57 = vrot.slane %v22215_v1, 4  ;;  %v13308_v11 = vadd.f32 %v13307_v61, %v13306_v34 }
0x11cc   :  { %v13340_v20 = vmul.f32 0.0625, %v13287_v12  ;;  %v13364_v7 = vmul.f32 %v22169_v24, %v13339_v32  ;;  %v13418_v22 = vsel %vm13400_vm8, %v13417_v63, %v13416_v30  ;;  %v13294_v39 = vadd.f32 %v13293_v60, %v13292_v58 }
0x11cd   :  { %v13301_v21 = vadd.f32 %v13300_v57, %v22215_v1  ;;  %v13309_v3 = vrot.slane %v13308_v11, 4  ;;  %v13315_v8 = vsel %vm234_vm0, %v13142_v10, 0.0  ;;  %v13316_v4 = vsel %vm234_vm0, %v13143_v15, 0.0 }
0x11ce   :  { %v13365_v37 = vmul.f32 %v22169_v24, %v13340_v20  ;;  %v13421_v16 = vrot.slane %v13364_v7, 2  ;;  %v13317_v43 = vadd.f32 %v13316_v4, %v13315_v8  ;;  %v13420_v46 = vsel %vm13403_vm9, %v13419_v0, %v13418_v22 }
0x11cf   :  { %v13302_v19 = vrot.slane %v13301_v21, 2  ;;  %v13310_v40 = vadd.f32 %v13309_v3, %v13308_v11  ;;  %v16551_v38 = vmov 0   ;;  %v13295_v1 = vrot.slane %v13294_v39, 1 }
0x11d0   :  { %15635 = vset.pattern.permute.xlu0 %v16551_v38  ;;  %15636 = vset.pattern.permute.xlu1 %v16551_v38  ;;  %v13422_v28 = vsel %vm13406_vm10, %v13421_v16, %v13420_v46  ;;  %v13423_v48 = vrot.slane %v13365_v37, 1  ;;  %v13318_v55 = vrot.slane %v13317_v43, 4 }
0x11d1   :  { %v13303_v2 = vadd.f32 %v13302_v19, %v13301_v21  ;;  %v13311_v31 = vrot.slane %v13310_v40, 2  ;;  %v13296_v25 = vadd.f32 %v13295_v1, %v13294_v39 }
0x11d2   :  { %v13424_v49 = vsel %vm13409_vm11, %v13423_v48, %v13422_v28  ;;  %v13319_v36 = vadd.f32 %v13318_v55, %v13317_v43 }
0x11d3   :  { %v13437_v9 = vsel %vm234_vm0, %v13424_v49, 0.0  ;;  %v13304_v54 = vrot.slane %v13303_v2, 1  ;;  %v13312_v51 = vadd.f32 %v13311_v31, %v13310_v40  ;;  %v13341_v14 = vmul.f32 0.0625, %v13296_v25 }
0x11d4   :  { %13438 = vadd.xlane.f32.xlu0 %v13437_v9  ;;  %v13320_v41 = vrot.slane %v13319_v36, 2 }
0x11d5   :  { %v13305_v17 = vadd.f32 %v13304_v54, %v13303_v2  ;;  %v13313_v59 = vrot.slane %v13312_v51, 1  ;;  %v13366_v47 = vmul.f32 %v22169_v24, %v13341_v14 }
0x11d6   :  { %v13321_v29 = vadd.f32 %v13320_v41, %v13319_v36 }
0x11d7   :  { %v13314_v27 = vadd.f32 %v13313_v59, %v13312_v51  ;;  %v13342_v42 = vmul.f32 0.0625, %v13305_v17 }
0x11d8   :  { %v13322_v58 = vrot.slane %v13321_v29, 1 }
0x11d9   :  { %v13343_v53 = vmul.f32 0.0625, %v13314_v27  ;;  %v13367_v44 = vmul.f32 %v22169_v24, %v13342_v42 }
0x11da   :  { %v13323_v62 = vadd.f32 %v13322_v58, %v13321_v29 }
0x11db   :  { %v13368_v33 = vmul.f32 %v22169_v24, %v13343_v53  ;;  %v13425_v18 = vrot.slane %v13367_v44, 7 }
0x11dc   :  { %v13344_v6 = vmul.f32 0.0625, %v13323_v62 }
0x11dd   :  { %v13427_v45 = vrot.slane %v13368_v33, 6  ;;  %v13426_v52 = vsel %vm13391_vm5, %v13425_v18, %v13366_v47 }
0x11de   :  { %v13369_v26 = vmul.f32 %v22169_v24, %v13344_v6 }
0x11df   :  { %v13428_v63 = vsel %vm13394_vm6, %v13427_v45, %v13426_v52 }
0x11e0   :  { %v13429_v35 = vrot.slane %v13369_v26, 5 }
0x11e2   :  { %v13430_v23 = vsel %vm13397_vm7, %v13429_v35, %v13428_v63 }
0x11e3   :  { %v13441_v56 = vsel %vm13440_vm12, %v13430_v23, 0.0 }
0x11e4   :  { %13442 = vadd.xlane.f32.xlu1 %v13441_v56 }
0x1249   :  { %v13436_v13 = vpop.xlane.xlu1 %13435 }
0x124a   :  { %v13449_v34 = vadd.f32 %v13749_v50, %v13436_v13 }
0x124c   :  { %13454 = vperm.xlu0 %15635, %v13449_v34  }
0x1261   :  { %v13439_v10 = vpop.xlane.xlu0 %13438 }
0x1262   :  { %v13450_v24 = vadd.f32 %v13749_v50, %v13439_v10 }
0x1264   :  { %13459 = vperm.xlu1 %15636, %v13450_v24  }
0x1271   :  { %v13443_v5 = vpop.xlane.xlu1 %13442 }
0x1272   :  { %v13451_v60 = vadd.f32 %v13749_v50, %v13443_v5 }
0x1274   :  { %13464 = vperm.xlu1 %15636, %v13451_v60  }
0x12cb   :  { %v13455_v61 = vpop.permute.xlu0 %13454 }
0x12cc   :  { %13467 = vst [vmem:[#allocation2] sm:$0xff] %v13455_v61 }
0x12e3   :  { %v13460_v15 = vpop.permute.xlu1 %13459 }
0x12e4   :  { %13468 = vst [vmem:[#allocation2 + $0x8] sm:$0xff] %v13460_v15 }
0x12f3   :  { %v13465_v12 = vpop.permute.xlu1 %13464 }
0x12f4   :  { %13469 = vst [vmem:[#allocation2 + $0x10] sm:$0xf] %v13465_v12 }
0x12f5   :  { %16522 = shalt.err (!%p16519_p4)
}
0x12f6   :  { %s16523_s24 = scalar_lea.hbm %s22315_s8, 384 }
0x12f7   :  { %p16524_p5 = scmp.ne.s32.totalorder %s22315_s8, %s16523_s24  ;;  %p16527_p6 = scmp.lt.u32.totalorder %s16523_s24, %s22315_s8 }
0x12f9   :  { %p16529_p7 = pnand %p16527_p6, %p16524_p5 }
0x12fb   :  { %16532 = shalt.err (!%p16529_p7)
}
0x12fc   :  { %s16553_s28 = smov 128  }
0x12fd   :  { %13481 = dma.vmem_to_hbm [thread:$0]  %s13476_s21, 384, %s22315_s8, [#allocation3], %s16553_s28, %s16553_s28, %s16548_s1  }
0x12fe   :  { %16533 = dma.done.wait [#allocation3], 384  }
0x12ff   :  { %16534 = vsyncadd [#allocation3], 4294966912 }
0x1300   :  { %13485 = vsyncpa [#allocation3], 1 }

</bundles_post_ra>
